<compile_context>
chip_gen: v7x
topology: tpu7x:2x2x1
jax: 0.10.0
libtpu: 0.0.40
codegen_flags: <defaults>
</compile_context>

<pallas_src>
import functools

import numpy as np
import jax
import jax.numpy as jnp
from jax.experimental import pallas as pl
from jax.experimental.pallas import tpu as pltpu


# ----------------------------------------------------------------------------
# Deterministic parameter init (mimics torch.nn.init.orthogonal_(w, sqrt(2)),
# biases zeroed).  Exact bit-match with torch's RNG is not required, only
# deterministic, orthogonal, gain-scaled weights.
# ----------------------------------------------------------------------------
def orthogonal_init(key, rows, cols, gain):
    a = jax.random.normal(key, (rows, cols), dtype=jnp.float32)
    if rows < cols:
        q, r = jnp.linalg.qr(a.T)
        d = jnp.diag(r)
        q = q * jnp.where(d >= 0, 1.0, -1.0)[None, :]
        w = q.T[:rows, :cols]
    else:
        q, r = jnp.linalg.qr(a)
        d = jnp.diag(r)
        q = q * jnp.where(d >= 0, 1.0, -1.0)[None, :]
        w = q[:rows, :cols]
    return (gain * w).astype(jnp.float32)


def make_linear_params(key, in_f, out_f, gain):
    # nn.Linear stores (out_f, in_f); we store its transpose (in_f, out_f) so
    # the kernel computes y = x @ W + b.  Weights bf16 (HBM traffic), bias f32.
    w = orthogonal_init(key, out_f, in_f, gain).T.astype(jnp.bfloat16)
    b = jnp.zeros((1, out_f), dtype=jnp.float32)
    return w, b


# ----------------------------------------------------------------------------
# Pallas kernel: fused predictor MLP + target MLP + pairwise L2 distance
# for one batch tile.  First layers of both branches are fused into one
# (tb, in) @ (in, 1600) matmul.
# ----------------------------------------------------------------------------
def rnd_kernel(x_ref,
               w0c, b0c,
               pw1, pb1, pw2, pb2, pw3, pb3, pw4, pb4, pw5, pb5,
               tw1, tb1, tw2, tb2, tw3, tb3,
               out_ref, *, h_split):
    def linear(h_f32, w_ref, b_ref):
        # bf16 MXU operands, f32 accumulation; bias-add in f32.
        return jnp.dot(h_f32.astype(jnp.bfloat16), w_ref[...],
                       preferred_element_type=jnp.float32) + b_ref[...]

    def relu(h):
        return jnp.maximum(h, 0.0)

    x = x_ref[...]

    # Fused first layer of both branches (one wide MXU pass, single x cast).
    h0 = relu(jnp.dot(x.astype(jnp.bfloat16), w0c[...],
                      preferred_element_type=jnp.float32) + b0c[...])
    hp = h0[:, :h_split]      # predictor branch (width 800)
    ht = h0[:, h_split:]      # target branch    (width 800)

    # predictor: (Lin->ReLU) x5, then Lin (no ReLU after last Linear)
    h = relu(linear(hp, pw1, pb1))
    h = relu(linear(h, pw2, pb2))
    h = relu(linear(h, pw3, pb3))
    h = relu(linear(h, pw4, pb4))
    pred = linear(h, pw5, pb5)

    # target: (Lin->ReLU) x3, then Lin
    t = relu(linear(ht, tw1, tb1))
    t = relu(linear(t, tw2, tb2))
    tgt = linear(t, tw3, tb3)

    # torch.nn.PairwiseDistance(p=2): || pred - tgt + eps ||_2, eps = 1e-6
    diff = pred - tgt + 1e-6
    out_ref[...] = jnp.sqrt(jnp.sum(diff * diff, axis=-1, keepdims=True))


def _vmem_limit_bytes():
    # Generation-aware scoped VMEM limit: 3/4 of physical, capped at 64 MiB
    # (=> ~48 MiB on v7x's 64 MiB/TC, 64 MiB on v5e/v6e's 128 MiB).
    try:
        cap = int(pltpu.get_tpu_info().vmem_capacity_bytes)
    except Exception:
        cap = 64 << 20
    return min(64 << 20, (cap * 3) // 4)


def rnd_forward(x, pred_params, tgt_params, *, batch_tile=256):
    """x: (B, input_size) float32 -> (B,) float32 predict_error."""
    B, in_f = x.shape

    # Batch tile: multiple of 8 (sublane), default 256 rows per grid step.
    # Small batches collapse to one tile (grid=(1,)) -> weights DMA'd once.
    tb = max(8, min(batch_tile, ((B + 7) // 8) * 8))
    Bp = ((B + tb - 1) // tb) * tb
    xp = x if Bp == B else jnp.pad(x, ((0, Bp - B), (0, 0)))

    # Fuse the two input-facing layers: (in, 800)|(in, 800) -> (in, 1600).
    (pw0, pb0), *pred_rest = list(pred_params)
    (tw0, tb0), *tgt_rest = list(tgt_params)
    h_split = pw0.shape[1]
    w0c = jnp.concatenate([pw0, tw0], axis=1)
    b0c = jnp.concatenate([pb0, tb0], axis=1)

    weight_args = [w0c, b0c]
    for w, b in pred_rest + tgt_rest:
        weight_args += [w, b]

    in_specs = [pl.BlockSpec((tb, in_f), lambda i: (i, 0))]
    for a in weight_args:
        # Constant block index + single buffer: fetched once, VMEM-resident
        # across all batch tiles, no wasted double-buffer copy (~6 MB saved).
        in_specs.append(pl.BlockSpec(a.shape, lambda i: (0, 0),
                                     pipeline_mode=pl.Buffered(1)))

    # Advisory cost estimate: weight-heavy, low-FLOP call.
    n_weight_elems = sum(int(np.prod(a.shape)) for a in weight_args[0::2])
    weight_bytes = sum(int(a.size) * a.dtype.itemsize for a in weight_args)
    cost = pl.CostEstimate(
        flops=2 * Bp * n_weight_elems,
        transcendentals=0,
        bytes_accessed=int(weight_bytes + Bp * in_f * 4 + Bp * 4))

    out = pl.pallas_call(
        functools.partial(rnd_kernel, h_split=h_split),
        out_shape=jax.ShapeDtypeStruct((Bp, 1), jnp.float32),
        grid=(Bp // tb,),
        in_specs=in_specs,
        out_specs=pl.BlockSpec((tb, 1), lambda i: (i, 0)),
        compiler_params=pltpu.CompilerParams(
            dimension_semantics=("parallel",),
            vmem_limit_bytes=_vmem_limit_bytes()),
        cost_estimate=cost,
    )(xp, *weight_args)
    return out[:B, 0]


# ----------------------------------------------------------------------------
# Pure-JAX reference with the SAME bf16-operand / f32-accumulate math
# (outside Pallas) for the correctness check.
# ----------------------------------------------------------------------------
def rnd_forward_ref(x, pred_params, tgt_params):
    def mlp(h, params, relu_mask):
        for (w, b), do_relu in zip(params, relu_mask):
            h = jnp.dot(h.astype(jnp.bfloat16), w,
                        preferred_element_type=jnp.float32) + b
            if do_relu:
                h = jnp.maximum(h, 0.0)
        return h

    pred = mlp(x, pred_params, [True, True, True, True, True, False])
    tgt = mlp(x, tgt_params, [True, True, True, False])
    diff = pred - tgt + 1e-6
    return jnp.sqrt(jnp.sum(diff * diff, axis=-1))


if __name__ == "__main__":
    # Small, module-consistent shapes.  Hidden widths (800/400) are fixed by
    # the module definition; input_size / output_dim chosen small.
    B = 8
    input_size = 32
    output_dim = 16
    gain = float(np.sqrt(2.0))

    root = jax.random.PRNGKey(0)
    keys = jax.random.split(root, 16)

    # predictor: input->800->800->800->400->output_dim->output_dim
    pred_dims = [(input_size, 800), (800, 800), (800, 800),
                 (800, 400), (400, output_dim), (output_dim, output_dim)]
    pred_params = [make_linear_params(keys[i], di, do, gain)
                   for i, (di, do) in enumerate(pred_dims)]

    # target: input->800->800->800->output_dim
    tgt_dims = [(input_size, 800), (800, 800), (800, 800), (800, output_dim)]
    tgt_params = [make_linear_params(keys[6 + i], di, do, gain)
                  for i, (di, do) in enumerate(tgt_dims)]

    x = jax.random.normal(keys[15], (B, input_size), dtype=jnp.float32)

    out = jax.block_until_ready(rnd_forward(x, pred_params, tgt_params))
    ref = jax.block_until_ready(rnd_forward_ref(x, pred_params, tgt_params))
    np.testing.assert_allclose(np.asarray(out), np.asarray(ref),
                               rtol=1e-2, atol=1e-3)
    assert out.shape == (B,)

    print("KERNEL_OK")
</pallas_src>

<mosaic_0001>
module attributes {stable_mosaic.version = 11 : i64} {
  func.func @rnd_kernel(%arg0: i32, %arg1: memref<8x32xf32, #tpu.memory_space<vmem>>, %arg2: memref<32x1600xbf16, #tpu.memory_space<vmem>>, %arg3: memref<1x1600xf32, #tpu.memory_space<vmem>>, %arg4: memref<800x800xbf16, #tpu.memory_space<vmem>>, %arg5: memref<1x800xf32, #tpu.memory_space<vmem>>, %arg6: memref<800x800xbf16, #tpu.memory_space<vmem>>, %arg7: memref<1x800xf32, #tpu.memory_space<vmem>>, %arg8: memref<800x400xbf16, #tpu.memory_space<vmem>>, %arg9: memref<1x400xf32, #tpu.memory_space<vmem>>, %arg10: memref<400x16xbf16, #tpu.memory_space<vmem>>, %arg11: memref<1x16xf32, #tpu.memory_space<vmem>>, %arg12: memref<16x16xbf16, #tpu.memory_space<vmem>>, %arg13: memref<1x16xf32, #tpu.memory_space<vmem>>, %arg14: memref<800x800xbf16, #tpu.memory_space<vmem>>, %arg15: memref<1x800xf32, #tpu.memory_space<vmem>>, %arg16: memref<800x800xbf16, #tpu.memory_space<vmem>>, %arg17: memref<1x800xf32, #tpu.memory_space<vmem>>, %arg18: memref<800x16xbf16, #tpu.memory_space<vmem>>, %arg19: memref<1x16xf32, #tpu.memory_space<vmem>>, %arg20: memref<8x1xf32, #tpu.memory_space<vmem>>) attributes {dimension_semantics = [#tpu.dimension_semantics<parallel>], iteration_bounds = array<i64: 1>, scalar_prefetch = 0 : i64, scratch_operands = 0 : i64, tpu.core_type = #tpu.core_type<tc>, window_params = [{transform_indices = @transform_0, window_bounds = array<i64: 8, 32>}, {pipeline_mode = #tpu.pipeline_mode<synchronous>, transform_indices = @transform_1, window_bounds = array<i64: 32, 1600>}, {pipeline_mode = #tpu.pipeline_mode<synchronous>, transform_indices = @transform_2, window_bounds = array<i64: 1, 1600>}, {pipeline_mode = #tpu.pipeline_mode<synchronous>, transform_indices = @transform_3, window_bounds = array<i64: 800, 800>}, {pipeline_mode = #tpu.pipeline_mode<synchronous>, transform_indices = @transform_4, window_bounds = array<i64: 1, 800>}, {pipeline_mode = #tpu.pipeline_mode<synchronous>, transform_indices = @transform_5, window_bounds = array<i64: 800, 800>}, {pipeline_mode = #tpu.pipeline_mode<synchronous>, transform_indices = @transform_6, window_bounds = array<i64: 1, 800>}, {pipeline_mode = #tpu.pipeline_mode<synchronous>, transform_indices = @transform_7, window_bounds = array<i64: 800, 400>}, {pipeline_mode = #tpu.pipeline_mode<synchronous>, transform_indices = @transform_8, window_bounds = array<i64: 1, 400>}, {pipeline_mode = #tpu.pipeline_mode<synchronous>, transform_indices = @transform_9, window_bounds = array<i64: 400, 16>}, {pipeline_mode = #tpu.pipeline_mode<synchronous>, transform_indices = @transform_10, window_bounds = array<i64: 1, 16>}, {pipeline_mode = #tpu.pipeline_mode<synchronous>, transform_indices = @transform_11, window_bounds = array<i64: 16, 16>}, {pipeline_mode = #tpu.pipeline_mode<synchronous>, transform_indices = @transform_12, window_bounds = array<i64: 1, 16>}, {pipeline_mode = #tpu.pipeline_mode<synchronous>, transform_indices = @transform_13, window_bounds = array<i64: 800, 800>}, {pipeline_mode = #tpu.pipeline_mode<synchronous>, transform_indices = @transform_14, window_bounds = array<i64: 1, 800>}, {pipeline_mode = #tpu.pipeline_mode<synchronous>, transform_indices = @transform_15, window_bounds = array<i64: 800, 800>}, {pipeline_mode = #tpu.pipeline_mode<synchronous>, transform_indices = @transform_16, window_bounds = array<i64: 1, 800>}, {pipeline_mode = #tpu.pipeline_mode<synchronous>, transform_indices = @transform_17, window_bounds = array<i64: 800, 16>}, {pipeline_mode = #tpu.pipeline_mode<synchronous>, transform_indices = @transform_18, window_bounds = array<i64: 1, 16>}, {transform_indices = @transform_19, window_bounds = array<i64: 8, 1>}]} {
    %c0 = arith.constant 0 : index
    %c0_0 = arith.constant 0 : index
    %0 = vector.load %arg1[%c0, %c0_0] : memref<8x32xf32, #tpu.memory_space<vmem>>, vector<8x32xf32>
    %1 = arith.truncf %0 : vector<8x32xf32> to vector<8x32xbf16>
    %c0_1 = arith.constant 0 : index
    %c0_2 = arith.constant 0 : index
    %2 = vector.load %arg2[%c0_1, %c0_2] : memref<32x1600xbf16, #tpu.memory_space<vmem>>, vector<32x1600xbf16>
    %cst = arith.constant dense<0.000000e+00> : vector<8x1600xf32>
    %3 = tpu.matmul %1, %2, %cst {dimension_numbers = #tpu.dot_dimension_numbers<[1], [0], [0], [1], [0, 0, 1, 1], [], []>} : vector<8x32xbf16>, vector<32x1600xbf16>, vector<8x1600xf32> -> vector<8x1600xf32>
    %c0_3 = arith.constant 0 : index
    %c0_4 = arith.constant 0 : index
    %4 = vector.load %arg3[%c0_3, %c0_4] : memref<1x1600xf32, #tpu.memory_space<vmem>>, vector<1x1600xf32>
    %5 = vector.broadcast %4 : vector<1x1600xf32> to vector<8x1600xf32>
    %6 = arith.addf %3, %5 : vector<8x1600xf32>
    %cst_5 = arith.constant 0.000000e+00 : f32
    %7 = vector.broadcast %cst_5 : f32 to vector<8x1600xf32>
    %8 = arith.maximumf %6, %7 : vector<8x1600xf32>
    %9 = vector.extract_strided_slice %8 {offsets = [0, 0], sizes = [8, 800], strides = [1, 1]} : vector<8x1600xf32> to vector<8x800xf32>
    %10 = vector.extract_strided_slice %8 {offsets = [0, 800], sizes = [8, 800], strides = [1, 1]} : vector<8x1600xf32> to vector<8x800xf32>
    %11 = arith.truncf %9 : vector<8x800xf32> to vector<8x800xbf16>
    %c0_6 = arith.constant 0 : index
    %c0_7 = arith.constant 0 : index
    %12 = vector.load %arg4[%c0_6, %c0_7] : memref<800x800xbf16, #tpu.memory_space<vmem>>, vector<800x800xbf16>
    %cst_8 = arith.constant dense<0.000000e+00> : vector<8x800xf32>
    %13 = tpu.matmul %11, %12, %cst_8 {dimension_numbers = #tpu.dot_dimension_numbers<[1], [0], [0], [1], [0, 0, 1, 1], [], []>} : vector<8x800xbf16>, vector<800x800xbf16>, vector<8x800xf32> -> vector<8x800xf32>
    %c0_9 = arith.constant 0 : index
    %c0_10 = arith.constant 0 : index
    %14 = vector.load %arg5[%c0_9, %c0_10] : memref<1x800xf32, #tpu.memory_space<vmem>>, vector<1x800xf32>
    %15 = vector.broadcast %14 : vector<1x800xf32> to vector<8x800xf32>
    %16 = arith.addf %13, %15 : vector<8x800xf32>
    %cst_11 = arith.constant 0.000000e+00 : f32
    %17 = vector.broadcast %cst_11 : f32 to vector<8x800xf32>
    %18 = arith.maximumf %16, %17 : vector<8x800xf32>
    %19 = arith.truncf %18 : vector<8x800xf32> to vector<8x800xbf16>
    %c0_12 = arith.constant 0 : index
    %c0_13 = arith.constant 0 : index
    %20 = vector.load %arg6[%c0_12, %c0_13] : memref<800x800xbf16, #tpu.memory_space<vmem>>, vector<800x800xbf16>
    %cst_14 = arith.constant dense<0.000000e+00> : vector<8x800xf32>
    %21 = tpu.matmul %19, %20, %cst_14 {dimension_numbers = #tpu.dot_dimension_numbers<[1], [0], [0], [1], [0, 0, 1, 1], [], []>} : vector<8x800xbf16>, vector<800x800xbf16>, vector<8x800xf32> -> vector<8x800xf32>
    %c0_15 = arith.constant 0 : index
    %c0_16 = arith.constant 0 : index
    %22 = vector.load %arg7[%c0_15, %c0_16] : memref<1x800xf32, #tpu.memory_space<vmem>>, vector<1x800xf32>
    %23 = vector.broadcast %22 : vector<1x800xf32> to vector<8x800xf32>
    %24 = arith.addf %21, %23 : vector<8x800xf32>
    %cst_17 = arith.constant 0.000000e+00 : f32
    %25 = vector.broadcast %cst_17 : f32 to vector<8x800xf32>
    %26 = arith.maximumf %24, %25 : vector<8x800xf32>
    %27 = arith.truncf %26 : vector<8x800xf32> to vector<8x800xbf16>
    %c0_18 = arith.constant 0 : index
    %c0_19 = arith.constant 0 : index
    %28 = vector.load %arg8[%c0_18, %c0_19] : memref<800x400xbf16, #tpu.memory_space<vmem>>, vector<800x400xbf16>
    %cst_20 = arith.constant dense<0.000000e+00> : vector<8x400xf32>
    %29 = tpu.matmul %27, %28, %cst_20 {dimension_numbers = #tpu.dot_dimension_numbers<[1], [0], [0], [1], [0, 0, 1, 1], [], []>} : vector<8x800xbf16>, vector<800x400xbf16>, vector<8x400xf32> -> vector<8x400xf32>
    %c0_21 = arith.constant 0 : index
    %c0_22 = arith.constant 0 : index
    %30 = vector.load %arg9[%c0_21, %c0_22] : memref<1x400xf32, #tpu.memory_space<vmem>>, vector<1x400xf32>
    %31 = vector.broadcast %30 : vector<1x400xf32> to vector<8x400xf32>
    %32 = arith.addf %29, %31 : vector<8x400xf32>
    %cst_23 = arith.constant 0.000000e+00 : f32
    %33 = vector.broadcast %cst_23 : f32 to vector<8x400xf32>
    %34 = arith.maximumf %32, %33 : vector<8x400xf32>
    %35 = arith.truncf %34 : vector<8x400xf32> to vector<8x400xbf16>
    %c0_24 = arith.constant 0 : index
    %c0_25 = arith.constant 0 : index
    %36 = vector.load %arg10[%c0_24, %c0_25] : memref<400x16xbf16, #tpu.memory_space<vmem>>, vector<400x16xbf16>
    %cst_26 = arith.constant dense<0.000000e+00> : vector<8x16xf32>
    %37 = tpu.matmul %35, %36, %cst_26 {dimension_numbers = #tpu.dot_dimension_numbers<[1], [0], [0], [1], [0, 0, 1, 1], [], []>} : vector<8x400xbf16>, vector<400x16xbf16>, vector<8x16xf32> -> vector<8x16xf32>
    %c0_27 = arith.constant 0 : index
    %c0_28 = arith.constant 0 : index
    %38 = vector.load %arg11[%c0_27, %c0_28] : memref<1x16xf32, #tpu.memory_space<vmem>>, vector<1x16xf32>
    %39 = vector.broadcast %38 : vector<1x16xf32> to vector<8x16xf32>
    %40 = arith.addf %37, %39 : vector<8x16xf32>
    %cst_29 = arith.constant 0.000000e+00 : f32
    %41 = vector.broadcast %cst_29 : f32 to vector<8x16xf32>
    %42 = arith.maximumf %40, %41 : vector<8x16xf32>
    %43 = arith.truncf %42 : vector<8x16xf32> to vector<8x16xbf16>
    %c0_30 = arith.constant 0 : index
    %c0_31 = arith.constant 0 : index
    %44 = vector.load %arg12[%c0_30, %c0_31] : memref<16x16xbf16, #tpu.memory_space<vmem>>, vector<16x16xbf16>
    %cst_32 = arith.constant dense<0.000000e+00> : vector<8x16xf32>
    %45 = tpu.matmul %43, %44, %cst_32 {dimension_numbers = #tpu.dot_dimension_numbers<[1], [0], [0], [1], [0, 0, 1, 1], [], []>} : vector<8x16xbf16>, vector<16x16xbf16>, vector<8x16xf32> -> vector<8x16xf32>
    %c0_33 = arith.constant 0 : index
    %c0_34 = arith.constant 0 : index
    %46 = vector.load %arg13[%c0_33, %c0_34] : memref<1x16xf32, #tpu.memory_space<vmem>>, vector<1x16xf32>
    %47 = vector.broadcast %46 : vector<1x16xf32> to vector<8x16xf32>
    %48 = arith.addf %45, %47 : vector<8x16xf32>
    %49 = arith.truncf %10 : vector<8x800xf32> to vector<8x800xbf16>
    %c0_35 = arith.constant 0 : index
    %c0_36 = arith.constant 0 : index
    %50 = vector.load %arg14[%c0_35, %c0_36] : memref<800x800xbf16, #tpu.memory_space<vmem>>, vector<800x800xbf16>
    %cst_37 = arith.constant dense<0.000000e+00> : vector<8x800xf32>
    %51 = tpu.matmul %49, %50, %cst_37 {dimension_numbers = #tpu.dot_dimension_numbers<[1], [0], [0], [1], [0, 0, 1, 1], [], []>} : vector<8x800xbf16>, vector<800x800xbf16>, vector<8x800xf32> -> vector<8x800xf32>
    %c0_38 = arith.constant 0 : index
    %c0_39 = arith.constant 0 : index
    %52 = vector.load %arg15[%c0_38, %c0_39] : memref<1x800xf32, #tpu.memory_space<vmem>>, vector<1x800xf32>
    %53 = vector.broadcast %52 : vector<1x800xf32> to vector<8x800xf32>
    %54 = arith.addf %51, %53 : vector<8x800xf32>
    %cst_40 = arith.constant 0.000000e+00 : f32
    %55 = vector.broadcast %cst_40 : f32 to vector<8x800xf32>
    %56 = arith.maximumf %54, %55 : vector<8x800xf32>
    %57 = arith.truncf %56 : vector<8x800xf32> to vector<8x800xbf16>
    %c0_41 = arith.constant 0 : index
    %c0_42 = arith.constant 0 : index
    %58 = vector.load %arg16[%c0_41, %c0_42] : memref<800x800xbf16, #tpu.memory_space<vmem>>, vector<800x800xbf16>
    %cst_43 = arith.constant dense<0.000000e+00> : vector<8x800xf32>
    %59 = tpu.matmul %57, %58, %cst_43 {dimension_numbers = #tpu.dot_dimension_numbers<[1], [0], [0], [1], [0, 0, 1, 1], [], []>} : vector<8x800xbf16>, vector<800x800xbf16>, vector<8x800xf32> -> vector<8x800xf32>
    %c0_44 = arith.constant 0 : index
    %c0_45 = arith.constant 0 : index
    %60 = vector.load %arg17[%c0_44, %c0_45] : memref<1x800xf32, #tpu.memory_space<vmem>>, vector<1x800xf32>
    %61 = vector.broadcast %60 : vector<1x800xf32> to vector<8x800xf32>
    %62 = arith.addf %59, %61 : vector<8x800xf32>
    %cst_46 = arith.constant 0.000000e+00 : f32
    %63 = vector.broadcast %cst_46 : f32 to vector<8x800xf32>
    %64 = arith.maximumf %62, %63 : vector<8x800xf32>
    %65 = arith.truncf %64 : vector<8x800xf32> to vector<8x800xbf16>
    %c0_47 = arith.constant 0 : index
    %c0_48 = arith.constant 0 : index
    %66 = vector.load %arg18[%c0_47, %c0_48] : memref<800x16xbf16, #tpu.memory_space<vmem>>, vector<800x16xbf16>
    %cst_49 = arith.constant dense<0.000000e+00> : vector<8x16xf32>
    %67 = tpu.matmul %65, %66, %cst_49 {dimension_numbers = #tpu.dot_dimension_numbers<[1], [0], [0], [1], [0, 0, 1, 1], [], []>} : vector<8x800xbf16>, vector<800x16xbf16>, vector<8x16xf32> -> vector<8x16xf32>
    %c0_50 = arith.constant 0 : index
    %c0_51 = arith.constant 0 : index
    %68 = vector.load %arg19[%c0_50, %c0_51] : memref<1x16xf32, #tpu.memory_space<vmem>>, vector<1x16xf32>
    %69 = vector.broadcast %68 : vector<1x16xf32> to vector<8x16xf32>
    %70 = arith.addf %67, %69 : vector<8x16xf32>
    %71 = arith.subf %48, %70 : vector<8x16xf32>
    %cst_52 = arith.constant 9.99999997E-7 : f32
    %72 = vector.broadcast %cst_52 : f32 to vector<8x16xf32>
    %73 = arith.addf %71, %72 : vector<8x16xf32>
    %74 = arith.mulf %73, %73 : vector<8x16xf32>
    %cst_53 = arith.constant dense<0.000000e+00> : vector<8xf32>
    %75 = vector.multi_reduction <add>, %74, %cst_53 [1] : vector<8x16xf32> to vector<8xf32>
    %76 = vector.shape_cast %75 : vector<8xf32> to vector<8x1xf32>
    %77 = math.sqrt %76 : vector<8x1xf32>
    %c0_54 = arith.constant 0 : index
    %c0_55 = arith.constant 0 : index
    %78 = vector.load %arg20[%c0_54, %c0_55] : memref<8x1xf32, #tpu.memory_space<vmem>>, vector<8x1xf32>
    tpu.vector_store %arg20[%c0_54, %c0_55], %77 {strides = array<i32>} : memref<8x1xf32, #tpu.memory_space<vmem>>, vector<8x1xf32>,
    return
  }
  func.func @transform_0(%arg0: i32) -> (i32, i32) {
    %c0_i32 = arith.constant 0 : i32
    %c0_i32_0 = arith.constant 0 : i32
    return %arg0, %c0_i32 : i32, i32
  }
  func.func @transform_1(%arg0: i32) -> (i32, i32) {
    %c0_i32 = arith.constant 0 : i32
    %c0_i32_0 = arith.constant 0 : i32
    %c0_i32_1 = arith.constant 0 : i32
    return %c0_i32, %c0_i32_0 : i32, i32
  }
  func.func @transform_2(%arg0: i32) -> (i32, i32) {
    %c0_i32 = arith.constant 0 : i32
    %c0_i32_0 = arith.constant 0 : i32
    %c0_i32_1 = arith.constant 0 : i32
    return %c0_i32, %c0_i32_0 : i32, i32
  }
  func.func @transform_3(%arg0: i32) -> (i32, i32) {
    %c0_i32 = arith.constant 0 : i32
    %c0_i32_0 = arith.constant 0 : i32
    %c0_i32_1 = arith.constant 0 : i32
    return %c0_i32, %c0_i32_0 : i32, i32
  }
  func.func @transform_4(%arg0: i32) -> (i32, i32) {
    %c0_i32 = arith.constant 0 : i32
    %c0_i32_0 = arith.constant 0 : i32
    %c0_i32_1 = arith.constant 0 : i32
    return %c0_i32, %c0_i32_0 : i32, i32
  }
  func.func @transform_5(%arg0: i32) -> (i32, i32) {
    %c0_i32 = arith.constant 0 : i32
    %c0_i32_0 = arith.constant 0 : i32
    %c0_i32_1 = arith.constant 0 : i32
    return %c0_i32, %c0_i32_0 : i32, i32
  }
  func.func @transform_6(%arg0: i32) -> (i32, i32) {
    %c0_i32 = arith.constant 0 : i32
    %c0_i32_0 = arith.constant 0 : i32
    %c0_i32_1 = arith.constant 0 : i32
    return %c0_i32, %c0_i32_0 : i32, i32
  }
  func.func @transform_7(%arg0: i32) -> (i32, i32) {
    %c0_i32 = arith.constant 0 : i32
    %c0_i32_0 = arith.constant 0 : i32
    %c0_i32_1 = arith.constant 0 : i32
    return %c0_i32, %c0_i32_0 : i32, i32
  }
  func.func @transform_8(%arg0: i32) -> (i32, i32) {
    %c0_i32 = arith.constant 0 : i32
    %c0_i32_0 = arith.constant 0 : i32
    %c0_i32_1 = arith.constant 0 : i32
    return %c0_i32, %c0_i32_0 : i32, i32
  }
  func.func @transform_9(%arg0: i32) -> (i32, i32) {
    %c0_i32 = arith.constant 0 : i32
    %c0_i32_0 = arith.constant 0 : i32
    %c0_i32_1 = arith.constant 0 : i32
    return %c0_i32, %c0_i32_0 : i32, i32
  }
  func.func @transform_10(%arg0: i32) -> (i32, i32) {
    %c0_i32 = arith.constant 0 : i32
    %c0_i32_0 = arith.constant 0 : i32
    %c0_i32_1 = arith.constant 0 : i32
    return %c0_i32, %c0_i32_0 : i32, i32
  }
  func.func @transform_11(%arg0: i32) -> (i32, i32) {
    %c0_i32 = arith.constant 0 : i32
    %c0_i32_0 = arith.constant 0 : i32
    %c0_i32_1 = arith.constant 0 : i32
    return %c0_i32, %c0_i32_0 : i32, i32
  }
  func.func @transform_12(%arg0: i32) -> (i32, i32) {
    %c0_i32 = arith.constant 0 : i32
    %c0_i32_0 = arith.constant 0 : i32
    %c0_i32_1 = arith.constant 0 : i32
    return %c0_i32, %c0_i32_0 : i32, i32
  }
  func.func @transform_13(%arg0: i32) -> (i32, i32) {
    %c0_i32 = arith.constant 0 : i32
    %c0_i32_0 = arith.constant 0 : i32
    %c0_i32_1 = arith.constant 0 : i32
    return %c0_i32, %c0_i32_0 : i32, i32
  }
  func.func @transform_14(%arg0: i32) -> (i32, i32) {
    %c0_i32 = arith.constant 0 : i32
    %c0_i32_0 = arith.constant 0 : i32
    %c0_i32_1 = arith.constant 0 : i32
    return %c0_i32, %c0_i32_0 : i32, i32
  }
  func.func @transform_15(%arg0: i32) -> (i32, i32) {
    %c0_i32 = arith.constant 0 : i32
    %c0_i32_0 = arith.constant 0 : i32
    %c0_i32_1 = arith.constant 0 : i32
    return %c0_i32, %c0_i32_0 : i32, i32
  }
  func.func @transform_16(%arg0: i32) -> (i32, i32) {
    %c0_i32 = arith.constant 0 : i32
    %c0_i32_0 = arith.constant 0 : i32
    %c0_i32_1 = arith.constant 0 : i32
    return %c0_i32, %c0_i32_0 : i32, i32
  }
  func.func @transform_17(%arg0: i32) -> (i32, i32) {
    %c0_i32 = arith.constant 0 : i32
    %c0_i32_0 = arith.constant 0 : i32
    %c0_i32_1 = arith.constant 0 : i32
    return %c0_i32, %c0_i32_0 : i32, i32
  }
  func.func @transform_18(%arg0: i32) -> (i32, i32) {
    %c0_i32 = arith.constant 0 : i32
    %c0_i32_0 = arith.constant 0 : i32
    %c0_i32_1 = arith.constant 0 : i32
    return %c0_i32, %c0_i32_0 : i32, i32
  }
  func.func @transform_19(%arg0: i32) -> (i32, i32) {
    %c0_i32 = arith.constant 0 : i32
    %c0_i32_0 = arith.constant 0 : i32
    return %arg0, %c0_i32 : i32, i32
  }
}

</mosaic_0001>

<bundles_post_ra>
// kernel: tpu_custom_call.1
= control target key start
LH: loop header
LB: loop body
LE: loop exit
PB: predicated region body
PF: predicated region fallthrough
CT: control target
= control target key end

     0   :  { %s22306_s0 = inlined_call_operand.vmem [shape: f32[8,32], index: 0, kind: input, shape index: {}]   ;;  %s22307_s1 = inlined_call_operand.vmem [shape: bf16[32,1600], index: 1, kind: input, shape index: {}]   ;;  %s22308_s2 = inlined_call_operand.vmem [shape: f32[1,1600], index: 2, kind: input, shape index: {}]   ;;  %s22309_s3 = inlined_call_operand.vmem [shape: bf16[800,800], index: 3, kind: input, shape index: {}]   ;;  %s22310_s4 = inlined_call_operand.vmem [shape: f32[1,800], index: 4, kind: input, shape index: {}]   ;;  %s22311_s5 = inlined_call_operand.hbm [shape: bf16[800,800], index: 5, kind: input, shape index: {}]   ;;  %s22312_s6 = inlined_call_operand.vmem [shape: f32[1,800], index: 6, kind: input, shape index: {}]   ;;  %s22313_s7 = inlined_call_operand.vmem [shape: bf16[800,400], index: 7, kind: input, shape index: {}]   ;;  %s22314_s8 = inlined_call_operand.vmem [shape: f32[1,400], index: 8, kind: input, shape index: {}]   ;;  %s22315_s9 = inlined_call_operand.vmem [shape: bf16[400,16], index: 9, kind: input, shape index: {}]   ;;  %s22316_s10 = inlined_call_operand.vmem [shape: f32[1,16], index: 10, kind: input, shape index: {}]   ;;  %s22317_s11 = inlined_call_operand.vmem [shape: bf16[16,16], index: 11, kind: input, shape index: {}]   ;;  %s22318_s12 = inlined_call_operand.vmem [shape: f32[1,16], index: 12, kind: input, shape index: {}]   ;;  %s22319_s13 = inlined_call_operand.hbm [shape: bf16[800,800], index: 13, kind: input, shape index: {}]   ;;  %s22320_s14 = inlined_call_operand.vmem [shape: f32[1,800], index: 14, kind: input, shape index: {}]   ;;  %s22321_s15 = inlined_call_operand.hbm [shape: bf16[800,800], index: 15, kind: input, shape index: {}]   ;;  %s22322_s16 = inlined_call_operand.vmem [shape: f32[1,800], index: 16, kind: input, shape index: {}]   ;;  %s22323_s17 = inlined_call_operand.vmem [shape: bf16[800,16], index: 17, kind: input, shape index: {}]   ;;  %s22324_s18 = inlined_call_operand.vmem [shape: f32[1,16], index: 18, kind: input, shape index: {}]   ;;  %s22325_s19 = inlined_call_operand.vmem [shape: f32[8,1], index: 19, kind: output, shape index: {}]  }
   0x1   :  { %22329 = sst [smem:[#allocation9_spill]] %s22306_s0 }
   0x2   :  { %22330 = sst [smem:[#allocation10_spill]] %s22307_s1 }
   0x3   :  { %22331 = sst [smem:[#allocation11_spill]] %s22308_s2 }
   0x4   :  { %22332 = sst [smem:[#allocation12_spill]] %s22309_s3 }
   0x5   :  { %24 = vsyncpa [#allocation3], 0 }
   0x6   :  { %25 = vsyncpa [#allocation5], 0  ;;  %s19665_s0 = smov [#allocation4]   ;;  %s19666_s20 = smov [#allocation2]  }
   0x7   :  { %s67_s30 = sshll.u32 %s19665_s0, 4  ;;  %s41_s21 = sshll.u32 %s19666_s20, 4  ;;  %s68_s30 = int_to_ptr.vmem [resolvable:$true] %s67_s30  ;;  %s19774_s21 = int_to_ptr.vmem [resolvable:$true] %s41_s21 }
   0x8   :  { %s19595_s2 = scalar_lea.hbm %s22319_s13, 44800 }
   0x9   :  { %p19596_p0 = scmp.ne.s32.totalorder %s22319_s13, %s19595_s2  ;;  %p19599_p1 = scmp.lt.u32.totalorder %s19595_s2, %s22319_s13 }
   0xb   :  { %p19601_p2 = pnand %p19599_p1, %p19596_p0 }
   0xd   :  { %19604 = shalt.err (!%p19601_p2)
}
   0xe   :  { %s19605_s26 = scalar_lea.vmem %s68_s30, 44800  ;;  %p19610_p4 = scmp.lt.s32.totalorder %s68_s30, %s68_s30 }
   0xf   :  { %p19606_p3 = scmp.ne.s32.totalorder %s68_s30, %s19605_s26  ;;  %p19611_p5 = scmp.lt.s32.totalorder %s19605_s26, %s19605_s26 }
  0x11   :  { %p19612_p6 = por %p19611_p5, %p19610_p4 }
  0x13   :  { %p19613_p7 = pnand %p19612_p6, %p19606_p3 }
  0x15   :  { %19616 = shalt.err (!%p19613_p7)
}
  0x16   :  { %s19667_s27 = smov 448   ;;  %s19668_s28 = smov 28  }
  0x17   :  { %73 = dma.hbm_to_vmem [thread:$0]  %s22319_s13, 44800, %s68_s30, [#allocation5], %s19667_s27, %s19667_s27, %s19668_s28  }
  0x18   :  { %s19617_s22 = scalar_lea.hbm %s22311_s5, 44800 }
  0x19   :  { %p19618_p8 = scmp.ne.s32.totalorder %s22311_s5, %s19617_s22  ;;  %p19621_p9 = scmp.lt.u32.totalorder %s19617_s22, %s22311_s5 }
  0x1b   :  { %p19623_p10 = pnand %p19621_p9, %p19618_p8 }
  0x1d   :  { %19626 = shalt.err (!%p19623_p10)
}
  0x1e   :  { %s19627_s3 = scalar_lea.vmem %s19774_s21, 44800  ;;  %p19632_p12 = scmp.lt.s32.totalorder %s19774_s21, %s19774_s21 }
  0x1f   :  { %p19628_p11 = scmp.ne.s32.totalorder %s19774_s21, %s19627_s3  ;;  %p19633_p13 = scmp.lt.s32.totalorder %s19627_s3, %s19627_s3 }
  0x21   :  { %p19634_p0 = por %p19633_p13, %p19632_p12 }
  0x23   :  { %p19635_p1 = pnand %p19634_p0, %p19628_p11 }
  0x25   :  { %19638 = shalt.err (!%p19635_p1)
}
  0x26   :  { %47 = dma.hbm_to_vmem [thread:$0]  %s22311_s5, 44800, %s19774_s21, [#allocation3], %s19667_s27, %s19667_s27, %s19668_s28  }
  0x27   :  { %s19669_s26 = smov [#allocation6]   ;;  %s19639_s1 = scalar_lea.hbm %s22321_s15, 44800 }
  0x28   :  { %s81_s29 = sshll.u32 %s19669_s26, 4  ;;  %p19640_p2 = scmp.ne.s32.totalorder %s22321_s15, %s19639_s1  ;;  %s82_s29 = int_to_ptr.vmem [resolvable:$true] %s81_s29 }
  0x29   :  { %p19643_p3 = scmp.lt.u32.totalorder %s19639_s1, %s22321_s15 }
  0x2b   :  { %p19645_p4 = pnand %p19643_p3, %p19640_p2 }
  0x2d   :  { %19648 = shalt.err (!%p19645_p4)
}
  0x2e   :  { %s19649_s25 = scalar_lea.vmem %s82_s29, 44800  ;;  %p19654_p6 = scmp.lt.s32.totalorder %s82_s29, %s82_s29 }
  0x2f   :  { %p19650_p5 = scmp.ne.s32.totalorder %s82_s29, %s19649_s25  ;;  %p19655_p7 = scmp.lt.s32.totalorder %s19649_s25, %s19649_s25 }
  0x31   :  { %p19656_p8 = por %p19655_p7, %p19654_p6 }
  0x33   :  { %p19657_p9 = pnand %p19656_p8, %p19650_p5 }
  0x35   :  { %19660 = shalt.err (!%p19657_p9)
}
  0x36   :  { %87 = dma.hbm_to_vmem [thread:$0]  %s22321_s15, 44800, %s82_s29, [#allocation5], %s19667_s27, %s19667_s27, %s19668_s28  }
  0x37   :  { %19661 = dma.done.wait [#allocation3], 44800  }
  0x38   :  { %19662 = vsyncadd [#allocation3], 4294922496 }
  0x39   :  { %19663 = dma.done.wait [#allocation5], 89600  }
  0x3a   :  { %19664 = vsyncadd [#allocation5], 4294877696  ;;  %v19670_v0 = vmov 0   ;;  %s22333_s30 = sld [smem:[#allocation10_spill]]  ;;  %s22334_s22 = sld [smem:[#allocation9_spill]]  ;;  %vm335_vm0 = vcmask 261120  }
  0x3b   :  { %371 = vmatprep.mubr.bf16.mxu0 %v19670_v0  ;;  %494 = vmatprep.mubr.bf16.mxu1 %v19670_v0  ;;  %s22335_s24 = sld [smem:[#allocation12_spill]]  ;;  %v19671_v33 = vmov 0.0   ;;  %vm19672_vm1 = vmmov 0   ;;  %s22336_s20 = sld [smem:[#allocation11_spill]]  ;;  %vm8833_vm2 = vcmask 785408   ;;  %vm8225_vm3 = vcmask 130048  }
  0x3c   :  { %s19673_s28 = smov 96   ;;  %vm14804_vm4 = vcmask 7168  }
  0x40   :  { %v17176_v1 = vld [vmem:[%s22333_s30 + $0x4] ss:$52 sps:$4 sm:$0xff]   ;;  %v17178_v2 = vld [vmem:[%s22333_s30] ss:$52 sps:$4 sm:$0xff]   ;;  %v17181_v4 = vld [vmem:[%s22333_s30 + $0x68] ss:$52 sps:$4 sm:$0xff]  }
  0x41   :  { %339 = vmatprep.subr.bf16.mxu0 %v17176_v1  ;;  %v17179_v3 = vld [vmem:[%s22333_s30 + $0x6c] ss:$52 sps:$4 sm:$0xff]   ;;  %v17182_v8 = vld [vmem:[%s22333_s30 + $0x8] ss:$52 sps:$4 sm:$0xff]   ;;  %v17197_v12 = vld [vmem:[%s22333_s30 + $0x84] ss:$52 sps:$4 sm:$0xff]  }
  0x42   :  { %340 = vmatpush1.bf16.msra.mxu0 %v17178_v2  ;;  %v104_v5 = vld [vmem:[%s22334_s22] sm:$0xff]  ;;  %v17187_v9 = vld [vmem:[%s22333_s30 + $0x74] ss:$52 sps:$4 sm:$0xff]   ;;  %v17194_v10 = vld [vmem:[%s22333_s30 + $0x1c] ss:$52 sps:$4 sm:$0xff]  }
  0x43   :  { %341 = vmatprep.subr.bf16.mxu0 %v17179_v3  ;;  %v17184_v6 = vld [vmem:[%s22333_s30 + $0xc] ss:$52 sps:$4 sm:$0xff]   ;;  %v19846_v7 = vpack.c.bf16 %v104_v5, %v104_v5  ;;  %v17185_v13 = vld [vmem:[%s22333_s30 + $0x70] ss:$52 sps:$4 sm:$0xff]   ;;  %v17190_v14 = vld [vmem:[%s22333_s30 + $0x14] ss:$52 sps:$4 sm:$0xff]   ;;  %462 = vmatprep.subr.bf16.mxu1 %v17194_v10 }
  0x44   :  { %v17196_v11 = vld [vmem:[%s22333_s30 + $0x18] ss:$52 sps:$4 sm:$0xff]   ;;  %v17199_v15 = vld [vmem:[%s22333_s30 + $0x80] ss:$52 sps:$4 sm:$0xff]   ;;  %v17188_v17 = vld [vmem:[%s22333_s30 + $0x10] ss:$52 sps:$4 sm:$0xff]  }
  0x45   :  { %463 = vmatpush1.bf16.msra.mxu1 %v17196_v11  ;;  %v17208_v16 = vld [vmem:[%s22333_s30 + $0x2c] ss:$52 sps:$4 sm:$0xff]   ;;  %v17193_v18 = vld [vmem:[%s22333_s30 + $0x7c] ss:$52 sps:$4 sm:$0xff]   ;;  %v17211_v20 = vld [vmem:[%s22333_s30 + $0x94] ss:$52 sps:$4 sm:$0xff]  }
  0x46   :  { %342 = vmatpush1.bf16.msra.mxu0 %v17181_v4  ;;  %464 = vmatprep.subr.bf16.mxu1 %v17197_v12  ;;  %v17206_v19 = vld [vmem:[%s22333_s30 + $0x28] ss:$52 sps:$4 sm:$0xff]   ;;  %v17191_v21 = vld [vmem:[%s22333_s30 + $0x78] ss:$52 sps:$4 sm:$0xff]   ;;  %v17209_v23 = vld [vmem:[%s22333_s30 + $0x90] ss:$52 sps:$4 sm:$0xff]  }
  0x47   :  { %380 = vmatprep.subr.bf16.mxu0 %v17184_v6  ;;  %v17202_v22 = vld [vmem:[%s22333_s30 + $0x24] ss:$52 sps:$4 sm:$0xff]   ;;  %v17200_v25 = vld [vmem:[%s22333_s30 + $0x20] ss:$52 sps:$4 sm:$0xff]   ;;  %v17203_v29 = vld [vmem:[%s22333_s30 + $0x88] ss:$52 sps:$4 sm:$0xff]  }
  0x48   :  { %v17216_v24 = vld [vmem:[%s22335_s24 + $0x4] ss:$28 sps:$4 sm:$0xff]   ;;  %v17222_v28 = vld [vmem:[%s22335_s24 + $0x3c] ss:$28 sps:$4 sm:$0xff]   ;;  %v17228_v31 = vld [vmem:[%s22335_s24 + $0x74] ss:$28 sps:$4 sm:$0xff]  }
  0x49   :  { %14838 = vmatmul.mubr.msk.bf16.vlgmr.msra.gmra.mrb[0].mxu0 %vm335_vm0, %v19846_v7  ;;  %465 = vmatpush1.bf16.msra.mxu1 %v17199_v15  ;;  %v17205_v26 = vld [vmem:[%s22333_s30 + $0x8c] ss:$52 sps:$4 sm:$0xff]   ;;  %v17220_v30 = vld [vmem:[%s22335_s24 + $0x38] ss:$28 sps:$4 sm:$0xff]   ;;  %v17212_v32 = vld [vmem:[%s22333_s30 + $0x30] ss:$52 sps:$4 sm:$0xff]  }
  0x4a   :  { %381 = vmatpush1.bf16.msra.mxu0 %v17182_v8  ;;  %412 = vmatprep.mubr.bf16.mxu0 %v19670_v0  ;;  %v17214_v27 = vld [vmem:[%s22335_s24] ss:$28 sps:$4 sm:$0xff]   ;;  %v17226_v34 = vld [vmem:[%s22335_s24 + $0x70] ss:$28 sps:$4 sm:$0xff]   ;;  %v17232_v38 = vld [vmem:[%s22335_s24 + $0xa8] ss:$28 sps:$4 sm:$0xff]  }
  0x4b   :  { %382 = vmatprep.subr.bf16.mxu0 %v17187_v9  ;;  %544 = vmatprep.subr.bf16.mxu1 %v17208_v16  ;;  %v17234_v35 = vld [vmem:[%s22335_s24 + $0xac] ss:$28 sps:$4 sm:$0xff]   ;;  %v17240_v39 = vld [vmem:[%s22335_s24 + $0xe4] ss:$28 sps:$4 sm:$0xff]   ;;  %v17246_v43 = vld [vmem:[%s22335_s24 + $0x11c] ss:$28 sps:$4 sm:$0xff]  }
  0x4c   :  { %14841 = vmatmul.mubr.msk.bf16.vlgmr.msra.gmra.mrb[0].mxu1 %vm335_vm0, %v19846_v7  ;;  %v17213_v36 = vld [vmem:[%s22333_s30 + $0x98] ss:$52 sps:$4 sm:$0xff]   ;;  %v17217_v40 = vld [vmem:[%s22335_s24 + $0x8] ss:$28 sps:$4 sm:$0xff]   ;;  %v17238_v42 = vld [vmem:[%s22335_s24 + $0xe0] ss:$28 sps:$4 sm:$0xff]  }
  0x4d   :  { %545 = vmatpush1.bf16.msra.mxu1 %v17206_v19  ;;  %576 = vmatprep.mubr.bf16.mxu1 %v19670_v0  ;;  %v17219_v37 = vld [vmem:[%s22335_s24 + $0xc] ss:$28 sps:$4 sm:$0xff]   ;;  %v17225_v41 = vld [vmem:[%s22335_s24 + $0x44] ss:$28 sps:$4 sm:$0xff]   ;;  %v17231_v45 = vld [vmem:[%s22335_s24 + $0x7c] ss:$28 sps:$4 sm:$0xff]  }
  0x4e   :  { %383 = vmatpush1.bf16.msra.mxu0 %v17185_v13  ;;  %546 = vmatprep.subr.bf16.mxu1 %v17211_v20  ;;  %v17223_v44 = vld [vmem:[%s22335_s24 + $0x40] ss:$28 sps:$4 sm:$0xff]   ;;  %v17244_v46 = vld [vmem:[%s22335_s24 + $0x118] ss:$28 sps:$4 sm:$0xff]   ;;  %v17250_v50 = vld [vmem:[%s22335_s24 + $0x150] ss:$28 sps:$4 sm:$0xff]  }
  0x4f   :  { %421 = vmatprep.subr.bf16.mxu0 %v17190_v14  ;;  %v17252_v47 = vld [vmem:[%s22335_s24 + $0x154] ss:$28 sps:$4 sm:$0xff]   ;;  %v17258_v51 = vld [vmem:[%s22335_s24 + $0x18c] ss:$28 sps:$4 sm:$0xff]   ;;  %v17264_v55 = vld [vmem:[%s22335_s24 + $0x1c4] ss:$28 sps:$4 sm:$0xff]  }
  0x50   :  { %v17229_v48 = vld [vmem:[%s22335_s24 + $0x78] ss:$28 sps:$4 sm:$0xff]   ;;  %v17235_v52 = vld [vmem:[%s22335_s24 + $0xb0] ss:$28 sps:$4 sm:$0xff]   ;;  %v17256_v54 = vld [vmem:[%s22335_s24 + $0x188] ss:$28 sps:$4 sm:$0xff]  }
  0x51   :  { %14839 = vmatmul.mubr.msk.bf16.vlgmr.msra.gmra.mrb[4].mxu0 %vm335_vm0, %v19846_v7  ;;  %547 = vmatpush1.bf16.msra.mxu1 %v17209_v23  ;;  %v17237_v49 = vld [vmem:[%s22335_s24 + $0xb4] ss:$28 sps:$4 sm:$0xff]   ;;  %v17243_v53 = vld [vmem:[%s22335_s24 + $0xec] ss:$28 sps:$4 sm:$0xff]   ;;  %v17249_v57 = vld [vmem:[%s22335_s24 + $0x124] ss:$28 sps:$4 sm:$0xff]  }
  0x52   :  { %422 = vmatpush1.bf16.msra.mxu0 %v17188_v17  ;;  %453 = vmatprep.mubr.bf16.mxu0 %v19670_v0  ;;  %v17241_v56 = vld [vmem:[%s22335_s24 + $0xe8] ss:$28 sps:$4 sm:$0xff]   ;;  %v17262_v58 = vld [vmem:[%s22335_s24 + $0x1c0] ss:$28 sps:$4 sm:$0xff]   ;;  %v17268_v62 = vld [vmem:[%s22335_s24 + $0x1f8] ss:$28 sps:$4 sm:$0xff]  }
  0x53   :  { %423 = vmatprep.subr.bf16.mxu0 %v17193_v18  ;;  %2885 = vmatprep.subr.bf16.mxu1 %v17216_v24  ;;  %v17270_v59 = vld [vmem:[%s22335_s24 + $0x1fc] ss:$28 sps:$4 sm:$0xff]   ;;  %v17276_v63 = vld [vmem:[%s22335_s24 + $0x234] ss:$28 sps:$4 sm:$0xff]   ;;  %v17282_v4 = vld [vmem:[%s22335_s24 + $0x26c] ss:$28 sps:$4 sm:$0xff]  }
  0x54   :  { %14843 = vmatmul.mubr.msk.bf16.vlgmr.msra.gmra.mrb[4].mxu1 %vm335_vm0, %v19846_v7  ;;  %v17247_v60 = vld [vmem:[%s22335_s24 + $0x120] ss:$28 sps:$4 sm:$0xff]   ;;  %v17253_v1 = vld [vmem:[%s22335_s24 + $0x158] ss:$28 sps:$4 sm:$0xff]   ;;  %v17274_v3 = vld [vmem:[%s22335_s24 + $0x230] ss:$28 sps:$4 sm:$0xff]  }
  0x55   :  { %2886 = vmatpush1.bf16.msra.mxu1 %v17214_v27  ;;  %v17255_v61 = vld [vmem:[%s22335_s24 + $0x15c] ss:$28 sps:$4 sm:$0xff]   ;;  %v17261_v2 = vld [vmem:[%s22335_s24 + $0x194] ss:$28 sps:$4 sm:$0xff]   ;;  %v17267_v6 = vld [vmem:[%s22335_s24 + $0x1cc] ss:$28 sps:$4 sm:$0xff]  }
  0x56   :  { %424 = vmatpush1.bf16.msra.mxu0 %v17191_v21  ;;  %2887 = vmatprep.subr.bf16.mxu1 %v17222_v28  ;;  %v17259_v5 = vld [vmem:[%s22335_s24 + $0x190] ss:$28 sps:$4 sm:$0xff]   ;;  %v17288_v8 = vld [vmem:[%s22335_s24 + $0x2a4] ss:$28 sps:$4 sm:$0xff]   ;;  %v17294_v12 = vld [vmem:[%s22335_s24 + $0x2dc] ss:$28 sps:$4 sm:$0xff]  }
  0x57   :  { %503 = vmatprep.subr.bf16.mxu0 %v17202_v22  ;;  %v17265_v9 = vld [vmem:[%s22335_s24 + $0x1c8] ss:$28 sps:$4 sm:$0xff]   ;;  %v17286_v11 = vld [vmem:[%s22335_s24 + $0x2a0] ss:$28 sps:$4 sm:$0xff]   ;;  %v17292_v15 = vld [vmem:[%s22335_s24 + $0x2d8] ss:$28 sps:$4 sm:$0xff]  }
  0x58   :  { %v17273_v10 = vld [vmem:[%s22335_s24 + $0x204] ss:$28 sps:$4 sm:$0xff]   ;;  %v17279_v14 = vld [vmem:[%s22335_s24 + $0x23c] ss:$28 sps:$4 sm:$0xff]   ;;  %v17285_v17 = vld [vmem:[%s22335_s24 + $0x274] ss:$28 sps:$4 sm:$0xff]  }
  0x59   :  { %14840 = vmatmul.mubr.msk.bf16.vlgmr.msra.gmra.mrb[8].mxu0 %vm335_vm0, %v19846_v7  ;;  %2888 = vmatpush1.bf16.msra.mxu1 %v17220_v30  ;;  %v17271_v13 = vld [vmem:[%s22335_s24 + $0x200] ss:$28 sps:$4 sm:$0xff]   ;;  %v17277_v16 = vld [vmem:[%s22335_s24 + $0x238] ss:$28 sps:$4 sm:$0xff]   ;;  %v17283_v18 = vld [vmem:[%s22335_s24 + $0x270] ss:$28 sps:$4 sm:$0xff]  }
  0x5a   :  { %504 = vmatpush1.bf16.msra.mxu0 %v17200_v25  ;;  %535 = vmatprep.mubr.bf16.mxu0 %v19670_v0  ;;  %v17291_v19 = vld [vmem:[%s22335_s24 + $0x2ac] ss:$28 sps:$4 sm:$0xff]   ;;  %v17297_v21 = vld [vmem:[%s22335_s24 + $0x2e4] ss:$28 sps:$4 sm:$0xff]   ;;  %v17300_v23 = vld [vmem:[%s22335_s24 + $0x314] ss:$28 sps:$4 sm:$0xff]  }
  0x5b   :  { %505 = vmatprep.subr.bf16.mxu0 %v17205_v26  ;;  %2889 = vmatprep.subr.bf16.mxu1 %v17228_v31  ;;  %v17289_v20 = vld [vmem:[%s22335_s24 + $0x2a8] ss:$28 sps:$4 sm:$0xff]   ;;  %v17295_v22 = vld [vmem:[%s22335_s24 + $0x2e0] ss:$28 sps:$4 sm:$0xff]   ;;  %v17298_v24 = vld [vmem:[%s22335_s24 + $0x310] ss:$28 sps:$4 sm:$0xff]  }
  0x5c   :  { %v17303_v25 = vld [vmem:[%s22335_s24 + $0x31c] ss:$28 sps:$4 sm:$0xff]   ;;  %v17306_v27 = vld [vmem:[%s22335_s24 + $0x34c] ss:$28 sps:$4 sm:$0xff]   ;;  %v17312_v31 = vld [vmem:[%s22335_s24 + $0x384] ss:$28 sps:$4 sm:$0xff]  }
  0x5d   :  { %2890 = vmatpush1.bf16.msra.mxu1 %v17226_v34  ;;  %v17301_v26 = vld [vmem:[%s22335_s24 + $0x318] ss:$28 sps:$4 sm:$0xff]   ;;  %v17304_v28 = vld [vmem:[%s22335_s24 + $0x348] ss:$28 sps:$4 sm:$0xff]   ;;  %v17307_v30 = vld [vmem:[%s22335_s24 + $0x350] ss:$28 sps:$4 sm:$0xff]   ;;  %v138_v34 = vlaneseq }
  0x5e   :  { %506 = vmatpush1.bf16.msra.mxu0 %v17203_v29  ;;  %2891 = vmatprep.subr.bf16.mxu1 %v17234_v35  ;;  %v17309_v29 = vld [vmem:[%s22335_s24 + $0x354] ss:$28 sps:$4 sm:$0xff]  }
  0x5f   :  { %16917 = vmatprep.subr.bf16.mxu0 %v19671_v33  ;;  %v20131_v35 = vshrl.u32 %v138_v34, 7  ;;  %v17337_v34 = vld [vmem:[%s22335_s24 + $0x468] ss:$28 sps:$4 sm:$0xff]  }
  0x61   :  { %14842 = vmatmul.mubr.msk.bf16.vlgmr.msra.gmra.mrb[12].mxu0 %vm335_vm0, %v19846_v7  ;;  %2892 = vmatpush1.bf16.msra.mxu1 %v17232_v38  ;;  %v20142_v38 = vsub.s32 1, %v20131_v35 }
  0x62   :  { %16918 = vmatpush3.bf16.msra.mxu0 %v17212_v32  ;;  %16921 = vmatprep.mubr.msk.bf16.mxu0 %vm19672_vm1, %v19671_v33  ;;  %v17315_v32 = vld [vmem:[%s22335_s24 + $0x38c] ss:$28 sps:$4 sm:$0xff]  }
  0x63   :  { %16919 = vmatprep.subr.bf16.mxu0 %v19671_v33  ;;  %2893 = vmatprep.subr.bf16.mxu1 %v17240_v39 }
  0x65   :  { %2894 = vmatpush1.bf16.msra.mxu1 %v17238_v42 }
  0x66   :  { %16920 = vmatpush3.bf16.msra.mxu0 %v17213_v36  ;;  %2895 = vmatprep.subr.bf16.mxu1 %v17246_v43  ;;  %v20134_v36 = vsub.s32 0, %v20131_v35 }
  0x67   :  { %3049 = vmatprep.subr.bf16.mxu0 %v17219_v37  ;;  %v20139_v37 = vld [vmem:[%s22336_s20] sm:$0xff] }
  0x68   :  { %v141_v39 = vrot.slane %v20139_v37, %v20134_v36 }
  0x69   :  { %16922 = vmatmul.mubr.msk.bf16.vlgmr.msra.gmra.mrb[16].mxu0 %vm335_vm0, %v19846_v7  ;;  %2896 = vmatpush1.bf16.msra.mxu1 %v17244_v46  ;;  %v17280_v7 = vld [vmem:[%s22335_s24 + $0x268] ss:$28 sps:$4 sm:$0xff]   ;;  %v20149_v46 = vsub.s32 3, %v20131_v35 }
  0x6a   :  { %3050 = vmatpush1.bf16.msra.mxu0 %v17217_v40  ;;  %2897 = vmatprep.subr.bf16.mxu1 %v17252_v47  ;;  %v145_v40 = vrot.slane %v20139_v37, %v20142_v38 }
  0x6b   :  { %3051 = vmatprep.subr.bf16.mxu0 %v17225_v41 }
  0x6d   :  { %2898 = vmatpush1.bf16.msra.mxu1 %v17250_v50  ;;  %v17310_v50 = vld [vmem:[%s22335_s24 + $0x380] ss:$28 sps:$4 sm:$0xff]  }
  0x6e   :  { %3052 = vmatpush1.bf16.msra.mxu0 %v17223_v44  ;;  %2899 = vmatprep.subr.bf16.mxu1 %v17258_v51  ;;  %v17313_v51 = vld [vmem:[%s22335_s24 + $0x388] ss:$28 sps:$4 sm:$0xff]  }
  0x6f   :  { %3053 = vmatprep.subr.bf16.mxu0 %v17231_v45 }
  0x71   :  { %2900 = vmatpush1.bf16.msra.mxu1 %v17256_v54 }
  0x72   :  { %3054 = vmatpush1.bf16.msra.mxu0 %v17229_v48  ;;  %2901 = vmatprep.subr.bf16.mxu1 %v17264_v55  ;;  %v153_v55 = vrot.slane %v20139_v37, %v20149_v46 }
  0x73   :  { %3055 = vmatprep.subr.bf16.mxu0 %v17237_v49 }
  0x75   :  { %2902 = vmatpush1.bf16.msra.mxu1 %v17262_v58  ;;  %v168_v58 = vsub.s32 7, %v20131_v35 }
  0x76   :  { %3056 = vmatpush1.bf16.msra.mxu0 %v17235_v52  ;;  %2903 = vmatprep.subr.bf16.mxu1 %v17270_v59  ;;  %v17318_v52 = vld [vmem:[%s22335_s24 + $0x3bc] ss:$28 sps:$4 sm:$0xff]  }
  0x77   :  { %3057 = vmatprep.subr.bf16.mxu0 %v17243_v53  ;;  %v17321_v53 = vld [vmem:[%s22335_s24 + $0x3c4] ss:$28 sps:$4 sm:$0xff]  }
  0x79   :  { %2904 = vmatpush1.bf16.msra.mxu1 %v17268_v62 }
  0x7a   :  { %3058 = vmatpush1.bf16.msra.mxu0 %v17241_v56  ;;  %2905 = vmatprep.subr.bf16.mxu1 %v17276_v63  ;;  %v20168_v56 = vsub.s32 6, %v20131_v35  ;;  %v169_v63 = vrot.slane %v20139_v37, %v168_v58 }
  0x7b   :  { %3059 = vmatprep.subr.bf16.mxu0 %v17249_v57 }
  0x7d   :  { %2906 = vmatpush1.bf16.msra.mxu1 %v17274_v3 }
  0x7e   :  { %3060 = vmatpush1.bf16.msra.mxu0 %v17247_v60  ;;  %2907 = vmatprep.subr.bf16.mxu1 %v17282_v4  ;;  %v165_v60 = vrot.slane %v20139_v37, %v20168_v56 }
  0x7f   :  { %3061 = vmatprep.subr.bf16.mxu0 %v17255_v61  ;;  %v17316_v61 = vld [vmem:[%s22335_s24 + $0x3b8] ss:$28 sps:$4 sm:$0xff]  }
  0x81   :  { %2908 = vmatpush1.bf16.msra.mxu1 %v17280_v7 }
  0x82   :  { %3062 = vmatpush1.bf16.msra.mxu0 %v17253_v1  ;;  %2909 = vmatprep.subr.bf16.mxu1 %v17288_v8  ;;  %v17319_v1 = vld [vmem:[%s22335_s24 + $0x3c0] ss:$28 sps:$4 sm:$0xff]  }
  0x83   :  { %3063 = vmatprep.subr.bf16.mxu0 %v17261_v2  ;;  %v17324_v2 = vld [vmem:[%s22335_s24 + $0x3f4] ss:$28 sps:$4 sm:$0xff]  }
  0x85   :  { %2910 = vmatpush1.bf16.msra.mxu1 %v17286_v11 }
  0x86   :  { %3064 = vmatpush1.bf16.msra.mxu0 %v17259_v5  ;;  %2911 = vmatprep.subr.bf16.mxu1 %v17294_v12 }
  0x87   :  { %3065 = vmatprep.subr.bf16.mxu0 %v17267_v6  ;;  %v17327_v6 = vld [vmem:[%s22335_s24 + $0x3fc] ss:$28 sps:$4 sm:$0xff]  }
  0x89   :  { %2912 = vmatpush1.bf16.msra.mxu1 %v17292_v15  ;;  %v17322_v15 = vld [vmem:[%s22335_s24 + $0x3f0] ss:$28 sps:$4 sm:$0xff]  }
  0x8a   :  { %3066 = vmatpush1.bf16.msra.mxu0 %v17265_v9  ;;  %2913 = vmatprep.subr.bf16.mxu1 %v17300_v23  ;;  %v17331_v23 = vld [vmem:[%s22335_s24 + $0x430] ss:$28 sps:$4 sm:$0xff]  }
  0x8b   :  { %3067 = vmatprep.subr.bf16.mxu0 %v17273_v10 }
  0x8d   :  { %2914 = vmatpush1.bf16.msra.mxu1 %v17298_v24 }
  0x8e   :  { %3068 = vmatpush1.bf16.msra.mxu0 %v17271_v13  ;;  %2915 = vmatprep.subr.bf16.mxu1 %v17306_v27  ;;  %v17336_v27 = vld [vmem:[%s22335_s24 + $0x464] ss:$28 sps:$4 sm:$0xff]  }
  0x8f   :  { %3069 = vmatprep.subr.bf16.mxu0 %v17279_v14 }
  0x91   :  { %2916 = vmatpush1.bf16.msra.mxu1 %v17304_v28  ;;  %v17339_v28 = vld [vmem:[%s22335_s24 + $0x46c] ss:$28 sps:$4 sm:$0xff]  }
  0x92   :  { %3070 = vmatpush1.bf16.msra.mxu0 %v17277_v16  ;;  %2926 = vmatprep.subr.bf16.mxu1 %v17312_v31  ;;  %v17325_v16 = vld [vmem:[%s22335_s24 + $0x3f8] ss:$28 sps:$4 sm:$0xff]  }
  0x93   :  { %3071 = vmatprep.subr.bf16.mxu0 %v17285_v17 }
  0x96   :  { %3072 = vmatpush1.bf16.msra.mxu0 %v17283_v18 }
  0x97   :  { %3073 = vmatprep.subr.bf16.mxu0 %v17291_v19  ;;  %v17330_v19 = vld [vmem:[%s22335_s24 + $0x42c] ss:$28 sps:$4 sm:$0xff]  }
  0x9a   :  { %3074 = vmatpush1.bf16.msra.mxu0 %v17289_v20  ;;  %v17333_v20 = vld [vmem:[%s22335_s24 + $0x434] ss:$28 sps:$4 sm:$0xff]  }
  0x9b   :  { %3075 = vmatprep.subr.bf16.mxu0 %v17297_v21 }
  0x9e   :  { %3076 = vmatpush1.bf16.msra.mxu0 %v17295_v22  ;;  %v17328_v22 = vld [vmem:[%s22335_s24 + $0x428] ss:$28 sps:$4 sm:$0xff]  }
  0x9f   :  { %3077 = vmatprep.subr.bf16.mxu0 %v17303_v25  ;;  %v20223_v25 = vld [vmem:[%s22336_s20 + $0x8] sm:$0x1f] }
  0xa2   :  { %3078 = vmatpush1.bf16.msra.mxu0 %v17301_v26 }
  0xa3   :  { %3079 = vmatprep.subr.bf16.mxu0 %v17309_v29 }
  0xa6   :  { %3080 = vmatpush1.bf16.msra.mxu0 %v17307_v30 }
  0xa7   :  { %3090 = vmatprep.subr.bf16.mxu0 %v17315_v32  ;;  %v17334_v32 = vld [vmem:[%s22335_s24 + $0x460] ss:$28 sps:$4 sm:$0xff]  }
 0x11c   :  { %v373_v41 = vpop.f32.mrb[0].mxu0 }
 0x11d   :  { %v374_v42 = vadd.f32 %v373_v41, %v141_v39  ;;  %v375_v43 = vpop.f32.mrb[1].mxu0  ;;  %v173_v39 = vrot.slane %v20223_v25, %v20134_v36  ;;  %v17342_v41 = vld [vmem:[%s22335_s24 + $0x49c] ss:$28 sps:$4 sm:$0xff]  }
 0x11e   :  { %v376_v44 = vadd.f32 %v375_v43, %v145_v40  ;;  %v377_v45 = vpop.f32.mrb[2].mxu0  ;;  %v20245_v40 = vsub.s32 2, %v20131_v35  ;;  %v17340_v43 = vld [vmem:[%s22335_s24 + $0x498] ss:$28 sps:$4 sm:$0xff]  }
 0x11f   :  { %v625_v47 = vmax.f32 %v374_v42, 0.0  ;;  %v378_v48 = vpop.f32.mrb[3].mxu0  ;;  %v496_v5 = vpop.f32.mrb[0].mxu1  ;;  %v17345_v42 = vld [vmem:[%s22335_s24 + $0x4a4] ss:$28 sps:$4 sm:$0xff]  }
 0x120   :  { %v626_v49 = vmax.f32 %v376_v44, 0.0  ;;  %v497_v8 = vadd.f32 %v496_v5, %v165_v60  ;;  %v498_v9 = vpop.f32.mrb[1].mxu1  ;;  %v17343_v44 = vld [vmem:[%s22335_s24 + $0x4a0] ss:$28 sps:$4 sm:$0xff]   ;;  %v181_v48 = vrot.slane %v20223_v25, %v20245_v40 }
 0x121   :  { %v20170_v57 = vpack.c.bf16 %v625_v47, %v625_v47  ;;  %v499_v11 = vadd.f32 %v498_v9, %v169_v63  ;;  %v500_v12 = vpop.f32.mrb[2].mxu1  ;;  %v177_v47 = vrot.slane %v20223_v25, %v20142_v38  ;;  %v20272_v63 = vsub.s32 4, %v20131_v35 }
 0x122   :  { %v20163_v54 = vpack.c.bf16 %v626_v49, %v626_v49  ;;  %v631_v13 = vmax.f32 %v497_v8, 0.0  ;;  %v501_v14 = vpop.f32.mrb[3].mxu1  ;;  %v17354_v12 = vld [vmem:[%s22335_s24 + $0x50c] ss:$28 sps:$4 sm:$0xff]  }
 0x123   :  { %v632_v18 = vmax.f32 %v499_v11, 0.0  ;;  %v17349_v11 = vld [vmem:[%s22335_s24 + $0x4d8] ss:$28 sps:$4 sm:$0xff]  }
 0x124   :  { %2917 = vmatprep.mubr.bf16.mxu1 %v20163_v54  ;;  %3081 = vmatprep.mubr.bf16.mxu0 %v20163_v54  ;;  %v20175_v59 = vpop.f32.mrb[4].mxu0  ;;  %v20208_v21 = vpack.c.bf16 %v631_v13, %v631_v13 }
 0x125   :  { %2918 = vmatmul.mubr.bf16.vlgmr.msra.gmra.mrb[8].mxu1 %v20170_v57  ;;  %3082 = vmatmul.mubr.bf16.vlgmr.msra.gmra.mrb[20].mxu0 %v20170_v57  ;;  %v416_v62 = vpop.f32.mrb[5].mxu0  ;;  %v8369_v26 = vpack.c.bf16 %v632_v18, %v632_v18 }
 0x126   :  { %2927 = vmatpush1.bf16.msra.mxu1 %v17310_v50  ;;  %3091 = vmatpush1.bf16.msra.mxu0 %v17313_v51  ;;  %v417_v3 = vadd.f32 %v416_v62, %v153_v55  ;;  %v418_v4 = vpop.f32.mrb[6].mxu0 }
 0x127   :  { %2928 = vmatprep.subr.bf16.mxu1 %v17318_v52  ;;  %3092 = vmatprep.subr.bf16.mxu0 %v17321_v53  ;;  %v419_v7 = vpop.f32.mrb[7].mxu0  ;;  %v578_v49 = vpop.f32.mrb[4].mxu1  ;;  %v17348_v52 = vld [vmem:[%s22335_s24 + $0x4d4] ss:$28 sps:$4 sm:$0xff]   ;;  %v17351_v53 = vld [vmem:[%s22335_s24 + $0x4dc] ss:$28 sps:$4 sm:$0xff]  }
 0x128   :  { %v628_v10 = vmax.f32 %v417_v3, 0.0  ;;  %8819 = vrot.lane.b32.xlu1 %v20208_v21, %s19673_s28  ;;  %8821 = vrot.lane.b32.xlu0 %v8369_v26, %s19673_s28  ;;  %v579_v58 = vadd.f32 %v578_v49, %v181_v48  ;;  %v580_v62 = vpop.f32.mrb[5].mxu1  ;;  %v17346_v4 = vld [vmem:[%s22335_s24 + $0x4d0] ss:$28 sps:$4 sm:$0xff]   ;;  %v17360_v26 = vld [vmem:[%s22335_s24 + $0x544] ss:$28 sps:$4 sm:$0xff]  }
 0x129   :  { %v582_v3 = vpop.f32.mrb[6].mxu1  ;;  %v17370_v48 = vld [vmem:[%s22335_s24 + $0x5b0] ss:$28 sps:$4 sm:$0xff]   ;;  %v17373_v49 = vld [vmem:[%s22335_s24 + $0x5b8] ss:$28 sps:$4 sm:$0xff]  }
 0x12a   :  { %2929 = vmatpush1.bf16.msra.mxu1 %v17316_v61  ;;  %3093 = vmatpush1.bf16.msra.mxu0 %v17319_v1  ;;  %v20200_v17 = vpack.c.bf16 %v628_v10, %v628_v10  ;;  %v185_v61 = vrot.slane %v20223_v25, %v20149_v46  ;;  %v583_v8 = vpop.f32.mrb[7].mxu1  ;;  %v189_v10 = vrot.slane %v20223_v25, %v20272_v63  ;;  %v17355_v25 = vld [vmem:[%s22335_s24 + $0x510] ss:$28 sps:$4 sm:$0xff]   ;;  %v17388_v3 = vld [vmem:[%s22335_s24 + $0x658] ss:$28 sps:$4 sm:$0xff]  }
 0x12b   :  { %2930 = vmatprep.subr.bf16.mxu1 %v17324_v2  ;;  %3094 = vmatprep.subr.bf16.mxu0 %v17327_v6  ;;  %v635_v6 = vmax.f32 %v579_v58, 0.0  ;;  %v17387_v58 = vld [vmem:[%s22335_s24 + $0x62c] ss:$28 sps:$4 sm:$0xff]  }
 0x12c   :  { %2958 = vmatprep.mubr.bf16.mxu1 %v20200_v17  ;;  %3122 = vmatprep.mubr.bf16.mxu0 %v20200_v17  ;;  %v20218_v24 = vpop.f32.mrb[8].mxu0  ;;  %v581_v7 = vadd.f32 %v580_v62, %v185_v61  ;;  %v17385_v61 = vld [vmem:[%s22335_s24 + $0x628] ss:$28 sps:$4 sm:$0xff]   ;;  %v17390_v62 = vld [vmem:[%s22335_s24 + $0x65c] ss:$28 sps:$4 sm:$0xff]  }
 0x12d   :  { %v20231_v29 = vpop.f32.mrb[9].mxu0  ;;  %v8372_v18 = vpack.c.bf16 %v635_v6, %v635_v6  ;;  %v17396_v6 = vld [vmem:[%s22335_s24 + $0x694] ss:$28 sps:$4 sm:$0xff]  }
 0x12e   :  { %2931 = vmatpush1.bf16.msra.mxu1 %v17322_v15  ;;  %3095 = vmatpush1.bf16.msra.mxu0 %v17325_v16  ;;  %v459_v30 = vpop.f32.mrb[10].mxu0  ;;  %v636_v14 = vmax.f32 %v581_v7, 0.0  ;;  %v17357_v15 = vld [vmem:[%s22335_s24 + $0x514] ss:$28 sps:$4 sm:$0xff]   ;;  %v17352_v16 = vld [vmem:[%s22335_s24 + $0x508] ss:$28 sps:$4 sm:$0xff]  }
 0x12f   :  { %2932 = vmatprep.subr.bf16.mxu1 %v17330_v19  ;;  %3096 = vmatprep.subr.bf16.mxu0 %v17333_v20  ;;  %v460_v31 = vpop.f32.mrb[11].mxu0 }
 0x130   :  { %v8373_v19 = vpack.c.bf16 %v636_v14, %v636_v14  ;;  %v17403_v14 = vld [vmem:[%s22335_s24 + $0x6d0] ss:$28 sps:$4 sm:$0xff]  }
 0x132   :  { %2933 = vmatpush1.bf16.msra.mxu1 %v17328_v22  ;;  %3097 = vmatpush1.bf16.msra.mxu0 %v17331_v23 }
 0x133   :  { %2934 = vmatprep.subr.bf16.mxu1 %v17336_v27  ;;  %3098 = vmatprep.subr.bf16.mxu0 %v17339_v28  ;;  %v17363_v28 = vld [vmem:[%s22335_s24 + $0x54c] ss:$28 sps:$4 sm:$0xff]  }
 0x134   :  { %v537_v45 = vpop.f32.mrb[12].mxu0 }
 0x135   :  { %v538_v50 = vadd.f32 %v537_v45, %v173_v39  ;;  %v539_v51 = vpop.f32.mrb[13].mxu0  ;;  %v17361_v39 = vld [vmem:[%s22335_s24 + $0x548] ss:$28 sps:$4 sm:$0xff]   ;;  %v17372_v45 = vld [vmem:[%s22335_s24 + $0x5b4] ss:$28 sps:$4 sm:$0xff]  }
 0x136   :  { %2935 = vmatpush1.bf16.msra.mxu1 %v17334_v32  ;;  %3099 = vmatpush1.bf16.msra.mxu0 %v17337_v34  ;;  %v540_v55 = vadd.f32 %v539_v51, %v177_v47  ;;  %v541_v60 = vpop.f32.mrb[14].mxu0  ;;  %v17358_v32 = vld [vmem:[%s22335_s24 + $0x540] ss:$28 sps:$4 sm:$0xff]   ;;  %v17381_v51 = vld [vmem:[%s22335_s24 + $0x5f4] ss:$28 sps:$4 sm:$0xff]  }
 0x137   :  { %2936 = vmatprep.subr.bf16.mxu1 %v17342_v41  ;;  %3100 = vmatprep.subr.bf16.mxu0 %v17345_v42  ;;  %v633_v1 = vmax.f32 %v538_v50, 0.0  ;;  %v542_v2 = vpop.f32.mrb[15].mxu0  ;;  %v17366_v41 = vld [vmem:[%s22335_s24 + $0x57c] ss:$28 sps:$4 sm:$0xff]   ;;  %v17369_v42 = vld [vmem:[%s22335_s24 + $0x584] ss:$28 sps:$4 sm:$0xff]  }
 0x138   :  { %v634_v5 = vmax.f32 %v540_v55, 0.0  ;;  %v17375_v47 = vld [vmem:[%s22335_s24 + $0x5bc] ss:$28 sps:$4 sm:$0xff]   ;;  %v17378_v50 = vld [vmem:[%s22335_s24 + $0x5ec] ss:$28 sps:$4 sm:$0xff]   ;;  %v20366_v2 = vsub.s32 5, %v20131_v35 }
 0x139   :  { %v8370_v9 = vpack.c.bf16 %v633_v1, %v633_v1  ;;  %v17384_v55 = vld [vmem:[%s22335_s24 + $0x624] ss:$28 sps:$4 sm:$0xff]   ;;  %v17399_v35 = vld [vmem:[%s22335_s24 + $0x69c] ss:$28 sps:$4 sm:$0xff]  }
 0x13a   :  { %2937 = vmatpush1.bf16.msra.mxu1 %v17340_v43  ;;  %3101 = vmatpush1.bf16.msra.mxu0 %v17343_v44  ;;  %v8371_v13 = vpack.c.bf16 %v634_v5, %v634_v5  ;;  %v17364_v43 = vld [vmem:[%s22335_s24 + $0x578] ss:$28 sps:$4 sm:$0xff]   ;;  %v17367_v44 = vld [vmem:[%s22335_s24 + $0x580] ss:$28 sps:$4 sm:$0xff]   ;;  %v161_v7 = vrot.slane %v20139_v37, %v20366_v2 }
 0x13b   :  { %2938 = vmatprep.subr.bf16.mxu1 %v17348_v52  ;;  %3102 = vmatprep.subr.bf16.mxu0 %v17351_v53  ;;  %v17376_v52 = vld [vmem:[%s22335_s24 + $0x5e8] ss:$28 sps:$4 sm:$0xff]   ;;  %v17379_v53 = vld [vmem:[%s22335_s24 + $0x5f0] ss:$28 sps:$4 sm:$0xff]   ;;  %v17382_v60 = vld [vmem:[%s22335_s24 + $0x620] ss:$28 sps:$4 sm:$0xff]  }
 0x13c   :  { %8823 = vrot.lane.b32.xlu0 %v8370_v9, %s19673_s28  ;;  %v619_v20 = vpop.f32.mrb[16].mxu0  ;;  %8825 = vrot.lane.b32.xlu1 %v8371_v13, %s19673_s28  ;;  %v17393_v1 = vld [vmem:[%s22335_s24 + $0x664] ss:$28 sps:$4 sm:$0xff]   ;;  %v17394_v9 = vld [vmem:[%s22335_s24 + $0x690] ss:$28 sps:$4 sm:$0xff]  }
 0x13d   :  { %v620_v22 = vadd.f32 %v619_v20, %v189_v10  ;;  %v16923_v23 = vpop.f32.mrb[17].mxu0  ;;  %v17391_v5 = vld [vmem:[%s22335_s24 + $0x660] ss:$28 sps:$4 sm:$0xff]   ;;  %v17397_v10 = vld [vmem:[%s22335_s24 + $0x698] ss:$28 sps:$4 sm:$0xff]  }
 0x13e   :  { %2939 = vmatpush1.bf16.msra.mxu1 %v17346_v4  ;;  %3103 = vmatpush1.bf16.msra.mxu0 %v17349_v11  ;;  %v622_v27 = vpop.f32.mrb[18].mxu0  ;;  %v149_v4 = vrot.slane %v20139_v37, %v20245_v40  ;;  %v17402_v11 = vld [vmem:[%s22335_s24 + $0x6cc] ss:$28 sps:$4 sm:$0xff]   ;;  %v17405_v37 = vld [vmem:[%s22335_s24 + $0x6d4] ss:$28 sps:$4 sm:$0xff]  }
 0x13f   :  { %2940 = vmatprep.subr.bf16.mxu1 %v17354_v12  ;;  %3104 = vmatprep.subr.bf16.mxu0 %v17357_v15  ;;  %v637_v30 = vmax.f32 %v620_v22, 0.0  ;;  %v16924_v31 = vpop.f32.mrb[19].mxu0  ;;  %v17400_v13 = vld [vmem:[%s22335_s24 + $0x6c8] ss:$28 sps:$4 sm:$0xff]   ;;  %v17414_v22 = vld [vmem:[%s22335_s24 + $0x73c] ss:$28 sps:$4 sm:$0xff]  }
 0x140   :  { %8827 = vrot.lane.b32.xlu0 %v8372_v18, %s19673_s28  ;;  %8829 = vrot.lane.b32.xlu1 %v8373_v19, %s19673_s28  ;;  %v415_v8 = vadd.f32 %v20175_v59, %v149_v4  ;;  %v458_v59 = vadd.f32 %v20231_v29, %v161_v7  ;;  %v17408_v15 = vld [vmem:[%s22335_s24 + $0x704] ss:$28 sps:$4 sm:$0xff]   ;;  %v17411_v29 = vld [vmem:[%s22335_s24 + $0x70c] ss:$28 sps:$4 sm:$0xff]  }
 0x141   :  { %v8374_v34 = vpack.c.bf16 %v637_v30, %v637_v30  ;;  %v17406_v19 = vld [vmem:[%s22335_s24 + $0x700] ss:$28 sps:$4 sm:$0xff]   ;;  %v17409_v20 = vld [vmem:[%s22335_s24 + $0x708] ss:$28 sps:$4 sm:$0xff]   ;;  %v17418_v31 = vld [vmem:[%s22335_s24 + $0x770] ss:$28 sps:$4 sm:$0xff]  }
 0x142   :  { %2941 = vmatpush1.bf16.msra.mxu1 %v17352_v16  ;;  %3105 = vmatpush1.bf16.msra.mxu0 %v17355_v25  ;;  %v627_v12 = vmax.f32 %v415_v8, 0.0  ;;  %v630_v16 = vmax.f32 %v458_v59, 0.0  ;;  %v17417_v23 = vld [vmem:[%s22335_s24 + $0x744] ss:$28 sps:$4 sm:$0xff]   ;;  %v17423_v30 = vld [vmem:[%s22335_s24 + $0x77c] ss:$28 sps:$4 sm:$0xff]  }
 0x143   :  { %2942 = vmatprep.subr.bf16.mxu1 %v17360_v26  ;;  %3106 = vmatprep.subr.bf16.mxu0 %v17363_v28  ;;  %v17412_v26 = vld [vmem:[%s22335_s24 + $0x738] ss:$28 sps:$4 sm:$0xff]   ;;  %v17415_v27 = vld [vmem:[%s22335_s24 + $0x740] ss:$28 sps:$4 sm:$0xff]   ;;  %v17459_v4 = vld [vmem:[%s22335_s24 + $0x8cc] ss:$28 sps:$4 sm:$0xff]  }
 0x144   :  { %8831 = vrot.lane.b32.xlu0 %v8374_v34, %s19673_s28  ;;  %v20410_v18 = vpack.c.bf16 %v627_v12, %v627_v12  ;;  %v20424_v25 = vpack.c.bf16 %v630_v16, %v630_v16  ;;  %v17420_v28 = vld [vmem:[%s22335_s24 + $0x774] ss:$28 sps:$4 sm:$0xff]   ;;  %v17426_v34 = vld [vmem:[%s22335_s24 + $0x7ac] ss:$28 sps:$4 sm:$0xff]   ;;  %v17465_v7 = vld [vmem:[%s22335_s24 + $0x904] ss:$28 sps:$4 sm:$0xff]  }
 0x145   :  { %v17460_v8 = vld [vmem:[%s22335_s24 + $0x8f8] ss:$28 sps:$4 sm:$0xff]   ;;  %v17474_v12 = vld [vmem:[%s22335_s24 + $0x96c] ss:$28 sps:$4 sm:$0xff]  }
 0x146   :  { %2943 = vmatpush1.bf16.msra.mxu1 %v17358_v32  ;;  %3107 = vmatpush1.bf16.msra.mxu0 %v17361_v39  ;;  %v17421_v32 = vld [vmem:[%s22335_s24 + $0x778] ss:$28 sps:$4 sm:$0xff]   ;;  %v17483_v16 = vld [vmem:[%s22335_s24 + $0x9ac] ss:$28 sps:$4 sm:$0xff]  }
 0x147   :  { %2944 = vmatprep.subr.bf16.mxu1 %v17366_v41  ;;  %3108 = vmatprep.subr.bf16.mxu0 %v17369_v42  ;;  %v17429_v39 = vld [vmem:[%s22335_s24 + $0x7b4] ss:$28 sps:$4 sm:$0xff]   ;;  %v17424_v41 = vld [vmem:[%s22335_s24 + $0x7a8] ss:$28 sps:$4 sm:$0xff]  }
 0x148   :  { %v17427_v42 = vld [vmem:[%s22335_s24 + $0x7b0] ss:$28 sps:$4 sm:$0xff]   ;;  %v17469_v59 = vld [vmem:[%s22335_s24 + $0x938] ss:$28 sps:$4 sm:$0xff]  }
 0x14a   :  { %2945 = vmatpush1.bf16.msra.mxu1 %v17364_v43  ;;  %3109 = vmatpush1.bf16.msra.mxu0 %v17367_v44  ;;  %v17432_v43 = vld [vmem:[%s22335_s24 + $0x7e4] ss:$28 sps:$4 sm:$0xff]   ;;  %v17435_v44 = vld [vmem:[%s22335_s24 + $0x7ec] ss:$28 sps:$4 sm:$0xff]  }
 0x14b   :  { %2946 = vmatprep.subr.bf16.mxu1 %v17372_v45  ;;  %3110 = vmatprep.subr.bf16.mxu0 %v17375_v47  ;;  %v17430_v45 = vld [vmem:[%s22335_s24 + $0x7e0] ss:$28 sps:$4 sm:$0xff]   ;;  %v17433_v47 = vld [vmem:[%s22335_s24 + $0x7e8] ss:$28 sps:$4 sm:$0xff]  }
 0x14e   :  { %2947 = vmatpush1.bf16.msra.mxu1 %v17370_v48  ;;  %3111 = vmatpush1.bf16.msra.mxu0 %v17373_v49  ;;  %v17438_v48 = vld [vmem:[%s22335_s24 + $0x81c] ss:$28 sps:$4 sm:$0xff]   ;;  %v17441_v49 = vld [vmem:[%s22335_s24 + $0x824] ss:$28 sps:$4 sm:$0xff]  }
 0x14f   :  { %2948 = vmatprep.subr.bf16.mxu1 %v17378_v50  ;;  %3112 = vmatprep.subr.bf16.mxu0 %v17381_v51  ;;  %v17436_v50 = vld [vmem:[%s22335_s24 + $0x818] ss:$28 sps:$4 sm:$0xff]   ;;  %v17439_v51 = vld [vmem:[%s22335_s24 + $0x820] ss:$28 sps:$4 sm:$0xff]  }
 0x152   :  { %2949 = vmatpush1.bf16.msra.mxu1 %v17376_v52  ;;  %3113 = vmatpush1.bf16.msra.mxu0 %v17379_v53  ;;  %v17444_v52 = vld [vmem:[%s22335_s24 + $0x854] ss:$28 sps:$4 sm:$0xff]   ;;  %v17447_v53 = vld [vmem:[%s22335_s24 + $0x85c] ss:$28 sps:$4 sm:$0xff]  }
 0x153   :  { %2950 = vmatprep.subr.bf16.mxu1 %v17384_v55  ;;  %3114 = vmatprep.subr.bf16.mxu0 %v17387_v58  ;;  %v17442_v55 = vld [vmem:[%s22335_s24 + $0x850] ss:$28 sps:$4 sm:$0xff]   ;;  %v17445_v58 = vld [vmem:[%s22335_s24 + $0x858] ss:$28 sps:$4 sm:$0xff]  }
 0x156   :  { %2951 = vmatpush1.bf16.msra.mxu1 %v17382_v60  ;;  %3115 = vmatpush1.bf16.msra.mxu0 %v17385_v61  ;;  %v17450_v60 = vld [vmem:[%s22335_s24 + $0x88c] ss:$28 sps:$4 sm:$0xff]   ;;  %v17453_v61 = vld [vmem:[%s22335_s24 + $0x894] ss:$28 sps:$4 sm:$0xff]  }
 0x157   :  { %2952 = vmatprep.subr.bf16.mxu1 %v17390_v62  ;;  %3116 = vmatprep.subr.bf16.mxu0 %v17393_v1  ;;  %v17448_v62 = vld [vmem:[%s22335_s24 + $0x888] ss:$28 sps:$4 sm:$0xff]   ;;  %v17451_v1 = vld [vmem:[%s22335_s24 + $0x890] ss:$28 sps:$4 sm:$0xff]  }
 0x15a   :  { %2953 = vmatpush1.bf16.msra.mxu1 %v17388_v3  ;;  %3117 = vmatpush1.bf16.msra.mxu0 %v17391_v5  ;;  %v17456_v3 = vld [vmem:[%s22335_s24 + $0x8c4] ss:$28 sps:$4 sm:$0xff]  }
 0x15b   :  { %2954 = vmatprep.subr.bf16.mxu1 %v17396_v6  ;;  %3118 = vmatprep.subr.bf16.mxu0 %v17399_v35  ;;  %v17454_v5 = vld [vmem:[%s22335_s24 + $0x8c0] ss:$28 sps:$4 sm:$0xff]   ;;  %v17457_v6 = vld [vmem:[%s22335_s24 + $0x8c8] ss:$28 sps:$4 sm:$0xff]  }
 0x15c   :  { %v17462_v35 = vld [vmem:[%s22335_s24 + $0x8fc] ss:$28 sps:$4 sm:$0xff]  }
 0x15e   :  { %2955 = vmatpush1.bf16.msra.mxu1 %v17394_v9  ;;  %3119 = vmatpush1.bf16.msra.mxu0 %v17397_v10  ;;  %v17463_v9 = vld [vmem:[%s22335_s24 + $0x900] ss:$28 sps:$4 sm:$0xff]   ;;  %v17468_v10 = vld [vmem:[%s22335_s24 + $0x934] ss:$28 sps:$4 sm:$0xff]  }
 0x15f   :  { %2956 = vmatprep.subr.bf16.mxu1 %v17402_v11  ;;  %3120 = vmatprep.subr.bf16.mxu0 %v17405_v37  ;;  %v17471_v11 = vld [vmem:[%s22335_s24 + $0x93c] ss:$28 sps:$4 sm:$0xff]   ;;  %v17466_v37 = vld [vmem:[%s22335_s24 + $0x930] ss:$28 sps:$4 sm:$0xff]  }
 0x162   :  { %2957 = vmatpush1.bf16.msra.mxu1 %v17400_v13  ;;  %3121 = vmatpush1.bf16.msra.mxu0 %v17403_v14  ;;  %v17477_v13 = vld [vmem:[%s22335_s24 + $0x974] ss:$28 sps:$4 sm:$0xff]   ;;  %v17472_v14 = vld [vmem:[%s22335_s24 + $0x968] ss:$28 sps:$4 sm:$0xff]  }
 0x163   :  { %2967 = vmatprep.subr.bf16.mxu1 %v17408_v15  ;;  %3131 = vmatprep.subr.bf16.mxu0 %v17411_v29  ;;  %v17475_v15 = vld [vmem:[%s22335_s24 + $0x970] ss:$28 sps:$4 sm:$0xff]   ;;  %v17480_v29 = vld [vmem:[%s22335_s24 + $0x9a4] ss:$28 sps:$4 sm:$0xff]  }
 0x165   :  { %2959 = vmatmul.mubr.bf16.vlgmr.msra.gmra.mrb[8].mxu1 %v20410_v18  ;;  %3123 = vmatmul.mubr.bf16.vlgmr.msra.gmra.mrb[20].mxu0 %v20410_v18 }
 0x166   :  { %2968 = vmatpush1.bf16.msra.mxu1 %v17406_v19  ;;  %3132 = vmatpush1.bf16.msra.mxu0 %v17409_v20  ;;  %v17478_v19 = vld [vmem:[%s22335_s24 + $0x9a0] ss:$28 sps:$4 sm:$0xff]   ;;  %v17481_v20 = vld [vmem:[%s22335_s24 + $0x9a8] ss:$28 sps:$4 sm:$0xff]  }
 0x167   :  { %2969 = vmatprep.subr.bf16.mxu1 %v17414_v22  ;;  %3133 = vmatprep.subr.bf16.mxu0 %v17417_v23  ;;  %v17486_v22 = vld [vmem:[%s22335_s24 + $0x9dc] ss:$28 sps:$4 sm:$0xff]   ;;  %v17489_v23 = vld [vmem:[%s22335_s24 + $0x9e4] ss:$28 sps:$4 sm:$0xff]  }
 0x168   :  { %2999 = vmatprep.mubr.bf16.mxu1 %v20424_v25  ;;  %3163 = vmatprep.mubr.bf16.mxu0 %v20424_v25 }
 0x16a   :  { %2970 = vmatpush1.bf16.msra.mxu1 %v17412_v26  ;;  %3134 = vmatpush1.bf16.msra.mxu0 %v17415_v27  ;;  %v17484_v26 = vld [vmem:[%s22335_s24 + $0x9d8] ss:$28 sps:$4 sm:$0xff]   ;;  %v17487_v27 = vld [vmem:[%s22335_s24 + $0x9e0] ss:$28 sps:$4 sm:$0xff]  }
 0x16b   :  { %2971 = vmatprep.subr.bf16.mxu1 %v17420_v28  ;;  %3135 = vmatprep.subr.bf16.mxu0 %v17423_v30  ;;  %v19592_v28 = vld [vmem:[%s22336_s20] sm:$0xff] }
 0x16c   :  { %v157_v30 = vrot.slane %v19592_v28, %v20272_v63  ;;  %v17542_v28 = vld [vmem:[%s22335_s24 + $0x2f0] ss:$28 sps:$4 sm:$0xff]  }
 0x16e   :  { %2972 = vmatpush1.bf16.msra.mxu1 %v17418_v31  ;;  %3136 = vmatpush1.bf16.msra.mxu0 %v17421_v32  ;;  %v17492_v31 = vld [vmem:[%s22335_s24 + $0xa14] ss:$28 sps:$4 sm:$0xff]   ;;  %v17495_v32 = vld [vmem:[%s22335_s24 + $0xa1c] ss:$28 sps:$4 sm:$0xff]  }
 0x16f   :  { %2973 = vmatprep.subr.bf16.mxu1 %v17426_v34  ;;  %3137 = vmatprep.subr.bf16.mxu0 %v17429_v39  ;;  %v17490_v34 = vld [vmem:[%s22335_s24 + $0xa10] ss:$28 sps:$4 sm:$0xff]   ;;  %v17493_v39 = vld [vmem:[%s22335_s24 + $0xa18] ss:$28 sps:$4 sm:$0xff]  }
 0x172   :  { %2974 = vmatpush1.bf16.msra.mxu1 %v17424_v41  ;;  %3138 = vmatpush1.bf16.msra.mxu0 %v17427_v42  ;;  %v17498_v41 = vld [vmem:[%s22335_s24 + $0xa4c] ss:$28 sps:$4 sm:$0xff]   ;;  %v17501_v42 = vld [vmem:[%s22335_s24 + $0xa54] ss:$28 sps:$4 sm:$0xff]  }
 0x173   :  { %2975 = vmatprep.subr.bf16.mxu1 %v17432_v43  ;;  %3139 = vmatprep.subr.bf16.mxu0 %v17435_v44  ;;  %v456_v43 = vadd.f32 %v20218_v24, %v157_v30  ;;  %v17496_v44 = vld [vmem:[%s22335_s24 + $0xa48] ss:$28 sps:$4 sm:$0xff]  }
 0x174   :  { %v17507_v24 = vld [vmem:[%s22335_s24 + $0xa8c] ss:$28 sps:$4 sm:$0xff]  }
 0x175   :  { %v17539_v30 = vld [vmem:[%s22335_s24 + $0x128] ss:$28 sps:$4 sm:$0xff]  }
 0x176   :  { %2976 = vmatpush1.bf16.msra.mxu1 %v17430_v45  ;;  %3140 = vmatpush1.bf16.msra.mxu0 %v17433_v47  ;;  %v17499_v45 = vld [vmem:[%s22335_s24 + $0xa50] ss:$28 sps:$4 sm:$0xff]   ;;  %v17504_v47 = vld [vmem:[%s22335_s24 + $0xa84] ss:$28 sps:$4 sm:$0xff]  }
 0x177   :  { %2977 = vmatprep.subr.bf16.mxu1 %v17438_v48  ;;  %3141 = vmatprep.subr.bf16.mxu0 %v17441_v49  ;;  %v629_v48 = vmax.f32 %v456_v43, 0.0  ;;  %v17502_v49 = vld [vmem:[%s22335_s24 + $0xa80] ss:$28 sps:$4 sm:$0xff]  }
 0x178   :  { %v17552_v43 = vld [vmem:[%s22335_s24 + $0x360] ss:$28 sps:$4 sm:$0xff]  }
 0x17a   :  { %2978 = vmatpush1.bf16.msra.mxu1 %v17436_v50  ;;  %3142 = vmatpush1.bf16.msra.mxu0 %v17439_v51  ;;  %v17505_v50 = vld [vmem:[%s22335_s24 + $0xa88] ss:$28 sps:$4 sm:$0xff]   ;;  %v17510_v51 = vld [vmem:[%s22335_s24 + $0xabc] ss:$28 sps:$4 sm:$0xff]  }
 0x17b   :  { %2979 = vmatprep.subr.bf16.mxu1 %v17444_v52  ;;  %3143 = vmatprep.subr.bf16.mxu0 %v17447_v53  ;;  %v17513_v52 = vld [vmem:[%s22335_s24 + $0xac4] ss:$28 sps:$4 sm:$0xff]   ;;  %v20627_v53 = vpack.c.bf16 %v629_v48, %v629_v48  ;;  %v17554_v48 = vld [vmem:[%s22335_s24 + $0x1d0] ss:$28 sps:$4 sm:$0xff]  }
 0x17e   :  { %2980 = vmatpush1.bf16.msra.mxu1 %v17442_v55  ;;  %3144 = vmatpush1.bf16.msra.mxu0 %v17445_v58  ;;  %v17508_v55 = vld [vmem:[%s22335_s24 + $0xab8] ss:$28 sps:$4 sm:$0xff]   ;;  %v17511_v58 = vld [vmem:[%s22335_s24 + $0xac0] ss:$28 sps:$4 sm:$0xff]  }
 0x17f   :  { %2981 = vmatprep.subr.bf16.mxu1 %v17450_v60  ;;  %3145 = vmatprep.subr.bf16.mxu0 %v17453_v61  ;;  %v17516_v60 = vld [vmem:[%s22335_s24 + $0x14] ss:$28 sps:$4 sm:$0xff]  }
 0x180   :  { %v17517_v61 = vld [vmem:[%s22335_s24 + $0x1d8] ss:$28 sps:$4 sm:$0xff]  }
 0x182   :  { %2982 = vmatpush1.bf16.msra.mxu1 %v17448_v62  ;;  %3146 = vmatpush1.bf16.msra.mxu0 %v17451_v1 }
 0x183   :  { %2983 = vmatprep.subr.bf16.mxu1 %v17456_v3  ;;  %3147 = vmatprep.subr.bf16.mxu0 %v17459_v4  ;;  %v17514_v3 = vld [vmem:[%s22335_s24 + $0x10] ss:$28 sps:$4 sm:$0xff]   ;;  %v17518_v4 = vld [vmem:[%s22335_s24 + $0x18] ss:$28 sps:$4 sm:$0xff]  }
 0x186   :  { %2984 = vmatpush1.bf16.msra.mxu1 %v17454_v5  ;;  %3148 = vmatpush1.bf16.msra.mxu0 %v17457_v6  ;;  %v17521_v5 = vld [vmem:[%s22335_s24 + $0x4c] ss:$28 sps:$4 sm:$0xff]  }
 0x187   :  { %2985 = vmatprep.subr.bf16.mxu1 %v17462_v35  ;;  %3149 = vmatprep.subr.bf16.mxu0 %v17465_v7 }
 0x18a   :  { %2986 = vmatpush1.bf16.msra.mxu1 %v17460_v8  ;;  %3150 = vmatpush1.bf16.msra.mxu0 %v17463_v9  ;;  %v17519_v8 = vld [vmem:[%s22335_s24 + $0x48] ss:$28 sps:$4 sm:$0xff]   ;;  %v17522_v9 = vld [vmem:[%s22335_s24 + $0x210] ss:$28 sps:$4 sm:$0xff]  }
 0x18b   :  { %2987 = vmatprep.subr.bf16.mxu1 %v17468_v10  ;;  %3151 = vmatprep.subr.bf16.mxu0 %v17471_v11  ;;  %v17523_v10 = vld [vmem:[%s22335_s24 + $0x50] ss:$28 sps:$4 sm:$0xff]   ;;  %v17526_v11 = vld [vmem:[%s22335_s24 + $0x84] ss:$28 sps:$4 sm:$0xff]  }
 0x18e   :  { %2988 = vmatpush1.bf16.msra.mxu1 %v17466_v37  ;;  %3152 = vmatpush1.bf16.msra.mxu0 %v17469_v59  ;;  %v17527_v37 = vld [vmem:[%s22335_s24 + $0x248] ss:$28 sps:$4 sm:$0xff]  }
 0x18f   :  { %2989 = vmatprep.subr.bf16.mxu1 %v17474_v12  ;;  %3153 = vmatprep.subr.bf16.mxu0 %v17477_v13 }
 0x192   :  { %2990 = vmatpush1.bf16.msra.mxu1 %v17472_v14  ;;  %3154 = vmatpush1.bf16.msra.mxu0 %v17475_v15  ;;  %v17524_v14 = vld [vmem:[%s22335_s24 + $0x80] ss:$28 sps:$4 sm:$0xff]   ;;  %v17528_v15 = vld [vmem:[%s22335_s24 + $0x88] ss:$28 sps:$4 sm:$0xff]  }
 0x193   :  { %2991 = vmatprep.subr.bf16.mxu1 %v17480_v29  ;;  %3155 = vmatprep.subr.bf16.mxu0 %v17483_v16  ;;  %v17532_v29 = vld [vmem:[%s22335_s24 + $0x280] ss:$28 sps:$4 sm:$0xff]   ;;  %v17529_v16 = vld [vmem:[%s22335_s24 + $0xb8] ss:$28 sps:$4 sm:$0xff]  }
 0x196   :  { %2992 = vmatpush1.bf16.msra.mxu1 %v17478_v19  ;;  %3156 = vmatpush1.bf16.msra.mxu0 %v17481_v20  ;;  %v17533_v19 = vld [vmem:[%s22335_s24 + $0xc0] ss:$28 sps:$4 sm:$0xff]   ;;  %v17536_v20 = vld [vmem:[%s22335_s24 + $0xf4] ss:$28 sps:$4 sm:$0xff]  }
 0x197   :  { %2993 = vmatprep.subr.bf16.mxu1 %v17486_v22  ;;  %3157 = vmatprep.subr.bf16.mxu0 %v17489_v23  ;;  %v17537_v22 = vld [vmem:[%s22335_s24 + $0x2b8] ss:$28 sps:$4 sm:$0xff]   ;;  %v17534_v23 = vld [vmem:[%s22335_s24 + $0xf0] ss:$28 sps:$4 sm:$0xff]  }
 0x19a   :  { %2994 = vmatpush1.bf16.msra.mxu1 %v17484_v26  ;;  %3158 = vmatpush1.bf16.msra.mxu0 %v17487_v27  ;;  %v20645_v62 = vpop.permute.xlu0 %8821  ;;  %v20647_v1 = vpop.permute.xlu1 %8819  ;;  %v17538_v26 = vld [vmem:[%s22335_s24 + $0xf8] ss:$28 sps:$4 sm:$0xff]   ;;  %v17541_v27 = vld [vmem:[%s22335_s24 + $0x12c] ss:$28 sps:$4 sm:$0xff]  }
 0x19b   :  { %2995 = vmatprep.subr.bf16.mxu1 %v17492_v31  ;;  %3159 = vmatprep.subr.bf16.mxu0 %v17495_v32  ;;  %v17543_v31 = vld [vmem:[%s22335_s24 + $0x130] ss:$28 sps:$4 sm:$0xff]   ;;  %v17546_v32 = vld [vmem:[%s22335_s24 + $0x164] ss:$28 sps:$4 sm:$0xff]  }
 0x19e   :  { %2996 = vmatpush1.bf16.msra.mxu1 %v17490_v34  ;;  %3160 = vmatpush1.bf16.msra.mxu0 %v17493_v39  ;;  %v17547_v34 = vld [vmem:[%s22335_s24 + $0x328] ss:$28 sps:$4 sm:$0xff]   ;;  %v17544_v39 = vld [vmem:[%s22335_s24 + $0x160] ss:$28 sps:$4 sm:$0xff]  }
 0x19f   :  { %2997 = vmatprep.subr.bf16.mxu1 %v17498_v41  ;;  %3161 = vmatprep.subr.bf16.mxu0 %v17501_v42  ;;  %v17548_v41 = vld [vmem:[%s22335_s24 + $0x168] ss:$28 sps:$4 sm:$0xff]   ;;  %v17551_v42 = vld [vmem:[%s22335_s24 + $0x19c] ss:$28 sps:$4 sm:$0xff]  }
 0x1a2   :  { %2998 = vmatpush1.bf16.msra.mxu1 %v17496_v44  ;;  %3162 = vmatpush1.bf16.msra.mxu0 %v17499_v45  ;;  %v17549_v44 = vld [vmem:[%s22335_s24 + $0x198] ss:$28 sps:$4 sm:$0xff]   ;;  %v17553_v45 = vld [vmem:[%s22335_s24 + $0x1a0] ss:$28 sps:$4 sm:$0xff]  }
 0x1a3   :  { %3008 = vmatprep.subr.bf16.mxu1 %v17504_v47  ;;  %3172 = vmatprep.subr.bf16.mxu0 %v17507_v24  ;;  %v17556_v47 = vld [vmem:[%s22335_s24 + $0x1d4] ss:$28 sps:$4 sm:$0xff]  }
 0x1a4   :  { %v17557_v24 = vld [vmem:[%s22335_s24 + $0x558] ss:$28 sps:$4 sm:$0xff]  }
 0x1a5   :  { %3000 = vmatmul.mubr.bf16.vlgmr.msra.gmra.mrb[8].mxu1 %v20627_v53  ;;  %3164 = vmatmul.mubr.bf16.vlgmr.msra.gmra.mrb[20].mxu0 %v20627_v53 }
 0x1a6   :  { %3009 = vmatpush1.bf16.msra.mxu1 %v17502_v49  ;;  %3173 = vmatpush1.bf16.msra.mxu0 %v17505_v50  ;;  %v17558_v49 = vld [vmem:[%s22335_s24 + $0x398] ss:$28 sps:$4 sm:$0xff]   ;;  %v17561_v50 = vld [vmem:[%s22335_s24 + $0x20c] ss:$28 sps:$4 sm:$0xff]  }
 0x1a7   :  { %3010 = vmatprep.subr.bf16.mxu1 %v17510_v51  ;;  %3174 = vmatprep.subr.bf16.mxu0 %v17513_v52  ;;  %v17562_v51 = vld [vmem:[%s22335_s24 + $0x590] ss:$28 sps:$4 sm:$0xff]   ;;  %v17559_v52 = vld [vmem:[%s22335_s24 + $0x208] ss:$28 sps:$4 sm:$0xff]  }
 0x1a8   :  { %3040 = vmatprep.mubr.bf16.mxu1 %v19670_v0  ;;  %3204 = vmatprep.mubr.bf16.mxu0 %v19670_v0 }
 0x1aa   :  { %3011 = vmatpush1.bf16.msra.mxu1 %v17508_v55  ;;  %3175 = vmatpush1.bf16.msra.mxu0 %v17511_v58  ;;  %v17563_v55 = vld [vmem:[%s22335_s24 + $0x3d0] ss:$28 sps:$4 sm:$0xff]   ;;  %v17566_v58 = vld [vmem:[%s22335_s24 + $0x244] ss:$28 sps:$4 sm:$0xff]  }
 0x1ab   :  { %3213 = vmatprep.subr.bf16.mxu1 %v17516_v60  ;;  %16548 = vmatprep.subr.bf16.mxu0 %v17517_v61  ;;  %v17567_v60 = vld [vmem:[%s22335_s24 + $0x5c8] ss:$28 sps:$4 sm:$0xff]   ;;  %v17564_v61 = vld [vmem:[%s22335_s24 + $0x240] ss:$28 sps:$4 sm:$0xff]  }
 0x1ae   :  { %v20658_v6 = vpop.permute.xlu0 %8823  ;;  %v20660_v35 = vpop.permute.xlu1 %8825 }
 0x1af   :  { %v20665_v7 = vsel %vm8833_vm2, %v20658_v6, %v20660_v35 }
 0x1b1   :  { %15195 = vmatmul.mubr.msk.bf16.vlgmr.msra.gmra.mrb[8].mxu1 %vm335_vm0, %v20208_v21  ;;  %15196 = vmatmul.mubr.msk.bf16.vlgmr.msra.gmra.mrb[20].mxu0 %vm335_vm0, %v20208_v21 }
 0x1b2   :  { %3214 = vmatpush1.bf16.msra.mxu1 %v17514_v3  ;;  %16549 = vmatpush3.bf16.msra.mxu0 %v17518_v4  ;;  %v20686_v59 = vpop.permute.xlu0 %8827  ;;  %v20688_v12 = vpop.permute.xlu1 %8829  ;;  %v17568_v3 = vld [vmem:[%s22335_s24 + $0x408] ss:$28 sps:$4 sm:$0xff]   ;;  %v17571_v4 = vld [vmem:[%s22335_s24 + $0x27c] ss:$28 sps:$4 sm:$0xff]  }
 0x1b3   :  { %3245 = vmatprep.mubr.bf16.mxu1 %v20163_v54  ;;  %3409 = vmatprep.mubr.bf16.mxu0 %v20163_v54  ;;  %v20695_v13 = vsel %vm8833_vm2, %v20686_v59, %v20688_v12  ;;  %v17531_v54 = vld [vmem:[%s22335_s24 + $0xbc] ss:$28 sps:$4 sm:$0xff]  }
 0x1b4   :  { %3215 = vmatprep.subr.bf16.mxu1 %v17521_v5  ;;  %16550 = vmatprep.subr.bf16.mxu0 %v17522_v9  ;;  %v17572_v5 = vld [vmem:[%s22335_s24 + $0x600] ss:$28 sps:$4 sm:$0xff]  }
 0x1b5   :  { %v17573_v9 = vld [vmem:[%s22335_s24 + $0x440] ss:$28 sps:$4 sm:$0xff]  }
 0x1b6   :  { %3216 = vmatpush1.bf16.msra.mxu1 %v17519_v8  ;;  %16551 = vmatpush3.bf16.msra.mxu0 %v17523_v10  ;;  %v17569_v8 = vld [vmem:[%s22335_s24 + $0x278] ss:$28 sps:$4 sm:$0xff]  }
 0x1b7   :  { %3217 = vmatprep.subr.bf16.mxu1 %v17526_v11  ;;  %16552 = vmatprep.subr.bf16.mxu0 %v17527_v37  ;;  %v17576_v10 = vld [vmem:[%s22335_s24 + $0x2b4] ss:$28 sps:$4 sm:$0xff]  }
 0x1b8   :  { %v17577_v11 = vld [vmem:[%s22335_s24 + $0x638] ss:$28 sps:$4 sm:$0xff]   ;;  %v17574_v37 = vld [vmem:[%s22335_s24 + $0x2b0] ss:$28 sps:$4 sm:$0xff]  }
 0x1ba   :  { %3218 = vmatpush1.bf16.msra.mxu1 %v17524_v14  ;;  %16553 = vmatpush3.bf16.msra.mxu0 %v17528_v15  ;;  %v17578_v14 = vld [vmem:[%s22335_s24 + $0x478] ss:$28 sps:$4 sm:$0xff]   ;;  %v17581_v15 = vld [vmem:[%s22335_s24 + $0x2ec] ss:$28 sps:$4 sm:$0xff]  }
 0x1bb   :  { %3219 = vmatprep.subr.bf16.mxu1 %v17531_v54  ;;  %16554 = vmatprep.subr.bf16.mxu0 %v17532_v29  ;;  %v17582_v54 = vld [vmem:[%s22335_s24 + $0x670] ss:$28 sps:$4 sm:$0xff]   ;;  %v17579_v29 = vld [vmem:[%s22335_s24 + $0x2e8] ss:$28 sps:$4 sm:$0xff]  }
 0x1be   :  { %3220 = vmatpush1.bf16.msra.mxu1 %v17529_v16  ;;  %16555 = vmatpush3.bf16.msra.mxu0 %v17533_v19  ;;  %v17583_v16 = vld [vmem:[%s22335_s24 + $0x4b0] ss:$28 sps:$4 sm:$0xff]   ;;  %v17586_v19 = vld [vmem:[%s22335_s24 + $0x324] ss:$28 sps:$4 sm:$0xff]  }
 0x1bf   :  { %3221 = vmatprep.subr.bf16.mxu1 %v17536_v20  ;;  %16556 = vmatprep.subr.bf16.mxu0 %v17537_v22  ;;  %v17587_v20 = vld [vmem:[%s22335_s24 + $0x6a8] ss:$28 sps:$4 sm:$0xff]   ;;  %v17584_v22 = vld [vmem:[%s22335_s24 + $0x320] ss:$28 sps:$4 sm:$0xff]  }
 0x1c2   :  { %3222 = vmatpush1.bf16.msra.mxu1 %v17534_v23  ;;  %16557 = vmatpush3.bf16.msra.mxu0 %v17538_v26  ;;  %v17588_v23 = vld [vmem:[%s22335_s24 + $0x4e8] ss:$28 sps:$4 sm:$0xff]   ;;  %v17591_v26 = vld [vmem:[%s22335_s24 + $0x35c] ss:$28 sps:$4 sm:$0xff]  }
 0x1c3   :  { %3223 = vmatprep.subr.bf16.mxu1 %v17541_v27  ;;  %16558 = vmatprep.subr.bf16.mxu0 %v17542_v28  ;;  %v17592_v27 = vld [vmem:[%s22335_s24 + $0x6e0] ss:$28 sps:$4 sm:$0xff]   ;;  %v17589_v28 = vld [vmem:[%s22335_s24 + $0x358] ss:$28 sps:$4 sm:$0xff]  }
 0x1c6   :  { %3224 = vmatpush1.bf16.msra.mxu1 %v17539_v30  ;;  %16559 = vmatpush3.bf16.msra.mxu0 %v17543_v31  ;;  %v17593_v30 = vld [vmem:[%s22335_s24 + $0x520] ss:$28 sps:$4 sm:$0xff]   ;;  %v17596_v31 = vld [vmem:[%s22335_s24 + $0x394] ss:$28 sps:$4 sm:$0xff]  }
 0x1c7   :  { %3225 = vmatprep.subr.bf16.mxu1 %v17546_v32  ;;  %16560 = vmatprep.subr.bf16.mxu0 %v17547_v34  ;;  %v17597_v32 = vld [vmem:[%s22335_s24 + $0x8d8] ss:$28 sps:$4 sm:$0xff]   ;;  %v17594_v34 = vld [vmem:[%s22335_s24 + $0x390] ss:$28 sps:$4 sm:$0xff]  }
 0x1ca   :  { %3226 = vmatpush1.bf16.msra.mxu1 %v17544_v39  ;;  %16561 = vmatpush3.bf16.msra.mxu0 %v17548_v41  ;;  %v17598_v39 = vld [vmem:[%s22335_s24 + $0x718] ss:$28 sps:$4 sm:$0xff]   ;;  %v17601_v41 = vld [vmem:[%s22335_s24 + $0x3cc] ss:$28 sps:$4 sm:$0xff]  }
 0x1cb   :  { %3227 = vmatprep.subr.bf16.mxu1 %v17551_v42  ;;  %16562 = vmatprep.subr.bf16.mxu0 %v17552_v43  ;;  %v17602_v42 = vld [vmem:[%s22335_s24 + $0x910] ss:$28 sps:$4 sm:$0xff]   ;;  %v17599_v43 = vld [vmem:[%s22335_s24 + $0x3c8] ss:$28 sps:$4 sm:$0xff]  }
 0x1ce   :  { %3228 = vmatpush1.bf16.msra.mxu1 %v17549_v44  ;;  %16563 = vmatpush3.bf16.msra.mxu0 %v17553_v45  ;;  %v17603_v44 = vld [vmem:[%s22335_s24 + $0x750] ss:$28 sps:$4 sm:$0xff]   ;;  %v17606_v45 = vld [vmem:[%s22335_s24 + $0x404] ss:$28 sps:$4 sm:$0xff]  }
 0x1cf   :  { %3229 = vmatprep.subr.bf16.mxu1 %v17556_v47  ;;  %16570 = vmatprep.subr.bf16.mxu0 %v17557_v24  ;;  %v17608_v47 = vld [vmem:[%s22335_s24 + $0x788] ss:$28 sps:$4 sm:$0xff]   ;;  %v17611_v24 = vld [vmem:[%s22335_s24 + $0x43c] ss:$28 sps:$4 sm:$0xff]  }
 0x1d1   :  { %3410 = vmatmul.mubr.bf16.vlgmr.msra.gmra.mrb[24].mxu0 %v20170_v57 }
 0x1d2   :  { %3230 = vmatpush1.bf16.msra.mxu1 %v17554_v48  ;;  %16571 = vmatpush3.bf16.msra.mxu0 %v17558_v49  ;;  %v17612_v48 = vld [vmem:[%s22335_s24 + $0x980] ss:$28 sps:$4 sm:$0xff]   ;;  %v17609_v49 = vld [vmem:[%s22335_s24 + $0x438] ss:$28 sps:$4 sm:$0xff]  }
 0x1d3   :  { %3449 = vmatprep.mubr.bf16.mxu0 %v20200_v17  ;;  %3231 = vmatprep.subr.bf16.mxu1 %v17561_v50  ;;  %v17613_v50 = vld [vmem:[%s22335_s24 + $0x7c0] ss:$28 sps:$4 sm:$0xff]  }
 0x1d4   :  { %16572 = vmatprep.subr.bf16.mxu0 %v17562_v51  ;;  %v17616_v51 = vld [vmem:[%s22335_s24 + $0x474] ss:$28 sps:$4 sm:$0xff]  }
 0x1d6   :  { %3232 = vmatpush1.bf16.msra.mxu1 %v17559_v52  ;;  %16573 = vmatpush3.bf16.msra.mxu0 %v17563_v55  ;;  %v17617_v52 = vld [vmem:[%s22335_s24 + $0x9b8] ss:$28 sps:$4 sm:$0xff]   ;;  %v17614_v55 = vld [vmem:[%s22335_s24 + $0x470] ss:$28 sps:$4 sm:$0xff]  }
 0x1d7   :  { %3233 = vmatprep.subr.bf16.mxu1 %v17566_v58  ;;  %16574 = vmatprep.subr.bf16.mxu0 %v17567_v60  ;;  %v17618_v58 = vld [vmem:[%s22335_s24 + $0x7f8] ss:$28 sps:$4 sm:$0xff]   ;;  %v17621_v60 = vld [vmem:[%s22335_s24 + $0x4ac] ss:$28 sps:$4 sm:$0xff]  }
 0x1da   :  { %3234 = vmatpush1.bf16.msra.mxu1 %v17564_v61  ;;  %16575 = vmatpush3.bf16.msra.mxu0 %v17568_v3  ;;  %v17622_v61 = vld [vmem:[%s22335_s24 + $0x9f0] ss:$28 sps:$4 sm:$0xff]   ;;  %v17619_v3 = vld [vmem:[%s22335_s24 + $0x4a8] ss:$28 sps:$4 sm:$0xff]  }
 0x1db   :  { %3235 = vmatprep.subr.bf16.mxu1 %v17571_v4  ;;  %16576 = vmatprep.subr.bf16.mxu0 %v17572_v5  ;;  %v17623_v4 = vld [vmem:[%s22335_s24 + $0x830] ss:$28 sps:$4 sm:$0xff]   ;;  %v17626_v5 = vld [vmem:[%s22335_s24 + $0x4e4] ss:$28 sps:$4 sm:$0xff]  }
 0x1de   :  { %3236 = vmatpush1.bf16.msra.mxu1 %v17569_v8  ;;  %16577 = vmatpush3.bf16.msra.mxu0 %v17573_v9  ;;  %v17624_v8 = vld [vmem:[%s22335_s24 + $0x4e0] ss:$28 sps:$4 sm:$0xff]   ;;  %v17627_v9 = vld [vmem:[%s22335_s24 + $0xa28] ss:$28 sps:$4 sm:$0xff]  }
 0x1df   :  { %3237 = vmatprep.subr.bf16.mxu1 %v17576_v10  ;;  %16578 = vmatprep.subr.bf16.mxu0 %v17577_v11  ;;  %v17628_v10 = vld [vmem:[%s22335_s24 + $0x868] ss:$28 sps:$4 sm:$0xff]   ;;  %v17631_v11 = vld [vmem:[%s22335_s24 + $0x51c] ss:$28 sps:$4 sm:$0xff]  }
 0x1e2   :  { %3238 = vmatpush1.bf16.msra.mxu1 %v17574_v37  ;;  %16579 = vmatpush3.bf16.msra.mxu0 %v17578_v14  ;;  %v17632_v37 = vld [vmem:[%s22335_s24 + $0xa60] ss:$28 sps:$4 sm:$0xff]   ;;  %v17629_v14 = vld [vmem:[%s22335_s24 + $0x518] ss:$28 sps:$4 sm:$0xff]  }
 0x1e3   :  { %3239 = vmatprep.subr.bf16.mxu1 %v17581_v15  ;;  %16580 = vmatprep.subr.bf16.mxu0 %v17582_v54  ;;  %v17633_v15 = vld [vmem:[%s22335_s24 + $0x8a0] ss:$28 sps:$4 sm:$0xff]   ;;  %v17636_v54 = vld [vmem:[%s22335_s24 + $0x554] ss:$28 sps:$4 sm:$0xff]  }
 0x1e6   :  { %3240 = vmatpush1.bf16.msra.mxu1 %v17579_v29  ;;  %16581 = vmatpush3.bf16.msra.mxu0 %v17583_v16  ;;  %v17634_v29 = vld [vmem:[%s22335_s24 + $0x550] ss:$28 sps:$4 sm:$0xff]   ;;  %v17637_v16 = vld [vmem:[%s22335_s24 + $0xa98] ss:$28 sps:$4 sm:$0xff]  }
 0x1e7   :  { %3241 = vmatprep.subr.bf16.mxu1 %v17586_v19  ;;  %16582 = vmatprep.subr.bf16.mxu0 %v17587_v20  ;;  %v17640_v19 = vld [vmem:[%s22335_s24 + $0x58c] ss:$28 sps:$4 sm:$0xff]  }
 0x1e8   :  { %v17638_v20 = vld [vmem:[%s22335_s24 + $0x588] ss:$28 sps:$4 sm:$0xff]  }
 0x1ea   :  { %3242 = vmatpush1.bf16.msra.mxu1 %v17584_v22  ;;  %16583 = vmatpush3.bf16.msra.mxu0 %v17588_v23  ;;  %v17641_v22 = vld [vmem:[%s22335_s24 + $0xad0] ss:$28 sps:$4 sm:$0xff]   ;;  %v17644_v23 = vld [vmem:[%s22335_s24 + $0x5c4] ss:$28 sps:$4 sm:$0xff]  }
 0x1eb   :  { %3243 = vmatprep.subr.bf16.mxu1 %v17591_v26  ;;  %16584 = vmatprep.subr.bf16.mxu0 %v17592_v27  ;;  %v17686_v26 = vld [vmem:[#allocation2 + $0x4] ss:$28 sps:$4 sm:$0xff]  }
 0x1ec   :  { %v17642_v27 = vld [vmem:[%s22335_s24 + $0x5c0] ss:$28 sps:$4 sm:$0xff]  }
 0x1ee   :  { %3244 = vmatpush1.bf16.msra.mxu1 %v17589_v28  ;;  %16585 = vmatpush3.bf16.msra.mxu0 %v17593_v30  ;;  %v17647_v28 = vld [vmem:[%s22335_s24 + $0x5fc] ss:$28 sps:$4 sm:$0xff]  }
 0x1ef   :  { %3254 = vmatprep.subr.bf16.mxu1 %v17596_v31  ;;  %16592 = vmatprep.subr.bf16.mxu0 %v17597_v32  ;;  %v17684_v30 = vld [vmem:[#allocation2] ss:$28 sps:$4 sm:$0xff]   ;;  %v17645_v32 = vld [vmem:[%s22335_s24 + $0x5f8] ss:$28 sps:$4 sm:$0xff]  }
 0x1f0   :  { %v17692_v31 = vld [vmem:[#allocation2 + $0x3c] ss:$28 sps:$4 sm:$0xff]  }
 0x1f1   :  { %3246 = vmatmul.mubr.bf16.vlgmr.msra.gmra.mrb[12].mxu1 %v20170_v57  ;;  %3450 = vmatmul.mubr.bf16.vlgmr.msra.gmra.mrb[28].mxu0 %v20410_v18  ;;  %v17607_v57 = vld [vmem:[%s22335_s24 + $0x948] ss:$28 sps:$4 sm:$0xff]  }
 0x1f2   :  { %3255 = vmatpush1.bf16.msra.mxu1 %v17594_v34  ;;  %3286 = vmatprep.mubr.bf16.mxu1 %v20200_v17  ;;  %v17604_v17 = vld [vmem:[%s22335_s24 + $0x400] ss:$28 sps:$4 sm:$0xff]   ;;  %v17650_v34 = vld [vmem:[%s22335_s24 + $0x634] ss:$28 sps:$4 sm:$0xff]  }
 0x1f3   :  { %16593 = vmatpush3.bf16.msra.mxu0 %v17598_v39  ;;  %3489 = vmatprep.mubr.bf16.mxu0 %v20424_v25  ;;  %v17690_v39 = vld [vmem:[#allocation2 + $0x38] ss:$28 sps:$4 sm:$0xff]  }
 0x1f4   :  { %3256 = vmatprep.subr.bf16.mxu1 %v17601_v41  ;;  %16594 = vmatprep.subr.bf16.mxu0 %v17602_v42  ;;  %v17698_v41 = vld [vmem:[#allocation2 + $0x74] ss:$28 sps:$4 sm:$0xff]  }
 0x1f5   :  { %v17648_v42 = vld [vmem:[%s22335_s24 + $0x630] ss:$28 sps:$4 sm:$0xff]  }
 0x1f6   :  { %3257 = vmatpush1.bf16.msra.mxu1 %v17599_v43  ;;  %v17653_v43 = vld [vmem:[%s22335_s24 + $0x66c] ss:$28 sps:$4 sm:$0xff]  }
 0x1f7   :  { %16595 = vmatpush3.bf16.msra.mxu0 %v17603_v44  ;;  %3258 = vmatprep.subr.bf16.mxu1 %v17606_v45  ;;  %v17696_v44 = vld [vmem:[#allocation2 + $0x70] ss:$28 sps:$4 sm:$0xff]  }
 0x1f8   :  { %16596 = vmatprep.subr.bf16.mxu0 %v17607_v57  ;;  %v17704_v45 = vld [vmem:[#allocation2 + $0xac] ss:$28 sps:$4 sm:$0xff]  }
 0x1f9   :  { %v17651_v57 = vld [vmem:[%s22335_s24 + $0x668] ss:$28 sps:$4 sm:$0xff]  }
 0x1fa   :  { %3259 = vmatpush1.bf16.msra.mxu1 %v17604_v17  ;;  %v17656_v17 = vld [vmem:[%s22335_s24 + $0x6a4] ss:$28 sps:$4 sm:$0xff]  }
 0x1fb   :  { %16597 = vmatpush3.bf16.msra.mxu0 %v17608_v47  ;;  %3260 = vmatprep.subr.bf16.mxu1 %v17611_v24  ;;  %v17702_v47 = vld [vmem:[#allocation2 + $0xa8] ss:$28 sps:$4 sm:$0xff]   ;;  %v17654_v24 = vld [vmem:[%s22335_s24 + $0x6a0] ss:$28 sps:$4 sm:$0xff]  }
 0x1fc   :  { %16598 = vmatprep.subr.bf16.mxu0 %v17612_v48  ;;  %v17710_v48 = vld [vmem:[#allocation2 + $0xe4] ss:$28 sps:$4 sm:$0xff]  }
 0x1fe   :  { %3261 = vmatpush1.bf16.msra.mxu1 %v17609_v49  ;;  %v17659_v49 = vld [vmem:[%s22335_s24 + $0x6dc] ss:$28 sps:$4 sm:$0xff]  }
 0x1ff   :  { %16599 = vmatpush3.bf16.msra.mxu0 %v17613_v50  ;;  %3262 = vmatprep.subr.bf16.mxu1 %v17616_v51  ;;  %v17708_v50 = vld [vmem:[#allocation2 + $0xe0] ss:$28 sps:$4 sm:$0xff]  }
 0x200   :  { %16600 = vmatprep.subr.bf16.mxu0 %v17617_v52  ;;  %v17716_v51 = vld [vmem:[#allocation2 + $0x11c] ss:$28 sps:$4 sm:$0xff]  }
 0x201   :  { %v17657_v52 = vld [vmem:[%s22335_s24 + $0x6d8] ss:$28 sps:$4 sm:$0xff]  }
 0x202   :  { %3263 = vmatpush1.bf16.msra.mxu1 %v17614_v55  ;;  %v17662_v55 = vld [vmem:[%s22335_s24 + $0x714] ss:$28 sps:$4 sm:$0xff]  }
 0x203   :  { %16601 = vmatpush3.bf16.msra.mxu0 %v17618_v58  ;;  %3264 = vmatprep.subr.bf16.mxu1 %v17621_v60  ;;  %v17714_v58 = vld [vmem:[#allocation2 + $0x118] ss:$28 sps:$4 sm:$0xff]  }
 0x204   :  { %16602 = vmatprep.subr.bf16.mxu0 %v17622_v61  ;;  %v17722_v60 = vld [vmem:[#allocation2 + $0x154] ss:$28 sps:$4 sm:$0xff]  }
 0x205   :  { %v17660_v61 = vld [vmem:[%s22335_s24 + $0x710] ss:$28 sps:$4 sm:$0xff]  }
 0x206   :  { %3265 = vmatpush1.bf16.msra.mxu1 %v17619_v3  ;;  %v17665_v3 = vld [vmem:[%s22335_s24 + $0x74c] ss:$28 sps:$4 sm:$0xff]  }
 0x207   :  { %16603 = vmatpush3.bf16.msra.mxu0 %v17623_v4  ;;  %3266 = vmatprep.subr.bf16.mxu1 %v17626_v5  ;;  %v17720_v4 = vld [vmem:[#allocation2 + $0x150] ss:$28 sps:$4 sm:$0xff]  }
 0x208   :  { %16604 = vmatprep.subr.bf16.mxu0 %v17627_v9  ;;  %v17728_v5 = vld [vmem:[#allocation2 + $0x18c] ss:$28 sps:$4 sm:$0xff]   ;;  %v17668_v9 = vld [vmem:[%s22335_s24 + $0x784] ss:$28 sps:$4 sm:$0xff]  }
 0x20a   :  { %3267 = vmatpush1.bf16.msra.mxu1 %v17624_v8  ;;  %v17663_v8 = vld [vmem:[%s22335_s24 + $0x748] ss:$28 sps:$4 sm:$0xff]  }
 0x20b   :  { %16605 = vmatpush3.bf16.msra.mxu0 %v17628_v10  ;;  %3268 = vmatprep.subr.bf16.mxu1 %v17631_v11  ;;  %v17726_v10 = vld [vmem:[#allocation2 + $0x188] ss:$28 sps:$4 sm:$0xff]  }
 0x20c   :  { %16606 = vmatprep.subr.bf16.mxu0 %v17632_v37  ;;  %v17734_v11 = vld [vmem:[#allocation2 + $0x1c4] ss:$28 sps:$4 sm:$0xff]  }
 0x20d   :  { %v17732_v37 = vld [vmem:[#allocation2 + $0x1c0] ss:$28 sps:$4 sm:$0xff]  }
 0x20e   :  { %3269 = vmatpush1.bf16.msra.mxu1 %v17629_v14  ;;  %v17740_v14 = vld [vmem:[#allocation2 + $0x1fc] ss:$28 sps:$4 sm:$0xff]  }
 0x20f   :  { %16607 = vmatpush3.bf16.msra.mxu0 %v17633_v15  ;;  %3270 = vmatprep.subr.bf16.mxu1 %v17636_v54  ;;  %v17669_v15 = vld [vmem:[%s22335_s24 + $0x7b8] ss:$28 sps:$4 sm:$0xff]  }
 0x210   :  { %16925 = vmatprep.subr.bf16.mxu0 %v19671_v33  ;;  %v17674_v54 = vld [vmem:[%s22335_s24 + $0x7f4] ss:$28 sps:$4 sm:$0xff]  }
 0x212   :  { %3490 = vmatmul.mubr.bf16.vlgmr.msra.gmra.mrb[32].mxu0 %v20627_v53  ;;  %3271 = vmatpush1.bf16.msra.mxu1 %v17634_v29  ;;  %v17738_v29 = vld [vmem:[#allocation2 + $0x1f8] ss:$28 sps:$4 sm:$0xff]  }
 0x213   :  { %16926 = vmatpush3.bf16.msra.mxu0 %v17637_v16  ;;  %3272 = vmatprep.subr.bf16.mxu1 %v17640_v19  ;;  %v17743_v16 = vld [vmem:[#allocation2 + $0x234] ss:$28 sps:$4 sm:$0xff]  }
 0x214   :  { %16927 = vmatprep.subr.bf16.mxu0 %v19671_v33  ;;  %16929 = vmatprep.mubr.msk.bf16.mxu0 %vm19672_vm1, %v19671_v33  ;;  %v17672_v19 = vld [vmem:[%s22335_s24 + $0x7f0] ss:$28 sps:$4 sm:$0xff]  }
 0x216   :  { %3273 = vmatpush1.bf16.msra.mxu1 %v17638_v20  ;;  %v17677_v20 = vld [vmem:[%s22335_s24 + $0x82c] ss:$28 sps:$4 sm:$0xff]  }
 0x217   :  { %16928 = vmatpush3.bf16.msra.mxu0 %v17641_v22  ;;  %3274 = vmatprep.subr.bf16.mxu1 %v17644_v23  ;;  %v17741_v22 = vld [vmem:[#allocation2 + $0x230] ss:$28 sps:$4 sm:$0xff]   ;;  %v17675_v23 = vld [vmem:[%s22335_s24 + $0x828] ss:$28 sps:$4 sm:$0xff]  }
 0x218   :  { %5791 = vmatprep.subr.bf16.mxu0 %v17686_v26  ;;  %v17749_v26 = vld [vmem:[#allocation2 + $0x26c] ss:$28 sps:$4 sm:$0xff]  }
 0x21a   :  { %16930 = vmatmul.mubr.msk.bf16.vlgmr.msra.gmra.mrb[36].mxu0 %vm335_vm0, %v20208_v21  ;;  %3275 = vmatpush1.bf16.msra.mxu1 %v17642_v27  ;;  %v17680_v27 = vld [vmem:[%s22335_s24 + $0x864] ss:$28 sps:$4 sm:$0xff]  }
 0x21b   :  { %3276 = vmatprep.subr.bf16.mxu1 %v17647_v28  ;;  %5792 = vmatpush1.bf16.msra.mxu0 %v17684_v30  ;;  %v17747_v28 = vld [vmem:[#allocation2 + $0x268] ss:$28 sps:$4 sm:$0xff]   ;;  %v17678_v30 = vld [vmem:[%s22335_s24 + $0x860] ss:$28 sps:$4 sm:$0xff]  }
 0x21c   :  { %5793 = vmatprep.subr.bf16.mxu0 %v17692_v31  ;;  %v17755_v31 = vld [vmem:[#allocation2 + $0x2a4] ss:$28 sps:$4 sm:$0xff]  }
 0x21e   :  { %3277 = vmatpush1.bf16.msra.mxu1 %v17645_v32  ;;  %v17683_v32 = vld [vmem:[%s22335_s24 + $0x89c] ss:$28 sps:$4 sm:$0xff]  }
 0x21f   :  { %3278 = vmatprep.subr.bf16.mxu1 %v17650_v34  ;;  %5794 = vmatpush1.bf16.msra.mxu0 %v17690_v39  ;;  %v17753_v34 = vld [vmem:[#allocation2 + $0x2a0] ss:$28 sps:$4 sm:$0xff]   ;;  %v17681_v39 = vld [vmem:[%s22335_s24 + $0x898] ss:$28 sps:$4 sm:$0xff]  }
 0x220   :  { %5795 = vmatprep.subr.bf16.mxu0 %v17698_v41  ;;  %v17761_v41 = vld [vmem:[#allocation2 + $0x2dc] ss:$28 sps:$4 sm:$0xff]  }
 0x222   :  { %3279 = vmatpush1.bf16.msra.mxu1 %v17648_v42  ;;  %v17689_v42 = vld [vmem:[%s22335_s24 + $0x8d4] ss:$28 sps:$4 sm:$0xff]  }
 0x223   :  { %3280 = vmatprep.subr.bf16.mxu1 %v17653_v43  ;;  %5796 = vmatpush1.bf16.msra.mxu0 %v17696_v44  ;;  %v17759_v43 = vld [vmem:[#allocation2 + $0x2d8] ss:$28 sps:$4 sm:$0xff]  }
 0x224   :  { %5797 = vmatprep.subr.bf16.mxu0 %v17704_v45  ;;  %v17767_v44 = vld [vmem:[#allocation2 + $0x314] ss:$28 sps:$4 sm:$0xff]  }
 0x225   :  { %v17687_v45 = vld [vmem:[%s22335_s24 + $0x8d0] ss:$28 sps:$4 sm:$0xff]  }
 0x226   :  { %3281 = vmatpush1.bf16.msra.mxu1 %v17651_v57  ;;  %v17695_v57 = vld [vmem:[%s22335_s24 + $0x90c] ss:$28 sps:$4 sm:$0xff]  }
 0x227   :  { %3282 = vmatprep.subr.bf16.mxu1 %v17656_v17  ;;  %5798 = vmatpush1.bf16.msra.mxu0 %v17702_v47  ;;  %v17765_v17 = vld [vmem:[#allocation2 + $0x310] ss:$28 sps:$4 sm:$0xff]  }
 0x228   :  { %5799 = vmatprep.subr.bf16.mxu0 %v17710_v48  ;;  %v17773_v47 = vld [vmem:[#allocation2 + $0x34c] ss:$28 sps:$4 sm:$0xff]   ;;  %v17701_v48 = vld [vmem:[%s22335_s24 + $0x944] ss:$28 sps:$4 sm:$0xff]  }
 0x22a   :  { %3283 = vmatpush1.bf16.msra.mxu1 %v17654_v24  ;;  %v17693_v24 = vld [vmem:[%s22335_s24 + $0x908] ss:$28 sps:$4 sm:$0xff]  }
 0x22b   :  { %3284 = vmatprep.subr.bf16.mxu1 %v17659_v49  ;;  %5800 = vmatpush1.bf16.msra.mxu0 %v17708_v50  ;;  %v17771_v49 = vld [vmem:[#allocation2 + $0x348] ss:$28 sps:$4 sm:$0xff]  }
 0x22c   :  { %5801 = vmatprep.subr.bf16.mxu0 %v17716_v51  ;;  %v17779_v50 = vld [vmem:[#allocation2 + $0x384] ss:$28 sps:$4 sm:$0xff]  }
 0x22d   :  { %v17699_v51 = vld [vmem:[%s22335_s24 + $0x940] ss:$28 sps:$4 sm:$0xff]  }
 0x22e   :  { %3285 = vmatpush1.bf16.msra.mxu1 %v17657_v52  ;;  %v17707_v52 = vld [vmem:[%s22335_s24 + $0x97c] ss:$28 sps:$4 sm:$0xff]  }
 0x22f   :  { %3295 = vmatprep.subr.bf16.mxu1 %v17662_v55  ;;  %5802 = vmatpush1.bf16.msra.mxu0 %v17714_v58  ;;  %v17705_v55 = vld [vmem:[%s22335_s24 + $0x978] ss:$28 sps:$4 sm:$0xff]  }
 0x230   :  { %5803 = vmatprep.subr.bf16.mxu0 %v17722_v60  ;;  %v17713_v58 = vld [vmem:[%s22335_s24 + $0x9b4] ss:$28 sps:$4 sm:$0xff]  }
 0x231   :  { %3287 = vmatmul.mubr.bf16.vlgmr.msra.gmra.mrb[12].mxu1 %v20410_v18  ;;  %v17666_v18 = vld [vmem:[%s22335_s24 + $0x780] ss:$28 sps:$4 sm:$0xff]   ;;  %v17711_v60 = vld [vmem:[%s22335_s24 + $0x9b0] ss:$28 sps:$4 sm:$0xff]  }
 0x232   :  { %3296 = vmatpush1.bf16.msra.mxu1 %v17660_v61  ;;  %3327 = vmatprep.mubr.bf16.mxu1 %v20424_v25  ;;  %v17671_v25 = vld [vmem:[%s22335_s24 + $0x7bc] ss:$28 sps:$4 sm:$0xff]   ;;  %v17719_v61 = vld [vmem:[%s22335_s24 + $0x9ec] ss:$28 sps:$4 sm:$0xff]  }
 0x233   :  { %3297 = vmatprep.subr.bf16.mxu1 %v17665_v3  ;;  %5804 = vmatpush1.bf16.msra.mxu0 %v17720_v4  ;;  %v17717_v3 = vld [vmem:[%s22335_s24 + $0x9e8] ss:$28 sps:$4 sm:$0xff]  }
 0x234   :  { %5805 = vmatprep.subr.bf16.mxu0 %v17728_v5  ;;  %v17725_v4 = vld [vmem:[%s22335_s24 + $0xa24] ss:$28 sps:$4 sm:$0xff]  }
 0x235   :  { %v17723_v5 = vld [vmem:[%s22335_s24 + $0xa20] ss:$28 sps:$4 sm:$0xff]  }
 0x236   :  { %3298 = vmatpush1.bf16.msra.mxu1 %v17663_v8  ;;  %v17731_v8 = vld [vmem:[%s22335_s24 + $0xa5c] ss:$28 sps:$4 sm:$0xff]  }
 0x237   :  { %3299 = vmatprep.subr.bf16.mxu1 %v17668_v9  ;;  %5806 = vmatpush1.bf16.msra.mxu0 %v17726_v10  ;;  %v17729_v9 = vld [vmem:[%s22335_s24 + $0xa58] ss:$28 sps:$4 sm:$0xff]  }
 0x238   :  { %5807 = vmatprep.subr.bf16.mxu0 %v17734_v11  ;;  %v17737_v10 = vld [vmem:[%s22335_s24 + $0xa94] ss:$28 sps:$4 sm:$0xff]  }
 0x239   :  { %v17735_v11 = vld [vmem:[%s22335_s24 + $0xa90] ss:$28 sps:$4 sm:$0xff]  }
 0x23a   :  { %3300 = vmatpush1.bf16.msra.mxu1 %v17666_v18  ;;  %v17746_v18 = vld [vmem:[%s22335_s24 + $0xacc] ss:$28 sps:$4 sm:$0xff]  }
 0x23b   :  { %3301 = vmatprep.subr.bf16.mxu1 %v17671_v25  ;;  %5808 = vmatpush1.bf16.msra.mxu0 %v17732_v37  ;;  %v17744_v25 = vld [vmem:[%s22335_s24 + $0xac8] ss:$28 sps:$4 sm:$0xff]  }
 0x23c   :  { %5809 = vmatprep.subr.bf16.mxu0 %v17740_v14  ;;  %v17752_v37 = vld [vmem:[#allocation2 + $0xc] ss:$28 sps:$4 sm:$0xff]  }
 0x23d   :  { %v17750_v14 = vld [vmem:[#allocation2 + $0x8] ss:$28 sps:$4 sm:$0xff]  }
 0x23e   :  { %3302 = vmatpush1.bf16.msra.mxu1 %v17669_v15  ;;  %v17758_v15 = vld [vmem:[#allocation2 + $0x44] ss:$28 sps:$4 sm:$0xff]  }
 0x23f   :  { %3303 = vmatprep.subr.bf16.mxu1 %v17674_v54  ;;  %5810 = vmatpush1.bf16.msra.mxu0 %v17738_v29  ;;  %v17756_v54 = vld [vmem:[#allocation2 + $0x40] ss:$28 sps:$4 sm:$0xff]  }
 0x240   :  { %5811 = vmatprep.subr.bf16.mxu0 %v17743_v16  ;;  %v17764_v29 = vld [vmem:[#allocation2 + $0x7c] ss:$28 sps:$4 sm:$0xff]  }
 0x242   :  { %3304 = vmatpush1.bf16.msra.mxu1 %v17672_v19  ;;  %v17762_v19 = vld [vmem:[#allocation2 + $0x78] ss:$28 sps:$4 sm:$0xff]  }
 0x243   :  { %3305 = vmatprep.subr.bf16.mxu1 %v17677_v20  ;;  %5812 = vmatpush1.bf16.msra.mxu0 %v17741_v22  ;;  %v17770_v22 = vld [vmem:[#allocation2 + $0xb4] ss:$28 sps:$4 sm:$0xff]  }
 0x244   :  { %5813 = vmatprep.subr.bf16.mxu0 %v17749_v26 }
 0x246   :  { %3306 = vmatpush1.bf16.msra.mxu1 %v17675_v23 }
 0x247   :  { %3307 = vmatprep.subr.bf16.mxu1 %v17680_v27  ;;  %5814 = vmatpush1.bf16.msra.mxu0 %v17747_v28 }
 0x248   :  { %5815 = vmatprep.subr.bf16.mxu0 %v17755_v31 }
 0x24a   :  { %3308 = vmatpush1.bf16.msra.mxu1 %v17678_v30 }
 0x24b   :  { %3309 = vmatprep.subr.bf16.mxu1 %v17683_v32  ;;  %5816 = vmatpush1.bf16.msra.mxu0 %v17753_v34 }
 0x24c   :  { %5817 = vmatprep.subr.bf16.mxu0 %v17761_v41  ;;  %v17768_v41 = vld [vmem:[#allocation2 + $0xb0] ss:$28 sps:$4 sm:$0xff]  }
 0x24e   :  { %3310 = vmatpush1.bf16.msra.mxu1 %v17681_v39 }
 0x24f   :  { %3311 = vmatprep.subr.bf16.mxu1 %v17689_v42  ;;  %5818 = vmatpush1.bf16.msra.mxu0 %v17759_v43 }
 0x250   :  { %5819 = vmatprep.subr.bf16.mxu0 %v17767_v44 }
 0x252   :  { %3312 = vmatpush1.bf16.msra.mxu1 %v17687_v45  ;;  %v17776_v45 = vld [vmem:[#allocation2 + $0xec] ss:$28 sps:$4 sm:$0xff]  }
 0x253   :  { %3313 = vmatprep.subr.bf16.mxu1 %v17695_v57  ;;  %5820 = vmatpush1.bf16.msra.mxu0 %v17765_v17 }
 0x254   :  { %5821 = vmatprep.subr.bf16.mxu0 %v17773_v47 }
 0x256   :  { %3314 = vmatpush1.bf16.msra.mxu1 %v17693_v24  ;;  %v17774_v24 = vld [vmem:[#allocation2 + $0xe8] ss:$28 sps:$4 sm:$0xff]  }
 0x257   :  { %3315 = vmatprep.subr.bf16.mxu1 %v17701_v48  ;;  %5822 = vmatpush1.bf16.msra.mxu0 %v17771_v49  ;;  %v17777_v48 = vld [vmem:[#allocation2 + $0x380] ss:$28 sps:$4 sm:$0xff]  }
 0x258   :  { %5832 = vmatprep.subr.bf16.mxu0 %v17779_v50  ;;  %v17782_v49 = vld [vmem:[#allocation2 + $0x124] ss:$28 sps:$4 sm:$0xff]  }
 0x25a   :  { %3316 = vmatpush1.bf16.msra.mxu1 %v17699_v51  ;;  %v17785_v51 = vld [vmem:[#allocation2 + $0x3bc] ss:$28 sps:$4 sm:$0xff]  }
 0x25b   :  { %3317 = vmatprep.subr.bf16.mxu1 %v17707_v52 }
 0x25e   :  { %3318 = vmatpush1.bf16.msra.mxu1 %v17705_v55  ;;  %v17780_v55 = vld [vmem:[#allocation2 + $0x120] ss:$28 sps:$4 sm:$0xff]  }
 0x25f   :  { %3319 = vmatprep.subr.bf16.mxu1 %v17713_v58  ;;  %v17783_v58 = vld [vmem:[#allocation2 + $0x3b8] ss:$28 sps:$4 sm:$0xff]  }
 0x262   :  { %3320 = vmatpush1.bf16.msra.mxu1 %v17711_v60  ;;  %v17788_v60 = vld [vmem:[#allocation2 + $0x15c] ss:$28 sps:$4 sm:$0xff]  }
 0x263   :  { %3321 = vmatprep.subr.bf16.mxu1 %v17719_v61  ;;  %v17791_v61 = vld [vmem:[#allocation2 + $0x3f4] ss:$28 sps:$4 sm:$0xff]  }
 0x266   :  { %3322 = vmatpush1.bf16.msra.mxu1 %v17717_v3  ;;  %v17786_v3 = vld [vmem:[#allocation2 + $0x158] ss:$28 sps:$4 sm:$0xff]  }
 0x267   :  { %3323 = vmatprep.subr.bf16.mxu1 %v17725_v4  ;;  %v17789_v4 = vld [vmem:[#allocation2 + $0x3f0] ss:$28 sps:$4 sm:$0xff]  }
 0x26a   :  { %3324 = vmatpush1.bf16.msra.mxu1 %v17723_v5  ;;  %v17794_v5 = vld [vmem:[#allocation2 + $0x194] ss:$28 sps:$4 sm:$0xff]  }
 0x26b   :  { %3325 = vmatprep.subr.bf16.mxu1 %v17731_v8  ;;  %v17797_v8 = vld [vmem:[#allocation2 + $0x42c] ss:$28 sps:$4 sm:$0xff]  }
 0x26e   :  { %3326 = vmatpush1.bf16.msra.mxu1 %v17729_v9  ;;  %v17792_v9 = vld [vmem:[#allocation2 + $0x190] ss:$28 sps:$4 sm:$0xff]  }
 0x26f   :  { %3336 = vmatprep.subr.bf16.mxu1 %v17737_v10  ;;  %v17795_v10 = vld [vmem:[#allocation2 + $0x428] ss:$28 sps:$4 sm:$0xff]  }
 0x271   :  { %3328 = vmatmul.mubr.bf16.vlgmr.msra.gmra.mrb[12].mxu1 %v20627_v53  ;;  %v21139_v53 = vld [vmem:[%s22310_s4] sm:$0x7f] }
 0x272   :  { %3337 = vmatpush1.bf16.msra.mxu1 %v17735_v11  ;;  %3368 = vmatprep.mubr.bf16.mxu1 %v19670_v0  ;;  %v1050_v16 = vrot.slane %v21139_v53, %v20134_v36  ;;  %v1054_v20 = vrot.slane %v21139_v53, %v20142_v38  ;;  %v17800_v11 = vld [vmem:[#allocation2 + $0x1cc] ss:$28 sps:$4 sm:$0xff]  }
 0x273   :  { %3338 = vmatprep.subr.bf16.mxu1 %v17746_v18  ;;  %v17803_v18 = vld [vmem:[#allocation2 + $0x464] ss:$28 sps:$4 sm:$0xff]  }
 0x276   :  { %3339 = vmatpush1.bf16.msra.mxu1 %v17744_v25  ;;  %v17798_v25 = vld [vmem:[#allocation2 + $0x1c8] ss:$28 sps:$4 sm:$0xff]  }
 0x277   :  { %5955 = vmatprep.subr.bf16.mxu1 %v17752_v37  ;;  %v17801_v37 = vld [vmem:[#allocation2 + $0x460] ss:$28 sps:$4 sm:$0xff]  }
 0x27d   :  { %15197 = vmatmul.mubr.msk.bf16.vlgmr.msra.gmra.mrb[12].mxu1 %vm335_vm0, %v20208_v21  ;;  %v1062_v21 = vrot.slane %v21139_v53, %v20149_v46 }
 0x27e   :  { %5956 = vmatpush1.bf16.msra.mxu1 %v17750_v14  ;;  %v17806_v14 = vld [vmem:[#allocation2 + $0x204] ss:$28 sps:$4 sm:$0xff]  }
 0x27f   :  { %5957 = vmatprep.subr.bf16.mxu1 %v17758_v15  ;;  %v17809_v15 = vld [vmem:[#allocation2 + $0x49c] ss:$28 sps:$4 sm:$0xff]  }
 0x282   :  { %5958 = vmatpush1.bf16.msra.mxu1 %v17756_v54  ;;  %v17804_v54 = vld [vmem:[#allocation2 + $0x200] ss:$28 sps:$4 sm:$0xff]  }
 0x283   :  { %5959 = vmatprep.subr.bf16.mxu1 %v17764_v29  ;;  %v17807_v29 = vld [vmem:[#allocation2 + $0x498] ss:$28 sps:$4 sm:$0xff]  }
 0x284   :  { %v3042_v23 = vpop.f32.mrb[8].mxu1  ;;  %v21147_v26 = vpop.f32.mrb[20].mxu0 }
 0x285   :  { %v16971_v27 = vadd.f32 %v3042_v23, %v1050_v16  ;;  %v3044_v28 = vpop.f32.mrb[9].mxu1  ;;  %v3208_v30 = vpop.f32.mrb[21].mxu0  ;;  %v17812_v16 = vld [vmem:[#allocation2 + $0x23c] ss:$28 sps:$4 sm:$0xff]   ;;  %v17821_v23 = vld [vmem:[#allocation2 + $0x50c] ss:$28 sps:$4 sm:$0xff]  }
 0x286   :  { %5960 = vmatpush1.bf16.msra.mxu1 %v17762_v19  ;;  %v16972_v31 = vadd.f32 %v3044_v28, %v1054_v20  ;;  %v16974_v32 = vadd.f32 %v3208_v30, %v1062_v21  ;;  %v3046_v34 = vpop.f32.mrb[10].mxu1  ;;  %v3210_v39 = vpop.f32.mrb[22].mxu0  ;;  %v17815_v19 = vld [vmem:[#allocation2 + $0x4d4] ss:$28 sps:$4 sm:$0xff]  }
 0x287   :  { %v3537_v42 = vmax.f32 %v16971_v27, 0.0  ;;  %v3047_v43 = vpop.f32.mrb[11].mxu1  ;;  %v3211_v44 = vpop.f32.mrb[23].mxu0  ;;  %5961 = vmatprep.subr.bf16.mxu1 %v17770_v22  ;;  %v17810_v20 = vld [vmem:[#allocation2 + $0x238] ss:$28 sps:$4 sm:$0xff]  }
 0x288   :  { %v3538_v57 = vmax.f32 %v16972_v31, 0.0  ;;  %v3540_v17 = vmax.f32 %v16974_v32, 0.0  ;;  %v17813_v21 = vld [vmem:[#allocation2 + $0x4d0] ss:$28 sps:$4 sm:$0xff]   ;;  %v17819_v34 = vld [vmem:[#allocation2 + $0x508] ss:$28 sps:$4 sm:$0xff]  }
 0x289   :  { %v21151_v50 = vpack.c.bf16 %v3537_v42, %v3537_v42  ;;  %v17818_v22 = vld [vmem:[#allocation2 + $0x274] ss:$28 sps:$4 sm:$0xff]   ;;  %v17827_v42 = vld [vmem:[#allocation2 + $0x544] ss:$28 sps:$4 sm:$0xff]  }
 0x28a   :  { %v21149_v47 = vpack.c.bf16 %v3538_v57, %v3538_v57  ;;  %5962 = vmatpush1.bf16.msra.mxu1 %v17768_v41  ;;  %v21155_v52 = vpack.c.bf16 %v3540_v17, %v3540_v17  ;;  %v17816_v32 = vld [vmem:[#allocation2 + $0x270] ss:$28 sps:$4 sm:$0xff]   ;;  %v17822_v43 = vld [vmem:[#allocation2 + $0x2a8] ss:$28 sps:$4 sm:$0xff]   ;;  %v17825_v44 = vld [vmem:[#allocation2 + $0x540] ss:$28 sps:$4 sm:$0xff]  }
 0x28b   :  { %5963 = vmatprep.subr.bf16.mxu1 %v17776_v45  ;;  %v17824_v41 = vld [vmem:[#allocation2 + $0x2ac] ss:$28 sps:$4 sm:$0xff]   ;;  %v17830_v45 = vld [vmem:[#allocation2 + $0x2e4] ss:$28 sps:$4 sm:$0xff]   ;;  %v17833_v57 = vld [vmem:[#allocation2 + $0x57c] ss:$28 sps:$4 sm:$0xff]  }
 0x28c   :  { %5823 = vmatprep.mubr.bf16.mxu0 %v21149_v47  ;;  %5987 = vmatprep.mubr.bf16.mxu1 %v21149_v47  ;;  %v17828_v17 = vld [vmem:[#allocation2 + $0x2e0] ss:$28 sps:$4 sm:$0xff]  }
 0x28d   :  { %5824 = vmatmul.mubr.bf16.vlgmr.msra.gmra.mrb[40].mxu0 %v21151_v50 }
 0x28e   :  { %5964 = vmatpush1.bf16.msra.mxu1 %v17774_v24  ;;  %5833 = vmatpush1.bf16.msra.mxu0 %v17777_v48  ;;  %v17831_v24 = vld [vmem:[#allocation2 + $0x578] ss:$28 sps:$4 sm:$0xff]  }
 0x28f   :  { %5864 = vmatprep.mubr.bf16.mxu0 %v21155_v52  ;;  %5965 = vmatprep.subr.bf16.mxu1 %v17782_v49  ;;  %v17836_v48 = vld [vmem:[#allocation2 + $0x31c] ss:$28 sps:$4 sm:$0xff]   ;;  %v17839_v49 = vld [vmem:[#allocation2 + $0x5b4] ss:$28 sps:$4 sm:$0xff]  }
 0x290   :  { %5834 = vmatprep.subr.bf16.mxu0 %v17785_v51  ;;  %v17834_v51 = vld [vmem:[#allocation2 + $0x318] ss:$28 sps:$4 sm:$0xff]  }
 0x292   :  { %5966 = vmatpush1.bf16.msra.mxu1 %v17780_v55  ;;  %5835 = vmatpush1.bf16.msra.mxu0 %v17783_v58  ;;  %v17837_v55 = vld [vmem:[#allocation2 + $0x5b0] ss:$28 sps:$4 sm:$0xff]  }
 0x293   :  { %5967 = vmatprep.subr.bf16.mxu1 %v17788_v60  ;;  %5836 = vmatprep.subr.bf16.mxu0 %v17791_v61  ;;  %v17842_v58 = vld [vmem:[#allocation2 + $0x354] ss:$28 sps:$4 sm:$0xff]   ;;  %v17845_v60 = vld [vmem:[#allocation2 + $0x5ec] ss:$28 sps:$4 sm:$0xff]  }
 0x294   :  { %v17840_v61 = vld [vmem:[#allocation2 + $0x350] ss:$28 sps:$4 sm:$0xff]  }
 0x296   :  { %5968 = vmatpush1.bf16.msra.mxu1 %v17786_v3  ;;  %5837 = vmatpush1.bf16.msra.mxu0 %v17789_v4  ;;  %v17843_v3 = vld [vmem:[#allocation2 + $0x5e8] ss:$28 sps:$4 sm:$0xff]  }
 0x297   :  { %5969 = vmatprep.subr.bf16.mxu1 %v17794_v5  ;;  %5838 = vmatprep.subr.bf16.mxu0 %v17797_v8  ;;  %v17848_v4 = vld [vmem:[#allocation2 + $0x38c] ss:$28 sps:$4 sm:$0xff]   ;;  %v17851_v5 = vld [vmem:[#allocation2 + $0x624] ss:$28 sps:$4 sm:$0xff]  }
 0x298   :  { %v17846_v8 = vld [vmem:[#allocation2 + $0x388] ss:$28 sps:$4 sm:$0xff]  }
 0x29a   :  { %5970 = vmatpush1.bf16.msra.mxu1 %v17792_v9  ;;  %5839 = vmatpush1.bf16.msra.mxu0 %v17795_v10  ;;  %v17849_v9 = vld [vmem:[#allocation2 + $0x620] ss:$28 sps:$4 sm:$0xff]  }
 0x29b   :  { %5971 = vmatprep.subr.bf16.mxu1 %v17800_v11  ;;  %5840 = vmatprep.subr.bf16.mxu0 %v17803_v18  ;;  %v17854_v10 = vld [vmem:[#allocation2 + $0x3c4] ss:$28 sps:$4 sm:$0xff]   ;;  %v17857_v11 = vld [vmem:[#allocation2 + $0x65c] ss:$28 sps:$4 sm:$0xff]  }
 0x29c   :  { %v17852_v18 = vld [vmem:[#allocation2 + $0x3c0] ss:$28 sps:$4 sm:$0xff]  }
 0x29e   :  { %5972 = vmatpush1.bf16.msra.mxu1 %v17798_v25  ;;  %5841 = vmatpush1.bf16.msra.mxu0 %v17801_v37  ;;  %v17855_v25 = vld [vmem:[#allocation2 + $0x658] ss:$28 sps:$4 sm:$0xff]  }
 0x29f   :  { %5973 = vmatprep.subr.bf16.mxu1 %v17806_v14  ;;  %5842 = vmatprep.subr.bf16.mxu0 %v17809_v15  ;;  %v17860_v37 = vld [vmem:[#allocation2 + $0x3fc] ss:$28 sps:$4 sm:$0xff]   ;;  %v17863_v14 = vld [vmem:[#allocation2 + $0x694] ss:$28 sps:$4 sm:$0xff]   ;;  %v1058_v15 = vrot.slane %v21139_v53, %v20245_v40 }
 0x2a2   :  { %5974 = vmatpush1.bf16.msra.mxu1 %v17804_v54  ;;  %5843 = vmatpush1.bf16.msra.mxu0 %v17807_v29  ;;  %v17858_v54 = vld [vmem:[#allocation2 + $0x3f8] ss:$28 sps:$4 sm:$0xff]   ;;  %v17861_v29 = vld [vmem:[#allocation2 + $0x690] ss:$28 sps:$4 sm:$0xff]  }
 0x2a3   :  { %5975 = vmatprep.subr.bf16.mxu1 %v17812_v16  ;;  %5844 = vmatprep.subr.bf16.mxu0 %v17815_v19  ;;  %v17866_v16 = vld [vmem:[#allocation2 + $0x434] ss:$28 sps:$4 sm:$0xff]   ;;  %v1074_v19 = vrot.slane %v21139_v53, %v20168_v56 }
 0x2a4   :  { %v16564_v27 = vpop.f32.mrb[24].mxu0 }
 0x2a5   :  { %v16565_v28 = vpop.f32.mrb[25].mxu0 }
 0x2a6   :  { %v21159_v30 = vadd.f32 %v16565_v28, %v16564_v27  ;;  %5976 = vmatpush1.bf16.msra.mxu1 %v17810_v20  ;;  %v16567_v31 = vpop.f32.mrb[26].mxu0  ;;  %5845 = vmatpush1.bf16.msra.mxu0 %v17813_v21  ;;  %v17869_v20 = vld [vmem:[#allocation2 + $0x6cc] ss:$28 sps:$4 sm:$0xff]   ;;  %v16973_v21 = vadd.f32 %v21147_v26, %v1058_v15  ;;  %v17888_v15 = vld [vmem:[#allocation2 + $0x5b8] ss:$28 sps:$4 sm:$0xff]  }
 0x2a7   :  { %v16568_v39 = vpop.f32.mrb[27].mxu0  ;;  %5977 = vmatprep.subr.bf16.mxu1 %v17818_v22  ;;  %5846 = vmatprep.subr.bf16.mxu0 %v17821_v23  ;;  %v17864_v23 = vld [vmem:[#allocation2 + $0x430] ss:$28 sps:$4 sm:$0xff]   ;;  %v17867_v28 = vld [vmem:[#allocation2 + $0x6c8] ss:$28 sps:$4 sm:$0xff]  }
 0x2a8   :  { %v17872_v31 = vld [vmem:[#allocation2 + $0x46c] ss:$28 sps:$4 sm:$0xff]  }
 0x2a9   :  { %v17870_v26 = vld [vmem:[#allocation2 + $0x468] ss:$28 sps:$4 sm:$0xff]  }
 0x2aa   :  { %5978 = vmatpush1.bf16.msra.mxu1 %v17816_v32  ;;  %5847 = vmatpush1.bf16.msra.mxu0 %v17819_v34  ;;  %v3412_v32 = vadd.f32 %v21159_v30, %v1074_v19  ;;  %v17873_v30 = vld [vmem:[#allocation2 + $0x4a0] ss:$28 sps:$4 sm:$0xff]   ;;  %v17950_v19 = vld [vmem:[#allocation2 + $0x88c] ss:$28 sps:$4 sm:$0xff]  }
 0x2ab   :  { %5979 = vmatprep.subr.bf16.mxu1 %v17824_v41  ;;  %5848 = vmatprep.subr.bf16.mxu0 %v17827_v42  ;;  %v17908_v41 = vld [vmem:[#allocation2 + $0x704] ss:$28 sps:$4 sm:$0xff]   ;;  %v3539_v42 = vmax.f32 %v16973_v21, 0.0 }
 0x2ae   :  { %5980 = vmatpush1.bf16.msra.mxu1 %v17822_v43  ;;  %5849 = vmatpush1.bf16.msra.mxu0 %v17825_v44  ;;  %v17875_v44 = vld [vmem:[#allocation2 + $0x4a4] ss:$28 sps:$4 sm:$0xff]  }
 0x2af   :  { %5981 = vmatprep.subr.bf16.mxu1 %v17830_v45  ;;  %5850 = vmatprep.subr.bf16.mxu0 %v17833_v57  ;;  %v17906_v45 = vld [vmem:[#allocation2 + $0x700] ss:$28 sps:$4 sm:$0xff]  }
 0x2b0   :  { %v17914_v57 = vld [vmem:[#allocation2 + $0x73c] ss:$28 sps:$4 sm:$0xff]  }
 0x2b2   :  { %5982 = vmatpush1.bf16.msra.mxu1 %v17828_v17  ;;  %5851 = vmatpush1.bf16.msra.mxu0 %v17831_v24  ;;  %v21171_v17 = vpack.c.bf16 %v3539_v42, %v3539_v42  ;;  %v17878_v24 = vld [vmem:[#allocation2 + $0x4dc] ss:$28 sps:$4 sm:$0xff]  }
 0x2b3   :  { %5983 = vmatprep.subr.bf16.mxu1 %v17836_v48  ;;  %5852 = vmatprep.subr.bf16.mxu0 %v17839_v49  ;;  %v17912_v48 = vld [vmem:[#allocation2 + $0x738] ss:$28 sps:$4 sm:$0xff]  }
 0x2b4   :  { %v17876_v49 = vld [vmem:[#allocation2 + $0x4d8] ss:$28 sps:$4 sm:$0xff]  }
 0x2b5   :  { %v17962_v42 = vld [vmem:[#allocation2 + $0x8fc] ss:$28 sps:$4 sm:$0xff]  }
 0x2b6   :  { %5984 = vmatpush1.bf16.msra.mxu1 %v17834_v51  ;;  %5853 = vmatpush1.bf16.msra.mxu0 %v17837_v55  ;;  %v17920_v51 = vld [vmem:[#allocation2 + $0x774] ss:$28 sps:$4 sm:$0xff]  }
 0x2b7   :  { %5985 = vmatprep.subr.bf16.mxu1 %v17842_v58  ;;  %5854 = vmatprep.subr.bf16.mxu0 %v17845_v60  ;;  %v17881_v55 = vld [vmem:[#allocation2 + $0x514] ss:$28 sps:$4 sm:$0xff]  }
 0x2b8   :  { %v17918_v58 = vld [vmem:[#allocation2 + $0x770] ss:$28 sps:$4 sm:$0xff]  }
 0x2b9   :  { %v17879_v60 = vld [vmem:[#allocation2 + $0x510] ss:$28 sps:$4 sm:$0xff]  }
 0x2ba   :  { %5986 = vmatpush1.bf16.msra.mxu1 %v17840_v61  ;;  %5855 = vmatpush1.bf16.msra.mxu0 %v17843_v3  ;;  %v17926_v61 = vld [vmem:[#allocation2 + $0x7ac] ss:$28 sps:$4 sm:$0xff]  }
 0x2bb   :  { %5996 = vmatprep.subr.bf16.mxu1 %v17848_v4  ;;  %5856 = vmatprep.subr.bf16.mxu0 %v17851_v5  ;;  %v17884_v3 = vld [vmem:[#allocation2 + $0x54c] ss:$28 sps:$4 sm:$0xff]   ;;  %v17932_v5 = vld [vmem:[#allocation2 + $0x7e4] ss:$28 sps:$4 sm:$0xff]  }
 0x2bc   :  { %v17924_v4 = vld [vmem:[#allocation2 + $0x7a8] ss:$28 sps:$4 sm:$0xff]  }
 0x2bd   :  { %5988 = vmatmul.mubr.bf16.vlgmr.msra.gmra.mrb[16].mxu1 %v21151_v50 }
 0x2be   :  { %5997 = vmatpush1.bf16.msra.mxu1 %v17846_v8  ;;  %6028 = vmatprep.mubr.bf16.mxu1 %v21155_v52  ;;  %v17882_v8 = vld [vmem:[#allocation2 + $0x548] ss:$28 sps:$4 sm:$0xff]  }
 0x2bf   :  { %5857 = vmatpush1.bf16.msra.mxu0 %v17849_v9  ;;  %5998 = vmatprep.subr.bf16.mxu1 %v17854_v10  ;;  %v17887_v9 = vld [vmem:[#allocation2 + $0x584] ss:$28 sps:$4 sm:$0xff]  }
 0x2c0   :  { %5858 = vmatprep.subr.bf16.mxu0 %v17857_v11  ;;  %v17930_v10 = vld [vmem:[#allocation2 + $0x7e0] ss:$28 sps:$4 sm:$0xff]  }
 0x2c1   :  { %v17938_v11 = vld [vmem:[#allocation2 + $0x81c] ss:$28 sps:$4 sm:$0xff]  }
 0x2c2   :  { %5999 = vmatpush1.bf16.msra.mxu1 %v17852_v18  ;;  %v17885_v18 = vld [vmem:[#allocation2 + $0x580] ss:$28 sps:$4 sm:$0xff]  }
 0x2c3   :  { %5859 = vmatpush1.bf16.msra.mxu0 %v17855_v25  ;;  %6000 = vmatprep.subr.bf16.mxu1 %v17860_v37  ;;  %v17890_v25 = vld [vmem:[#allocation2 + $0x5bc] ss:$28 sps:$4 sm:$0xff]  }
 0x2c4   :  { %v16586_v22 = vpop.f32.mrb[28].mxu0  ;;  %5860 = vmatprep.subr.bf16.mxu0 %v17863_v14  ;;  %v17936_v37 = vld [vmem:[#allocation2 + $0x818] ss:$28 sps:$4 sm:$0xff]  }
 0x2c5   :  { %v16587_v27 = vpop.f32.mrb[29].mxu0  ;;  %v17944_v14 = vld [vmem:[#allocation2 + $0x854] ss:$28 sps:$4 sm:$0xff]  }
 0x2c6   :  { %v16588_v34 = vadd.f32 %v16587_v27, %v16586_v22  ;;  %6001 = vmatpush1.bf16.msra.mxu1 %v17858_v54  ;;  %v16589_v39 = vpop.f32.mrb[30].mxu0  ;;  %v17893_v54 = vld [vmem:[#allocation2 + $0x5f4] ss:$28 sps:$4 sm:$0xff]   ;;  %v17896_v27 = vld [vmem:[#allocation2 + $0x62c] ss:$28 sps:$4 sm:$0xff]  }
 0x2c7   :  { %5861 = vmatpush1.bf16.msra.mxu0 %v17861_v29  ;;  %v16590_v53 = vpop.f32.mrb[31].mxu0  ;;  %6002 = vmatprep.subr.bf16.mxu1 %v17866_v16  ;;  %v17942_v29 = vld [vmem:[#allocation2 + $0x850] ss:$28 sps:$4 sm:$0xff]   ;;  %v17894_v39 = vld [vmem:[#allocation2 + $0x628] ss:$28 sps:$4 sm:$0xff]  }
 0x2c8   :  { %v21169_v43 = vadd.f32 %v16588_v34, %v3412_v32  ;;  %5862 = vmatprep.subr.bf16.mxu0 %v17869_v20  ;;  %v17891_v16 = vld [vmem:[#allocation2 + $0x5f0] ss:$28 sps:$4 sm:$0xff]   ;;  %v17956_v32 = vld [vmem:[#allocation2 + $0x8c4] ss:$28 sps:$4 sm:$0xff]  }
 0x2c9   :  { %v17954_v53 = vld [vmem:[#allocation2 + $0x8c0] ss:$28 sps:$4 sm:$0xff]  }
 0x2ca   :  { %6003 = vmatpush1.bf16.msra.mxu1 %v17864_v23 }
 0x2cb   :  { %5863 = vmatpush1.bf16.msra.mxu0 %v17867_v28  ;;  %6004 = vmatprep.subr.bf16.mxu1 %v17872_v31  ;;  %v17948_v28 = vld [vmem:[#allocation2 + $0x888] ss:$28 sps:$4 sm:$0xff]  }
 0x2cc   :  { %5873 = vmatprep.subr.bf16.mxu0 %v17908_v41  ;;  %v17899_v41 = vld [vmem:[#allocation2 + $0x664] ss:$28 sps:$4 sm:$0xff]  }
 0x2ce   :  { %5865 = vmatmul.mubr.bf16.vlgmr.msra.gmra.mrb[40].mxu0 %v21171_v17  ;;  %6005 = vmatpush1.bf16.msra.mxu1 %v17870_v26 }
 0x2cf   :  { %6006 = vmatprep.subr.bf16.mxu1 %v17875_v44  ;;  %5874 = vmatpush1.bf16.msra.mxu0 %v17906_v45 }
 0x2d0   :  { %5875 = vmatprep.subr.bf16.mxu0 %v17914_v57  ;;  %v17897_v57 = vld [vmem:[#allocation2 + $0x660] ss:$28 sps:$4 sm:$0xff]  }
 0x2d2   :  { %6007 = vmatpush1.bf16.msra.mxu1 %v17873_v30  ;;  %v17902_v30 = vld [vmem:[#allocation2 + $0x69c] ss:$28 sps:$4 sm:$0xff]  }
 0x2d3   :  { %6008 = vmatprep.subr.bf16.mxu1 %v17878_v24  ;;  %5876 = vmatpush1.bf16.msra.mxu0 %v17912_v48  ;;  %v17960_v48 = vld [vmem:[#allocation2 + $0x8f8] ss:$28 sps:$4 sm:$0xff]  }
 0x2d4   :  { %5877 = vmatprep.subr.bf16.mxu0 %v17920_v51  ;;  %v17900_v51 = vld [vmem:[#allocation2 + $0x698] ss:$28 sps:$4 sm:$0xff]  }
 0x2d6   :  { %6009 = vmatpush1.bf16.msra.mxu1 %v17876_v49  ;;  %v17968_v49 = vld [vmem:[#allocation2 + $0x934] ss:$28 sps:$4 sm:$0xff]  }
 0x2d7   :  { %6010 = vmatprep.subr.bf16.mxu1 %v17881_v55  ;;  %5878 = vmatpush1.bf16.msra.mxu0 %v17918_v58  ;;  %v17905_v55 = vld [vmem:[#allocation2 + $0x6d4] ss:$28 sps:$4 sm:$0xff]  }
 0x2d8   :  { %5879 = vmatprep.subr.bf16.mxu0 %v17926_v61  ;;  %v17966_v58 = vld [vmem:[#allocation2 + $0x930] ss:$28 sps:$4 sm:$0xff]  }
 0x2d9   :  { %v17903_v61 = vld [vmem:[#allocation2 + $0x6d0] ss:$28 sps:$4 sm:$0xff]  }
 0x2da   :  { %6011 = vmatpush1.bf16.msra.mxu1 %v17879_v60  ;;  %v17974_v60 = vld [vmem:[#allocation2 + $0x96c] ss:$28 sps:$4 sm:$0xff]  }
 0x2db   :  { %6012 = vmatprep.subr.bf16.mxu1 %v17884_v3  ;;  %5880 = vmatpush1.bf16.msra.mxu0 %v17924_v4  ;;  %v17911_v3 = vld [vmem:[#allocation2 + $0x70c] ss:$28 sps:$4 sm:$0xff]  }
 0x2dc   :  { %5881 = vmatprep.subr.bf16.mxu0 %v17932_v5  ;;  %v17972_v4 = vld [vmem:[#allocation2 + $0x968] ss:$28 sps:$4 sm:$0xff]  }
 0x2dd   :  { %v17980_v5 = vld [vmem:[#allocation2 + $0x9a4] ss:$28 sps:$4 sm:$0xff]  }
 0x2de   :  { %6013 = vmatpush1.bf16.msra.mxu1 %v17882_v8  ;;  %v17909_v8 = vld [vmem:[#allocation2 + $0x708] ss:$28 sps:$4 sm:$0xff]  }
 0x2df   :  { %6014 = vmatprep.subr.bf16.mxu1 %v17887_v9  ;;  %5882 = vmatpush1.bf16.msra.mxu0 %v17930_v10  ;;  %v17917_v9 = vld [vmem:[#allocation2 + $0x744] ss:$28 sps:$4 sm:$0xff]  }
 0x2e0   :  { %5883 = vmatprep.subr.bf16.mxu0 %v17938_v11  ;;  %v17978_v10 = vld [vmem:[#allocation2 + $0x9a0] ss:$28 sps:$4 sm:$0xff]  }
 0x2e1   :  { %v17986_v11 = vld [vmem:[#allocation2 + $0x9dc] ss:$28 sps:$4 sm:$0xff]  }
 0x2e2   :  { %6015 = vmatpush1.bf16.msra.mxu1 %v17885_v18  ;;  %v17915_v18 = vld [vmem:[#allocation2 + $0x740] ss:$28 sps:$4 sm:$0xff]  }
 0x2e3   :  { %6016 = vmatprep.subr.bf16.mxu1 %v17890_v25  ;;  %5884 = vmatpush1.bf16.msra.mxu0 %v17936_v37  ;;  %v17923_v25 = vld [vmem:[#allocation2 + $0x77c] ss:$28 sps:$4 sm:$0xff]  }
 0x2e4   :  { %5885 = vmatprep.subr.bf16.mxu0 %v17944_v14  ;;  %v17984_v37 = vld [vmem:[#allocation2 + $0x9d8] ss:$28 sps:$4 sm:$0xff]  }
 0x2e5   :  { %v16608_v20 = vpop.f32.mrb[32].mxu0  ;;  %v17992_v14 = vld [vmem:[#allocation2 + $0xa14] ss:$28 sps:$4 sm:$0xff]  }
 0x2e6   :  { %v16609_v21 = vpop.f32.mrb[33].mxu0  ;;  %6017 = vmatpush1.bf16.msra.mxu1 %v17888_v15  ;;  %v17921_v15 = vld [vmem:[#allocation2 + $0x778] ss:$28 sps:$4 sm:$0xff]  }
 0x2e7   :  { %v16610_v22 = vadd.f32 %v16609_v21, %v16608_v20  ;;  %v16611_v23 = vpop.f32.mrb[34].mxu0  ;;  %6018 = vmatprep.subr.bf16.mxu1 %v17893_v54  ;;  %5886 = vmatpush1.bf16.msra.mxu0 %v17942_v29  ;;  %v17929_v54 = vld [vmem:[#allocation2 + $0x7b4] ss:$28 sps:$4 sm:$0xff]   ;;  %v17935_v20 = vld [vmem:[#allocation2 + $0x7ec] ss:$28 sps:$4 sm:$0xff]  }
 0x2e8   :  { %v16612_v31 = vpop.f32.mrb[35].mxu0  ;;  %5887 = vmatprep.subr.bf16.mxu0 %v17950_v19  ;;  %v17990_v29 = vld [vmem:[#allocation2 + $0xa10] ss:$28 sps:$4 sm:$0xff]   ;;  %v17996_v21 = vld [vmem:[#allocation2 + $0xa48] ss:$28 sps:$4 sm:$0xff]  }
 0x2e9   :  { %v3492_v34 = vadd.f32 %v16610_v22, %v21169_v43  ;;  %v17998_v19 = vld [vmem:[#allocation2 + $0xa4c] ss:$28 sps:$4 sm:$0xff]   ;;  %v18004_v22 = vld [vmem:[#allocation2 + $0xa84] ss:$28 sps:$4 sm:$0xff]   ;;  %v17947_v31 = vld [vmem:[#allocation2 + $0x85c] ss:$28 sps:$4 sm:$0xff]  }
 0x2ea   :  { %6019 = vmatpush1.bf16.msra.mxu1 %v17891_v16  ;;  %v17927_v16 = vld [vmem:[#allocation2 + $0x7b0] ss:$28 sps:$4 sm:$0xff]   ;;  %v17933_v23 = vld [vmem:[#allocation2 + $0x7e8] ss:$28 sps:$4 sm:$0xff]  }
 0x2eb   :  { %6020 = vmatprep.subr.bf16.mxu1 %v17896_v27  ;;  %5888 = vmatpush1.bf16.msra.mxu0 %v17948_v28  ;;  %v17941_v27 = vld [vmem:[#allocation2 + $0x824] ss:$28 sps:$4 sm:$0xff]  }
 0x2ec   :  { %5889 = vmatprep.subr.bf16.mxu0 %v17956_v32  ;;  %v17939_v28 = vld [vmem:[#allocation2 + $0x820] ss:$28 sps:$4 sm:$0xff]   ;;  %v17945_v32 = vld [vmem:[#allocation2 + $0x858] ss:$28 sps:$4 sm:$0xff]  }
 0x2ed   :  { %v3531_v26 = vpop.f32.mrb[36].mxu0 }
 0x2ee   :  { %v21175_v44 = vadd.f32 %v3531_v26, %v3492_v34  ;;  %v16931_v45 = vpop.f32.mrb[37].mxu0  ;;  %6021 = vmatpush1.bf16.msra.mxu1 %v17894_v39  ;;  %v17953_v34 = vld [vmem:[#allocation2 + $0x894] ss:$28 sps:$4 sm:$0xff]   ;;  %v17963_v26 = vld [vmem:[#allocation2 + $0x900] ss:$28 sps:$4 sm:$0xff]  }
 0x2ef   :  { %v3534_v24 = vpop.f32.mrb[38].mxu0  ;;  %6022 = vmatprep.subr.bf16.mxu1 %v17899_v41  ;;  %5890 = vmatpush1.bf16.msra.mxu0 %v17954_v53  ;;  %v17951_v39 = vld [vmem:[#allocation2 + $0x890] ss:$28 sps:$4 sm:$0xff]   ;;  %v17957_v53 = vld [vmem:[#allocation2 + $0x8c8] ss:$28 sps:$4 sm:$0xff]  }
 0x2f0   :  { %v16932_v43 = vpop.f32.mrb[39].mxu0  ;;  %5891 = vmatprep.subr.bf16.mxu0 %v17962_v42  ;;  %v17959_v41 = vld [vmem:[#allocation2 + $0x8cc] ss:$28 sps:$4 sm:$0xff]   ;;  %v17965_v42 = vld [vmem:[#allocation2 + $0x904] ss:$28 sps:$4 sm:$0xff]  }
 0x2f1   :  { %v17971_v45 = vld [vmem:[#allocation2 + $0x93c] ss:$28 sps:$4 sm:$0xff]   ;;  %v17975_v24 = vld [vmem:[#allocation2 + $0x970] ss:$28 sps:$4 sm:$0xff]   ;;  %v17981_v43 = vld [vmem:[#allocation2 + $0x9a8] ss:$28 sps:$4 sm:$0xff]  }
 0x2f2   :  { %6023 = vmatpush1.bf16.msra.mxu1 %v17897_v57  ;;  %v17969_v57 = vld [vmem:[#allocation2 + $0x938] ss:$28 sps:$4 sm:$0xff]  }
 0x2f3   :  { %6024 = vmatprep.subr.bf16.mxu1 %v17902_v30  ;;  %5892 = vmatpush1.bf16.msra.mxu0 %v17960_v48  ;;  %v17977_v30 = vld [vmem:[#allocation2 + $0x974] ss:$28 sps:$4 sm:$0xff]   ;;  %v17983_v48 = vld [vmem:[#allocation2 + $0x9ac] ss:$28 sps:$4 sm:$0xff]  }
 0x2f4   :  { %5893 = vmatprep.subr.bf16.mxu0 %v17968_v49  ;;  %v17989_v49 = vld [vmem:[#allocation2 + $0x9e4] ss:$28 sps:$4 sm:$0xff]  }
 0x2f6   :  { %6025 = vmatpush1.bf16.msra.mxu1 %v17900_v51  ;;  %v17987_v51 = vld [vmem:[#allocation2 + $0x9e0] ss:$28 sps:$4 sm:$0xff]  }
 0x2f7   :  { %6026 = vmatprep.subr.bf16.mxu1 %v17905_v55  ;;  %5894 = vmatpush1.bf16.msra.mxu0 %v17966_v58  ;;  %v17995_v55 = vld [vmem:[#allocation2 + $0xa1c] ss:$28 sps:$4 sm:$0xff]  }
 0x2f8   :  { %5895 = vmatprep.subr.bf16.mxu0 %v17974_v60  ;;  %v17993_v58 = vld [vmem:[#allocation2 + $0xa18] ss:$28 sps:$4 sm:$0xff]  }
 0x2f9   :  { %v18001_v60 = vld [vmem:[#allocation2 + $0xa54] ss:$28 sps:$4 sm:$0xff]  }
 0x2fa   :  { %6027 = vmatpush1.bf16.msra.mxu1 %v17903_v61  ;;  %v17999_v61 = vld [vmem:[#allocation2 + $0xa50] ss:$28 sps:$4 sm:$0xff]  }
 0x2fb   :  { %6037 = vmatprep.subr.bf16.mxu1 %v17911_v3  ;;  %5896 = vmatpush1.bf16.msra.mxu0 %v17972_v4  ;;  %v18007_v3 = vld [vmem:[#allocation2 + $0xa8c] ss:$28 sps:$4 sm:$0xff]   ;;  %v19593_v4 = vld [vmem:[%s22310_s4] sm:$0x7f] }
 0x2fc   :  { %5897 = vmatprep.subr.bf16.mxu0 %v17980_v5  ;;  %v1066_v5 = vrot.slane %v19593_v4, %v20272_v63 }
 0x2fd   :  { %6029 = vmatmul.mubr.bf16.vlgmr.msra.gmra.mrb[16].mxu1 %v21171_v17 }
 0x2fe   :  { %6038 = vmatpush1.bf16.msra.mxu1 %v17909_v8  ;;  %v1070_v8 = vrot.slane %v19593_v4, %v20366_v2  ;;  %v18043_v4 = vld [vmem:[#allocation2 + $0x130] ss:$28 sps:$4 sm:$0xff]  }
 0x2ff   :  { %6039 = vmatprep.subr.bf16.mxu1 %v17917_v9  ;;  %5898 = vmatpush1.bf16.msra.mxu0 %v17978_v10 }
 0x300   :  { %5899 = vmatprep.subr.bf16.mxu0 %v17986_v11 }
 0x302   :  { %6040 = vmatpush1.bf16.msra.mxu1 %v17915_v18 }
 0x303   :  { %6041 = vmatprep.subr.bf16.mxu1 %v17923_v25  ;;  %5900 = vmatpush1.bf16.msra.mxu0 %v17984_v37 }
 0x304   :  { %5901 = vmatprep.subr.bf16.mxu0 %v17992_v14 }
 0x306   :  { %6042 = vmatpush1.bf16.msra.mxu1 %v17921_v15 }
 0x307   :  { %6043 = vmatprep.subr.bf16.mxu1 %v17929_v54  ;;  %5902 = vmatpush1.bf16.msra.mxu0 %v17990_v29  ;;  %v18002_v54 = vld [vmem:[#allocation2 + $0xa80] ss:$28 sps:$4 sm:$0xff]   ;;  %v18005_v29 = vld [vmem:[#allocation2 + $0xa88] ss:$28 sps:$4 sm:$0xff]  }
 0x308   :  { %5903 = vmatprep.subr.bf16.mxu0 %v17998_v19  ;;  %v18010_v19 = vld [vmem:[#allocation2 + $0xabc] ss:$28 sps:$4 sm:$0xff]  }
 0x30a   :  { %6044 = vmatpush1.bf16.msra.mxu1 %v17927_v16 }
 0x30b   :  { %6045 = vmatprep.subr.bf16.mxu1 %v17935_v20  ;;  %5904 = vmatpush1.bf16.msra.mxu0 %v17996_v21  ;;  %v18013_v20 = vld [vmem:[#allocation2 + $0xac4] ss:$28 sps:$4 sm:$0xff]  }
 0x30c   :  { %5914 = vmatprep.subr.bf16.mxu0 %v18004_v22  ;;  %v18008_v22 = vld [vmem:[#allocation2 + $0xab8] ss:$28 sps:$4 sm:$0xff]  }
 0x30e   :  { %6046 = vmatpush1.bf16.msra.mxu1 %v17933_v23  ;;  %v18011_v23 = vld [vmem:[#allocation2 + $0xac0] ss:$28 sps:$4 sm:$0xff]  }
 0x30f   :  { %6047 = vmatprep.subr.bf16.mxu1 %v17941_v27  ;;  %v18016_v27 = vld [vmem:[#allocation2 + $0x14] ss:$28 sps:$4 sm:$0xff]  }
 0x312   :  { %6048 = vmatpush1.bf16.msra.mxu1 %v17939_v28  ;;  %v18017_v28 = vld [vmem:[#allocation2 + $0x1d8] ss:$28 sps:$4 sm:$0xff]  }
 0x313   :  { %6049 = vmatprep.subr.bf16.mxu1 %v17947_v31  ;;  %v3543_v31 = vmax.f32 %v21175_v44, 0.0  ;;  %v18027_v44 = vld [vmem:[#allocation2 + $0x248] ss:$28 sps:$4 sm:$0xff]  }
 0x316   :  { %6050 = vmatpush1.bf16.msra.mxu1 %v17945_v32  ;;  %v18014_v32 = vld [vmem:[#allocation2 + $0x10] ss:$28 sps:$4 sm:$0xff]  }
 0x317   :  { %6051 = vmatprep.subr.bf16.mxu1 %v17953_v34  ;;  %v18018_v34 = vld [vmem:[#allocation2 + $0x18] ss:$28 sps:$4 sm:$0xff]  }
 0x31a   :  { %6052 = vmatpush1.bf16.msra.mxu1 %v17951_v39  ;;  %v18021_v39 = vld [vmem:[#allocation2 + $0x4c] ss:$28 sps:$4 sm:$0xff]  }
 0x31b   :  { %6053 = vmatprep.subr.bf16.mxu1 %v17959_v41  ;;  %v21194_v41 = vpack.c.bf16 %v3543_v31, %v3543_v31  ;;  %v18064_v31 = vld [vmem:[#allocation2 + $0x240] ss:$28 sps:$4 sm:$0xff]  }
 0x31e   :  { %6054 = vmatpush1.bf16.msra.mxu1 %v17957_v53  ;;  %v18019_v53 = vld [vmem:[#allocation2 + $0x48] ss:$28 sps:$4 sm:$0xff]  }
 0x31f   :  { %6055 = vmatprep.subr.bf16.mxu1 %v17965_v42  ;;  %v18022_v42 = vld [vmem:[#allocation2 + $0x210] ss:$28 sps:$4 sm:$0xff]  }
 0x322   :  { %6056 = vmatpush1.bf16.msra.mxu1 %v17963_v26  ;;  %v18023_v26 = vld [vmem:[#allocation2 + $0x50] ss:$28 sps:$4 sm:$0xff]  }
 0x323   :  { %6057 = vmatprep.subr.bf16.mxu1 %v17971_v45  ;;  %v18026_v45 = vld [vmem:[#allocation2 + $0x84] ss:$28 sps:$4 sm:$0xff]  }
 0x326   :  { %6058 = vmatpush1.bf16.msra.mxu1 %v17969_v57  ;;  %v18024_v57 = vld [vmem:[#allocation2 + $0x80] ss:$28 sps:$4 sm:$0xff]  }
 0x327   :  { %6059 = vmatprep.subr.bf16.mxu1 %v17977_v30  ;;  %v18028_v30 = vld [vmem:[#allocation2 + $0x88] ss:$28 sps:$4 sm:$0xff]  }
 0x32a   :  { %6060 = vmatpush1.bf16.msra.mxu1 %v17975_v24  ;;  %v18031_v24 = vld [vmem:[#allocation2 + $0xbc] ss:$28 sps:$4 sm:$0xff]  }
 0x32b   :  { %6061 = vmatprep.subr.bf16.mxu1 %v17983_v48  ;;  %v18032_v48 = vld [vmem:[#allocation2 + $0x280] ss:$28 sps:$4 sm:$0xff]  }
 0x32e   :  { %6062 = vmatpush1.bf16.msra.mxu1 %v17981_v43  ;;  %v18029_v43 = vld [vmem:[#allocation2 + $0xb8] ss:$28 sps:$4 sm:$0xff]  }
 0x32f   :  { %6063 = vmatprep.subr.bf16.mxu1 %v17989_v49  ;;  %v18033_v49 = vld [vmem:[#allocation2 + $0xc0] ss:$28 sps:$4 sm:$0xff]  }
 0x332   :  { %6064 = vmatpush1.bf16.msra.mxu1 %v17987_v51  ;;  %v18036_v51 = vld [vmem:[#allocation2 + $0xf4] ss:$28 sps:$4 sm:$0xff]  }
 0x333   :  { %6065 = vmatprep.subr.bf16.mxu1 %v17995_v55  ;;  %v18037_v55 = vld [vmem:[#allocation2 + $0x2b8] ss:$28 sps:$4 sm:$0xff]  }
 0x336   :  { %6066 = vmatpush1.bf16.msra.mxu1 %v17993_v58  ;;  %v18034_v58 = vld [vmem:[#allocation2 + $0xf0] ss:$28 sps:$4 sm:$0xff]  }
 0x337   :  { %6067 = vmatprep.subr.bf16.mxu1 %v18001_v60  ;;  %v18041_v60 = vld [vmem:[#allocation2 + $0x12c] ss:$28 sps:$4 sm:$0xff]  }
 0x33a   :  { %6068 = vmatpush1.bf16.msra.mxu1 %v17999_v61  ;;  %v18042_v61 = vld [vmem:[#allocation2 + $0x2f0] ss:$28 sps:$4 sm:$0xff]  }
 0x33b   :  { %6078 = vmatprep.subr.bf16.mxu1 %v18007_v3  ;;  %v18039_v3 = vld [vmem:[#allocation2 + $0x128] ss:$28 sps:$4 sm:$0xff]  }
 0x350   :  { %v3370_v9 = vpop.f32.mrb[12].mxu1 }
 0x351   :  { %v16975_v10 = vadd.f32 %v3370_v9, %v1066_v5  ;;  %v3372_v11 = vpop.f32.mrb[13].mxu1  ;;  %v18046_v5 = vld [vmem:[#allocation2 + $0x164] ss:$28 sps:$4 sm:$0xff]  }
 0x352   :  { %v16976_v18 = vadd.f32 %v3372_v11, %v1070_v8  ;;  %v3374_v25 = vpop.f32.mrb[14].mxu1  ;;  %v18047_v8 = vld [vmem:[#allocation2 + $0x328] ss:$28 sps:$4 sm:$0xff]   ;;  %v18044_v9 = vld [vmem:[#allocation2 + $0x160] ss:$28 sps:$4 sm:$0xff]  }
 0x353   :  { %v3541_v37 = vmax.f32 %v16975_v10, 0.0  ;;  %v3375_v14 = vpop.f32.mrb[15].mxu1  ;;  %v18048_v10 = vld [vmem:[#allocation2 + $0x168] ss:$28 sps:$4 sm:$0xff]   ;;  %v18051_v11 = vld [vmem:[#allocation2 + $0x19c] ss:$28 sps:$4 sm:$0xff]  }
 0x354   :  { %v3542_v15 = vmax.f32 %v16976_v18, 0.0  ;;  %v18052_v18 = vld [vmem:[#allocation2 + $0x360] ss:$28 sps:$4 sm:$0xff]   ;;  %v18049_v25 = vld [vmem:[#allocation2 + $0x198] ss:$28 sps:$4 sm:$0xff]  }
 0x355   :  { %v21185_v21 = vpack.c.bf16 %v3541_v37, %v3541_v37  ;;  %v18053_v37 = vld [vmem:[#allocation2 + $0x1a0] ss:$28 sps:$4 sm:$0xff]   ;;  %v18056_v14 = vld [vmem:[#allocation2 + $0x1d4] ss:$28 sps:$4 sm:$0xff]  }
 0x356   :  { %v21183_v16 = vpack.c.bf16 %v3542_v15, %v3542_v15  ;;  %v18057_v15 = vld [vmem:[#allocation2 + $0x558] ss:$28 sps:$4 sm:$0xff]  }
 0x358   :  { %5905 = vmatprep.mubr.bf16.mxu0 %v21183_v16  ;;  %6069 = vmatprep.mubr.bf16.mxu1 %v21183_v16 }
 0x359   :  { %5906 = vmatmul.mubr.bf16.vlgmr.msra.gmra.mrb[40].mxu0 %v21185_v21  ;;  %6070 = vmatmul.mubr.bf16.vlgmr.msra.gmra.mrb[16].mxu1 %v21185_v21 }
 0x35a   :  { %5915 = vmatpush1.bf16.msra.mxu0 %v18002_v54  ;;  %6079 = vmatpush1.bf16.msra.mxu1 %v18005_v29  ;;  %v18054_v54 = vld [vmem:[#allocation2 + $0x1d0] ss:$28 sps:$4 sm:$0xff]   ;;  %v18058_v29 = vld [vmem:[#allocation2 + $0x398] ss:$28 sps:$4 sm:$0xff]  }
 0x35b   :  { %5916 = vmatprep.subr.bf16.mxu0 %v18010_v19  ;;  %6080 = vmatprep.subr.bf16.mxu1 %v18013_v20  ;;  %v18061_v19 = vld [vmem:[#allocation2 + $0x20c] ss:$28 sps:$4 sm:$0xff]  }
 0x35c   :  { %5946 = vmatprep.mubr.bf16.mxu0 %v19670_v0  ;;  %6110 = vmatprep.mubr.bf16.mxu1 %v19670_v0  ;;  %v18062_v20 = vld [vmem:[#allocation2 + $0x590] ss:$28 sps:$4 sm:$0xff]  }
 0x35e   :  { %5917 = vmatpush1.bf16.msra.mxu0 %v18008_v22  ;;  %6081 = vmatpush1.bf16.msra.mxu1 %v18011_v23  ;;  %v18059_v22 = vld [vmem:[#allocation2 + $0x208] ss:$28 sps:$4 sm:$0xff]   ;;  %v18063_v23 = vld [vmem:[#allocation2 + $0x3d0] ss:$28 sps:$4 sm:$0xff]  }
 0x35f   :  { %6119 = vmatprep.subr.bf16.mxu0 %v18016_v27  ;;  %16617 = vmatprep.subr.bf16.mxu1 %v18017_v28  ;;  %v18066_v27 = vld [vmem:[#allocation2 + $0x244] ss:$28 sps:$4 sm:$0xff]  }
 0x360   :  { %v18067_v28 = vld [vmem:[#allocation2 + $0x5c8] ss:$28 sps:$4 sm:$0xff]  }
 0x365   :  { %15549 = vmatmul.mubr.msk.bf16.vlgmr.msra.gmra.mrb[40].mxu0 %vm335_vm0, %v21194_v41  ;;  %15550 = vmatmul.mubr.msk.bf16.vlgmr.msra.gmra.mrb[16].mxu1 %vm335_vm0, %v21194_v41 }
 0x366   :  { %6120 = vmatpush1.bf16.msra.mxu0 %v18014_v32  ;;  %16618 = vmatpush3.bf16.msra.mxu1 %v18018_v34  ;;  %v18068_v32 = vld [vmem:[#allocation2 + $0x408] ss:$28 sps:$4 sm:$0xff]   ;;  %v18071_v34 = vld [vmem:[#allocation2 + $0x27c] ss:$28 sps:$4 sm:$0xff]  }
 0x367   :  { %6151 = vmatprep.mubr.bf16.mxu0 %v21149_v47  ;;  %6315 = vmatprep.mubr.bf16.mxu1 %v21149_v47  ;;  %v18038_v47 = vld [vmem:[#allocation2 + $0xf8] ss:$28 sps:$4 sm:$0xff]  }
 0x368   :  { %6121 = vmatprep.subr.bf16.mxu0 %v18021_v39  ;;  %16619 = vmatprep.subr.bf16.mxu1 %v18022_v42  ;;  %v18072_v39 = vld [vmem:[#allocation2 + $0x600] ss:$28 sps:$4 sm:$0xff]  }
 0x369   :  { %v18073_v42 = vld [vmem:[#allocation2 + $0x440] ss:$28 sps:$4 sm:$0xff]  }
 0x36a   :  { %6122 = vmatpush1.bf16.msra.mxu0 %v18019_v53  ;;  %16620 = vmatpush3.bf16.msra.mxu1 %v18023_v26  ;;  %v18069_v53 = vld [vmem:[#allocation2 + $0x278] ss:$28 sps:$4 sm:$0xff]  }
 0x36b   :  { %6123 = vmatprep.subr.bf16.mxu0 %v18026_v45  ;;  %16621 = vmatprep.subr.bf16.mxu1 %v18027_v44  ;;  %v18076_v26 = vld [vmem:[#allocation2 + $0x2b4] ss:$28 sps:$4 sm:$0xff]  }
 0x36c   :  { %v18077_v45 = vld [vmem:[#allocation2 + $0x638] ss:$28 sps:$4 sm:$0xff]   ;;  %v18074_v44 = vld [vmem:[#allocation2 + $0x2b0] ss:$28 sps:$4 sm:$0xff]  }
 0x36e   :  { %6124 = vmatpush1.bf16.msra.mxu0 %v18024_v57  ;;  %16622 = vmatpush3.bf16.msra.mxu1 %v18028_v30  ;;  %v18078_v57 = vld [vmem:[#allocation2 + $0x478] ss:$28 sps:$4 sm:$0xff]   ;;  %v18081_v30 = vld [vmem:[#allocation2 + $0x2ec] ss:$28 sps:$4 sm:$0xff]  }
 0x36f   :  { %6125 = vmatprep.subr.bf16.mxu0 %v18031_v24  ;;  %16623 = vmatprep.subr.bf16.mxu1 %v18032_v48  ;;  %v18082_v24 = vld [vmem:[#allocation2 + $0x670] ss:$28 sps:$4 sm:$0xff]   ;;  %v18079_v48 = vld [vmem:[#allocation2 + $0x2e8] ss:$28 sps:$4 sm:$0xff]  }
 0x372   :  { %6126 = vmatpush1.bf16.msra.mxu0 %v18029_v43  ;;  %16624 = vmatpush3.bf16.msra.mxu1 %v18033_v49  ;;  %v18083_v43 = vld [vmem:[#allocation2 + $0x4b0] ss:$28 sps:$4 sm:$0xff]   ;;  %v18086_v49 = vld [vmem:[#allocation2 + $0x324] ss:$28 sps:$4 sm:$0xff]  }
 0x373   :  { %6127 = vmatprep.subr.bf16.mxu0 %v18036_v51  ;;  %16625 = vmatprep.subr.bf16.mxu1 %v18037_v55  ;;  %v18087_v51 = vld [vmem:[#allocation2 + $0x6a8] ss:$28 sps:$4 sm:$0xff]   ;;  %v18084_v55 = vld [vmem:[#allocation2 + $0x320] ss:$28 sps:$4 sm:$0xff]  }
 0x376   :  { %6128 = vmatpush1.bf16.msra.mxu0 %v18034_v58  ;;  %16626 = vmatpush3.bf16.msra.mxu1 %v18038_v47  ;;  %v18088_v58 = vld [vmem:[#allocation2 + $0x4e8] ss:$28 sps:$4 sm:$0xff]   ;;  %v18091_v47 = vld [vmem:[#allocation2 + $0x35c] ss:$28 sps:$4 sm:$0xff]  }
 0x377   :  { %6129 = vmatprep.subr.bf16.mxu0 %v18041_v60  ;;  %16627 = vmatprep.subr.bf16.mxu1 %v18042_v61  ;;  %v18092_v60 = vld [vmem:[#allocation2 + $0x6e0] ss:$28 sps:$4 sm:$0xff]   ;;  %v18089_v61 = vld [vmem:[#allocation2 + $0x358] ss:$28 sps:$4 sm:$0xff]  }
 0x37a   :  { %6130 = vmatpush1.bf16.msra.mxu0 %v18039_v3  ;;  %16628 = vmatpush3.bf16.msra.mxu1 %v18043_v4  ;;  %v18093_v3 = vld [vmem:[#allocation2 + $0x520] ss:$28 sps:$4 sm:$0xff]   ;;  %v18096_v4 = vld [vmem:[#allocation2 + $0x394] ss:$28 sps:$4 sm:$0xff]  }
 0x37b   :  { %6131 = vmatprep.subr.bf16.mxu0 %v18046_v5  ;;  %16629 = vmatprep.subr.bf16.mxu1 %v18047_v8  ;;  %v18097_v5 = vld [vmem:[#allocation2 + $0x8d8] ss:$28 sps:$4 sm:$0xff]   ;;  %v18094_v8 = vld [vmem:[#allocation2 + $0x390] ss:$28 sps:$4 sm:$0xff]  }
 0x37e   :  { %6132 = vmatpush1.bf16.msra.mxu0 %v18044_v9  ;;  %16630 = vmatpush3.bf16.msra.mxu1 %v18048_v10  ;;  %v18098_v9 = vld [vmem:[#allocation2 + $0x718] ss:$28 sps:$4 sm:$0xff]   ;;  %v18101_v10 = vld [vmem:[#allocation2 + $0x3cc] ss:$28 sps:$4 sm:$0xff]  }
 0x37f   :  { %6133 = vmatprep.subr.bf16.mxu0 %v18051_v11  ;;  %16631 = vmatprep.subr.bf16.mxu1 %v18052_v18  ;;  %v18102_v11 = vld [vmem:[#allocation2 + $0x910] ss:$28 sps:$4 sm:$0xff]   ;;  %v18099_v18 = vld [vmem:[#allocation2 + $0x3c8] ss:$28 sps:$4 sm:$0xff]  }
 0x382   :  { %6134 = vmatpush1.bf16.msra.mxu0 %v18049_v25  ;;  %16632 = vmatpush3.bf16.msra.mxu1 %v18053_v37  ;;  %v18103_v25 = vld [vmem:[#allocation2 + $0x750] ss:$28 sps:$4 sm:$0xff]   ;;  %v18106_v37 = vld [vmem:[#allocation2 + $0x404] ss:$28 sps:$4 sm:$0xff]  }
 0x383   :  { %6135 = vmatprep.subr.bf16.mxu0 %v18056_v14  ;;  %16639 = vmatprep.subr.bf16.mxu1 %v18057_v15  ;;  %v18107_v14 = vld [vmem:[#allocation2 + $0x948] ss:$28 sps:$4 sm:$0xff]   ;;  %v18104_v15 = vld [vmem:[#allocation2 + $0x400] ss:$28 sps:$4 sm:$0xff]  }
 0x385   :  { %6316 = vmatmul.mubr.bf16.vlgmr.msra.gmra.mrb[20].mxu1 %v21151_v50 }
 0x386   :  { %6136 = vmatpush1.bf16.msra.mxu0 %v18054_v54  ;;  %16640 = vmatpush3.bf16.msra.mxu1 %v18058_v29  ;;  %v18108_v54 = vld [vmem:[#allocation2 + $0x788] ss:$28 sps:$4 sm:$0xff]   ;;  %v18111_v29 = vld [vmem:[#allocation2 + $0x43c] ss:$28 sps:$4 sm:$0xff]  }
 0x387   :  { %6355 = vmatprep.mubr.bf16.mxu1 %v21155_v52  ;;  %6137 = vmatprep.subr.bf16.mxu0 %v18061_v19  ;;  %v18109_v19 = vld [vmem:[#allocation2 + $0x438] ss:$28 sps:$4 sm:$0xff]  }
 0x388   :  { %16641 = vmatprep.subr.bf16.mxu1 %v18062_v20  ;;  %v18113_v20 = vld [vmem:[#allocation2 + $0x7c0] ss:$28 sps:$4 sm:$0xff]  }
 0x38a   :  { %6138 = vmatpush1.bf16.msra.mxu0 %v18059_v22  ;;  %16642 = vmatpush3.bf16.msra.mxu1 %v18063_v23  ;;  %v18117_v22 = vld [vmem:[#allocation2 + $0x9b8] ss:$28 sps:$4 sm:$0xff]   ;;  %v18114_v23 = vld [vmem:[#allocation2 + $0x470] ss:$28 sps:$4 sm:$0xff]  }
 0x38b   :  { %6139 = vmatprep.subr.bf16.mxu0 %v18066_v27  ;;  %16643 = vmatprep.subr.bf16.mxu1 %v18067_v28  ;;  %v18118_v27 = vld [vmem:[#allocation2 + $0x7f8] ss:$28 sps:$4 sm:$0xff]   ;;  %v18121_v28 = vld [vmem:[#allocation2 + $0x4ac] ss:$28 sps:$4 sm:$0xff]  }
 0x38e   :  { %6140 = vmatpush1.bf16.msra.mxu0 %v18064_v31  ;;  %16644 = vmatpush3.bf16.msra.mxu1 %v18068_v32  ;;  %v18122_v31 = vld [vmem:[#allocation2 + $0x9f0] ss:$28 sps:$4 sm:$0xff]   ;;  %v18119_v32 = vld [vmem:[#allocation2 + $0x4a8] ss:$28 sps:$4 sm:$0xff]  }
 0x38f   :  { %6141 = vmatprep.subr.bf16.mxu0 %v18071_v34  ;;  %16645 = vmatprep.subr.bf16.mxu1 %v18072_v39  ;;  %v18123_v34 = vld [vmem:[#allocation2 + $0x830] ss:$28 sps:$4 sm:$0xff]   ;;  %v18126_v39 = vld [vmem:[#allocation2 + $0x4e4] ss:$28 sps:$4 sm:$0xff]  }
 0x392   :  { %6142 = vmatpush1.bf16.msra.mxu0 %v18069_v53  ;;  %16646 = vmatpush3.bf16.msra.mxu1 %v18073_v42  ;;  %v18124_v53 = vld [vmem:[#allocation2 + $0x4e0] ss:$28 sps:$4 sm:$0xff]   ;;  %v18127_v42 = vld [vmem:[#allocation2 + $0xa28] ss:$28 sps:$4 sm:$0xff]  }
 0x393   :  { %6143 = vmatprep.subr.bf16.mxu0 %v18076_v26  ;;  %16647 = vmatprep.subr.bf16.mxu1 %v18077_v45  ;;  %v18128_v26 = vld [vmem:[#allocation2 + $0x868] ss:$28 sps:$4 sm:$0xff]   ;;  %v18131_v45 = vld [vmem:[#allocation2 + $0x51c] ss:$28 sps:$4 sm:$0xff]  }
 0x396   :  { %6144 = vmatpush1.bf16.msra.mxu0 %v18074_v44  ;;  %16648 = vmatpush3.bf16.msra.mxu1 %v18078_v57  ;;  %v18132_v44 = vld [vmem:[#allocation2 + $0xa60] ss:$28 sps:$4 sm:$0xff]   ;;  %v18129_v57 = vld [vmem:[#allocation2 + $0x518] ss:$28 sps:$4 sm:$0xff]  }
 0x397   :  { %6145 = vmatprep.subr.bf16.mxu0 %v18081_v30  ;;  %16649 = vmatprep.subr.bf16.mxu1 %v18082_v24  ;;  %v18133_v30 = vld [vmem:[#allocation2 + $0x8a0] ss:$28 sps:$4 sm:$0xff]   ;;  %v18136_v24 = vld [vmem:[#allocation2 + $0x554] ss:$28 sps:$4 sm:$0xff]  }
 0x39a   :  { %6146 = vmatpush1.bf16.msra.mxu0 %v18079_v48  ;;  %16650 = vmatpush3.bf16.msra.mxu1 %v18083_v43  ;;  %v18134_v48 = vld [vmem:[#allocation2 + $0x550] ss:$28 sps:$4 sm:$0xff]   ;;  %v18137_v43 = vld [vmem:[#allocation2 + $0xa98] ss:$28 sps:$4 sm:$0xff]  }
 0x39b   :  { %6147 = vmatprep.subr.bf16.mxu0 %v18086_v49  ;;  %16651 = vmatprep.subr.bf16.mxu1 %v18087_v51  ;;  %v18140_v49 = vld [vmem:[#allocation2 + $0x58c] ss:$28 sps:$4 sm:$0xff]  }
 0x39c   :  { %v18138_v51 = vld [vmem:[#allocation2 + $0x588] ss:$28 sps:$4 sm:$0xff]  }
 0x39e   :  { %6148 = vmatpush1.bf16.msra.mxu0 %v18084_v55  ;;  %16652 = vmatpush3.bf16.msra.mxu1 %v18088_v58  ;;  %v18141_v55 = vld [vmem:[#allocation2 + $0xad0] ss:$28 sps:$4 sm:$0xff]   ;;  %v18144_v58 = vld [vmem:[#allocation2 + $0x5c4] ss:$28 sps:$4 sm:$0xff]  }
 0x39f   :  { %6149 = vmatprep.subr.bf16.mxu0 %v18091_v47  ;;  %16653 = vmatprep.subr.bf16.mxu1 %v18092_v60  ;;  %v18186_v47 = vld [vmem:[%s22313_s7 + $0x4] ss:$16 sps:$4 sm:$0xff]   ;;  %v18142_v60 = vld [vmem:[#allocation2 + $0x5c0] ss:$28 sps:$4 sm:$0xff]  }
 0x3a2   :  { %6150 = vmatpush1.bf16.msra.mxu0 %v18089_v61  ;;  %16654 = vmatpush3.bf16.msra.mxu1 %v18093_v3  ;;  %v18147_v61 = vld [vmem:[#allocation2 + $0x5fc] ss:$28 sps:$4 sm:$0xff]   ;;  %v18184_v3 = vld [vmem:[%s22313_s7] ss:$16 sps:$4 sm:$0xff]  }
 0x3a3   :  { %6160 = vmatprep.subr.bf16.mxu0 %v18096_v4  ;;  %16661 = vmatprep.subr.bf16.mxu1 %v18097_v5  ;;  %v18192_v4 = vld [vmem:[%s22313_s7 + $0x24] ss:$16 sps:$4 sm:$0xff]  }
 0x3a4   :  { %v18145_v5 = vld [vmem:[#allocation2 + $0x5f8] ss:$28 sps:$4 sm:$0xff]  }
 0x3a5   :  { %6152 = vmatmul.mubr.bf16.vlgmr.msra.gmra.mrb[44].mxu0 %v21151_v50  ;;  %6356 = vmatmul.mubr.bf16.vlgmr.msra.gmra.mrb[24].mxu1 %v21171_v17  ;;  %v18112_v50 = vld [vmem:[#allocation2 + $0x980] ss:$28 sps:$4 sm:$0xff]  }
 0x3a6   :  { %6161 = vmatpush1.bf16.msra.mxu0 %v18094_v8  ;;  %6192 = vmatprep.mubr.bf16.mxu0 %v21155_v52  ;;  %v18116_v52 = vld [vmem:[#allocation2 + $0x474] ss:$28 sps:$4 sm:$0xff]  }
 0x3a7   :  { %16662 = vmatpush3.bf16.msra.mxu1 %v18098_v9  ;;  %6395 = vmatprep.mubr.bf16.mxu1 %v21183_v16  ;;  %v18150_v8 = vld [vmem:[#allocation2 + $0x634] ss:$28 sps:$4 sm:$0xff]  }
 0x3a8   :  { %6162 = vmatprep.subr.bf16.mxu0 %v18101_v10  ;;  %16663 = vmatprep.subr.bf16.mxu1 %v18102_v11  ;;  %v18190_v9 = vld [vmem:[%s22313_s7 + $0x20] ss:$16 sps:$4 sm:$0xff]   ;;  %v18198_v10 = vld [vmem:[%s22313_s7 + $0x44] ss:$16 sps:$4 sm:$0xff]  }
 0x3a9   :  { %v18148_v11 = vld [vmem:[#allocation2 + $0x630] ss:$28 sps:$4 sm:$0xff]  }
 0x3aa   :  { %6163 = vmatpush1.bf16.msra.mxu0 %v18099_v18  ;;  %v18153_v18 = vld [vmem:[#allocation2 + $0x66c] ss:$28 sps:$4 sm:$0xff]  }
 0x3ab   :  { %16664 = vmatpush3.bf16.msra.mxu1 %v18103_v25  ;;  %6164 = vmatprep.subr.bf16.mxu0 %v18106_v37  ;;  %v18196_v25 = vld [vmem:[%s22313_s7 + $0x40] ss:$16 sps:$4 sm:$0xff]   ;;  %v18204_v37 = vld [vmem:[%s22313_s7 + $0x64] ss:$16 sps:$4 sm:$0xff]  }
 0x3ac   :  { %16665 = vmatprep.subr.bf16.mxu1 %v18107_v14  ;;  %v18151_v14 = vld [vmem:[#allocation2 + $0x668] ss:$28 sps:$4 sm:$0xff]  }
 0x3ae   :  { %6165 = vmatpush1.bf16.msra.mxu0 %v18104_v15  ;;  %v18156_v15 = vld [vmem:[#allocation2 + $0x6a4] ss:$28 sps:$4 sm:$0xff]  }
 0x3af   :  { %16666 = vmatpush3.bf16.msra.mxu1 %v18108_v54  ;;  %6166 = vmatprep.subr.bf16.mxu0 %v18111_v29  ;;  %v18202_v54 = vld [vmem:[%s22313_s7 + $0x60] ss:$16 sps:$4 sm:$0xff]  }
 0x3b0   :  { %16667 = vmatprep.subr.bf16.mxu1 %v18112_v50  ;;  %v18154_v29 = vld [vmem:[#allocation2 + $0x6a0] ss:$28 sps:$4 sm:$0xff]   ;;  %v18210_v50 = vld [vmem:[%s22313_s7 + $0x84] ss:$16 sps:$4 sm:$0xff]  }
 0x3b2   :  { %6167 = vmatpush1.bf16.msra.mxu0 %v18109_v19  ;;  %v18159_v19 = vld [vmem:[#allocation2 + $0x6dc] ss:$28 sps:$4 sm:$0xff]  }
 0x3b3   :  { %16668 = vmatpush3.bf16.msra.mxu1 %v18113_v20  ;;  %6168 = vmatprep.subr.bf16.mxu0 %v18116_v52  ;;  %v18208_v20 = vld [vmem:[%s22313_s7 + $0x80] ss:$16 sps:$4 sm:$0xff]   ;;  %v18216_v52 = vld [vmem:[%s22313_s7 + $0xa4] ss:$16 sps:$4 sm:$0xff]  }
 0x3b4   :  { %16669 = vmatprep.subr.bf16.mxu1 %v18117_v22  ;;  %v18157_v22 = vld [vmem:[#allocation2 + $0x6d8] ss:$28 sps:$4 sm:$0xff]  }
 0x3b6   :  { %6169 = vmatpush1.bf16.msra.mxu0 %v18114_v23  ;;  %v18162_v23 = vld [vmem:[#allocation2 + $0x714] ss:$28 sps:$4 sm:$0xff]  }
 0x3b7   :  { %16670 = vmatpush3.bf16.msra.mxu1 %v18118_v27  ;;  %6170 = vmatprep.subr.bf16.mxu0 %v18121_v28  ;;  %v18214_v27 = vld [vmem:[%s22313_s7 + $0xa0] ss:$16 sps:$4 sm:$0xff]   ;;  %v18222_v28 = vld [vmem:[%s22313_s7 + $0xc4] ss:$16 sps:$4 sm:$0xff]  }
 0x3b8   :  { %16671 = vmatprep.subr.bf16.mxu1 %v18122_v31  ;;  %v18160_v31 = vld [vmem:[#allocation2 + $0x710] ss:$28 sps:$4 sm:$0xff]  }
 0x3ba   :  { %6171 = vmatpush1.bf16.msra.mxu0 %v18119_v32  ;;  %v18165_v32 = vld [vmem:[#allocation2 + $0x74c] ss:$28 sps:$4 sm:$0xff]  }
 0x3bb   :  { %16672 = vmatpush3.bf16.msra.mxu1 %v18123_v34  ;;  %6172 = vmatprep.subr.bf16.mxu0 %v18126_v39  ;;  %v18220_v34 = vld [vmem:[%s22313_s7 + $0xc0] ss:$16 sps:$4 sm:$0xff]   ;;  %v18228_v39 = vld [vmem:[%s22313_s7 + $0xe4] ss:$16 sps:$4 sm:$0xff]  }
 0x3bc   :  { %16673 = vmatprep.subr.bf16.mxu1 %v18127_v42  ;;  %v18168_v42 = vld [vmem:[#allocation2 + $0x784] ss:$28 sps:$4 sm:$0xff]  }
 0x3be   :  { %6173 = vmatpush1.bf16.msra.mxu0 %v18124_v53  ;;  %v18163_v53 = vld [vmem:[#allocation2 + $0x748] ss:$28 sps:$4 sm:$0xff]  }
 0x3bf   :  { %16674 = vmatpush3.bf16.msra.mxu1 %v18128_v26  ;;  %6174 = vmatprep.subr.bf16.mxu0 %v18131_v45  ;;  %v18226_v26 = vld [vmem:[%s22313_s7 + $0xe0] ss:$16 sps:$4 sm:$0xff]   ;;  %v18234_v45 = vld [vmem:[%s22313_s7 + $0x104] ss:$16 sps:$4 sm:$0xff]  }
 0x3c0   :  { %16675 = vmatprep.subr.bf16.mxu1 %v18132_v44  ;;  %v18166_v44 = vld [vmem:[#allocation2 + $0x780] ss:$28 sps:$4 sm:$0xff]  }
 0x3c2   :  { %6175 = vmatpush1.bf16.msra.mxu0 %v18129_v57  ;;  %v18240_v57 = vld [vmem:[%s22313_s7 + $0x124] ss:$16 sps:$4 sm:$0xff]  }
 0x3c3   :  { %16676 = vmatpush3.bf16.msra.mxu1 %v18133_v30  ;;  %6176 = vmatprep.subr.bf16.mxu0 %v18136_v24  ;;  %v18169_v30 = vld [vmem:[#allocation2 + $0x7b8] ss:$28 sps:$4 sm:$0xff]  }
 0x3c4   :  { %16933 = vmatprep.subr.bf16.mxu1 %v19671_v33  ;;  %v18174_v24 = vld [vmem:[#allocation2 + $0x7f4] ss:$28 sps:$4 sm:$0xff]  }
 0x3c6   :  { %6396 = vmatmul.mubr.bf16.vlgmr.msra.gmra.mrb[28].mxu1 %v21185_v21  ;;  %6177 = vmatpush1.bf16.msra.mxu0 %v18134_v48  ;;  %v18238_v48 = vld [vmem:[%s22313_s7 + $0x120] ss:$16 sps:$4 sm:$0xff]  }
 0x3c7   :  { %16934 = vmatpush3.bf16.msra.mxu1 %v18137_v43  ;;  %6178 = vmatprep.subr.bf16.mxu0 %v18140_v49  ;;  %v18243_v43 = vld [vmem:[%s22313_s7 + $0x144] ss:$16 sps:$4 sm:$0xff]   ;;  %v18172_v49 = vld [vmem:[#allocation2 + $0x7f0] ss:$28 sps:$4 sm:$0xff]  }
 0x3c8   :  { %16935 = vmatprep.subr.bf16.mxu1 %v19671_v33  ;;  %16937 = vmatprep.mubr.msk.bf16.mxu1 %vm19672_vm1, %v19671_v33 }
 0x3ca   :  { %6179 = vmatpush1.bf16.msra.mxu0 %v18138_v51  ;;  %v18177_v51 = vld [vmem:[#allocation2 + $0x82c] ss:$28 sps:$4 sm:$0xff]  }
 0x3cb   :  { %16936 = vmatpush3.bf16.msra.mxu1 %v18141_v55  ;;  %6180 = vmatprep.subr.bf16.mxu0 %v18144_v58  ;;  %v18241_v55 = vld [vmem:[%s22313_s7 + $0x140] ss:$16 sps:$4 sm:$0xff]   ;;  %v18249_v58 = vld [vmem:[%s22313_s7 + $0x164] ss:$16 sps:$4 sm:$0xff]  }
 0x3cc   :  { %7682 = vmatprep.subr.bf16.mxu1 %v18186_v47  ;;  %v18175_v47 = vld [vmem:[#allocation2 + $0x828] ss:$28 sps:$4 sm:$0xff]  }
 0x3ce   :  { %16938 = vmatmul.mubr.msk.bf16.vlgmr.msra.gmra.mrb[32].mxu1 %vm335_vm0, %v21194_v41  ;;  %6181 = vmatpush1.bf16.msra.mxu0 %v18142_v60  ;;  %v18180_v60 = vld [vmem:[#allocation2 + $0x864] ss:$28 sps:$4 sm:$0xff]  }
 0x3cf   :  { %6182 = vmatprep.subr.bf16.mxu0 %v18147_v61  ;;  %7683 = vmatpush1.bf16.msra.mxu1 %v18184_v3  ;;  %v18247_v61 = vld [vmem:[%s22313_s7 + $0x160] ss:$16 sps:$4 sm:$0xff]   ;;  %v18255_v3 = vld [vmem:[%s22313_s7 + $0x184] ss:$16 sps:$4 sm:$0xff]  }
 0x3d0   :  { %7684 = vmatprep.subr.bf16.mxu1 %v18192_v4  ;;  %v18178_v4 = vld [vmem:[#allocation2 + $0x860] ss:$28 sps:$4 sm:$0xff]  }
 0x3d2   :  { %6183 = vmatpush1.bf16.msra.mxu0 %v18145_v5  ;;  %v18183_v5 = vld [vmem:[#allocation2 + $0x89c] ss:$28 sps:$4 sm:$0xff]  }
 0x3d3   :  { %6184 = vmatprep.subr.bf16.mxu0 %v18150_v8  ;;  %7685 = vmatpush1.bf16.msra.mxu1 %v18190_v9  ;;  %v18253_v8 = vld [vmem:[%s22313_s7 + $0x180] ss:$16 sps:$4 sm:$0xff]   ;;  %v18261_v9 = vld [vmem:[%s22313_s7 + $0x1a4] ss:$16 sps:$4 sm:$0xff]  }
 0x3d4   :  { %7686 = vmatprep.subr.bf16.mxu1 %v18198_v10  ;;  %v18181_v10 = vld [vmem:[#allocation2 + $0x898] ss:$28 sps:$4 sm:$0xff]  }
 0x3d6   :  { %6185 = vmatpush1.bf16.msra.mxu0 %v18148_v11  ;;  %v18189_v11 = vld [vmem:[#allocation2 + $0x8d4] ss:$28 sps:$4 sm:$0xff]  }
 0x3d7   :  { %6186 = vmatprep.subr.bf16.mxu0 %v18153_v18  ;;  %7687 = vmatpush1.bf16.msra.mxu1 %v18196_v25  ;;  %v18259_v18 = vld [vmem:[%s22313_s7 + $0x1a0] ss:$16 sps:$4 sm:$0xff]   ;;  %v18267_v25 = vld [vmem:[%s22313_s7 + $0x1c4] ss:$16 sps:$4 sm:$0xff]  }
 0x3d8   :  { %7688 = vmatprep.subr.bf16.mxu1 %v18204_v37  ;;  %v18187_v37 = vld [vmem:[#allocation2 + $0x8d0] ss:$28 sps:$4 sm:$0xff]  }
 0x3da   :  { %6187 = vmatpush1.bf16.msra.mxu0 %v18151_v14  ;;  %v18195_v14 = vld [vmem:[#allocation2 + $0x90c] ss:$28 sps:$4 sm:$0xff]  }
 0x3db   :  { %6188 = vmatprep.subr.bf16.mxu0 %v18156_v15  ;;  %7689 = vmatpush1.bf16.msra.mxu1 %v18202_v54  ;;  %v18265_v15 = vld [vmem:[%s22313_s7 + $0x1c0] ss:$16 sps:$4 sm:$0xff]   ;;  %v18273_v54 = vld [vmem:[%s22313_s7 + $0x1e4] ss:$16 sps:$4 sm:$0xff]  }
 0x3dc   :  { %7690 = vmatprep.subr.bf16.mxu1 %v18210_v50  ;;  %v18201_v50 = vld [vmem:[#allocation2 + $0x944] ss:$28 sps:$4 sm:$0xff]  }
 0x3de   :  { %6189 = vmatpush1.bf16.msra.mxu0 %v18154_v29  ;;  %v18193_v29 = vld [vmem:[#allocation2 + $0x908] ss:$28 sps:$4 sm:$0xff]  }
 0x3df   :  { %6190 = vmatprep.subr.bf16.mxu0 %v18159_v19  ;;  %7691 = vmatpush1.bf16.msra.mxu1 %v18208_v20  ;;  %v18271_v19 = vld [vmem:[%s22313_s7 + $0x1e0] ss:$16 sps:$4 sm:$0xff]   ;;  %v18279_v20 = vld [vmem:[%s22313_s7 + $0x204] ss:$16 sps:$4 sm:$0xff]  }
 0x3e0   :  { %7692 = vmatprep.subr.bf16.mxu1 %v18216_v52  ;;  %v18199_v52 = vld [vmem:[#allocation2 + $0x940] ss:$28 sps:$4 sm:$0xff]  }
 0x3e2   :  { %6191 = vmatpush1.bf16.msra.mxu0 %v18157_v22  ;;  %v18207_v22 = vld [vmem:[#allocation2 + $0x97c] ss:$28 sps:$4 sm:$0xff]  }
 0x3e3   :  { %6201 = vmatprep.subr.bf16.mxu0 %v18162_v23  ;;  %7693 = vmatpush1.bf16.msra.mxu1 %v18214_v27  ;;  %v18205_v23 = vld [vmem:[#allocation2 + $0x978] ss:$28 sps:$4 sm:$0xff]  }
 0x3e4   :  { %7694 = vmatprep.subr.bf16.mxu1 %v18222_v28  ;;  %v18213_v27 = vld [vmem:[#allocation2 + $0x9b4] ss:$28 sps:$4 sm:$0xff]  }
 0x3e5   :  { %6193 = vmatmul.mubr.bf16.vlgmr.msra.gmra.mrb[44].mxu0 %v21171_v17  ;;  %v18171_v17 = vld [vmem:[#allocation2 + $0x7bc] ss:$28 sps:$4 sm:$0xff]   ;;  %v18211_v28 = vld [vmem:[#allocation2 + $0x9b0] ss:$28 sps:$4 sm:$0xff]  }
 0x3e6   :  { %6202 = vmatpush1.bf16.msra.mxu0 %v18160_v31  ;;  %6233 = vmatprep.mubr.bf16.mxu0 %v21183_v16  ;;  %v18232_v16 = vld [vmem:[%s22313_s7 + $0x100] ss:$16 sps:$4 sm:$0xff]   ;;  %v18219_v31 = vld [vmem:[#allocation2 + $0x9ec] ss:$28 sps:$4 sm:$0xff]  }
 0x3e7   :  { %6203 = vmatprep.subr.bf16.mxu0 %v18165_v32  ;;  %7695 = vmatpush1.bf16.msra.mxu1 %v18220_v34  ;;  %v18217_v32 = vld [vmem:[#allocation2 + $0x9e8] ss:$28 sps:$4 sm:$0xff]  }
 0x3e8   :  { %7696 = vmatprep.subr.bf16.mxu1 %v18228_v39  ;;  %v18225_v34 = vld [vmem:[#allocation2 + $0xa24] ss:$28 sps:$4 sm:$0xff]  }
 0x3e9   :  { %v18223_v39 = vld [vmem:[#allocation2 + $0xa20] ss:$28 sps:$4 sm:$0xff]  }
 0x3ea   :  { %6204 = vmatpush1.bf16.msra.mxu0 %v18163_v53  ;;  %v18231_v53 = vld [vmem:[#allocation2 + $0xa5c] ss:$28 sps:$4 sm:$0xff]  }
 0x3eb   :  { %6205 = vmatprep.subr.bf16.mxu0 %v18168_v42  ;;  %7697 = vmatpush1.bf16.msra.mxu1 %v18226_v26  ;;  %v18229_v42 = vld [vmem:[#allocation2 + $0xa58] ss:$28 sps:$4 sm:$0xff]  }
 0x3ec   :  { %7698 = vmatprep.subr.bf16.mxu1 %v18234_v45  ;;  %v18237_v26 = vld [vmem:[#allocation2 + $0xa94] ss:$28 sps:$4 sm:$0xff]  }
 0x3ed   :  { %v18235_v45 = vld [vmem:[#allocation2 + $0xa90] ss:$28 sps:$4 sm:$0xff]  }
 0x3ee   :  { %6206 = vmatpush1.bf16.msra.mxu0 %v18166_v44  ;;  %v18246_v44 = vld [vmem:[#allocation2 + $0xacc] ss:$28 sps:$4 sm:$0xff]  }
 0x3ef   :  { %6207 = vmatprep.subr.bf16.mxu0 %v18171_v17  ;;  %7699 = vmatpush1.bf16.msra.mxu1 %v18232_v16  ;;  %v18244_v17 = vld [vmem:[#allocation2 + $0xac8] ss:$28 sps:$4 sm:$0xff]   ;;  %v18252_v16 = vld [vmem:[%s22313_s7 + $0xc] ss:$16 sps:$4 sm:$0xff]  }
 0x3f0   :  { %7700 = vmatprep.subr.bf16.mxu1 %v18240_v57  ;;  %v18250_v57 = vld [vmem:[%s22313_s7 + $0x8] ss:$16 sps:$4 sm:$0xff]  }
 0x3f2   :  { %6208 = vmatpush1.bf16.msra.mxu0 %v18169_v30  ;;  %v18258_v30 = vld [vmem:[%s22313_s7 + $0x2c] ss:$16 sps:$4 sm:$0xff]  }
 0x3f3   :  { %6209 = vmatprep.subr.bf16.mxu0 %v18174_v24  ;;  %7701 = vmatpush1.bf16.msra.mxu1 %v18238_v48  ;;  %v21335_v24 = vld [vmem:[%s22312_s6] sm:$0x7f]  ;;  %v18264_v48 = vld [vmem:[%s22313_s7 + $0x4c] ss:$16 sps:$4 sm:$0xff]  }
 0x3f4   :  { %7702 = vmatprep.subr.bf16.mxu1 %v18243_v43  ;;  %v3956_v43 = vrot.slane %v21335_v24, %v20134_v36 }
 0x3f6   :  { %6210 = vmatpush1.bf16.msra.mxu0 %v18172_v49  ;;  %v3960_v49 = vrot.slane %v21335_v24, %v20142_v38 }
 0x3f7   :  { %6211 = vmatprep.subr.bf16.mxu0 %v18177_v51  ;;  %7703 = vmatpush1.bf16.msra.mxu1 %v18241_v55  ;;  %v3968_v51 = vrot.slane %v21335_v24, %v20149_v46  ;;  %v18270_v55 = vld [vmem:[%s22313_s7 + $0x6c] ss:$16 sps:$4 sm:$0xff]  }
 0x3f8   :  { %7704 = vmatprep.subr.bf16.mxu1 %v18249_v58 }
 0x3fa   :  { %6212 = vmatpush1.bf16.msra.mxu0 %v18175_v47 }
 0x3fb   :  { %6213 = vmatprep.subr.bf16.mxu0 %v18180_v60  ;;  %7705 = vmatpush1.bf16.msra.mxu1 %v18247_v61 }
 0x3fc   :  { %7706 = vmatprep.subr.bf16.mxu1 %v18255_v3 }
 0x3fe   :  { %6214 = vmatpush1.bf16.msra.mxu0 %v18178_v4 }
 0x3ff   :  { %6215 = vmatprep.subr.bf16.mxu0 %v18183_v5  ;;  %7707 = vmatpush1.bf16.msra.mxu1 %v18253_v8 }
 0x400   :  { %7708 = vmatprep.subr.bf16.mxu1 %v18261_v9 }
 0x402   :  { %6216 = vmatpush1.bf16.msra.mxu0 %v18181_v10  ;;  %v18268_v10 = vld [vmem:[%s22313_s7 + $0x68] ss:$16 sps:$4 sm:$0xff]  }
 0x403   :  { %6217 = vmatprep.subr.bf16.mxu0 %v18189_v11  ;;  %7709 = vmatpush1.bf16.msra.mxu1 %v18259_v18 }
 0x404   :  { %7710 = vmatprep.subr.bf16.mxu1 %v18267_v25 }
 0x406   :  { %6218 = vmatpush1.bf16.msra.mxu0 %v18187_v37  ;;  %v18276_v37 = vld [vmem:[%s22313_s7 + $0x8c] ss:$16 sps:$4 sm:$0xff]  }
 0x407   :  { %6219 = vmatprep.subr.bf16.mxu0 %v18195_v14  ;;  %7711 = vmatpush1.bf16.msra.mxu1 %v18265_v15 }
 0x408   :  { %7712 = vmatprep.subr.bf16.mxu1 %v18273_v54 }
 0x40a   :  { %6220 = vmatpush1.bf16.msra.mxu0 %v18193_v29  ;;  %v18274_v29 = vld [vmem:[%s22313_s7 + $0x88] ss:$16 sps:$4 sm:$0xff]  }
 0x40b   :  { %6221 = vmatprep.subr.bf16.mxu0 %v18201_v50  ;;  %7713 = vmatpush1.bf16.msra.mxu1 %v18271_v19  ;;  %v18277_v50 = vld [vmem:[%s22313_s7 + $0x200] ss:$16 sps:$4 sm:$0xff]  }
 0x40c   :  { %7723 = vmatprep.subr.bf16.mxu1 %v18279_v20  ;;  %v18282_v20 = vld [vmem:[%s22313_s7 + $0xac] ss:$16 sps:$4 sm:$0xff]  }
 0x40e   :  { %6222 = vmatpush1.bf16.msra.mxu0 %v18199_v52  ;;  %v18285_v52 = vld [vmem:[%s22313_s7 + $0x224] ss:$16 sps:$4 sm:$0xff]  }
 0x40f   :  { %6223 = vmatprep.subr.bf16.mxu0 %v18207_v22 }
 0x412   :  { %6224 = vmatpush1.bf16.msra.mxu0 %v18205_v23  ;;  %v18280_v23 = vld [vmem:[%s22313_s7 + $0xa8] ss:$16 sps:$4 sm:$0xff]  }
 0x413   :  { %6225 = vmatprep.subr.bf16.mxu0 %v18213_v27  ;;  %v18283_v27 = vld [vmem:[%s22313_s7 + $0x220] ss:$16 sps:$4 sm:$0xff]  }
 0x416   :  { %6226 = vmatpush1.bf16.msra.mxu0 %v18211_v28  ;;  %v18288_v28 = vld [vmem:[%s22313_s7 + $0xcc] ss:$16 sps:$4 sm:$0xff]  }
 0x417   :  { %6227 = vmatprep.subr.bf16.mxu0 %v18219_v31  ;;  %v18291_v31 = vld [vmem:[%s22313_s7 + $0x244] ss:$16 sps:$4 sm:$0xff]  }
 0x41a   :  { %6228 = vmatpush1.bf16.msra.mxu0 %v18217_v32  ;;  %v18286_v32 = vld [vmem:[%s22313_s7 + $0xc8] ss:$16 sps:$4 sm:$0xff]  }
 0x41b   :  { %6229 = vmatprep.subr.bf16.mxu0 %v18225_v34  ;;  %v18289_v34 = vld [vmem:[%s22313_s7 + $0x240] ss:$16 sps:$4 sm:$0xff]  }
 0x41e   :  { %6230 = vmatpush1.bf16.msra.mxu0 %v18223_v39  ;;  %v18294_v39 = vld [vmem:[%s22313_s7 + $0xec] ss:$16 sps:$4 sm:$0xff]  }
 0x41f   :  { %6231 = vmatprep.subr.bf16.mxu0 %v18231_v53  ;;  %v18297_v53 = vld [vmem:[%s22313_s7 + $0x264] ss:$16 sps:$4 sm:$0xff]  }
 0x422   :  { %6232 = vmatpush1.bf16.msra.mxu0 %v18229_v42  ;;  %v18292_v42 = vld [vmem:[%s22313_s7 + $0xe8] ss:$16 sps:$4 sm:$0xff]  }
 0x423   :  { %6242 = vmatprep.subr.bf16.mxu0 %v18237_v26  ;;  %v18295_v26 = vld [vmem:[%s22313_s7 + $0x260] ss:$16 sps:$4 sm:$0xff]  }
 0x425   :  { %6234 = vmatmul.mubr.bf16.vlgmr.msra.gmra.mrb[44].mxu0 %v21185_v21  ;;  %v18256_v21 = vld [vmem:[%s22313_s7 + $0x28] ss:$16 sps:$4 sm:$0xff]  }
 0x426   :  { %6243 = vmatpush1.bf16.msra.mxu0 %v18235_v45  ;;  %6274 = vmatprep.mubr.bf16.mxu0 %v19670_v0  ;;  %v18300_v45 = vld [vmem:[%s22313_s7 + $0x10c] ss:$16 sps:$4 sm:$0xff]  }
 0x427   :  { %6244 = vmatprep.subr.bf16.mxu0 %v18246_v44  ;;  %v18303_v44 = vld [vmem:[%s22313_s7 + $0x284] ss:$16 sps:$4 sm:$0xff]  }
 0x42a   :  { %6245 = vmatpush1.bf16.msra.mxu0 %v18244_v17  ;;  %v18298_v17 = vld [vmem:[%s22313_s7 + $0x108] ss:$16 sps:$4 sm:$0xff]  }
 0x42b   :  { %7846 = vmatprep.subr.bf16.mxu0 %v18252_v16  ;;  %v18301_v16 = vld [vmem:[%s22313_s7 + $0x280] ss:$16 sps:$4 sm:$0xff]  }
 0x431   :  { %15551 = vmatmul.mubr.msk.bf16.vlgmr.msra.gmra.mrb[44].mxu0 %vm335_vm0, %v21194_v41  ;;  %v18262_v41 = vld [vmem:[%s22313_s7 + $0x48] ss:$16 sps:$4 sm:$0xff]  }
 0x432   :  { %7847 = vmatpush1.bf16.msra.mxu0 %v18250_v57  ;;  %v18306_v57 = vld [vmem:[%s22313_s7 + $0x12c] ss:$16 sps:$4 sm:$0xff]  }
 0x433   :  { %7848 = vmatprep.subr.bf16.mxu0 %v18258_v30  ;;  %v18309_v30 = vld [vmem:[%s22313_s7 + $0x2a4] ss:$16 sps:$4 sm:$0xff]  }
 0x436   :  { %7849 = vmatpush1.bf16.msra.mxu0 %v18256_v21  ;;  %v18304_v21 = vld [vmem:[%s22313_s7 + $0x128] ss:$16 sps:$4 sm:$0xff]  }
 0x437   :  { %7850 = vmatprep.subr.bf16.mxu0 %v18264_v48  ;;  %v18307_v48 = vld [vmem:[%s22313_s7 + $0x2a0] ss:$16 sps:$4 sm:$0xff]  }
 0x438   :  { %v5948_v58 = vpop.f32.mrb[40].mxu0  ;;  %v21352_v47 = vpop.f32.mrb[16].mxu1 }
 0x439   :  { %v16977_v60 = vadd.f32 %v5948_v58, %v3956_v43  ;;  %v5950_v61 = vpop.f32.mrb[41].mxu0  ;;  %v6114_v3 = vpop.f32.mrb[17].mxu1  ;;  %v18312_v43 = vld [vmem:[%s22313_s7 + $0x14c] ss:$16 sps:$4 sm:$0xff]   ;;  %v18321_v58 = vld [vmem:[%s22313_s7 + $0x2e4] ss:$16 sps:$4 sm:$0xff]  }
 0x43a   :  { %7851 = vmatpush1.bf16.msra.mxu0 %v18262_v41  ;;  %v16978_v4 = vadd.f32 %v5950_v61, %v3960_v49  ;;  %v16980_v5 = vadd.f32 %v6114_v3, %v3968_v51  ;;  %v5952_v8 = vpop.f32.mrb[42].mxu0  ;;  %v6116_v9 = vpop.f32.mrb[18].mxu1  ;;  %v18315_v41 = vld [vmem:[%s22313_s7 + $0x2c4] ss:$16 sps:$4 sm:$0xff]   ;;  %v18310_v49 = vld [vmem:[%s22313_s7 + $0x148] ss:$16 sps:$4 sm:$0xff]  }
 0x43b   :  { %v6443_v11 = vmax.f32 %v16977_v60, 0.0  ;;  %v5953_v18 = vpop.f32.mrb[43].mxu0  ;;  %v6117_v25 = vpop.f32.mrb[19].mxu1  ;;  %7852 = vmatprep.subr.bf16.mxu0 %v18270_v55  ;;  %v18313_v51 = vld [vmem:[%s22313_s7 + $0x2c0] ss:$16 sps:$4 sm:$0xff]  }
 0x43c   :  { %v6444_v14 = vmax.f32 %v16978_v4, 0.0  ;;  %v6446_v15 = vmax.f32 %v16980_v5, 0.0  ;;  %v18318_v55 = vld [vmem:[%s22313_s7 + $0x16c] ss:$16 sps:$4 sm:$0xff]   ;;  %v18316_v5 = vld [vmem:[%s22313_s7 + $0x168] ss:$16 sps:$4 sm:$0xff]  }
 0x43d   :  { %v21366_v19 = vpack.c.bf16 %v6443_v11, %v6443_v11  ;;  %v18319_v8 = vld [vmem:[%s22313_s7 + $0x2e0] ss:$16 sps:$4 sm:$0xff]   ;;  %v18327_v11 = vld [vmem:[%s22313_s7 + $0x304] ss:$16 sps:$4 sm:$0xff]   ;;  %v18322_v18 = vld [vmem:[%s22313_s7 + $0x188] ss:$16 sps:$4 sm:$0xff]  }
 0x43e   :  { %v6451_v54 = vpack.c.bf16 %v6444_v14, %v6444_v14  ;;  %7853 = vmatpush1.bf16.msra.mxu0 %v18268_v10  ;;  %v21374_v22 = vpack.c.bf16 %v6446_v15, %v6446_v15  ;;  %v18324_v10 = vld [vmem:[%s22313_s7 + $0x18c] ss:$16 sps:$4 sm:$0xff]   ;;  %v18325_v25 = vld [vmem:[%s22313_s7 + $0x300] ss:$16 sps:$4 sm:$0xff]   ;;  %v18333_v14 = vld [vmem:[%s22313_s7 + $0x324] ss:$16 sps:$4 sm:$0xff]  }
 0x43f   :  { %7854 = vmatprep.subr.bf16.mxu0 %v18276_v37  ;;  %v18330_v37 = vld [vmem:[%s22313_s7 + $0x1ac] ss:$16 sps:$4 sm:$0xff]   ;;  %v18328_v15 = vld [vmem:[%s22313_s7 + $0x1a8] ss:$16 sps:$4 sm:$0xff]  }
 0x440   :  { %7714 = vmatprep.mubr.bf16.mxu1 %v6451_v54  ;;  %7878 = vmatprep.mubr.bf16.mxu0 %v6451_v54  ;;  %v18331_v54 = vld [vmem:[%s22313_s7 + $0x320] ss:$16 sps:$4 sm:$0xff]  }
 0x441   :  { %7715 = vmatmul.mubr.bf16.vlgmr.msra.gmra.mrb[36].mxu1 %v21366_v19 }
 0x442   :  { %7855 = vmatpush1.bf16.msra.mxu0 %v18274_v29  ;;  %7724 = vmatpush1.bf16.msra.mxu1 %v18277_v50  ;;  %v18336_v29 = vld [vmem:[%s22313_s7 + $0x1cc] ss:$16 sps:$4 sm:$0xff]   ;;  %v18339_v50 = vld [vmem:[%s22313_s7 + $0x344] ss:$16 sps:$4 sm:$0xff]  }
 0x443   :  { %7755 = vmatprep.mubr.bf16.mxu1 %v21374_v22  ;;  %7856 = vmatprep.subr.bf16.mxu0 %v18282_v20  ;;  %v18334_v20 = vld [vmem:[%s22313_s7 + $0x1c8] ss:$16 sps:$4 sm:$0xff]  }
 0x444   :  { %7725 = vmatprep.subr.bf16.mxu1 %v18285_v52  ;;  %v18337_v52 = vld [vmem:[%s22313_s7 + $0x340] ss:$16 sps:$4 sm:$0xff]  }
 0x446   :  { %7857 = vmatpush1.bf16.msra.mxu0 %v18280_v23  ;;  %7726 = vmatpush1.bf16.msra.mxu1 %v18283_v27  ;;  %v18342_v23 = vld [vmem:[%s22313_s7 + $0x1ec] ss:$16 sps:$4 sm:$0xff]   ;;  %v18345_v27 = vld [vmem:[%s22313_s7 + $0x364] ss:$16 sps:$4 sm:$0xff]  }
 0x447   :  { %7858 = vmatprep.subr.bf16.mxu0 %v18288_v28  ;;  %7727 = vmatprep.subr.bf16.mxu1 %v18291_v31  ;;  %v18340_v28 = vld [vmem:[%s22313_s7 + $0x1e8] ss:$16 sps:$4 sm:$0xff]   ;;  %v18343_v31 = vld [vmem:[%s22313_s7 + $0x360] ss:$16 sps:$4 sm:$0xff]  }
 0x44a   :  { %7859 = vmatpush1.bf16.msra.mxu0 %v18286_v32  ;;  %7728 = vmatpush1.bf16.msra.mxu1 %v18289_v34  ;;  %v18348_v32 = vld [vmem:[%s22313_s7 + $0x20c] ss:$16 sps:$4 sm:$0xff]   ;;  %v18351_v34 = vld [vmem:[%s22313_s7 + $0x384] ss:$16 sps:$4 sm:$0xff]  }
 0x44b   :  { %7860 = vmatprep.subr.bf16.mxu0 %v18294_v39  ;;  %7729 = vmatprep.subr.bf16.mxu1 %v18297_v53  ;;  %v18346_v39 = vld [vmem:[%s22313_s7 + $0x208] ss:$16 sps:$4 sm:$0xff]   ;;  %v18349_v53 = vld [vmem:[%s22313_s7 + $0x380] ss:$16 sps:$4 sm:$0xff]  }
 0x44e   :  { %7861 = vmatpush1.bf16.msra.mxu0 %v18292_v42  ;;  %7730 = vmatpush1.bf16.msra.mxu1 %v18295_v26  ;;  %v18354_v42 = vld [vmem:[%s22313_s7 + $0x22c] ss:$16 sps:$4 sm:$0xff]   ;;  %v18357_v26 = vld [vmem:[%s22313_s7 + $0x3a4] ss:$16 sps:$4 sm:$0xff]  }
 0x44f   :  { %7862 = vmatprep.subr.bf16.mxu0 %v18300_v45  ;;  %7731 = vmatprep.subr.bf16.mxu1 %v18303_v44  ;;  %v18352_v45 = vld [vmem:[%s22313_s7 + $0x228] ss:$16 sps:$4 sm:$0xff]   ;;  %v18355_v44 = vld [vmem:[%s22313_s7 + $0x3a0] ss:$16 sps:$4 sm:$0xff]  }
 0x452   :  { %7863 = vmatpush1.bf16.msra.mxu0 %v18298_v17  ;;  %7732 = vmatpush1.bf16.msra.mxu1 %v18301_v16  ;;  %v18360_v17 = vld [vmem:[%s22313_s7 + $0x24c] ss:$16 sps:$4 sm:$0xff]   ;;  %v3980_v16 = vrot.slane %v21335_v24, %v20168_v56 }
 0x453   :  { %7864 = vmatprep.subr.bf16.mxu0 %v18306_v57  ;;  %7733 = vmatprep.subr.bf16.mxu1 %v18309_v30  ;;  %v18358_v57 = vld [vmem:[%s22313_s7 + $0x248] ss:$16 sps:$4 sm:$0xff]   ;;  %v18361_v30 = vld [vmem:[%s22313_s7 + $0x3c0] ss:$16 sps:$4 sm:$0xff]  }
 0x456   :  { %7865 = vmatpush1.bf16.msra.mxu0 %v18304_v21  ;;  %7734 = vmatpush1.bf16.msra.mxu1 %v18307_v48  ;;  %v18366_v21 = vld [vmem:[%s22313_s7 + $0x26c] ss:$16 sps:$4 sm:$0xff]  }
 0x457   :  { %7866 = vmatprep.subr.bf16.mxu0 %v18312_v43  ;;  %7735 = vmatprep.subr.bf16.mxu1 %v18315_v41  ;;  %v18369_v41 = vld [vmem:[%s22313_s7 + $0x3e4] ss:$16 sps:$4 sm:$0xff]  }
 0x458   :  { %v16633_v60 = vpop.f32.mrb[20].mxu1 }
 0x459   :  { %v16634_v61 = vpop.f32.mrb[21].mxu1 }
 0x45a   :  { %v21450_v3 = vadd.f32 %v16634_v61, %v16633_v60  ;;  %7867 = vmatpush1.bf16.msra.mxu0 %v18310_v49  ;;  %v16636_v4 = vpop.f32.mrb[22].mxu1  ;;  %7736 = vmatpush1.bf16.msra.mxu1 %v18313_v51  ;;  %v18364_v60 = vld [vmem:[%s22313_s7 + $0x268] ss:$16 sps:$4 sm:$0xff]  }
 0x45b   :  { %v16637_v9 = vpop.f32.mrb[23].mxu1  ;;  %7868 = vmatprep.subr.bf16.mxu0 %v18318_v55  ;;  %7737 = vmatprep.subr.bf16.mxu1 %v18321_v58  ;;  %v18372_v4 = vld [vmem:[%s22313_s7 + $0x28c] ss:$16 sps:$4 sm:$0xff]  }
 0x45c   :  { %v6318_v51 = vadd.f32 %v21450_v3, %v3980_v16  ;;  %v18370_v9 = vld [vmem:[%s22313_s7 + $0x288] ss:$16 sps:$4 sm:$0xff]   ;;  %v18450_v16 = vld [vmem:[%s22313_s7 + $0x4e4] ss:$16 sps:$4 sm:$0xff]  }
 0x45e   :  { %7869 = vmatpush1.bf16.msra.mxu0 %v18316_v5  ;;  %7738 = vmatpush1.bf16.msra.mxu1 %v18319_v8  ;;  %v18408_v8 = vld [vmem:[%s22313_s7 + $0x404] ss:$16 sps:$4 sm:$0xff]  }
 0x45f   :  { %7870 = vmatprep.subr.bf16.mxu0 %v18324_v10  ;;  %7739 = vmatprep.subr.bf16.mxu1 %v18327_v11  ;;  %v18375_v10 = vld [vmem:[%s22313_s7 + $0x2ac] ss:$16 sps:$4 sm:$0xff]   ;;  %v18406_v11 = vld [vmem:[%s22313_s7 + $0x400] ss:$16 sps:$4 sm:$0xff]  }
 0x462   :  { %7871 = vmatpush1.bf16.msra.mxu0 %v18322_v18  ;;  %7740 = vmatpush1.bf16.msra.mxu1 %v18325_v25  ;;  %v18414_v25 = vld [vmem:[%s22313_s7 + $0x424] ss:$16 sps:$4 sm:$0xff]  }
 0x463   :  { %7872 = vmatprep.subr.bf16.mxu0 %v18330_v37  ;;  %7741 = vmatprep.subr.bf16.mxu1 %v18333_v14  ;;  %v18373_v37 = vld [vmem:[%s22313_s7 + $0x2a8] ss:$16 sps:$4 sm:$0xff]   ;;  %v18378_v14 = vld [vmem:[%s22313_s7 + $0x2cc] ss:$16 sps:$4 sm:$0xff]  }
 0x466   :  { %7873 = vmatpush1.bf16.msra.mxu0 %v18328_v15  ;;  %7742 = vmatpush1.bf16.msra.mxu1 %v18331_v54  ;;  %v18412_v15 = vld [vmem:[%s22313_s7 + $0x420] ss:$16 sps:$4 sm:$0xff]   ;;  %v18420_v54 = vld [vmem:[%s22313_s7 + $0x444] ss:$16 sps:$4 sm:$0xff]  }
 0x467   :  { %7874 = vmatprep.subr.bf16.mxu0 %v18336_v29  ;;  %7743 = vmatprep.subr.bf16.mxu1 %v18339_v50  ;;  %v18376_v29 = vld [vmem:[%s22313_s7 + $0x2c8] ss:$16 sps:$4 sm:$0xff]   ;;  %v18381_v50 = vld [vmem:[%s22313_s7 + $0x2ec] ss:$16 sps:$4 sm:$0xff]  }
 0x46a   :  { %7875 = vmatpush1.bf16.msra.mxu0 %v18334_v20  ;;  %7744 = vmatpush1.bf16.msra.mxu1 %v18337_v52  ;;  %v18418_v20 = vld [vmem:[%s22313_s7 + $0x440] ss:$16 sps:$4 sm:$0xff]   ;;  %v18426_v52 = vld [vmem:[%s22313_s7 + $0x464] ss:$16 sps:$4 sm:$0xff]  }
 0x46b   :  { %7876 = vmatprep.subr.bf16.mxu0 %v18342_v23  ;;  %7745 = vmatprep.subr.bf16.mxu1 %v18345_v27  ;;  %v18379_v23 = vld [vmem:[%s22313_s7 + $0x2e8] ss:$16 sps:$4 sm:$0xff]   ;;  %v18384_v27 = vld [vmem:[%s22313_s7 + $0x30c] ss:$16 sps:$4 sm:$0xff]  }
 0x46e   :  { %7877 = vmatpush1.bf16.msra.mxu0 %v18340_v28  ;;  %7746 = vmatpush1.bf16.msra.mxu1 %v18343_v31  ;;  %v18424_v28 = vld [vmem:[%s22313_s7 + $0x460] ss:$16 sps:$4 sm:$0xff]   ;;  %v18432_v31 = vld [vmem:[%s22313_s7 + $0x484] ss:$16 sps:$4 sm:$0xff]  }
 0x46f   :  { %7887 = vmatprep.subr.bf16.mxu0 %v18348_v32  ;;  %7747 = vmatprep.subr.bf16.mxu1 %v18351_v34  ;;  %v18382_v32 = vld [vmem:[%s22313_s7 + $0x308] ss:$16 sps:$4 sm:$0xff]   ;;  %v18387_v34 = vld [vmem:[%s22313_s7 + $0x32c] ss:$16 sps:$4 sm:$0xff]  }
 0x471   :  { %7879 = vmatmul.mubr.bf16.vlgmr.msra.gmra.mrb[48].mxu0 %v21366_v19  ;;  %v3964_v19 = vrot.slane %v21335_v24, %v20245_v40 }
 0x472   :  { %7888 = vmatpush1.bf16.msra.mxu0 %v18346_v39  ;;  %7919 = vmatprep.mubr.bf16.mxu0 %v21374_v22  ;;  %v18363_v22 = vld [vmem:[%s22313_s7 + $0x3c4] ss:$16 sps:$4 sm:$0xff]   ;;  %v18430_v39 = vld [vmem:[%s22313_s7 + $0x480] ss:$16 sps:$4 sm:$0xff]  }
 0x473   :  { %7748 = vmatpush1.bf16.msra.mxu1 %v18349_v53  ;;  %7889 = vmatprep.subr.bf16.mxu0 %v18354_v42  ;;  %v16979_v48 = vadd.f32 %v21352_v47, %v3964_v19  ;;  %v18367_v47 = vld [vmem:[%s22313_s7 + $0x3e0] ss:$16 sps:$4 sm:$0xff]   ;;  %v18438_v53 = vld [vmem:[%s22313_s7 + $0x4a4] ss:$16 sps:$4 sm:$0xff]   ;;  %v18385_v42 = vld [vmem:[%s22313_s7 + $0x328] ss:$16 sps:$4 sm:$0xff]  }
 0x474   :  { %7749 = vmatprep.subr.bf16.mxu1 %v18357_v26  ;;  %v18390_v26 = vld [vmem:[%s22313_s7 + $0x34c] ss:$16 sps:$4 sm:$0xff]  }
 0x475   :  { %v6445_v5 = vmax.f32 %v16979_v48, 0.0  ;;  %v18393_v19 = vld [vmem:[%s22313_s7 + $0x36c] ss:$16 sps:$4 sm:$0xff]  }
 0x476   :  { %7890 = vmatpush1.bf16.msra.mxu0 %v18352_v45  ;;  %v18436_v45 = vld [vmem:[%s22313_s7 + $0x4a0] ss:$16 sps:$4 sm:$0xff]  }
 0x477   :  { %7750 = vmatpush1.bf16.msra.mxu1 %v18355_v44  ;;  %7891 = vmatprep.subr.bf16.mxu0 %v18360_v17  ;;  %v21579_v18 = vpack.c.bf16 %v6445_v5, %v6445_v5  ;;  %v18444_v44 = vld [vmem:[%s22313_s7 + $0x4c4] ss:$16 sps:$4 sm:$0xff]   ;;  %v18388_v17 = vld [vmem:[%s22313_s7 + $0x348] ss:$16 sps:$4 sm:$0xff]  }
 0x478   :  { %v16655_v43 = vpop.f32.mrb[24].mxu1  ;;  %7751 = vmatprep.subr.bf16.mxu1 %v18363_v22  ;;  %v18442_v22 = vld [vmem:[%s22313_s7 + $0x4c0] ss:$16 sps:$4 sm:$0xff]  }
 0x479   :  { %v16656_v49 = vpop.f32.mrb[25].mxu1 }
 0x47a   :  { %v16657_v55 = vadd.f32 %v16656_v49, %v16655_v43  ;;  %7892 = vmatpush1.bf16.msra.mxu0 %v18358_v57  ;;  %v16658_v58 = vpop.f32.mrb[26].mxu1  ;;  %v18448_v49 = vld [vmem:[%s22313_s7 + $0x4e0] ss:$16 sps:$4 sm:$0xff]  }
 0x47b   :  { %7752 = vmatpush1.bf16.msra.mxu1 %v18361_v30  ;;  %v16659_v61 = vpop.f32.mrb[27].mxu1  ;;  %7893 = vmatprep.subr.bf16.mxu0 %v18366_v21  ;;  %v18391_v21 = vld [vmem:[%s22313_s7 + $0x368] ss:$16 sps:$4 sm:$0xff]  }
 0x47c   :  { %v21565_v3 = vadd.f32 %v16657_v55, %v6318_v51  ;;  %7753 = vmatprep.subr.bf16.mxu1 %v18369_v41  ;;  %v18396_v41 = vld [vmem:[%s22313_s7 + $0x38c] ss:$16 sps:$4 sm:$0xff]   ;;  %v18456_v55 = vld [vmem:[%s22313_s7 + $0x504] ss:$16 sps:$4 sm:$0xff]  }
 0x47d   :  { %v18399_v61 = vld [vmem:[%s22313_s7 + $0x3ac] ss:$16 sps:$4 sm:$0xff]  }
 0x47e   :  { %7894 = vmatpush1.bf16.msra.mxu0 %v18364_v60  ;;  %v18394_v60 = vld [vmem:[%s22313_s7 + $0x388] ss:$16 sps:$4 sm:$0xff]  }
 0x47f   :  { %7754 = vmatpush1.bf16.msra.mxu1 %v18367_v47  ;;  %7895 = vmatprep.subr.bf16.mxu0 %v18372_v4  ;;  %v18454_v47 = vld [vmem:[%s22313_s7 + $0x500] ss:$16 sps:$4 sm:$0xff]   ;;  %v18462_v4 = vld [vmem:[%s22313_s7 + $0x524] ss:$16 sps:$4 sm:$0xff]  }
 0x480   :  { %7764 = vmatprep.subr.bf16.mxu1 %v18408_v8 }
 0x482   :  { %7756 = vmatmul.mubr.bf16.vlgmr.msra.gmra.mrb[36].mxu1 %v21579_v18  ;;  %7896 = vmatpush1.bf16.msra.mxu0 %v18370_v9  ;;  %v18397_v9 = vld [vmem:[%s22313_s7 + $0x3a8] ss:$16 sps:$4 sm:$0xff]  }
 0x483   :  { %7897 = vmatprep.subr.bf16.mxu0 %v18375_v10  ;;  %7765 = vmatpush1.bf16.msra.mxu1 %v18406_v11  ;;  %v18402_v11 = vld [vmem:[%s22313_s7 + $0x3cc] ss:$16 sps:$4 sm:$0xff]  }
 0x484   :  { %7766 = vmatprep.subr.bf16.mxu1 %v18414_v25  ;;  %v18460_v25 = vld [vmem:[%s22313_s7 + $0x520] ss:$16 sps:$4 sm:$0xff]  }
 0x486   :  { %7898 = vmatpush1.bf16.msra.mxu0 %v18373_v37 }
 0x487   :  { %7899 = vmatprep.subr.bf16.mxu0 %v18378_v14  ;;  %7767 = vmatpush1.bf16.msra.mxu1 %v18412_v15  ;;  %v18468_v14 = vld [vmem:[%s22313_s7 + $0x544] ss:$16 sps:$4 sm:$0xff]   ;;  %v18400_v15 = vld [vmem:[%s22313_s7 + $0x3c8] ss:$16 sps:$4 sm:$0xff]  }
 0x488   :  { %7768 = vmatprep.subr.bf16.mxu1 %v18420_v54  ;;  %v18405_v54 = vld [vmem:[%s22313_s7 + $0x3ec] ss:$16 sps:$4 sm:$0xff]  }
 0x48a   :  { %7900 = vmatpush1.bf16.msra.mxu0 %v18376_v29  ;;  %v18466_v29 = vld [vmem:[%s22313_s7 + $0x540] ss:$16 sps:$4 sm:$0xff]  }
 0x48b   :  { %7901 = vmatprep.subr.bf16.mxu0 %v18381_v50  ;;  %7769 = vmatpush1.bf16.msra.mxu1 %v18418_v20  ;;  %v18474_v50 = vld [vmem:[%s22313_s7 + $0x564] ss:$16 sps:$4 sm:$0xff]   ;;  %v18403_v20 = vld [vmem:[%s22313_s7 + $0x3e8] ss:$16 sps:$4 sm:$0xff]  }
 0x48c   :  { %7770 = vmatprep.subr.bf16.mxu1 %v18426_v52  ;;  %v18411_v52 = vld [vmem:[%s22313_s7 + $0x40c] ss:$16 sps:$4 sm:$0xff]  }
 0x48e   :  { %7902 = vmatpush1.bf16.msra.mxu0 %v18379_v23  ;;  %v18472_v23 = vld [vmem:[%s22313_s7 + $0x560] ss:$16 sps:$4 sm:$0xff]  }
 0x48f   :  { %7903 = vmatprep.subr.bf16.mxu0 %v18384_v27  ;;  %7771 = vmatpush1.bf16.msra.mxu1 %v18424_v28  ;;  %v18480_v27 = vld [vmem:[%s22313_s7 + $0x584] ss:$16 sps:$4 sm:$0xff]   ;;  %v18409_v28 = vld [vmem:[%s22313_s7 + $0x408] ss:$16 sps:$4 sm:$0xff]  }
 0x490   :  { %7772 = vmatprep.subr.bf16.mxu1 %v18432_v31  ;;  %v18417_v31 = vld [vmem:[%s22313_s7 + $0x42c] ss:$16 sps:$4 sm:$0xff]  }
 0x492   :  { %7904 = vmatpush1.bf16.msra.mxu0 %v18382_v32  ;;  %v18478_v32 = vld [vmem:[%s22313_s7 + $0x580] ss:$16 sps:$4 sm:$0xff]  }
 0x493   :  { %7905 = vmatprep.subr.bf16.mxu0 %v18387_v34  ;;  %7773 = vmatpush1.bf16.msra.mxu1 %v18430_v39  ;;  %v18486_v34 = vld [vmem:[%s22313_s7 + $0x5a4] ss:$16 sps:$4 sm:$0xff]   ;;  %v18415_v39 = vld [vmem:[%s22313_s7 + $0x428] ss:$16 sps:$4 sm:$0xff]  }
 0x494   :  { %7774 = vmatprep.subr.bf16.mxu1 %v18438_v53  ;;  %v18423_v53 = vld [vmem:[%s22313_s7 + $0x44c] ss:$16 sps:$4 sm:$0xff]  }
 0x496   :  { %7906 = vmatpush1.bf16.msra.mxu0 %v18385_v42  ;;  %v18484_v42 = vld [vmem:[%s22313_s7 + $0x5a0] ss:$16 sps:$4 sm:$0xff]  }
 0x497   :  { %7907 = vmatprep.subr.bf16.mxu0 %v18390_v26  ;;  %7775 = vmatpush1.bf16.msra.mxu1 %v18436_v45  ;;  %v18421_v26 = vld [vmem:[%s22313_s7 + $0x448] ss:$16 sps:$4 sm:$0xff]   ;;  %v18429_v45 = vld [vmem:[%s22313_s7 + $0x46c] ss:$16 sps:$4 sm:$0xff]  }
 0x498   :  { %7776 = vmatprep.subr.bf16.mxu1 %v18444_v44  ;;  %v18490_v44 = vld [vmem:[%s22313_s7 + $0x5c0] ss:$16 sps:$4 sm:$0xff]  }
 0x499   :  { %v16677_v57 = vpop.f32.mrb[28].mxu1 }
 0x49a   :  { %v16678_v30 = vpop.f32.mrb[29].mxu1  ;;  %7908 = vmatpush1.bf16.msra.mxu0 %v18388_v17  ;;  %v18498_v17 = vld [vmem:[%s22313_s7 + $0x5e4] ss:$16 sps:$4 sm:$0xff]  }
 0x49b   :  { %v16679_v48 = vadd.f32 %v16678_v30, %v16677_v57  ;;  %v16680_v43 = vpop.f32.mrb[30].mxu1  ;;  %7909 = vmatprep.subr.bf16.mxu0 %v18393_v19  ;;  %7777 = vmatpush1.bf16.msra.mxu1 %v18442_v22  ;;  %v18427_v19 = vld [vmem:[%s22313_s7 + $0x468] ss:$16 sps:$4 sm:$0xff]   ;;  %v18435_v22 = vld [vmem:[%s22313_s7 + $0x48c] ss:$16 sps:$4 sm:$0xff]  }
 0x49c   :  { %v16681_v51 = vpop.f32.mrb[31].mxu1  ;;  %7778 = vmatprep.subr.bf16.mxu1 %v18450_v16  ;;  %v18496_v16 = vld [vmem:[%s22313_s7 + $0x5e0] ss:$16 sps:$4 sm:$0xff]   ;;  %v18504_v57 = vld [vmem:[%s22313_s7 + $0x604] ss:$16 sps:$4 sm:$0xff]  }
 0x49d   :  { %v6398_v58 = vadd.f32 %v16679_v48, %v21565_v3  ;;  %v18433_v30 = vld [vmem:[%s22313_s7 + $0x488] ss:$16 sps:$4 sm:$0xff]   ;;  %v18447_v43 = vld [vmem:[%s22313_s7 + $0x4cc] ss:$16 sps:$4 sm:$0xff]  }
 0x49e   :  { %7910 = vmatpush1.bf16.msra.mxu0 %v18391_v21  ;;  %v18441_v21 = vld [vmem:[%s22313_s7 + $0x4ac] ss:$16 sps:$4 sm:$0xff]   ;;  %v18439_v48 = vld [vmem:[%s22313_s7 + $0x4a8] ss:$16 sps:$4 sm:$0xff]  }
 0x49f   :  { %7911 = vmatprep.subr.bf16.mxu0 %v18396_v41  ;;  %7779 = vmatpush1.bf16.msra.mxu1 %v18448_v49  ;;  %v18445_v41 = vld [vmem:[%s22313_s7 + $0x4c8] ss:$16 sps:$4 sm:$0xff]   ;;  %v18453_v49 = vld [vmem:[%s22313_s7 + $0x4ec] ss:$16 sps:$4 sm:$0xff]  }
 0x4a0   :  { %7780 = vmatprep.subr.bf16.mxu1 %v18456_v55  ;;  %v18451_v51 = vld [vmem:[%s22313_s7 + $0x4e8] ss:$16 sps:$4 sm:$0xff]   ;;  %v18459_v55 = vld [vmem:[%s22313_s7 + $0x50c] ss:$16 sps:$4 sm:$0xff]  }
 0x4a1   :  { %v6437_v5 = vpop.f32.mrb[32].mxu1 }
 0x4a2   :  { %v21682_v3 = vadd.f32 %v6437_v5, %v6398_v58  ;;  %v16939_v8 = vpop.f32.mrb[33].mxu1  ;;  %7912 = vmatpush1.bf16.msra.mxu0 %v18394_v60  ;;  %v18457_v58 = vld [vmem:[%s22313_s7 + $0x508] ss:$16 sps:$4 sm:$0xff]   ;;  %v18465_v60 = vld [vmem:[%s22313_s7 + $0x52c] ss:$16 sps:$4 sm:$0xff]  }
 0x4a3   :  { %v6440_v10 = vpop.f32.mrb[34].mxu1  ;;  %7913 = vmatprep.subr.bf16.mxu0 %v18399_v61  ;;  %7781 = vmatpush1.bf16.msra.mxu1 %v18454_v47  ;;  %v18463_v61 = vld [vmem:[%s22313_s7 + $0x528] ss:$16 sps:$4 sm:$0xff]   ;;  %v18471_v47 = vld [vmem:[%s22313_s7 + $0x54c] ss:$16 sps:$4 sm:$0xff]  }
 0x4a4   :  { %v16940_v37 = vpop.f32.mrb[35].mxu1  ;;  %7782 = vmatprep.subr.bf16.mxu1 %v18462_v4  ;;  %v18469_v4 = vld [vmem:[%s22313_s7 + $0x548] ss:$16 sps:$4 sm:$0xff]   ;;  %v18477_v5 = vld [vmem:[%s22313_s7 + $0x56c] ss:$16 sps:$4 sm:$0xff]  }
 0x4a5   :  { %v18475_v8 = vld [vmem:[%s22313_s7 + $0x568] ss:$16 sps:$4 sm:$0xff]   ;;  %v18495_v37 = vld [vmem:[%s22313_s7 + $0x5cc] ss:$16 sps:$4 sm:$0xff]  }
 0x4a6   :  { %7914 = vmatpush1.bf16.msra.mxu0 %v18397_v9  ;;  %v18483_v9 = vld [vmem:[%s22313_s7 + $0x58c] ss:$16 sps:$4 sm:$0xff]   ;;  %v18481_v10 = vld [vmem:[%s22313_s7 + $0x588] ss:$16 sps:$4 sm:$0xff]  }
 0x4a7   :  { %7915 = vmatprep.subr.bf16.mxu0 %v18402_v11  ;;  %7783 = vmatpush1.bf16.msra.mxu1 %v18460_v25  ;;  %v18489_v11 = vld [vmem:[%s22313_s7 + $0x5ac] ss:$16 sps:$4 sm:$0xff]   ;;  %v18487_v25 = vld [vmem:[%s22313_s7 + $0x5a8] ss:$16 sps:$4 sm:$0xff]  }
 0x4a8   :  { %7784 = vmatprep.subr.bf16.mxu1 %v18468_v14  ;;  %v18493_v14 = vld [vmem:[%s22313_s7 + $0x5c8] ss:$16 sps:$4 sm:$0xff]  }
 0x4aa   :  { %7916 = vmatpush1.bf16.msra.mxu0 %v18400_v15  ;;  %v18501_v15 = vld [vmem:[%s22313_s7 + $0x5ec] ss:$16 sps:$4 sm:$0xff]  }
 0x4ab   :  { %7917 = vmatprep.subr.bf16.mxu0 %v18405_v54  ;;  %7785 = vmatpush1.bf16.msra.mxu1 %v18466_v29  ;;  %v18499_v54 = vld [vmem:[%s22313_s7 + $0x5e8] ss:$16 sps:$4 sm:$0xff]   ;;  %v18507_v29 = vld [vmem:[%s22313_s7 + $0x60c] ss:$16 sps:$4 sm:$0xff]  }
 0x4ac   :  { %7786 = vmatprep.subr.bf16.mxu1 %v18474_v50  ;;  %v3972_v50 = vrot.slane %v21335_v24, %v20272_v63 }
 0x4ae   :  { %7918 = vmatpush1.bf16.msra.mxu0 %v18403_v20  ;;  %v3976_v20 = vrot.slane %v21335_v24, %v20366_v2  ;;  %v18510_v24 = vld [vmem:[%s22313_s7 + $0x624] ss:$16 sps:$4 sm:$0xff]  }
 0x4af   :  { %7928 = vmatprep.subr.bf16.mxu0 %v18411_v52  ;;  %7787 = vmatpush1.bf16.msra.mxu1 %v18472_v23 }
 0x4b0   :  { %7788 = vmatprep.subr.bf16.mxu1 %v18480_v27 }
 0x4b1   :  { %7920 = vmatmul.mubr.bf16.vlgmr.msra.gmra.mrb[48].mxu0 %v21579_v18  ;;  %v18492_v18 = vld [vmem:[%s22313_s7 + $0x5c4] ss:$16 sps:$4 sm:$0xff]  }
 0x4b2   :  { %7929 = vmatpush1.bf16.msra.mxu0 %v18409_v28 }
 0x4b3   :  { %7930 = vmatprep.subr.bf16.mxu0 %v18417_v31  ;;  %7789 = vmatpush1.bf16.msra.mxu1 %v18478_v32 }
 0x4b4   :  { %7790 = vmatprep.subr.bf16.mxu1 %v18486_v34 }
 0x4b6   :  { %7931 = vmatpush1.bf16.msra.mxu0 %v18415_v39 }
 0x4b7   :  { %7932 = vmatprep.subr.bf16.mxu0 %v18423_v53  ;;  %7791 = vmatpush1.bf16.msra.mxu1 %v18484_v42  ;;  %v18502_v42 = vld [vmem:[%s22313_s7 + $0x600] ss:$16 sps:$4 sm:$0xff]  }
 0x4b8   :  { %7792 = vmatprep.subr.bf16.mxu1 %v18492_v18  ;;  %v18505_v18 = vld [vmem:[%s22313_s7 + $0x608] ss:$16 sps:$4 sm:$0xff]  }
 0x4ba   :  { %7933 = vmatpush1.bf16.msra.mxu0 %v18421_v26 }
 0x4bb   :  { %7934 = vmatprep.subr.bf16.mxu0 %v18429_v45  ;;  %7793 = vmatpush1.bf16.msra.mxu1 %v18490_v44  ;;  %v18513_v45 = vld [vmem:[%s22313_s7 + $0x62c] ss:$16 sps:$4 sm:$0xff]   ;;  %v18508_v44 = vld [vmem:[%s22313_s7 + $0x620] ss:$16 sps:$4 sm:$0xff]  }
 0x4bc   :  { %7794 = vmatprep.subr.bf16.mxu1 %v18498_v17  ;;  %v18511_v17 = vld [vmem:[%s22313_s7 + $0x628] ss:$16 sps:$4 sm:$0xff]  }
 0x4be   :  { %7935 = vmatpush1.bf16.msra.mxu0 %v18427_v19  ;;  %v18515_v19 = vld [vmem:[%s22315_s9 + $0x40] sm:$0xff]  }
 0x4bf   :  { %7936 = vmatprep.subr.bf16.mxu0 %v18435_v22  ;;  %7795 = vmatpush1.bf16.msra.mxu1 %v18496_v16  ;;  %v6449_v22 = vmax.f32 %v21682_v3, 0.0  ;;  %v18514_v16 = vld [vmem:[%s22315_s9 + $0x80] sm:$0xff]   ;;  %v18516_v3 = vld [vmem:[%s22315_s9 + $0x88] sm:$0xff]  }
 0x4c0   :  { %7805 = vmatprep.subr.bf16.mxu1 %v18504_v57  ;;  %v18517_v57 = vld [vmem:[%s22315_s9] sm:$0xff]  }
 0x4c2   :  { %7937 = vmatpush1.bf16.msra.mxu0 %v18433_v30  ;;  %v6456_v30 = vpack.c.bf16 %v6449_v22, %v6449_v22 }
 0x4c3   :  { %7938 = vmatprep.subr.bf16.mxu0 %v18441_v21  ;;  %v18518_v21 = vld [vmem:[%s22315_s9 + $0x48] sm:$0xff]  }
 0x4c6   :  { %7939 = vmatpush1.bf16.msra.mxu0 %v18439_v48  ;;  %v18520_v48 = vld [vmem:[%s22315_s9 + $0x8] sm:$0xff]  }
 0x4c7   :  { %7940 = vmatprep.subr.bf16.mxu0 %v18447_v43  ;;  %v18521_v43 = vld [vmem:[%s22315_s9 + $0x50] sm:$0xff]  }
 0x4ca   :  { %7941 = vmatpush1.bf16.msra.mxu0 %v18445_v41  ;;  %v18519_v41 = vld [vmem:[%s22315_s9 + $0x90] sm:$0xff]  }
 0x4cb   :  { %7942 = vmatprep.subr.bf16.mxu0 %v18453_v49  ;;  %v18523_v49 = vld [vmem:[%s22315_s9 + $0x10] sm:$0xff]  }
 0x4ce   :  { %7943 = vmatpush1.bf16.msra.mxu0 %v18451_v51  ;;  %v18524_v51 = vld [vmem:[%s22315_s9 + $0x58] sm:$0xff]  }
 0x4cf   :  { %7944 = vmatprep.subr.bf16.mxu0 %v18459_v55  ;;  %v18522_v55 = vld [vmem:[%s22315_s9 + $0x98] sm:$0xff]  }
 0x4d2   :  { %7945 = vmatpush1.bf16.msra.mxu0 %v18457_v58  ;;  %v18526_v58 = vld [vmem:[%s22315_s9 + $0x18] sm:$0xff]  }
 0x4d3   :  { %7946 = vmatprep.subr.bf16.mxu0 %v18465_v60  ;;  %v18527_v60 = vld [vmem:[%s22315_s9 + $0x60] sm:$0xff]  }
 0x4d6   :  { %7947 = vmatpush1.bf16.msra.mxu0 %v18463_v61  ;;  %v18525_v61 = vld [vmem:[%s22315_s9 + $0xa0] sm:$0xff]  }
 0x4d7   :  { %7948 = vmatprep.subr.bf16.mxu0 %v18471_v47  ;;  %v18529_v47 = vld [vmem:[%s22315_s9 + $0x20] sm:$0xff]  }
 0x4da   :  { %7949 = vmatpush1.bf16.msra.mxu0 %v18469_v4  ;;  %v18530_v4 = vld [vmem:[%s22315_s9 + $0x68] sm:$0xff]  }
 0x4db   :  { %7950 = vmatprep.subr.bf16.mxu0 %v18477_v5  ;;  %v18528_v5 = vld [vmem:[%s22315_s9 + $0xa8] sm:$0xff]  }
 0x4de   :  { %7951 = vmatpush1.bf16.msra.mxu0 %v18475_v8  ;;  %v18532_v8 = vld [vmem:[%s22315_s9 + $0x28] sm:$0xff]  }
 0x4df   :  { %7952 = vmatprep.subr.bf16.mxu0 %v18483_v9  ;;  %v18531_v9 = vld [vmem:[%s22315_s9 + $0xb0] sm:$0xff]  }
 0x4e2   :  { %7953 = vmatpush1.bf16.msra.mxu0 %v18481_v10  ;;  %v18533_v10 = vld [vmem:[%s22315_s9 + $0x70] sm:$0xff]  }
 0x4e3   :  { %7954 = vmatprep.subr.bf16.mxu0 %v18489_v11  ;;  %v18534_v11 = vld [vmem:[%s22315_s9 + $0xb8] sm:$0xff]  }
 0x4e6   :  { %7955 = vmatpush1.bf16.msra.mxu0 %v18487_v25  ;;  %v18535_v25 = vld [vmem:[%s22315_s9 + $0x30] sm:$0xff]  }
 0x4e7   :  { %7956 = vmatprep.subr.bf16.mxu0 %v18495_v37  ;;  %v18536_v37 = vld [vmem:[%s22315_s9 + $0x78] sm:$0xff]  }
 0x4ea   :  { %7957 = vmatpush1.bf16.msra.mxu0 %v18493_v14  ;;  %v18537_v14 = vld [vmem:[%s22315_s9 + $0xc0] sm:$0xff]  }
 0x4eb   :  { %7958 = vmatprep.subr.bf16.mxu0 %v18501_v15  ;;  %v18538_v15 = vld [vmem:[%s22315_s9 + $0x38] sm:$0xff]  }
 0x4ee   :  { %7959 = vmatpush1.bf16.msra.mxu0 %v18499_v54  ;;  %v18541_v54 = vld [vmem:[#allocation4 + $0xc] ss:$28 sps:$4 sm:$0xff]  }
 0x4ef   :  { %7969 = vmatprep.subr.bf16.mxu0 %v18507_v29  ;;  %v6657_v29 = vld [vmem:[%s22314_s8] sm:$0xf] }
 0x504   :  { %v6276_v52 = vpop.f32.mrb[44].mxu0 }
 0x505   :  { %v16981_v23 = vadd.f32 %v6276_v52, %v3972_v50  ;;  %v6278_v27 = vpop.f32.mrb[45].mxu0  ;;  %v6662_v50 = vrot.slane %v6657_v29, %v20134_v36  ;;  %v6666_v52 = vrot.slane %v6657_v29, %v20142_v38 }
 0x506   :  { %v16982_v28 = vadd.f32 %v6278_v27, %v3976_v20  ;;  %v6280_v31 = vpop.f32.mrb[46].mxu0  ;;  %v6670_v20 = vrot.slane %v6657_v29, %v20245_v40 }
 0x507   :  { %v6447_v32 = vmax.f32 %v16981_v23, 0.0  ;;  %v6281_v34 = vpop.f32.mrb[47].mxu0  ;;  %v6674_v23 = vrot.slane %v6657_v29, %v20149_v46  ;;  %v18572_v29 = vld [vmem:[#allocation4 + $0x270] ss:$28 sps:$4 sm:$0xff]  }
 0x508   :  { %v6448_v39 = vmax.f32 %v16982_v28, 0.0 }
 0x509   :  { %v6454_v26 = vpack.c.bf16 %v6447_v32, %v6447_v32 }
 0x50a   :  { %v6455_v53 = vpack.c.bf16 %v6448_v39, %v6448_v39 }
 0x50c   :  { %7796 = vmatprep.mubr.bf16.mxu1 %v6455_v53  ;;  %7960 = vmatprep.mubr.bf16.mxu0 %v6455_v53 }
 0x50d   :  { %7797 = vmatmul.mubr.bf16.vlgmr.msra.gmra.mrb[36].mxu1 %v6454_v26  ;;  %7961 = vmatmul.mubr.bf16.vlgmr.msra.gmra.mrb[48].mxu0 %v6454_v26 }
 0x50e   :  { %7806 = vmatpush1.bf16.msra.mxu1 %v18502_v42  ;;  %7970 = vmatpush1.bf16.msra.mxu0 %v18505_v18 }
 0x50f   :  { %7807 = vmatprep.subr.bf16.mxu1 %v18510_v24  ;;  %7971 = vmatprep.subr.bf16.mxu0 %v18513_v45 }
 0x510   :  { %7837 = vmatprep.mubr.bf16.mxu1 %v19670_v0  ;;  %8001 = vmatprep.mubr.bf16.mxu0 %v19670_v0 }
 0x512   :  { %7808 = vmatpush1.bf16.msra.mxu1 %v18508_v44  ;;  %7972 = vmatpush1.bf16.msra.mxu0 %v18511_v17 }
 0x513   :  { %8269 = vmatprep.subr.bf16.mxu0 %v19670_v0  ;;  %16686 = vmatprep.subr.bf16.mxu1 %v18515_v19 }
 0x519   :  { %15753 = vmatmul.mubr.msk.bf16.vlgmr.msra.gmra.mrb[36].mxu1 %vm335_vm0, %v6456_v30  ;;  %15754 = vmatmul.mubr.msk.bf16.vlgmr.msra.gmra.mrb[48].mxu0 %vm335_vm0, %v6456_v30  ;;  %v18539_v30 = vld [vmem:[#allocation4 + $0x8] ss:$28 sps:$4 sm:$0xff]  }
 0x51a   :  { %8270 = vmatpush1.bf16.msra.mxu0 %v18514_v16  ;;  %16687 = vmatpush3.bf16.msra.mxu1 %v18517_v57 }
 0x51b   :  { %8271 = vmatprep.subr.bf16.mxu0 %v19670_v0  ;;  %16688 = vmatprep.subr.bf16.mxu1 %v18518_v21 }
 0x51e   :  { %8272 = vmatpush1.bf16.msra.mxu0 %v18516_v3  ;;  %16689 = vmatpush3.bf16.msra.mxu1 %v18520_v48  ;;  %v18544_v48 = vld [vmem:[#allocation4 + $0x44] ss:$28 sps:$4 sm:$0xff]  }
 0x51f   :  { %8273 = vmatprep.subr.bf16.mxu0 %v19670_v0  ;;  %16690 = vmatprep.subr.bf16.mxu1 %v18521_v43  ;;  %v21964_v43 = vsel %vm8833_vm2, %v20645_v62, %v20658_v6  ;;  %v18553_v6 = vld [vmem:[#allocation4 + $0xec] ss:$28 sps:$4 sm:$0xff]  }
 0x522   :  { %8274 = vmatpush1.bf16.msra.mxu0 %v18519_v41  ;;  %16691 = vmatpush3.bf16.msra.mxu1 %v18523_v49  ;;  %v18542_v41 = vld [vmem:[#allocation4 + $0x40] ss:$28 sps:$4 sm:$0xff]  }
 0x523   :  { %8275 = vmatprep.subr.bf16.mxu0 %v19670_v0  ;;  %16692 = vmatprep.subr.bf16.mxu1 %v18524_v51  ;;  %v18547_v49 = vld [vmem:[#allocation4 + $0x7c] ss:$28 sps:$4 sm:$0xff]  }
 0x524   :  { %v18545_v51 = vld [vmem:[#allocation4 + $0x78] ss:$28 sps:$4 sm:$0xff]  }
 0x526   :  { %8276 = vmatpush1.bf16.msra.mxu0 %v18522_v55  ;;  %16693 = vmatpush3.bf16.msra.mxu1 %v18526_v58  ;;  %v18550_v55 = vld [vmem:[#allocation4 + $0xb4] ss:$28 sps:$4 sm:$0xff]  }
 0x527   :  { %8277 = vmatprep.subr.bf16.mxu0 %v19670_v0  ;;  %16694 = vmatprep.subr.bf16.mxu1 %v18527_v60  ;;  %v18548_v58 = vld [vmem:[#allocation4 + $0xb0] ss:$28 sps:$4 sm:$0xff]   ;;  %v18551_v60 = vld [vmem:[#allocation4 + $0xe8] ss:$28 sps:$4 sm:$0xff]  }
 0x52a   :  { %8278 = vmatpush1.bf16.msra.mxu0 %v18525_v61  ;;  %16695 = vmatpush3.bf16.msra.mxu1 %v18529_v47  ;;  %v18556_v61 = vld [vmem:[#allocation4 + $0x124] ss:$28 sps:$4 sm:$0xff]  }
 0x52b   :  { %8279 = vmatprep.subr.bf16.mxu0 %v19670_v0  ;;  %16696 = vmatprep.subr.bf16.mxu1 %v18530_v4  ;;  %v18554_v47 = vld [vmem:[#allocation4 + $0x120] ss:$28 sps:$4 sm:$0xff]  }
 0x52c   :  { %v18559_v4 = vld [vmem:[#allocation4 + $0x15c] ss:$28 sps:$4 sm:$0xff]  }
 0x52e   :  { %8280 = vmatpush1.bf16.msra.mxu0 %v18528_v5  ;;  %16697 = vmatpush3.bf16.msra.mxu1 %v18532_v8  ;;  %v18557_v5 = vld [vmem:[#allocation4 + $0x158] ss:$28 sps:$4 sm:$0xff]  }
 0x52f   :  { %8281 = vmatprep.subr.bf16.mxu0 %v19670_v0  ;;  %16698 = vmatprep.subr.bf16.mxu1 %v18533_v10  ;;  %v18562_v8 = vld [vmem:[#allocation4 + $0x194] ss:$28 sps:$4 sm:$0xff]   ;;  %v18565_v10 = vld [vmem:[#allocation4 + $0x1cc] ss:$28 sps:$4 sm:$0xff]  }
 0x532   :  { %8282 = vmatpush1.bf16.msra.mxu0 %v18531_v9  ;;  %16699 = vmatpush3.bf16.msra.mxu1 %v18535_v25  ;;  %v18560_v9 = vld [vmem:[#allocation4 + $0x190] ss:$28 sps:$4 sm:$0xff]   ;;  %v18568_v25 = vld [vmem:[#allocation4 + $0x204] ss:$28 sps:$4 sm:$0xff]  }
 0x533   :  { %8283 = vmatprep.subr.bf16.mxu0 %v19670_v0  ;;  %16700 = vmatprep.subr.bf16.mxu1 %v18536_v37  ;;  %v18566_v37 = vld [vmem:[#allocation4 + $0x200] ss:$28 sps:$4 sm:$0xff]  }
 0x536   :  { %8284 = vmatpush1.bf16.msra.mxu0 %v18534_v11  ;;  %16701 = vmatpush3.bf16.msra.mxu1 %v18538_v15  ;;  %v18563_v11 = vld [vmem:[#allocation4 + $0x1c8] ss:$28 sps:$4 sm:$0xff]   ;;  %v18569_v15 = vld [vmem:[#allocation4 + $0x238] ss:$28 sps:$4 sm:$0xff]  }
 0x537   :  { %8285 = vmatprep.subr.bf16.mxu0 %v19670_v0  ;;  %16941 = vmatprep.subr.bf16.mxu1 %v19671_v33 }
 0x53a   :  { %8286 = vmatpush1.bf16.msra.mxu0 %v18537_v14  ;;  %v18571_v14 = vld [vmem:[#allocation4 + $0x23c] ss:$28 sps:$4 sm:$0xff]  }
 0x53b   :  { %10813 = vmatprep.subr.bf16.mxu0 %v18541_v54  ;;  %v18574_v54 = vld [vmem:[#allocation4 + $0x274] ss:$28 sps:$4 sm:$0xff]  }
 0x5ec   :  { %v7839_v27 = vpop.f32.mrb[36].mxu1  ;;  %v8003_v28 = vpop.f32.mrb[48].mxu0 }
 0x5ed   :  { %v16983_v31 = vadd.f32 %v7839_v27, %v6662_v50  ;;  %v16985_v32 = vadd.f32 %v8003_v28, %v6670_v20  ;;  %v7841_v34 = vpop.f32.mrb[37].mxu1  ;;  %v8005_v39 = vpop.f32.mrb[49].mxu0  ;;  %v18577_v50 = vld [vmem:[#allocation4 + $0x2ac] ss:$28 sps:$4 sm:$0xff]   ;;  %v18583_v27 = vld [vmem:[#allocation4 + $0x31c] ss:$28 sps:$4 sm:$0xff]  }
 0x5ee   :  { %v16984_v53 = vadd.f32 %v7841_v34, %v6666_v52  ;;  %v16986_v42 = vadd.f32 %v8005_v39, %v6674_v23  ;;  %v7843_v18 = vpop.f32.mrb[38].mxu1  ;;  %v8007_v26 = vpop.f32.mrb[50].mxu0  ;;  %v18575_v20 = vld [vmem:[#allocation4 + $0x2a8] ss:$28 sps:$4 sm:$0xff]   ;;  %v18578_v23 = vld [vmem:[#allocation4 + $0x2e0] ss:$28 sps:$4 sm:$0xff]  }
 0x5ef   :  { %v8010_v24 = vmax.f32 %v16983_v31, 0.0  ;;  %v8012_v45 = vmax.f32 %v16985_v32, 0.0  ;;  %v7844_v44 = vpop.f32.mrb[39].mxu1  ;;  %v8008_v17 = vpop.f32.mrb[51].mxu0  ;;  %v18580_v52 = vld [vmem:[#allocation4 + $0x2e4] ss:$28 sps:$4 sm:$0xff]   ;;  %v21977_v18 = vsel %vm8833_vm2, %v20660_v35, %v20686_v59 }
 0x5f0   :  { %v8011_v19 = vmax.f32 %v16984_v53, 0.0  ;;  %v8013_v22 = vmax.f32 %v16986_v42, 0.0  ;;  %v18581_v28 = vld [vmem:[#allocation4 + $0x318] ss:$28 sps:$4 sm:$0xff]   ;;  %v18584_v32 = vld [vmem:[#allocation4 + $0x350] ss:$28 sps:$4 sm:$0xff]   ;;  %v21972_v42 = vsel %vm8833_vm2, %v20647_v1, %v20645_v62 }
 0x5f1   :  { %v8014_v21 = vpack.c.bf16 %v8010_v24, %v8010_v24  ;;  %v8016_v3 = vpack.c.bf16 %v8012_v45, %v8012_v45  ;;  %v18586_v31 = vld [vmem:[#allocation4 + $0x354] ss:$28 sps:$4 sm:$0xff]   ;;  %v18589_v34 = vld [vmem:[#allocation4 + $0x38c] ss:$28 sps:$4 sm:$0xff]   ;;  %v18592_v53 = vld [vmem:[#allocation4 + $0x3c4] ss:$28 sps:$4 sm:$0xff]  }
 0x5f2   :  { %v8015_v16 = vpack.c.bf16 %v8011_v19, %v8011_v19  ;;  %v8017_v57 = vpack.c.bf16 %v8013_v22, %v8013_v22  ;;  %v18587_v39 = vld [vmem:[#allocation4 + $0x388] ss:$28 sps:$4 sm:$0xff]   ;;  %v18590_v26 = vld [vmem:[#allocation4 + $0x3c0] ss:$28 sps:$4 sm:$0xff]   ;;  %v18593_v45 = vld [vmem:[#allocation4 + $0x3f8] ss:$28 sps:$4 sm:$0xff]  }
 0x5f3   :  { %v18595_v24 = vld [vmem:[#allocation4 + $0x3fc] ss:$28 sps:$4 sm:$0xff]   ;;  %v18598_v44 = vld [vmem:[#allocation4 + $0x434] ss:$28 sps:$4 sm:$0xff]   ;;  %v18601_v1 = vld [vmem:[#allocation4 + $0x46c] ss:$28 sps:$4 sm:$0xff]  }
 0x5f4   :  { %8261 = vmatprep.mubr.bf16.mxu1 %v8015_v16  ;;  %15781 = vmatprep.mubr.msk.bf16.mxu0 %vm8225_vm3, %v8017_v57  ;;  %v18596_v62 = vld [vmem:[#allocation4 + $0x430] ss:$28 sps:$4 sm:$0xff]   ;;  %v18599_v17 = vld [vmem:[#allocation4 + $0x468] ss:$28 sps:$4 sm:$0xff]   ;;  %v18602_v59 = vld [vmem:[#allocation4 + $0x4a0] ss:$28 sps:$4 sm:$0xff]  }
 0x5f5   :  { %8262 = vmatmul.mubr.bf16.vlgmr.msra.gmra.mrb[40].mxu1 %v8014_v21  ;;  %8302 = vmatmul.mubr.bf16.vlgmr.msra.gmra.mrb[52].mxu0 %v8016_v3  ;;  %v18604_v35 = vld [vmem:[#allocation4 + $0x4a4] ss:$28 sps:$4 sm:$0xff]   ;;  %v18607_v19 = vld [vmem:[#allocation4 + $0x4dc] ss:$28 sps:$4 sm:$0xff]   ;;  %v18610_v16 = vld [vmem:[#allocation4 + $0x514] ss:$28 sps:$4 sm:$0xff]  }
 0x5f6   :  { %10814 = vmatpush1.bf16.msra.mxu0 %v18539_v30  ;;  %10845 = vmatprep.mubr.bf16.mxu0 %v21964_v43  ;;  %v18605_v22 = vld [vmem:[#allocation4 + $0x4d8] ss:$28 sps:$4 sm:$0xff]   ;;  %v18608_v57 = vld [vmem:[#allocation4 + $0x510] ss:$28 sps:$4 sm:$0xff]   ;;  %v18611_v3 = vld [vmem:[#allocation4 + $0x548] ss:$28 sps:$4 sm:$0xff]  }
 0x5f7   :  { %10815 = vmatprep.subr.bf16.mxu0 %v18544_v48  ;;  %16943 = vmatprep.mubr.msk.bf16.mxu1 %vm19672_vm1, %v19671_v33  ;;  %v18613_v30 = vld [vmem:[#allocation4 + $0x54c] ss:$28 sps:$4 sm:$0xff]   ;;  %v18697_v21 = vld [vmem:[%s22317_s11] sm:$0xff]   ;;  %v18702_v48 = vld [vmem:[#allocation4 + $0x4] ss:$28 sps:$4 sm:$0xff]  }
 0x5f8   :  { %16942 = vmatpush3.bf16.msra.mxu1 %v18697_v21  ;;  %v18680_v21 = vld [vmem:[#allocation4 + $0xa50] ss:$28 sps:$4 sm:$0xff]  }
 0x5f9   :  { %10649 = vmatprep.subr.bf16.mxu1 %v18702_v48  ;;  %v18683_v48 = vld [vmem:[#allocation4 + $0xa88] ss:$28 sps:$4 sm:$0xff]  }
 0x5fa   :  { %10816 = vmatpush1.bf16.msra.mxu0 %v18542_v41  ;;  %v18616_v41 = vld [vmem:[#allocation4 + $0x584] ss:$28 sps:$4 sm:$0xff]  }
 0x5fb   :  { %10817 = vmatprep.subr.bf16.mxu0 %v18547_v49  ;;  %v18614_v49 = vld [vmem:[#allocation4 + $0x580] ss:$28 sps:$4 sm:$0xff]  }
 0x5fe   :  { %10818 = vmatpush1.bf16.msra.mxu0 %v18545_v51  ;;  %v18619_v51 = vld [vmem:[#allocation4 + $0x5bc] ss:$28 sps:$4 sm:$0xff]  }
 0x5ff   :  { %10819 = vmatprep.subr.bf16.mxu0 %v18550_v55  ;;  %v18617_v55 = vld [vmem:[#allocation4 + $0x5b8] ss:$28 sps:$4 sm:$0xff]  }
 0x602   :  { %10820 = vmatpush1.bf16.msra.mxu0 %v18548_v58  ;;  %v18622_v58 = vld [vmem:[#allocation4 + $0x5f4] ss:$28 sps:$4 sm:$0xff]  }
 0x603   :  { %10821 = vmatprep.subr.bf16.mxu0 %v18553_v6  ;;  %v18620_v6 = vld [vmem:[#allocation4 + $0x5f0] ss:$28 sps:$4 sm:$0xff]  }
 0x606   :  { %10822 = vmatpush1.bf16.msra.mxu0 %v18551_v60  ;;  %v18625_v60 = vld [vmem:[#allocation4 + $0x62c] ss:$28 sps:$4 sm:$0xff]  }
 0x607   :  { %10823 = vmatprep.subr.bf16.mxu0 %v18556_v61  ;;  %v18623_v61 = vld [vmem:[#allocation4 + $0x628] ss:$28 sps:$4 sm:$0xff]  }
 0x60a   :  { %10824 = vmatpush1.bf16.msra.mxu0 %v18554_v47  ;;  %v18628_v47 = vld [vmem:[#allocation4 + $0x664] ss:$28 sps:$4 sm:$0xff]  }
 0x60b   :  { %10825 = vmatprep.subr.bf16.mxu0 %v18559_v4  ;;  %v18626_v4 = vld [vmem:[#allocation4 + $0x660] ss:$28 sps:$4 sm:$0xff]  }
 0x60e   :  { %10826 = vmatpush1.bf16.msra.mxu0 %v18557_v5  ;;  %v18631_v5 = vld [vmem:[#allocation4 + $0x69c] ss:$28 sps:$4 sm:$0xff]  }
 0x60f   :  { %10827 = vmatprep.subr.bf16.mxu0 %v18562_v8  ;;  %v18629_v8 = vld [vmem:[#allocation4 + $0x698] ss:$28 sps:$4 sm:$0xff]  }
 0x612   :  { %10828 = vmatpush1.bf16.msra.mxu0 %v18560_v9  ;;  %v18634_v9 = vld [vmem:[#allocation4 + $0x6d4] ss:$28 sps:$4 sm:$0xff]  }
 0x613   :  { %10829 = vmatprep.subr.bf16.mxu0 %v18565_v10  ;;  %v18632_v10 = vld [vmem:[#allocation4 + $0x6d0] ss:$28 sps:$4 sm:$0xff]  }
 0x616   :  { %10830 = vmatpush1.bf16.msra.mxu0 %v18563_v11  ;;  %v18637_v11 = vld [vmem:[#allocation4 + $0x70c] ss:$28 sps:$4 sm:$0xff]  }
 0x617   :  { %10831 = vmatprep.subr.bf16.mxu0 %v18568_v25  ;;  %v21984_v25 = vpop.permute.xlu0 %8831 }
 0x61a   :  { %10832 = vmatpush1.bf16.msra.mxu0 %v18566_v37  ;;  %v18635_v37 = vld [vmem:[#allocation4 + $0x708] ss:$28 sps:$4 sm:$0xff]  }
 0x61b   :  { %10833 = vmatprep.subr.bf16.mxu0 %v18571_v14  ;;  %v18640_v14 = vld [vmem:[#allocation4 + $0x744] ss:$28 sps:$4 sm:$0xff]  }
 0x61e   :  { %10834 = vmatpush1.bf16.msra.mxu0 %v18569_v15  ;;  %v21990_v15 = vsel %vm8833_vm2, %v20688_v12, %v21984_v25  ;;  %v18650_v12 = vld [vmem:[#allocation4 + $0x820] ss:$28 sps:$4 sm:$0xff]  }
 0x61f   :  { %10835 = vmatprep.subr.bf16.mxu0 %v18574_v54  ;;  %v18638_v54 = vld [vmem:[#allocation4 + $0x740] ss:$28 sps:$4 sm:$0xff]  }
 0x622   :  { %10836 = vmatpush1.bf16.msra.mxu0 %v18572_v29  ;;  %v18643_v29 = vld [vmem:[#allocation4 + $0x77c] ss:$28 sps:$4 sm:$0xff]  }
 0x623   :  { %10837 = vmatprep.subr.bf16.mxu0 %v18577_v50  ;;  %v18641_v50 = vld [vmem:[#allocation4 + $0x778] ss:$28 sps:$4 sm:$0xff]  }
 0x626   :  { %10838 = vmatpush1.bf16.msra.mxu0 %v18575_v20  ;;  %v18646_v20 = vld [vmem:[#allocation4 + $0x7b4] ss:$28 sps:$4 sm:$0xff]  }
 0x627   :  { %10839 = vmatprep.subr.bf16.mxu0 %v18580_v52  ;;  %v18644_v52 = vld [vmem:[#allocation4 + $0x7b0] ss:$28 sps:$4 sm:$0xff]  }
 0x62a   :  { %10840 = vmatpush1.bf16.msra.mxu0 %v18578_v23  ;;  %v18649_v23 = vld [vmem:[#allocation4 + $0x7ec] ss:$28 sps:$4 sm:$0xff]  }
 0x62b   :  { %10841 = vmatprep.subr.bf16.mxu0 %v18583_v27  ;;  %v18647_v27 = vld [vmem:[#allocation4 + $0x7e8] ss:$28 sps:$4 sm:$0xff]  }
 0x62e   :  { %10842 = vmatpush1.bf16.msra.mxu0 %v18581_v28  ;;  %v18652_v28 = vld [vmem:[#allocation4 + $0x824] ss:$28 sps:$4 sm:$0xff]  }
 0x62f   :  { %10843 = vmatprep.subr.bf16.mxu0 %v18586_v31  ;;  %v18655_v31 = vld [vmem:[#allocation4 + $0x85c] ss:$28 sps:$4 sm:$0xff]  }
 0x632   :  { %10844 = vmatpush1.bf16.msra.mxu0 %v18584_v32  ;;  %v18653_v32 = vld [vmem:[#allocation4 + $0x858] ss:$28 sps:$4 sm:$0xff]  }
 0x633   :  { %10854 = vmatprep.subr.bf16.mxu0 %v18589_v34  ;;  %v18658_v34 = vld [vmem:[#allocation4 + $0x894] ss:$28 sps:$4 sm:$0xff]  }
 0x635   :  { %10846 = vmatmul.mubr.bf16.vlgmr.msra.gmra.mrb[56].mxu0 %v21972_v42 }
 0x636   :  { %10855 = vmatpush1.bf16.msra.mxu0 %v18587_v39  ;;  %10886 = vmatprep.mubr.bf16.mxu0 %v21977_v18  ;;  %v18656_v39 = vld [vmem:[#allocation4 + $0x890] ss:$28 sps:$4 sm:$0xff]  }
 0x637   :  { %10856 = vmatprep.subr.bf16.mxu0 %v18592_v53  ;;  %v18661_v53 = vld [vmem:[#allocation4 + $0x8cc] ss:$28 sps:$4 sm:$0xff]  }
 0x63a   :  { %10857 = vmatpush1.bf16.msra.mxu0 %v18590_v26  ;;  %v18659_v26 = vld [vmem:[#allocation4 + $0x8c8] ss:$28 sps:$4 sm:$0xff]  }
 0x63b   :  { %10858 = vmatprep.subr.bf16.mxu0 %v18595_v24  ;;  %v18664_v24 = vld [vmem:[#allocation4 + $0x904] ss:$28 sps:$4 sm:$0xff]  }
 0x63e   :  { %10859 = vmatpush1.bf16.msra.mxu0 %v18593_v45  ;;  %v18662_v45 = vld [vmem:[#allocation4 + $0x900] ss:$28 sps:$4 sm:$0xff]  }
 0x63f   :  { %10860 = vmatprep.subr.bf16.mxu0 %v18598_v44  ;;  %v18667_v44 = vld [vmem:[#allocation4 + $0x93c] ss:$28 sps:$4 sm:$0xff]  }
 0x642   :  { %10861 = vmatpush1.bf16.msra.mxu0 %v18596_v62  ;;  %v18665_v62 = vld [vmem:[#allocation4 + $0x938] ss:$28 sps:$4 sm:$0xff]  }
 0x643   :  { %10862 = vmatprep.subr.bf16.mxu0 %v18601_v1  ;;  %v18670_v1 = vld [vmem:[#allocation4 + $0x974] ss:$28 sps:$4 sm:$0xff]  }
 0x646   :  { %10863 = vmatpush1.bf16.msra.mxu0 %v18599_v17  ;;  %v18668_v17 = vld [vmem:[#allocation4 + $0x970] ss:$28 sps:$4 sm:$0xff]  }
 0x647   :  { %10864 = vmatprep.subr.bf16.mxu0 %v18604_v35  ;;  %v18673_v35 = vld [vmem:[#allocation4 + $0x9ac] ss:$28 sps:$4 sm:$0xff]  }
 0x64a   :  { %10865 = vmatpush1.bf16.msra.mxu0 %v18602_v59  ;;  %v18671_v59 = vld [vmem:[#allocation4 + $0x9a8] ss:$28 sps:$4 sm:$0xff]  }
 0x64b   :  { %10866 = vmatprep.subr.bf16.mxu0 %v18607_v19  ;;  %v18676_v19 = vld [vmem:[#allocation4 + $0x9e4] ss:$28 sps:$4 sm:$0xff]  }
 0x64e   :  { %10867 = vmatpush1.bf16.msra.mxu0 %v18605_v22  ;;  %v18674_v22 = vld [vmem:[#allocation4 + $0x9e0] ss:$28 sps:$4 sm:$0xff]  }
 0x64f   :  { %10868 = vmatprep.subr.bf16.mxu0 %v18610_v16  ;;  %v18679_v16 = vld [vmem:[#allocation4 + $0xa1c] ss:$28 sps:$4 sm:$0xff]  }
 0x652   :  { %10869 = vmatpush1.bf16.msra.mxu0 %v18608_v57  ;;  %v18677_v57 = vld [vmem:[#allocation4 + $0xa18] ss:$28 sps:$4 sm:$0xff]  }
 0x653   :  { %10870 = vmatprep.subr.bf16.mxu0 %v18613_v30  ;;  %v18682_v30 = vld [vmem:[#allocation4 + $0xa54] ss:$28 sps:$4 sm:$0xff]  }
 0x656   :  { %10871 = vmatpush1.bf16.msra.mxu0 %v18611_v3  ;;  %v18685_v3 = vld [vmem:[#allocation4 + $0xa8c] ss:$28 sps:$4 sm:$0xff]  }
 0x657   :  { %10872 = vmatprep.subr.bf16.mxu0 %v18616_v41  ;;  %v18688_v41 = vld [vmem:[#allocation4 + $0xac4] ss:$28 sps:$4 sm:$0xff]  }
 0x65a   :  { %10873 = vmatpush1.bf16.msra.mxu0 %v18614_v49  ;;  %v18686_v49 = vld [vmem:[#allocation4 + $0xac0] ss:$28 sps:$4 sm:$0xff]  }
 0x65b   :  { %10874 = vmatprep.subr.bf16.mxu0 %v18619_v51  ;;  %v18689_v51 = vld [vmem:[#allocation4 + $0x1d8] ss:$28 sps:$4 sm:$0xff]  }
 0x65e   :  { %10875 = vmatpush1.bf16.msra.mxu0 %v18617_v55  ;;  %v18690_v55 = vld [vmem:[#allocation4 + $0x18] ss:$28 sps:$4 sm:$0xff]  }
 0x65f   :  { %10876 = vmatprep.subr.bf16.mxu0 %v18622_v58  ;;  %v18691_v58 = vld [vmem:[#allocation4 + $0x210] ss:$28 sps:$4 sm:$0xff]  }
 0x662   :  { %10877 = vmatpush1.bf16.msra.mxu0 %v18620_v6  ;;  %v18692_v6 = vld [vmem:[#allocation4 + $0x50] ss:$28 sps:$4 sm:$0xff]  }
 0x663   :  { %10878 = vmatprep.subr.bf16.mxu0 %v18625_v60  ;;  %v18693_v60 = vld [vmem:[#allocation4 + $0x248] ss:$28 sps:$4 sm:$0xff]  }
 0x666   :  { %10879 = vmatpush1.bf16.msra.mxu0 %v18623_v61  ;;  %v18694_v61 = vld [vmem:[#allocation4 + $0x88] ss:$28 sps:$4 sm:$0xff]  }
 0x667   :  { %10880 = vmatprep.subr.bf16.mxu0 %v18628_v47  ;;  %v18695_v47 = vld [vmem:[#allocation4 + $0x280] ss:$28 sps:$4 sm:$0xff]  }
 0x66a   :  { %10881 = vmatpush1.bf16.msra.mxu0 %v18626_v4 }
 0x66b   :  { %10882 = vmatprep.subr.bf16.mxu0 %v18631_v5 }
 0x66e   :  { %10883 = vmatpush1.bf16.msra.mxu0 %v18629_v8  ;;  %v15755_v8 = vld [vmem:[%s22316_s10] ss:$0 sm:$0xff] }
 0x66f   :  { %10884 = vmatprep.subr.bf16.mxu0 %v18634_v9 }
 0x672   :  { %10885 = vmatpush1.bf16.msra.mxu0 %v18632_v10 }
 0x673   :  { %10895 = vmatprep.subr.bf16.mxu0 %v18637_v11 }
 0x675   :  { %10887 = vmatmul.mubr.bf16.vlgmr.msra.gmra.mrb[56].mxu0 %v20665_v7 }
 0x676   :  { %10896 = vmatpush1.bf16.msra.mxu0 %v18635_v37  ;;  %10927 = vmatprep.mubr.bf16.mxu0 %v21990_v15 }
 0x677   :  { %10897 = vmatprep.subr.bf16.mxu0 %v18640_v14 }
 0x67a   :  { %10898 = vmatpush1.bf16.msra.mxu0 %v18638_v54  ;;  %v18696_v54 = vld [vmem:[#allocation4 + $0xc0] ss:$28 sps:$4 sm:$0xff]  }
 0x67b   :  { %10899 = vmatprep.subr.bf16.mxu0 %v18643_v29 }
 0x67e   :  { %10900 = vmatpush1.bf16.msra.mxu0 %v18641_v50 }
 0x67f   :  { %10901 = vmatprep.subr.bf16.mxu0 %v18646_v20  ;;  %v18698_v20 = vld [vmem:[#allocation4 + $0x2b8] ss:$28 sps:$4 sm:$0xff]  }
 0x682   :  { %10902 = vmatpush1.bf16.msra.mxu0 %v18644_v52 }
 0x683   :  { %10903 = vmatprep.subr.bf16.mxu0 %v18649_v23 }
 0x686   :  { %10904 = vmatpush1.bf16.msra.mxu0 %v18647_v27  ;;  %v18699_v27 = vld [vmem:[#allocation4 + $0xf8] ss:$28 sps:$4 sm:$0xff]  }
 0x687   :  { %10905 = vmatprep.subr.bf16.mxu0 %v18652_v28  ;;  %v18703_v28 = vld [vmem:[#allocation4 + $0x2f0] ss:$28 sps:$4 sm:$0xff]  }
 0x68a   :  { %10906 = vmatpush1.bf16.msra.mxu0 %v18650_v12 }
 0x68b   :  { %10907 = vmatprep.subr.bf16.mxu0 %v18655_v31  ;;  %v18700_v31 = vld [vmem:[#allocation4] ss:$28 sps:$4 sm:$0xff]  }
 0x68e   :  { %10908 = vmatpush1.bf16.msra.mxu0 %v18653_v32 }
 0x68f   :  { %10909 = vmatprep.subr.bf16.mxu0 %v18658_v34  ;;  %v18704_v34 = vld [vmem:[#allocation4 + $0x130] ss:$28 sps:$4 sm:$0xff]  }
 0x692   :  { %10910 = vmatpush1.bf16.msra.mxu0 %v18656_v39  ;;  %v18707_v39 = vld [vmem:[#allocation4 + $0x3c] ss:$28 sps:$4 sm:$0xff]  }
 0x693   :  { %10911 = vmatprep.subr.bf16.mxu0 %v18661_v53  ;;  %v18708_v53 = vld [vmem:[#allocation4 + $0x328] ss:$28 sps:$4 sm:$0xff]  }
 0x696   :  { %10912 = vmatpush1.bf16.msra.mxu0 %v18659_v26  ;;  %v18705_v26 = vld [vmem:[#allocation4 + $0x38] ss:$28 sps:$4 sm:$0xff]  }
 0x697   :  { %10913 = vmatprep.subr.bf16.mxu0 %v18664_v24  ;;  %v18709_v24 = vld [vmem:[#allocation4 + $0x168] ss:$28 sps:$4 sm:$0xff]  }
 0x69a   :  { %10914 = vmatpush1.bf16.msra.mxu0 %v18662_v45  ;;  %v18712_v45 = vld [vmem:[#allocation4 + $0x74] ss:$28 sps:$4 sm:$0xff]  }
 0x69b   :  { %10915 = vmatprep.subr.bf16.mxu0 %v18667_v44  ;;  %v18713_v44 = vld [vmem:[#allocation4 + $0x360] ss:$28 sps:$4 sm:$0xff]  }
 0x69e   :  { %10916 = vmatpush1.bf16.msra.mxu0 %v18665_v62  ;;  %v18710_v62 = vld [vmem:[#allocation4 + $0x70] ss:$28 sps:$4 sm:$0xff]  }
 0x69f   :  { %10917 = vmatprep.subr.bf16.mxu0 %v18670_v1  ;;  %v18714_v1 = vld [vmem:[#allocation4 + $0x1a0] ss:$28 sps:$4 sm:$0xff]  }
 0x6a2   :  { %10918 = vmatpush1.bf16.msra.mxu0 %v18668_v17  ;;  %v18717_v17 = vld [vmem:[#allocation4 + $0xac] ss:$28 sps:$4 sm:$0xff]  }
 0x6a3   :  { %10919 = vmatprep.subr.bf16.mxu0 %v18673_v35  ;;  %v18718_v35 = vld [vmem:[#allocation4 + $0x558] ss:$28 sps:$4 sm:$0xff]  }
 0x6a6   :  { %10920 = vmatpush1.bf16.msra.mxu0 %v18671_v59  ;;  %v18715_v59 = vld [vmem:[#allocation4 + $0xa8] ss:$28 sps:$4 sm:$0xff]  }
 0x6a7   :  { %10921 = vmatprep.subr.bf16.mxu0 %v18676_v19  ;;  %v18719_v19 = vld [vmem:[#allocation4 + $0x398] ss:$28 sps:$4 sm:$0xff]  }
 0x6aa   :  { %10922 = vmatpush1.bf16.msra.mxu0 %v18674_v22  ;;  %v18722_v22 = vld [vmem:[#allocation4 + $0xe4] ss:$28 sps:$4 sm:$0xff]  }
 0x6ab   :  { %10923 = vmatprep.subr.bf16.mxu0 %v18679_v16  ;;  %v18723_v16 = vld [vmem:[#allocation4 + $0x590] ss:$28 sps:$4 sm:$0xff]  }
 0x6ae   :  { %10924 = vmatpush1.bf16.msra.mxu0 %v18677_v57  ;;  %v18720_v57 = vld [vmem:[#allocation4 + $0xe0] ss:$28 sps:$4 sm:$0xff]  }
 0x6af   :  { %10925 = vmatprep.subr.bf16.mxu0 %v18682_v30  ;;  %v18724_v30 = vld [vmem:[#allocation4 + $0x3d0] ss:$28 sps:$4 sm:$0xff]  }
 0x6b2   :  { %10926 = vmatpush1.bf16.msra.mxu0 %v18680_v21  ;;  %v18727_v21 = vld [vmem:[#allocation4 + $0x11c] ss:$28 sps:$4 sm:$0xff]  }
 0x6b3   :  { %10936 = vmatprep.subr.bf16.mxu0 %v18685_v3  ;;  %v18728_v3 = vld [vmem:[#allocation4 + $0x5c8] ss:$28 sps:$4 sm:$0xff]  }
 0x6b5   :  { %10928 = vmatmul.mubr.bf16.vlgmr.msra.gmra.mrb[56].mxu0 %v20695_v13 }
 0x6b6   :  { %10937 = vmatpush1.bf16.msra.mxu0 %v18683_v48  ;;  %10968 = vmatprep.mubr.bf16.mxu0 %v19670_v0  ;;  %v18725_v48 = vld [vmem:[#allocation4 + $0x118] ss:$28 sps:$4 sm:$0xff]  }
 0x6b7   :  { %10938 = vmatprep.subr.bf16.mxu0 %v18688_v41  ;;  %v18729_v41 = vld [vmem:[#allocation4 + $0x408] ss:$28 sps:$4 sm:$0xff]  }
 0x6ba   :  { %10939 = vmatpush1.bf16.msra.mxu0 %v18686_v49  ;;  %v18732_v49 = vld [vmem:[#allocation4 + $0x154] ss:$28 sps:$4 sm:$0xff]  }
 0x6bb   :  { %16710 = vmatprep.subr.bf16.mxu0 %v18689_v51  ;;  %v18733_v51 = vld [vmem:[#allocation4 + $0x600] ss:$28 sps:$4 sm:$0xff]  }
 0x6c1   :  { %16136 = vmatmul.mubr.msk.bf16.vlgmr.msra.gmra.mrb[56].mxu0 %vm335_vm0, %v21984_v25 }
 0x6c2   :  { %16711 = vmatpush3.bf16.msra.mxu0 %v18690_v55  ;;  %11173 = vmatprep.mubr.bf16.mxu0 %v21964_v43  ;;  %v18730_v55 = vld [vmem:[#allocation4 + $0x150] ss:$28 sps:$4 sm:$0xff]  }
 0x6c3   :  { %16712 = vmatprep.subr.bf16.mxu0 %v18691_v58  ;;  %v18734_v58 = vld [vmem:[#allocation4 + $0x440] ss:$28 sps:$4 sm:$0xff]  }
 0x6c6   :  { %16713 = vmatpush3.bf16.msra.mxu0 %v18692_v6  ;;  %v18737_v6 = vld [vmem:[#allocation4 + $0x18c] ss:$28 sps:$4 sm:$0xff]  }
 0x6c7   :  { %16714 = vmatprep.subr.bf16.mxu0 %v18693_v60  ;;  %v18738_v60 = vld [vmem:[#allocation4 + $0x638] ss:$28 sps:$4 sm:$0xff]  }
 0x6c8   :  { %v16702_v4 = vpop.f32.mrb[40].mxu1  ;;  %v8303_v5 = vpop.f32.mrb[52].mxu0 }
 0x6c9   :  { %v16703_v9 = vpop.f32.mrb[41].mxu1  ;;  %v8305_v10 = vpop.f32.mrb[53].mxu0 }
 0x6ca   :  { %16715 = vmatpush3.bf16.msra.mxu0 %v18694_v61  ;;  %v16704_v11 = vadd.f32 %v16703_v9, %v16702_v4  ;;  %v16705_v37 = vpop.f32.mrb[42].mxu1  ;;  %v8306_v14 = vpop.f32.mrb[54].mxu0  ;;  %v18735_v61 = vld [vmem:[#allocation4 + $0x188] ss:$28 sps:$4 sm:$0xff]   ;;  %v18744_v9 = vld [vmem:[#allocation4 + $0x4b0] ss:$28 sps:$4 sm:$0xff]  }
 0x6cb   :  { %v16706_v29 = vpop.f32.mrb[43].mxu1  ;;  %v8307_v50 = vpop.f32.mrb[55].mxu0  ;;  %16716 = vmatprep.subr.bf16.mxu0 %v18695_v47  ;;  %v18739_v47 = vld [vmem:[#allocation4 + $0x478] ss:$28 sps:$4 sm:$0xff]   ;;  %v18742_v4 = vld [vmem:[#allocation4 + $0x1c4] ss:$28 sps:$4 sm:$0xff]  }
 0x6cc   :  { %v8264_v52 = vadd.f32 %v16704_v11, %v15755_v8  ;;  %v18740_v8 = vld [vmem:[#allocation4 + $0x1c0] ss:$28 sps:$4 sm:$0xff]   ;;  %v18748_v11 = vld [vmem:[#allocation4 + $0x6a8] ss:$28 sps:$4 sm:$0xff]   ;;  %v18745_v37 = vld [vmem:[#allocation4 + $0x1f8] ss:$28 sps:$4 sm:$0xff]  }
 0x6cd   :  { %v18747_v10 = vld [vmem:[#allocation4 + $0x1fc] ss:$28 sps:$4 sm:$0xff]   ;;  %v18749_v14 = vld [vmem:[#allocation4 + $0x4e8] ss:$28 sps:$4 sm:$0xff]   ;;  %v18750_v50 = vld [vmem:[#allocation4 + $0x230] ss:$28 sps:$4 sm:$0xff]  }
 0x6ce   :  { %v8304_v23 = vadd.f32 %v8303_v5, %v8264_v52  ;;  %16717 = vmatpush3.bf16.msra.mxu0 %v18696_v54  ;;  %v18743_v5 = vld [vmem:[#allocation4 + $0x670] ss:$28 sps:$4 sm:$0xff]   ;;  %v18753_v29 = vld [vmem:[#allocation4 + $0x6e0] ss:$28 sps:$4 sm:$0xff]  }
 0x6cf   :  { %16718 = vmatprep.subr.bf16.mxu0 %v18698_v20  ;;  %v18752_v54 = vld [vmem:[#allocation4 + $0x234] ss:$28 sps:$4 sm:$0xff]   ;;  %v18754_v20 = vld [vmem:[#allocation4 + $0x520] ss:$28 sps:$4 sm:$0xff]   ;;  %v18757_v52 = vld [vmem:[#allocation4 + $0x26c] ss:$28 sps:$4 sm:$0xff]  }
 0x6d0   :  { %v8309_v12 = vmax.f32 %v8304_v23, 0.0  ;;  %v18758_v23 = vld [vmem:[#allocation4 + $0x8d8] ss:$28 sps:$4 sm:$0xff]  }
 0x6d2   :  { %v8310_v32 = vpack.c.bf16 %v8309_v12, %v8309_v12  ;;  %16719 = vmatpush3.bf16.msra.mxu0 %v18699_v27  ;;  %v18755_v27 = vld [vmem:[#allocation4 + $0x268] ss:$28 sps:$4 sm:$0xff]  }
 0x6d3   :  { %16720 = vmatprep.subr.bf16.mxu0 %v18703_v28  ;;  %v18759_v28 = vld [vmem:[#allocation4 + $0x718] ss:$28 sps:$4 sm:$0xff]   ;;  %v18762_v12 = vld [vmem:[#allocation4 + $0x2a4] ss:$28 sps:$4 sm:$0xff]  }
 0x6d4   :  { %16944 = vmatmul.mubr.msk.bf16.vlgmr.msra.gmra.mrb[44].mxu1 %vm8225_vm3, %v8310_v32  ;;  %v18760_v32 = vld [vmem:[#allocation4 + $0x2a0] ss:$28 sps:$4 sm:$0xff]  }
 0x6d5   :  { %10650 = vmatpush1.bf16.msra.mxu1 %v18700_v31  ;;  %10681 = vmatprep.mubr.bf16.mxu1 %v21964_v43  ;;  %v18763_v31 = vld [vmem:[#allocation4 + $0x910] ss:$28 sps:$4 sm:$0xff]  }
 0x6d6   :  { %16721 = vmatpush3.bf16.msra.mxu0 %v18704_v34  ;;  %10651 = vmatprep.subr.bf16.mxu1 %v18707_v39  ;;  %v18764_v34 = vld [vmem:[#allocation4 + $0x750] ss:$28 sps:$4 sm:$0xff]   ;;  %v18767_v39 = vld [vmem:[#allocation4 + $0x2dc] ss:$28 sps:$4 sm:$0xff]  }
 0x6d7   :  { %16722 = vmatprep.subr.bf16.mxu0 %v18708_v53  ;;  %v18768_v53 = vld [vmem:[#allocation4 + $0x948] ss:$28 sps:$4 sm:$0xff]  }
 0x6d9   :  { %10652 = vmatpush1.bf16.msra.mxu1 %v18705_v26  ;;  %v18765_v26 = vld [vmem:[#allocation4 + $0x2d8] ss:$28 sps:$4 sm:$0xff]  }
 0x6da   :  { %16723 = vmatpush3.bf16.msra.mxu0 %v18709_v24  ;;  %10653 = vmatprep.subr.bf16.mxu1 %v18712_v45  ;;  %v18769_v24 = vld [vmem:[#allocation4 + $0x788] ss:$28 sps:$4 sm:$0xff]   ;;  %v18772_v45 = vld [vmem:[#allocation4 + $0x314] ss:$28 sps:$4 sm:$0xff]  }
 0x6db   :  { %16724 = vmatprep.subr.bf16.mxu0 %v18713_v44  ;;  %v18773_v44 = vld [vmem:[#allocation4 + $0x980] ss:$28 sps:$4 sm:$0xff]  }
 0x6dd   :  { %10654 = vmatpush1.bf16.msra.mxu1 %v18710_v62  ;;  %v18770_v62 = vld [vmem:[#allocation4 + $0x310] ss:$28 sps:$4 sm:$0xff]  }
 0x6de   :  { %16725 = vmatpush3.bf16.msra.mxu0 %v18714_v1  ;;  %10655 = vmatprep.subr.bf16.mxu1 %v18717_v17  ;;  %v18774_v1 = vld [vmem:[#allocation4 + $0x7c0] ss:$28 sps:$4 sm:$0xff]   ;;  %v18777_v17 = vld [vmem:[#allocation4 + $0x34c] ss:$28 sps:$4 sm:$0xff]  }
 0x6df   :  { %16732 = vmatprep.subr.bf16.mxu0 %v18718_v35  ;;  %v18778_v35 = vld [vmem:[#allocation4 + $0x9b8] ss:$28 sps:$4 sm:$0xff]  }
 0x6e1   :  { %11174 = vmatmul.mubr.bf16.vlgmr.msra.gmra.mrb[60].mxu0 %v21972_v42  ;;  %10656 = vmatpush1.bf16.msra.mxu1 %v18715_v59  ;;  %v18775_v59 = vld [vmem:[#allocation4 + $0x348] ss:$28 sps:$4 sm:$0xff]  }
 0x6e2   :  { %16733 = vmatpush3.bf16.msra.mxu0 %v18719_v19  ;;  %11213 = vmatprep.mubr.bf16.mxu0 %v21977_v18  ;;  %v18779_v19 = vld [vmem:[#allocation4 + $0x7f8] ss:$28 sps:$4 sm:$0xff]  }
 0x6e3   :  { %10657 = vmatprep.subr.bf16.mxu1 %v18722_v22  ;;  %16734 = vmatprep.subr.bf16.mxu0 %v18723_v16  ;;  %v18782_v22 = vld [vmem:[#allocation4 + $0x384] ss:$28 sps:$4 sm:$0xff]   ;;  %v18783_v16 = vld [vmem:[#allocation4 + $0x9f0] ss:$28 sps:$4 sm:$0xff]  }
 0x6e5   :  { %10658 = vmatpush1.bf16.msra.mxu1 %v18720_v57  ;;  %v18780_v57 = vld [vmem:[#allocation4 + $0x380] ss:$28 sps:$4 sm:$0xff]  }
 0x6e6   :  { %16735 = vmatpush3.bf16.msra.mxu0 %v18724_v30  ;;  %10659 = vmatprep.subr.bf16.mxu1 %v18727_v21  ;;  %v18784_v30 = vld [vmem:[#allocation4 + $0x830] ss:$28 sps:$4 sm:$0xff]   ;;  %v18787_v21 = vld [vmem:[#allocation4 + $0x3bc] ss:$28 sps:$4 sm:$0xff]  }
 0x6e7   :  { %16736 = vmatprep.subr.bf16.mxu0 %v18728_v3  ;;  %v18788_v3 = vld [vmem:[#allocation4 + $0xa28] ss:$28 sps:$4 sm:$0xff]  }
 0x6e9   :  { %10660 = vmatpush1.bf16.msra.mxu1 %v18725_v48  ;;  %v18785_v48 = vld [vmem:[#allocation4 + $0x3b8] ss:$28 sps:$4 sm:$0xff]  }
 0x6ea   :  { %16737 = vmatpush3.bf16.msra.mxu0 %v18729_v41  ;;  %10661 = vmatprep.subr.bf16.mxu1 %v18732_v49  ;;  %v18789_v41 = vld [vmem:[#allocation4 + $0x868] ss:$28 sps:$4 sm:$0xff]   ;;  %v18792_v49 = vld [vmem:[#allocation4 + $0x3f4] ss:$28 sps:$4 sm:$0xff]  }
 0x6eb   :  { %16738 = vmatprep.subr.bf16.mxu0 %v18733_v51  ;;  %v18793_v51 = vld [vmem:[#allocation4 + $0xa60] ss:$28 sps:$4 sm:$0xff]  }
 0x6ed   :  { %10662 = vmatpush1.bf16.msra.mxu1 %v18730_v55  ;;  %v18790_v55 = vld [vmem:[#allocation4 + $0x3f0] ss:$28 sps:$4 sm:$0xff]  }
 0x6ee   :  { %16739 = vmatpush3.bf16.msra.mxu0 %v18734_v58  ;;  %10663 = vmatprep.subr.bf16.mxu1 %v18737_v6  ;;  %v18794_v58 = vld [vmem:[#allocation4 + $0x8a0] ss:$28 sps:$4 sm:$0xff]   ;;  %v18797_v6 = vld [vmem:[#allocation4 + $0x42c] ss:$28 sps:$4 sm:$0xff]  }
 0x6ef   :  { %16740 = vmatprep.subr.bf16.mxu0 %v18738_v60  ;;  %v18795_v60 = vld [vmem:[#allocation4 + $0x428] ss:$28 sps:$4 sm:$0xff]  }
 0x6f1   :  { %10664 = vmatpush1.bf16.msra.mxu1 %v18735_v61  ;;  %v18798_v61 = vld [vmem:[#allocation4 + $0xa98] ss:$28 sps:$4 sm:$0xff]  }
 0x6f2   :  { %16741 = vmatpush3.bf16.msra.mxu0 %v18739_v47  ;;  %10665 = vmatprep.subr.bf16.mxu1 %v18742_v4  ;;  %v18801_v47 = vld [vmem:[#allocation4 + $0x464] ss:$28 sps:$4 sm:$0xff]  }
 0x6f3   :  { %16742 = vmatprep.subr.bf16.mxu0 %v18743_v5  ;;  %v18799_v4 = vld [vmem:[#allocation4 + $0x460] ss:$28 sps:$4 sm:$0xff]   ;;  %v18802_v5 = vld [vmem:[#allocation4 + $0xad0] ss:$28 sps:$4 sm:$0xff]  }
 0x6f5   :  { %10666 = vmatpush1.bf16.msra.mxu1 %v18740_v8  ;;  %v18805_v8 = vld [vmem:[#allocation4 + $0x49c] ss:$28 sps:$4 sm:$0xff]  }
 0x6f6   :  { %16743 = vmatpush3.bf16.msra.mxu0 %v18744_v9  ;;  %10667 = vmatprep.subr.bf16.mxu1 %v18747_v10  ;;  %v18803_v9 = vld [vmem:[#allocation4 + $0x498] ss:$28 sps:$4 sm:$0xff]  }
 0x6f7   :  { %16744 = vmatprep.subr.bf16.mxu0 %v18748_v11  ;;  %v18808_v10 = vld [vmem:[#allocation4 + $0x4d4] ss:$28 sps:$4 sm:$0xff]  }
 0x6f8   :  { %v18806_v11 = vld [vmem:[#allocation4 + $0x4d0] ss:$28 sps:$4 sm:$0xff]  }
 0x6f9   :  { %10668 = vmatpush1.bf16.msra.mxu1 %v18745_v37  ;;  %v18811_v37 = vld [vmem:[#allocation4 + $0x50c] ss:$28 sps:$4 sm:$0xff]  }
 0x6fa   :  { %16745 = vmatpush3.bf16.msra.mxu0 %v18749_v14  ;;  %10669 = vmatprep.subr.bf16.mxu1 %v18752_v54  ;;  %v18809_v14 = vld [vmem:[#allocation4 + $0x508] ss:$28 sps:$4 sm:$0xff]  }
 0x6fb   :  { %16746 = vmatprep.subr.bf16.mxu0 %v18753_v29  ;;  %v18814_v54 = vld [vmem:[#allocation4 + $0x544] ss:$28 sps:$4 sm:$0xff]  }
 0x6fc   :  { %v18812_v29 = vld [vmem:[#allocation4 + $0x540] ss:$28 sps:$4 sm:$0xff]  }
 0x6fd   :  { %10670 = vmatpush1.bf16.msra.mxu1 %v18750_v50  ;;  %v18817_v50 = vld [vmem:[#allocation4 + $0x57c] ss:$28 sps:$4 sm:$0xff]  }
 0x6fe   :  { %16747 = vmatpush3.bf16.msra.mxu0 %v18754_v20  ;;  %10671 = vmatprep.subr.bf16.mxu1 %v18757_v52  ;;  %v18815_v20 = vld [vmem:[#allocation4 + $0x578] ss:$28 sps:$4 sm:$0xff]  }
 0x6ff   :  { %16754 = vmatprep.subr.bf16.mxu0 %v18758_v23  ;;  %v18820_v52 = vld [vmem:[#allocation4 + $0x5b4] ss:$28 sps:$4 sm:$0xff]  }
 0x700   :  { %v18818_v23 = vld [vmem:[#allocation4 + $0x5b0] ss:$28 sps:$4 sm:$0xff]  }
 0x701   :  { %11214 = vmatmul.mubr.bf16.vlgmr.msra.gmra.mrb[64].mxu0 %v20665_v7  ;;  %10672 = vmatpush1.bf16.msra.mxu1 %v18755_v27  ;;  %v18823_v27 = vld [vmem:[#allocation4 + $0x5ec] ss:$28 sps:$4 sm:$0xff]  }
 0x702   :  { %16755 = vmatpush3.bf16.msra.mxu0 %v18759_v28  ;;  %11253 = vmatprep.mubr.bf16.mxu0 %v21990_v15  ;;  %v18821_v28 = vld [vmem:[#allocation4 + $0x5e8] ss:$28 sps:$4 sm:$0xff]  }
 0x703   :  { %10673 = vmatprep.subr.bf16.mxu1 %v18762_v12  ;;  %16756 = vmatprep.subr.bf16.mxu0 %v18763_v31  ;;  %v18826_v12 = vld [vmem:[#allocation4 + $0x624] ss:$28 sps:$4 sm:$0xff]  }
 0x704   :  { %v18824_v31 = vld [vmem:[#allocation4 + $0x620] ss:$28 sps:$4 sm:$0xff]  }
 0x705   :  { %10674 = vmatpush1.bf16.msra.mxu1 %v18760_v32  ;;  %v18829_v32 = vld [vmem:[#allocation4 + $0x65c] ss:$28 sps:$4 sm:$0xff]  }
 0x706   :  { %16757 = vmatpush3.bf16.msra.mxu0 %v18764_v34  ;;  %10675 = vmatprep.subr.bf16.mxu1 %v18767_v39  ;;  %v18827_v34 = vld [vmem:[#allocation4 + $0x658] ss:$28 sps:$4 sm:$0xff]  }
 0x707   :  { %16758 = vmatprep.subr.bf16.mxu0 %v18768_v53  ;;  %v18832_v39 = vld [vmem:[#allocation4 + $0x694] ss:$28 sps:$4 sm:$0xff]  }
 0x708   :  { %v18830_v53 = vld [vmem:[#allocation4 + $0x690] ss:$28 sps:$4 sm:$0xff]  }
 0x709   :  { %10676 = vmatpush1.bf16.msra.mxu1 %v18765_v26  ;;  %v18835_v26 = vld [vmem:[#allocation4 + $0x6cc] ss:$28 sps:$4 sm:$0xff]  }
 0x70a   :  { %16759 = vmatpush3.bf16.msra.mxu0 %v18769_v24  ;;  %10677 = vmatprep.subr.bf16.mxu1 %v18772_v45  ;;  %v18833_v24 = vld [vmem:[#allocation4 + $0x6c8] ss:$28 sps:$4 sm:$0xff]  }
 0x70b   :  { %16760 = vmatprep.subr.bf16.mxu0 %v18773_v44  ;;  %v18838_v45 = vld [vmem:[#allocation4 + $0x704] ss:$28 sps:$4 sm:$0xff]  }
 0x70c   :  { %v18836_v44 = vld [vmem:[#allocation4 + $0x700] ss:$28 sps:$4 sm:$0xff]  }
 0x70d   :  { %10678 = vmatpush1.bf16.msra.mxu1 %v18770_v62  ;;  %v18841_v62 = vld [vmem:[#allocation4 + $0x73c] ss:$28 sps:$4 sm:$0xff]  }
 0x70e   :  { %16761 = vmatpush3.bf16.msra.mxu0 %v18774_v1  ;;  %10679 = vmatprep.subr.bf16.mxu1 %v18777_v17  ;;  %v18839_v1 = vld [vmem:[#allocation4 + $0x738] ss:$28 sps:$4 sm:$0xff]  }
 0x70f   :  { %16762 = vmatprep.subr.bf16.mxu0 %v18778_v35  ;;  %v18844_v17 = vld [vmem:[#allocation4 + $0x774] ss:$28 sps:$4 sm:$0xff]  }
 0x710   :  { %v18842_v35 = vld [vmem:[#allocation4 + $0x770] ss:$28 sps:$4 sm:$0xff]  }
 0x711   :  { %10680 = vmatpush1.bf16.msra.mxu1 %v18775_v59  ;;  %v18847_v59 = vld [vmem:[#allocation4 + $0x7ac] ss:$28 sps:$4 sm:$0xff]  }
 0x712   :  { %16763 = vmatpush3.bf16.msra.mxu0 %v18779_v19  ;;  %10690 = vmatprep.subr.bf16.mxu1 %v18782_v22  ;;  %v18845_v19 = vld [vmem:[#allocation4 + $0x7a8] ss:$28 sps:$4 sm:$0xff]  }
 0x713   :  { %16764 = vmatprep.subr.bf16.mxu0 %v18783_v16  ;;  %v18850_v22 = vld [vmem:[#allocation4 + $0x7e4] ss:$28 sps:$4 sm:$0xff]  }
 0x714   :  { %10682 = vmatmul.mubr.bf16.vlgmr.msra.gmra.mrb[48].mxu1 %v21972_v42  ;;  %v18848_v16 = vld [vmem:[#allocation4 + $0x7e0] ss:$28 sps:$4 sm:$0xff]  }
 0x715   :  { %10691 = vmatpush1.bf16.msra.mxu1 %v18780_v57  ;;  %10722 = vmatprep.mubr.bf16.mxu1 %v21977_v18  ;;  %v18853_v57 = vld [vmem:[#allocation4 + $0x81c] ss:$28 sps:$4 sm:$0xff]  }
 0x716   :  { %16765 = vmatpush3.bf16.msra.mxu0 %v18784_v30  ;;  %10692 = vmatprep.subr.bf16.mxu1 %v18787_v21  ;;  %v18851_v30 = vld [vmem:[#allocation4 + $0x818] ss:$28 sps:$4 sm:$0xff]  }
 0x717   :  { %16766 = vmatprep.subr.bf16.mxu0 %v18788_v3  ;;  %v18856_v21 = vld [vmem:[#allocation4 + $0x854] ss:$28 sps:$4 sm:$0xff]  }
 0x718   :  { %v18854_v3 = vld [vmem:[#allocation4 + $0x850] ss:$28 sps:$4 sm:$0xff]  }
 0x719   :  { %10693 = vmatpush1.bf16.msra.mxu1 %v18785_v48  ;;  %v18859_v48 = vld [vmem:[#allocation4 + $0x88c] ss:$28 sps:$4 sm:$0xff]  }
 0x71a   :  { %16767 = vmatpush3.bf16.msra.mxu0 %v18789_v41  ;;  %10694 = vmatprep.subr.bf16.mxu1 %v18792_v49  ;;  %v18857_v41 = vld [vmem:[#allocation4 + $0x888] ss:$28 sps:$4 sm:$0xff]  }
 0x71b   :  { %16768 = vmatprep.subr.bf16.mxu0 %v18793_v51  ;;  %v18862_v49 = vld [vmem:[#allocation4 + $0x8c4] ss:$28 sps:$4 sm:$0xff]  }
 0x71c   :  { %v18860_v51 = vld [vmem:[#allocation4 + $0x8c0] ss:$28 sps:$4 sm:$0xff]  }
 0x71d   :  { %10695 = vmatpush1.bf16.msra.mxu1 %v18790_v55  ;;  %v18865_v55 = vld [vmem:[#allocation4 + $0x8fc] ss:$28 sps:$4 sm:$0xff]  }
 0x71e   :  { %16769 = vmatpush3.bf16.msra.mxu0 %v18794_v58  ;;  %10696 = vmatprep.subr.bf16.mxu1 %v18797_v6  ;;  %v18863_v58 = vld [vmem:[#allocation4 + $0x8f8] ss:$28 sps:$4 sm:$0xff]  }
 0x71f   :  { %16947 = vmatprep.subr.bf16.mxu0 %v19671_v33  ;;  %v18868_v6 = vld [vmem:[#allocation4 + $0x934] ss:$28 sps:$4 sm:$0xff]  }
 0x721   :  { %11254 = vmatmul.mubr.bf16.vlgmr.msra.gmra.mrb[68].mxu0 %v20695_v13  ;;  %10697 = vmatpush1.bf16.msra.mxu1 %v18795_v60  ;;  %v18866_v60 = vld [vmem:[#allocation4 + $0x930] ss:$28 sps:$4 sm:$0xff]  }
 0x722   :  { %16948 = vmatpush3.bf16.msra.mxu0 %v18798_v61  ;;  %10698 = vmatprep.subr.bf16.mxu1 %v18801_v47  ;;  %v18871_v61 = vld [vmem:[#allocation4 + $0x96c] ss:$28 sps:$4 sm:$0xff]  }
 0x723   :  { %16949 = vmatprep.subr.bf16.mxu0 %v19671_v33  ;;  %16951 = vmatprep.mubr.msk.bf16.mxu0 %vm19672_vm1, %v19671_v33  ;;  %v18869_v47 = vld [vmem:[#allocation4 + $0x968] ss:$28 sps:$4 sm:$0xff]  }
 0x725   :  { %10699 = vmatpush1.bf16.msra.mxu1 %v18799_v4  ;;  %v18874_v4 = vld [vmem:[#allocation4 + $0x9a4] ss:$28 sps:$4 sm:$0xff]  }
 0x726   :  { %16950 = vmatpush3.bf16.msra.mxu0 %v18802_v5  ;;  %10700 = vmatprep.subr.bf16.mxu1 %v18805_v8  ;;  %v18872_v5 = vld [vmem:[#allocation4 + $0x9a0] ss:$28 sps:$4 sm:$0xff]  }
 0x727   :  { %v18877_v8 = vld [vmem:[#allocation4 + $0x9dc] ss:$28 sps:$4 sm:$0xff]  }
 0x729   :  { %16952 = vmatmul.mubr.msk.bf16.vlgmr.msra.gmra.mrb[72].mxu0 %vm335_vm0, %v21984_v25  ;;  %10701 = vmatpush1.bf16.msra.mxu1 %v18803_v9  ;;  %v18875_v9 = vld [vmem:[#allocation4 + $0x9d8] ss:$28 sps:$4 sm:$0xff]  }
 0x72a   :  { %10702 = vmatprep.subr.bf16.mxu1 %v18808_v10  ;;  %v18880_v10 = vld [vmem:[#allocation4 + $0xa14] ss:$28 sps:$4 sm:$0xff]  }
 0x72d   :  { %10703 = vmatpush1.bf16.msra.mxu1 %v18806_v11  ;;  %v18878_v11 = vld [vmem:[#allocation4 + $0xa10] ss:$28 sps:$4 sm:$0xff]  }
 0x72e   :  { %10704 = vmatprep.subr.bf16.mxu1 %v18811_v37  ;;  %v18883_v37 = vld [vmem:[#allocation4 + $0xa4c] ss:$28 sps:$4 sm:$0xff]  }
 0x731   :  { %10705 = vmatpush1.bf16.msra.mxu1 %v18809_v14  ;;  %v18881_v14 = vld [vmem:[#allocation4 + $0xa48] ss:$28 sps:$4 sm:$0xff]  }
 0x732   :  { %10706 = vmatprep.subr.bf16.mxu1 %v18814_v54  ;;  %v18886_v54 = vld [vmem:[#allocation4 + $0xa84] ss:$28 sps:$4 sm:$0xff]  }
 0x735   :  { %10707 = vmatpush1.bf16.msra.mxu1 %v18812_v29  ;;  %v18884_v29 = vld [vmem:[#allocation4 + $0xa80] ss:$28 sps:$4 sm:$0xff]  }
 0x736   :  { %10708 = vmatprep.subr.bf16.mxu1 %v18817_v50  ;;  %v18889_v50 = vld [vmem:[#allocation4 + $0xabc] ss:$28 sps:$4 sm:$0xff]  }
 0x739   :  { %10709 = vmatpush1.bf16.msra.mxu1 %v18815_v20 }
 0x73a   :  { %10710 = vmatprep.subr.bf16.mxu1 %v18820_v52 }
 0x73d   :  { %10711 = vmatpush1.bf16.msra.mxu1 %v18818_v23  ;;  %v18887_v23 = vld [vmem:[#allocation4 + $0xab8] ss:$28 sps:$4 sm:$0xff]  }
 0x73e   :  { %10712 = vmatprep.subr.bf16.mxu1 %v18823_v27 }
 0x741   :  { %10713 = vmatpush1.bf16.msra.mxu1 %v18821_v28  ;;  %v18892_v28 = vld [vmem:[#allocation4 + $0x14] ss:$28 sps:$4 sm:$0xff]  }
 0x742   :  { %10714 = vmatprep.subr.bf16.mxu1 %v18826_v12 }
 0x745   :  { %10715 = vmatpush1.bf16.msra.mxu1 %v18824_v31  ;;  %v18890_v31 = vld [vmem:[#allocation4 + $0x10] ss:$28 sps:$4 sm:$0xff]  }
 0x746   :  { %10716 = vmatprep.subr.bf16.mxu1 %v18829_v32  ;;  %v18895_v32 = vld [vmem:[#allocation4 + $0x4c] ss:$28 sps:$4 sm:$0xff]  }
 0x749   :  { %10717 = vmatpush1.bf16.msra.mxu1 %v18827_v34  ;;  %v18893_v34 = vld [vmem:[#allocation4 + $0x48] ss:$28 sps:$4 sm:$0xff]  }
 0x74a   :  { %10718 = vmatprep.subr.bf16.mxu1 %v18832_v39  ;;  %v18898_v39 = vld [vmem:[#allocation4 + $0x84] ss:$28 sps:$4 sm:$0xff]  }
 0x74d   :  { %10719 = vmatpush1.bf16.msra.mxu1 %v18830_v53  ;;  %v18896_v53 = vld [vmem:[#allocation4 + $0x80] ss:$28 sps:$4 sm:$0xff]  }
 0x74e   :  { %10720 = vmatprep.subr.bf16.mxu1 %v18835_v26  ;;  %v18901_v26 = vld [vmem:[#allocation4 + $0xbc] ss:$28 sps:$4 sm:$0xff]  }
 0x751   :  { %10721 = vmatpush1.bf16.msra.mxu1 %v18833_v24 }
 0x752   :  { %10731 = vmatprep.subr.bf16.mxu1 %v18838_v45 }
 0x754   :  { %10723 = vmatmul.mubr.bf16.vlgmr.msra.gmra.mrb[48].mxu1 %v20665_v7 }
 0x755   :  { %10732 = vmatpush1.bf16.msra.mxu1 %v18836_v44  ;;  %10763 = vmatprep.mubr.bf16.mxu1 %v21990_v15 }
 0x756   :  { %10733 = vmatprep.subr.bf16.mxu1 %v18841_v62  ;;  %v18899_v62 = vld [vmem:[#allocation4 + $0xb8] ss:$28 sps:$4 sm:$0xff]  }
 0x759   :  { %10734 = vmatpush1.bf16.msra.mxu1 %v18839_v1 }
 0x75a   :  { %10735 = vmatprep.subr.bf16.mxu1 %v18844_v17  ;;  %v18904_v17 = vld [vmem:[#allocation4 + $0xf4] ss:$28 sps:$4 sm:$0xff]  }
 0x75d   :  { %10736 = vmatpush1.bf16.msra.mxu1 %v18842_v35  ;;  %v18902_v35 = vld [vmem:[#allocation4 + $0xf0] ss:$28 sps:$4 sm:$0xff]  }
 0x75e   :  { %10737 = vmatprep.subr.bf16.mxu1 %v18847_v59  ;;  %v18905_v59 = vld [vmem:[#allocation4 + $0x128] ss:$28 sps:$4 sm:$0xff]  }
 0x761   :  { %10738 = vmatpush1.bf16.msra.mxu1 %v18845_v19  ;;  %v18910_v19 = vld [vmem:[#allocation4 + $0x164] ss:$28 sps:$4 sm:$0xff]  }
 0x762   :  { %10739 = vmatprep.subr.bf16.mxu1 %v18850_v22 }
 0x765   :  { %10740 = vmatpush1.bf16.msra.mxu1 %v18848_v16 }
 0x766   :  { %10741 = vmatprep.subr.bf16.mxu1 %v18853_v57  ;;  %v18908_v57 = vld [vmem:[#allocation4 + $0x160] ss:$28 sps:$4 sm:$0xff]  }
 0x769   :  { %10742 = vmatpush1.bf16.msra.mxu1 %v18851_v30 }
 0x76a   :  { %10743 = vmatprep.subr.bf16.mxu1 %v18856_v21 }
 0x76d   :  { %10744 = vmatpush1.bf16.msra.mxu1 %v18854_v3  ;;  %v18913_v3 = vld [vmem:[#allocation4 + $0x19c] ss:$28 sps:$4 sm:$0xff]  }
 0x76e   :  { %10745 = vmatprep.subr.bf16.mxu1 %v18859_v48 }
 0x771   :  { %10746 = vmatpush1.bf16.msra.mxu1 %v18857_v41  ;;  %v18911_v41 = vld [vmem:[#allocation4 + $0x198] ss:$28 sps:$4 sm:$0xff]  }
 0x772   :  { %10747 = vmatprep.subr.bf16.mxu1 %v18862_v49  ;;  %v18916_v49 = vld [vmem:[#allocation4 + $0x1d4] ss:$28 sps:$4 sm:$0xff]  }
 0x775   :  { %10748 = vmatpush1.bf16.msra.mxu1 %v18860_v51  ;;  %v19010_v51 = vld [vmem:[#allocation6] ss:$28 sps:$4 sm:$0xff]  }
 0x776   :  { %10749 = vmatprep.subr.bf16.mxu1 %v18865_v55  ;;  %v19012_v55 = vld [vmem:[#allocation6 + $0x4] ss:$28 sps:$4 sm:$0xff]  }
 0x777   :  { %13555 = vmatprep.subr.bf16.mxu0 %v19012_v55  ;;  %v18941_v55 = vld [vmem:[#allocation4 + $0x3c8] ss:$28 sps:$4 sm:$0xff]  }
 0x778   :  { %13556 = vmatpush1.bf16.msra.mxu0 %v19010_v51  ;;  %v19064_v51 = vld [vmem:[#allocation6 + $0x1f8] ss:$28 sps:$4 sm:$0xff]  }
 0x779   :  { %10750 = vmatpush1.bf16.msra.mxu1 %v18863_v58  ;;  %v18914_v58 = vld [vmem:[#allocation4 + $0x1d0] ss:$28 sps:$4 sm:$0xff]  }
 0x77a   :  { %10751 = vmatprep.subr.bf16.mxu1 %v18868_v6  ;;  %v18919_v6 = vld [vmem:[#allocation4 + $0x20c] ss:$28 sps:$4 sm:$0xff]  }
 0x77d   :  { %10752 = vmatpush1.bf16.msra.mxu1 %v18866_v60  ;;  %v19016_v60 = vld [vmem:[#allocation6 + $0x38] ss:$28 sps:$4 sm:$0xff]  }
 0x77e   :  { %10753 = vmatprep.subr.bf16.mxu1 %v18871_v61  ;;  %v19018_v61 = vld [vmem:[#allocation6 + $0x3c] ss:$28 sps:$4 sm:$0xff]  }
 0x77f   :  { %13557 = vmatprep.subr.bf16.mxu0 %v19018_v61  ;;  %v18944_v61 = vld [vmem:[#allocation4 + $0x400] ss:$28 sps:$4 sm:$0xff]  }
 0x780   :  { %13558 = vmatpush1.bf16.msra.mxu0 %v19016_v60  ;;  %v19067_v60 = vld [vmem:[#allocation6 + $0x230] ss:$28 sps:$4 sm:$0xff]  }
 0x781   :  { %10754 = vmatpush1.bf16.msra.mxu1 %v18869_v47  ;;  %v18917_v47 = vld [vmem:[#allocation4 + $0x208] ss:$28 sps:$4 sm:$0xff]  }
 0x782   :  { %10755 = vmatprep.subr.bf16.mxu1 %v18874_v4  ;;  %v18922_v4 = vld [vmem:[#allocation4 + $0x244] ss:$28 sps:$4 sm:$0xff]  }
 0x785   :  { %10756 = vmatpush1.bf16.msra.mxu1 %v18872_v5  ;;  %v19022_v5 = vld [vmem:[#allocation6 + $0x70] ss:$28 sps:$4 sm:$0xff]  }
 0x786   :  { %10757 = vmatprep.subr.bf16.mxu1 %v18877_v8  ;;  %v19024_v8 = vld [vmem:[#allocation6 + $0x74] ss:$28 sps:$4 sm:$0xff]  }
 0x787   :  { %13559 = vmatprep.subr.bf16.mxu0 %v19024_v8  ;;  %v18952_v8 = vld [vmem:[#allocation4 + $0x474] ss:$28 sps:$4 sm:$0xff]  }
 0x788   :  { %13560 = vmatpush1.bf16.msra.mxu0 %v19022_v5  ;;  %v19073_v5 = vld [vmem:[#allocation6 + $0x268] ss:$28 sps:$4 sm:$0xff]  }
 0x789   :  { %10758 = vmatpush1.bf16.msra.mxu1 %v18875_v9  ;;  %v18920_v9 = vld [vmem:[#allocation4 + $0x240] ss:$28 sps:$4 sm:$0xff]  }
 0x78a   :  { %10759 = vmatprep.subr.bf16.mxu1 %v18880_v10  ;;  %v18925_v10 = vld [vmem:[#allocation4 + $0x27c] ss:$28 sps:$4 sm:$0xff]  }
 0x78d   :  { %10760 = vmatpush1.bf16.msra.mxu1 %v18878_v11  ;;  %v19028_v11 = vld [vmem:[#allocation6 + $0xa8] ss:$28 sps:$4 sm:$0xff]  }
 0x78e   :  { %10761 = vmatprep.subr.bf16.mxu1 %v18883_v37  ;;  %v19030_v37 = vld [vmem:[#allocation6 + $0xac] ss:$28 sps:$4 sm:$0xff]  }
 0x78f   :  { %13561 = vmatprep.subr.bf16.mxu0 %v19030_v37  ;;  %v19085_v37 = vld [vmem:[#allocation6 + $0x2d8] ss:$28 sps:$4 sm:$0xff]  }
 0x790   :  { %13562 = vmatpush1.bf16.msra.mxu0 %v19028_v11  ;;  %v18955_v11 = vld [vmem:[#allocation4 + $0x4ac] ss:$28 sps:$4 sm:$0xff]  }
 0x791   :  { %10762 = vmatpush1.bf16.msra.mxu1 %v18881_v14  ;;  %v18923_v14 = vld [vmem:[#allocation4 + $0x278] ss:$28 sps:$4 sm:$0xff]  }
 0x792   :  { %10772 = vmatprep.subr.bf16.mxu1 %v18886_v54  ;;  %v18928_v54 = vld [vmem:[#allocation4 + $0x2b4] ss:$28 sps:$4 sm:$0xff]  }
 0x794   :  { %10764 = vmatmul.mubr.bf16.vlgmr.msra.gmra.mrb[48].mxu1 %v20695_v13  ;;  %v22019_v20 = vpop.f32.mrb[56].mxu0 }
 0x795   :  { %10773 = vmatpush1.bf16.msra.mxu1 %v18884_v29  ;;  %v22021_v52 = vpop.f32.mrb[57].mxu0  ;;  %10804 = vmatprep.mubr.bf16.mxu1 %v19670_v0  ;;  %v19034_v29 = vld [vmem:[#allocation6 + $0xe0] ss:$28 sps:$4 sm:$0xff]  }
 0x796   :  { %v10974_v27 = vpop.f32.mrb[58].mxu0  ;;  %10774 = vmatprep.subr.bf16.mxu1 %v18889_v50  ;;  %v19036_v50 = vld [vmem:[#allocation6 + $0xe4] ss:$28 sps:$4 sm:$0xff]  }
 0x797   :  { %v10975_v12 = vpop.f32.mrb[59].mxu0  ;;  %13563 = vmatprep.subr.bf16.mxu0 %v19036_v50  ;;  %v18931_v27 = vld [vmem:[#allocation4 + $0x2ec] ss:$28 sps:$4 sm:$0xff]   ;;  %v19093_v50 = vld [vmem:[#allocation6 + $0x314] ss:$28 sps:$4 sm:$0xff]  }
 0x798   :  { %13564 = vmatpush1.bf16.msra.mxu0 %v19034_v29  ;;  %v19042_v12 = vld [vmem:[#allocation6 + $0x11c] ss:$28 sps:$4 sm:$0xff]   ;;  %v18958_v29 = vld [vmem:[#allocation4 + $0x4e4] ss:$28 sps:$4 sm:$0xff]  }
 0x799   :  { %10775 = vmatpush1.bf16.msra.mxu1 %v18887_v23  ;;  %v18926_v23 = vld [vmem:[#allocation4 + $0x2b0] ss:$28 sps:$4 sm:$0xff]   ;;  %13565 = vmatprep.subr.bf16.mxu0 %v19042_v12  ;;  %v18956_v12 = vld [vmem:[#allocation4 + $0x4e0] ss:$28 sps:$4 sm:$0xff]  }
 0x79a   :  { %10977 = vmatprep.subr.bf16.mxu1 %v18892_v28  ;;  %v19040_v28 = vld [vmem:[#allocation6 + $0x118] ss:$28 sps:$4 sm:$0xff]  }
 0x79c   :  { %13566 = vmatpush1.bf16.msra.mxu0 %v19040_v28 }
 0x7a0   :  { %16135 = vmatmul.mubr.msk.bf16.vlgmr.msra.gmra.mrb[48].mxu1 %vm335_vm0, %v21984_v25 }
 0x7a1   :  { %10978 = vmatpush1.bf16.msra.mxu1 %v18890_v31  ;;  %11009 = vmatprep.mubr.bf16.mxu1 %v21964_v43  ;;  %v18907_v43 = vld [vmem:[#allocation4 + $0x12c] ss:$28 sps:$4 sm:$0xff]   ;;  %v22034_v31 = vld [vmem:[%s22320_s14] sm:$0x7f] }
 0x7a2   :  { %10979 = vmatprep.subr.bf16.mxu1 %v18895_v32  ;;  %v18929_v32 = vld [vmem:[#allocation4 + $0x2e8] ss:$28 sps:$4 sm:$0xff]  }
 0x7a5   :  { %10980 = vmatpush1.bf16.msra.mxu1 %v18893_v34  ;;  %v8804_v34 = vrot.slane %v22034_v31, %v20168_v56 }
 0x7a6   :  { %10981 = vmatprep.subr.bf16.mxu1 %v18898_v39  ;;  %v18934_v39 = vld [vmem:[#allocation4 + $0x324] ss:$28 sps:$4 sm:$0xff]  }
 0x7a7   :  { %v22027_v24 = vpop.f32.mrb[44].mxu1 }
 0x7a8   :  { %v16945_v45 = vpop.f32.mrb[45].mxu1 }
 0x7a9   :  { %10982 = vmatpush1.bf16.msra.mxu1 %v18896_v53  ;;  %v8366_v44 = vpop.f32.mrb[46].mxu1  ;;  %v19046_v53 = vld [vmem:[#allocation6 + $0x150] ss:$28 sps:$4 sm:$0xff]  }
 0x7aa   :  { %v16946_v1 = vpop.f32.mrb[47].mxu1  ;;  %10983 = vmatprep.subr.bf16.mxu1 %v18901_v26  ;;  %v19048_v26 = vld [vmem:[#allocation6 + $0x154] ss:$28 sps:$4 sm:$0xff]  }
 0x7ab   :  { %13567 = vmatprep.subr.bf16.mxu0 %v19048_v26  ;;  %v18937_v1 = vld [vmem:[#allocation4 + $0x35c] ss:$28 sps:$4 sm:$0xff]  }
 0x7ac   :  { %13568 = vmatpush1.bf16.msra.mxu0 %v19046_v53  ;;  %v19099_v26 = vld [vmem:[#allocation6 + $0x34c] ss:$28 sps:$4 sm:$0xff]  }
 0x7ad   :  { %10984 = vmatpush1.bf16.msra.mxu1 %v18899_v62  ;;  %v18932_v62 = vld [vmem:[#allocation4 + $0x320] ss:$28 sps:$4 sm:$0xff]  }
 0x7ae   :  { %10985 = vmatprep.subr.bf16.mxu1 %v18904_v17 }
 0x7b1   :  { %10986 = vmatpush1.bf16.msra.mxu1 %v18902_v35 }
 0x7b2   :  { %10987 = vmatprep.subr.bf16.mxu1 %v18907_v43 }
 0x7b4   :  { %v16726_v22 = vpop.f32.mrb[60].mxu0 }
 0x7b5   :  { %10988 = vmatpush1.bf16.msra.mxu1 %v18905_v59  ;;  %v16727_v16 = vpop.f32.mrb[61].mxu0  ;;  %v19052_v59 = vld [vmem:[#allocation6 + $0x188] ss:$28 sps:$4 sm:$0xff]  }
 0x7b6   :  { %v22029_v30 = vadd.f32 %v16727_v16, %v16726_v22  ;;  %v16729_v21 = vpop.f32.mrb[62].mxu0  ;;  %10989 = vmatprep.subr.bf16.mxu1 %v18910_v19  ;;  %v19054_v19 = vld [vmem:[#allocation6 + $0x18c] ss:$28 sps:$4 sm:$0xff]  }
 0x7b7   :  { %v16730_v48 = vpop.f32.mrb[63].mxu0  ;;  %13569 = vmatprep.subr.bf16.mxu0 %v19054_v19  ;;  %v18940_v21 = vld [vmem:[#allocation4 + $0x394] ss:$28 sps:$4 sm:$0xff]  }
 0x7b8   :  { %v11176_v17 = vadd.f32 %v22029_v30, %v8804_v34  ;;  %13570 = vmatpush1.bf16.msra.mxu0 %v19052_v59  ;;  %v19060_v48 = vld [vmem:[#allocation6 + $0x1c4] ss:$28 sps:$4 sm:$0xff]   ;;  %v18943_v30 = vld [vmem:[#allocation4 + $0x3cc] ss:$28 sps:$4 sm:$0xff]  }
 0x7b9   :  { %10990 = vmatpush1.bf16.msra.mxu1 %v18908_v57  ;;  %v18935_v57 = vld [vmem:[#allocation4 + $0x358] ss:$28 sps:$4 sm:$0xff]   ;;  %13571 = vmatprep.subr.bf16.mxu0 %v19060_v48  ;;  %v18962_v19 = vld [vmem:[#allocation4 + $0x550] ss:$28 sps:$4 sm:$0xff]   ;;  %v18968_v48 = vld [vmem:[#allocation4 + $0x5c0] ss:$28 sps:$4 sm:$0xff]  }
 0x7ba   :  { %10991 = vmatprep.subr.bf16.mxu1 %v18913_v3  ;;  %v19058_v3 = vld [vmem:[#allocation6 + $0x1c0] ss:$28 sps:$4 sm:$0xff]  }
 0x7bc   :  { %13572 = vmatpush1.bf16.msra.mxu0 %v19058_v3  ;;  %v18970_v3 = vld [vmem:[#allocation4 + $0x5c4] ss:$28 sps:$4 sm:$0xff]  }
 0x7bd   :  { %10992 = vmatpush1.bf16.msra.mxu1 %v18911_v41  ;;  %v18938_v41 = vld [vmem:[#allocation4 + $0x390] ss:$28 sps:$4 sm:$0xff]  }
 0x7be   :  { %10993 = vmatprep.subr.bf16.mxu1 %v18916_v49  ;;  %v19066_v49 = vld [vmem:[#allocation6 + $0x1fc] ss:$28 sps:$4 sm:$0xff]  }
 0x7bf   :  { %13573 = vmatprep.subr.bf16.mxu0 %v19066_v49  ;;  %v18976_v49 = vld [vmem:[#allocation4 + $0x634] ss:$28 sps:$4 sm:$0xff]  }
 0x7c0   :  { %13574 = vmatpush1.bf16.msra.mxu0 %v19064_v51  ;;  %v18974_v51 = vld [vmem:[#allocation4 + $0x630] ss:$28 sps:$4 sm:$0xff]  }
 0x7c1   :  { %10994 = vmatpush1.bf16.msra.mxu1 %v18914_v58  ;;  %v19069_v58 = vld [vmem:[#allocation6 + $0x234] ss:$28 sps:$4 sm:$0xff]  }
 0x7c2   :  { %10995 = vmatprep.subr.bf16.mxu1 %v18919_v6  ;;  %v18946_v6 = vld [vmem:[#allocation4 + $0x404] ss:$28 sps:$4 sm:$0xff]   ;;  %13575 = vmatprep.subr.bf16.mxu0 %v19069_v58 }
 0x7c3   :  { %v18977_v58 = vld [vmem:[#allocation4 + $0x668] ss:$28 sps:$4 sm:$0xff]  }
 0x7c4   :  { %13576 = vmatpush1.bf16.msra.mxu0 %v19067_v60  ;;  %v18980_v60 = vld [vmem:[#allocation4 + $0x6a0] ss:$28 sps:$4 sm:$0xff]  }
 0x7c5   :  { %10996 = vmatpush1.bf16.msra.mxu1 %v18917_v47  ;;  %v19075_v47 = vld [vmem:[#allocation6 + $0x26c] ss:$28 sps:$4 sm:$0xff]  }
 0x7c6   :  { %10997 = vmatprep.subr.bf16.mxu1 %v18922_v4  ;;  %v18949_v4 = vld [vmem:[#allocation4 + $0x43c] ss:$28 sps:$4 sm:$0xff]   ;;  %13577 = vmatprep.subr.bf16.mxu0 %v19075_v47 }
 0x7c7   :  { %v18983_v47 = vld [vmem:[#allocation4 + $0x6d8] ss:$28 sps:$4 sm:$0xff]  }
 0x7c8   :  { %13578 = vmatpush1.bf16.msra.mxu0 %v19073_v5  ;;  %v18986_v5 = vld [vmem:[#allocation4 + $0x710] ss:$28 sps:$4 sm:$0xff]  }
 0x7c9   :  { %10998 = vmatpush1.bf16.msra.mxu1 %v18920_v9  ;;  %v19079_v9 = vld [vmem:[#allocation6 + $0x2a0] ss:$28 sps:$4 sm:$0xff]  }
 0x7ca   :  { %10999 = vmatprep.subr.bf16.mxu1 %v18925_v10  ;;  %v18950_v10 = vld [vmem:[#allocation4 + $0x470] ss:$28 sps:$4 sm:$0xff]  }
 0x7cd   :  { %11000 = vmatpush1.bf16.msra.mxu1 %v18923_v14  ;;  %v19087_v14 = vld [vmem:[#allocation6 + $0x2dc] ss:$28 sps:$4 sm:$0xff]  }
 0x7ce   :  { %11001 = vmatprep.subr.bf16.mxu1 %v18928_v54  ;;  %v18953_v54 = vld [vmem:[#allocation4 + $0x4a8] ss:$28 sps:$4 sm:$0xff]  }
 0x7d1   :  { %11002 = vmatpush1.bf16.msra.mxu1 %v18926_v23 }
 0x7d2   :  { %11003 = vmatprep.subr.bf16.mxu1 %v18931_v27  ;;  %v19091_v27 = vld [vmem:[#allocation6 + $0x310] ss:$28 sps:$4 sm:$0xff]  }
 0x7d4   :  { %v16748_v45 = vpop.f32.mrb[64].mxu0 }
 0x7d5   :  { %11004 = vmatpush1.bf16.msra.mxu1 %v18929_v32  ;;  %v16749_v44 = vpop.f32.mrb[65].mxu0 }
 0x7d6   :  { %v16750_v35 = vadd.f32 %v16749_v44, %v16748_v45  ;;  %v16751_v43 = vpop.f32.mrb[66].mxu0  ;;  %11005 = vmatprep.subr.bf16.mxu1 %v18934_v39  ;;  %v18961_v39 = vld [vmem:[#allocation4 + $0x51c] ss:$28 sps:$4 sm:$0xff]  }
 0x7d7   :  { %v16752_v22 = vpop.f32.mrb[67].mxu0  ;;  %v19097_v44 = vld [vmem:[#allocation6 + $0x348] ss:$28 sps:$4 sm:$0xff]  }
 0x7d8   :  { %v22039_v16 = vadd.f32 %v16750_v35, %v11176_v17  ;;  %v19105_v17 = vld [vmem:[#allocation6 + $0x384] ss:$28 sps:$4 sm:$0xff]  }
 0x7d9   :  { %11006 = vmatpush1.bf16.msra.mxu1 %v18932_v62  ;;  %v18959_v62 = vld [vmem:[#allocation4 + $0x518] ss:$28 sps:$4 sm:$0xff]  }
 0x7da   :  { %11007 = vmatprep.subr.bf16.mxu1 %v18937_v1  ;;  %v18964_v1 = vld [vmem:[#allocation4 + $0x554] ss:$28 sps:$4 sm:$0xff]  }
 0x7dd   :  { %11008 = vmatpush1.bf16.msra.mxu1 %v18935_v57  ;;  %v18967_v57 = vld [vmem:[#allocation4 + $0x58c] ss:$28 sps:$4 sm:$0xff]  }
 0x7de   :  { %11018 = vmatprep.subr.bf16.mxu1 %v18940_v21 }
 0x7e0   :  { %11010 = vmatmul.mubr.bf16.vlgmr.msra.gmra.mrb[52].mxu1 %v21972_v42  ;;  %v18947_v42 = vld [vmem:[#allocation4 + $0x438] ss:$28 sps:$4 sm:$0xff]  }
 0x7e1   :  { %11019 = vmatpush1.bf16.msra.mxu1 %v18938_v41  ;;  %11050 = vmatprep.mubr.bf16.mxu1 %v21977_v18  ;;  %v19081_v18 = vld [vmem:[#allocation6 + $0x2a4] ss:$28 sps:$4 sm:$0xff]   ;;  %v18973_v41 = vld [vmem:[#allocation4 + $0x5fc] ss:$28 sps:$4 sm:$0xff]  }
 0x7e2   :  { %11020 = vmatprep.subr.bf16.mxu1 %v18943_v30  ;;  %13579 = vmatprep.subr.bf16.mxu0 %v19081_v18  ;;  %v18971_v30 = vld [vmem:[#allocation4 + $0x5f8] ss:$28 sps:$4 sm:$0xff]   ;;  %v18994_v18 = vld [vmem:[#allocation4 + $0x784] ss:$28 sps:$4 sm:$0xff]  }
 0x7e3   :  { %13580 = vmatpush1.bf16.msra.mxu0 %v19079_v9  ;;  %v18992_v9 = vld [vmem:[#allocation4 + $0x780] ss:$28 sps:$4 sm:$0xff]  }
 0x7e4   :  { %13581 = vmatprep.subr.bf16.mxu0 %v19087_v14  ;;  %v18998_v14 = vld [vmem:[#allocation4 + $0x7f0] ss:$28 sps:$4 sm:$0xff]  }
 0x7e5   :  { %11021 = vmatpush1.bf16.msra.mxu1 %v18941_v55  ;;  %v18979_v55 = vld [vmem:[#allocation4 + $0x66c] ss:$28 sps:$4 sm:$0xff]  }
 0x7e6   :  { %11022 = vmatprep.subr.bf16.mxu1 %v18946_v6  ;;  %v18982_v6 = vld [vmem:[#allocation4 + $0x6a4] ss:$28 sps:$4 sm:$0xff]  }
 0x7e7   :  { %13582 = vmatpush1.bf16.msra.mxu0 %v19085_v37  ;;  %v19000_v37 = vld [vmem:[#allocation4 + $0x7f4] ss:$28 sps:$4 sm:$0xff]  }
 0x7e8   :  { %13583 = vmatprep.subr.bf16.mxu0 %v19093_v50  ;;  %v19009_v50 = vld [vmem:[#allocation4 + $0x89c] ss:$28 sps:$4 sm:$0xff]  }
 0x7e9   :  { %11023 = vmatpush1.bf16.msra.mxu1 %v18944_v61  ;;  %v18985_v61 = vld [vmem:[#allocation4 + $0x6dc] ss:$28 sps:$4 sm:$0xff]  }
 0x7ea   :  { %11024 = vmatprep.subr.bf16.mxu1 %v18949_v4  ;;  %v18988_v4 = vld [vmem:[#allocation4 + $0x714] ss:$28 sps:$4 sm:$0xff]  }
 0x7eb   :  { %13584 = vmatpush1.bf16.msra.mxu0 %v19091_v27  ;;  %v19015_v27 = vld [vmem:[#allocation4 + $0x8d4] ss:$28 sps:$4 sm:$0xff]  }
 0x7ec   :  { %13585 = vmatprep.subr.bf16.mxu0 %v19099_v26  ;;  %v19031_v26 = vld [vmem:[#allocation4 + $0x978] ss:$28 sps:$4 sm:$0xff]  }
 0x7ed   :  { %11025 = vmatpush1.bf16.msra.mxu1 %v18947_v42  ;;  %v18991_v42 = vld [vmem:[#allocation4 + $0x74c] ss:$28 sps:$4 sm:$0xff]  }
 0x7ee   :  { %11026 = vmatprep.subr.bf16.mxu1 %v18952_v8  ;;  %v18989_v8 = vld [vmem:[#allocation4 + $0x748] ss:$28 sps:$4 sm:$0xff]  }
 0x7ef   :  { %13586 = vmatpush1.bf16.msra.mxu0 %v19097_v44  ;;  %v19037_v44 = vld [vmem:[#allocation4 + $0x9b0] ss:$28 sps:$4 sm:$0xff]  }
 0x7f0   :  { %13596 = vmatprep.subr.bf16.mxu0 %v19105_v17  ;;  %v19051_v17 = vld [vmem:[#allocation4 + $0xa24] ss:$28 sps:$4 sm:$0xff]  }
 0x7f1   :  { %11027 = vmatpush1.bf16.msra.mxu1 %v18950_v10  ;;  %v18997_v10 = vld [vmem:[#allocation4 + $0x7bc] ss:$28 sps:$4 sm:$0xff]  }
 0x7f2   :  { %11028 = vmatprep.subr.bf16.mxu1 %v18955_v11  ;;  %v18995_v11 = vld [vmem:[#allocation4 + $0x7b8] ss:$28 sps:$4 sm:$0xff]  }
 0x7f4   :  { %v16770_v23 = vpop.f32.mrb[68].mxu0 }
 0x7f5   :  { %11029 = vmatpush1.bf16.msra.mxu1 %v18953_v54  ;;  %v16771_v28 = vpop.f32.mrb[69].mxu0  ;;  %v19003_v54 = vld [vmem:[#allocation4 + $0x82c] ss:$28 sps:$4 sm:$0xff]  }
 0x7f6   :  { %v16772_v32 = vadd.f32 %v16771_v28, %v16770_v23  ;;  %v16773_v34 = vpop.f32.mrb[70].mxu0  ;;  %11030 = vmatprep.subr.bf16.mxu1 %v18958_v29  ;;  %v19006_v29 = vld [vmem:[#allocation4 + $0x864] ss:$28 sps:$4 sm:$0xff]   ;;  %v19007_v23 = vld [vmem:[#allocation4 + $0x898] ss:$28 sps:$4 sm:$0xff]  }
 0x7f7   :  { %v16774_v53 = vpop.f32.mrb[71].mxu0  ;;  %v19013_v28 = vld [vmem:[#allocation4 + $0x8d0] ss:$28 sps:$4 sm:$0xff]   ;;  %v19027_v34 = vld [vmem:[#allocation4 + $0x944] ss:$28 sps:$4 sm:$0xff]  }
 0x7f8   :  { %v11256_v45 = vadd.f32 %v16772_v32, %v22039_v16  ;;  %v18965_v16 = vld [vmem:[#allocation4 + $0x588] ss:$28 sps:$4 sm:$0xff]   ;;  %v19033_v53 = vld [vmem:[#allocation4 + $0x97c] ss:$28 sps:$4 sm:$0xff]  }
 0x7f9   :  { %11031 = vmatpush1.bf16.msra.mxu1 %v18956_v12  ;;  %v19021_v12 = vld [vmem:[#allocation4 + $0x90c] ss:$28 sps:$4 sm:$0xff]  }
 0x7fa   :  { %11032 = vmatprep.subr.bf16.mxu1 %v18961_v39  ;;  %v19019_v32 = vld [vmem:[#allocation4 + $0x908] ss:$28 sps:$4 sm:$0xff]   ;;  %v19025_v39 = vld [vmem:[#allocation4 + $0x940] ss:$28 sps:$4 sm:$0xff]  }
 0x7fc   :  { %v11295_v35 = vpop.f32.mrb[72].mxu0 }
 0x7fd   :  { %v22044_v43 = vadd.f32 %v11295_v35, %v11256_v45  ;;  %11033 = vmatpush1.bf16.msra.mxu1 %v18959_v62  ;;  %v16953_v59 = vpop.f32.mrb[73].mxu0  ;;  %v19039_v45 = vld [vmem:[#allocation4 + $0x9b4] ss:$28 sps:$4 sm:$0xff]   ;;  %v19045_v62 = vld [vmem:[#allocation4 + $0x9ec] ss:$28 sps:$4 sm:$0xff]  }
 0x7fe   :  { %v11298_v22 = vpop.f32.mrb[74].mxu0  ;;  %11034 = vmatprep.subr.bf16.mxu1 %v18964_v1  ;;  %v19043_v1 = vld [vmem:[#allocation4 + $0x9e8] ss:$28 sps:$4 sm:$0xff]   ;;  %v19049_v35 = vld [vmem:[#allocation4 + $0xa20] ss:$28 sps:$4 sm:$0xff]  }
 0x7ff   :  { %v16954_v21 = vpop.f32.mrb[75].mxu0  ;;  %v19057_v59 = vld [vmem:[#allocation4 + $0xa5c] ss:$28 sps:$4 sm:$0xff]   ;;  %v19063_v22 = vld [vmem:[#allocation4 + $0xa94] ss:$28 sps:$4 sm:$0xff]  }
 0x800   :  { %v19072_v21 = vld [vmem:[#allocation4 + $0xacc] ss:$28 sps:$4 sm:$0xff]  }
 0x801   :  { %11035 = vmatpush1.bf16.msra.mxu1 %v18962_v19  ;;  %v19055_v19 = vld [vmem:[#allocation4 + $0xa58] ss:$28 sps:$4 sm:$0xff]  }
 0x802   :  { %11036 = vmatprep.subr.bf16.mxu1 %v18967_v57  ;;  %v19061_v57 = vld [vmem:[#allocation4 + $0xa90] ss:$28 sps:$4 sm:$0xff]  }
 0x805   :  { %11037 = vmatpush1.bf16.msra.mxu1 %v18965_v16  ;;  %v19070_v16 = vld [vmem:[#allocation4 + $0xac8] ss:$28 sps:$4 sm:$0xff]  }
 0x806   :  { %11038 = vmatprep.subr.bf16.mxu1 %v18970_v3  ;;  %v19078_v3 = vld [vmem:[#allocation6 + $0xc] ss:$28 sps:$4 sm:$0xff]  }
 0x809   :  { %11039 = vmatpush1.bf16.msra.mxu1 %v18968_v48  ;;  %v19076_v48 = vld [vmem:[#allocation6 + $0x8] ss:$28 sps:$4 sm:$0xff]  }
 0x80a   :  { %11040 = vmatprep.subr.bf16.mxu1 %v18973_v41  ;;  %v19084_v41 = vld [vmem:[#allocation6 + $0x44] ss:$28 sps:$4 sm:$0xff]  }
 0x80d   :  { %11041 = vmatpush1.bf16.msra.mxu1 %v18971_v30  ;;  %v19082_v30 = vld [vmem:[#allocation6 + $0x40] ss:$28 sps:$4 sm:$0xff]  }
 0x80e   :  { %11042 = vmatprep.subr.bf16.mxu1 %v18976_v49  ;;  %v19090_v49 = vld [vmem:[#allocation6 + $0x7c] ss:$28 sps:$4 sm:$0xff]  }
 0x811   :  { %11043 = vmatpush1.bf16.msra.mxu1 %v18974_v51  ;;  %v8780_v51 = vrot.slane %v22034_v31, %v20134_v36 }
 0x812   :  { %11044 = vmatprep.subr.bf16.mxu1 %v18979_v55  ;;  %v19088_v55 = vld [vmem:[#allocation6 + $0x78] ss:$28 sps:$4 sm:$0xff]  }
 0x815   :  { %11045 = vmatpush1.bf16.msra.mxu1 %v18977_v58  ;;  %v8784_v58 = vrot.slane %v22034_v31, %v20142_v38 }
 0x816   :  { %11046 = vmatprep.subr.bf16.mxu1 %v18982_v6  ;;  %v19096_v6 = vld [vmem:[#allocation6 + $0xb4] ss:$28 sps:$4 sm:$0xff]  }
 0x819   :  { %11047 = vmatpush1.bf16.msra.mxu1 %v18980_v60 }
 0x81a   :  { %11048 = vmatprep.subr.bf16.mxu1 %v18985_v61 }
 0x81d   :  { %11049 = vmatpush1.bf16.msra.mxu1 %v18983_v47 }
 0x81e   :  { %11059 = vmatprep.subr.bf16.mxu1 %v18988_v4 }
 0x820   :  { %11051 = vmatmul.mubr.bf16.vlgmr.msra.gmra.mrb[52].mxu1 %v20665_v7  ;;  %v19001_v7 = vld [vmem:[#allocation4 + $0x828] ss:$28 sps:$4 sm:$0xff]  }
 0x821   :  { %11060 = vmatpush1.bf16.msra.mxu1 %v18986_v5  ;;  %11091 = vmatprep.mubr.bf16.mxu1 %v21990_v15  ;;  %v19004_v15 = vld [vmem:[#allocation4 + $0x860] ss:$28 sps:$4 sm:$0xff]  }
 0x822   :  { %11061 = vmatprep.subr.bf16.mxu1 %v18991_v42  ;;  %v19094_v42 = vld [vmem:[#allocation6 + $0xb0] ss:$28 sps:$4 sm:$0xff]  }
 0x825   :  { %11062 = vmatpush1.bf16.msra.mxu1 %v18989_v8 }
 0x826   :  { %11063 = vmatprep.subr.bf16.mxu1 %v18994_v18 }
 0x829   :  { %11064 = vmatpush1.bf16.msra.mxu1 %v18992_v9  ;;  %v19102_v9 = vld [vmem:[#allocation6 + $0xec] ss:$28 sps:$4 sm:$0xff]  }
 0x82a   :  { %11065 = vmatprep.subr.bf16.mxu1 %v18997_v10 }
 0x82d   :  { %11066 = vmatpush1.bf16.msra.mxu1 %v18995_v11 }
 0x82e   :  { %11067 = vmatprep.subr.bf16.mxu1 %v19000_v37 }
 0x831   :  { %11068 = vmatpush1.bf16.msra.mxu1 %v18998_v14  ;;  %v19100_v14 = vld [vmem:[#allocation6 + $0xe8] ss:$28 sps:$4 sm:$0xff]  }
 0x832   :  { %11069 = vmatprep.subr.bf16.mxu1 %v19003_v54  ;;  %v19103_v54 = vld [vmem:[#allocation6 + $0x380] ss:$28 sps:$4 sm:$0xff]  }
 0x835   :  { %11070 = vmatpush1.bf16.msra.mxu1 %v19001_v7 }
 0x836   :  { %11071 = vmatprep.subr.bf16.mxu1 %v19006_v29  ;;  %v19111_v29 = vld [vmem:[#allocation6 + $0x3bc] ss:$28 sps:$4 sm:$0xff]  }
 0x839   :  { %11072 = vmatpush1.bf16.msra.mxu1 %v19004_v15 }
 0x83a   :  { %11073 = vmatprep.subr.bf16.mxu1 %v19009_v50  ;;  %v19106_v50 = vld [vmem:[#allocation6 + $0x120] ss:$28 sps:$4 sm:$0xff]  }
 0x83d   :  { %11074 = vmatpush1.bf16.msra.mxu1 %v19007_v23  ;;  %v19109_v23 = vld [vmem:[#allocation6 + $0x3b8] ss:$28 sps:$4 sm:$0xff]  }
 0x83e   :  { %11075 = vmatprep.subr.bf16.mxu1 %v19015_v27  ;;  %v19114_v27 = vld [vmem:[#allocation6 + $0x15c] ss:$28 sps:$4 sm:$0xff]  }
 0x841   :  { %11076 = vmatpush1.bf16.msra.mxu1 %v19013_v28  ;;  %v19117_v28 = vld [vmem:[#allocation6 + $0x3f4] ss:$28 sps:$4 sm:$0xff]  }
 0x842   :  { %11077 = vmatprep.subr.bf16.mxu1 %v19021_v12  ;;  %v19112_v12 = vld [vmem:[#allocation6 + $0x158] ss:$28 sps:$4 sm:$0xff]  }
 0x845   :  { %11078 = vmatpush1.bf16.msra.mxu1 %v19019_v32  ;;  %v19115_v32 = vld [vmem:[#allocation6 + $0x3f0] ss:$28 sps:$4 sm:$0xff]  }
 0x846   :  { %11079 = vmatprep.subr.bf16.mxu1 %v19027_v34  ;;  %v19120_v34 = vld [vmem:[#allocation6 + $0x194] ss:$28 sps:$4 sm:$0xff]  }
 0x849   :  { %11080 = vmatpush1.bf16.msra.mxu1 %v19025_v39  ;;  %v19123_v39 = vld [vmem:[#allocation6 + $0x42c] ss:$28 sps:$4 sm:$0xff]  }
 0x84a   :  { %11081 = vmatprep.subr.bf16.mxu1 %v19033_v53  ;;  %v19118_v53 = vld [vmem:[#allocation6 + $0x190] ss:$28 sps:$4 sm:$0xff]  }
 0x84d   :  { %11082 = vmatpush1.bf16.msra.mxu1 %v19031_v26  ;;  %v19121_v26 = vld [vmem:[#allocation6 + $0x428] ss:$28 sps:$4 sm:$0xff]  }
 0x84e   :  { %11083 = vmatprep.subr.bf16.mxu1 %v19039_v45  ;;  %v19126_v45 = vld [vmem:[#allocation6 + $0x1cc] ss:$28 sps:$4 sm:$0xff]  }
 0x851   :  { %11084 = vmatpush1.bf16.msra.mxu1 %v19037_v44  ;;  %v19129_v44 = vld [vmem:[#allocation6 + $0x464] ss:$28 sps:$4 sm:$0xff]  }
 0x852   :  { %11085 = vmatprep.subr.bf16.mxu1 %v19045_v62  ;;  %v19124_v62 = vld [vmem:[#allocation6 + $0x1c8] ss:$28 sps:$4 sm:$0xff]  }
 0x855   :  { %11086 = vmatpush1.bf16.msra.mxu1 %v19043_v1  ;;  %v19127_v1 = vld [vmem:[#allocation6 + $0x460] ss:$28 sps:$4 sm:$0xff]  }
 0x856   :  { %11087 = vmatprep.subr.bf16.mxu1 %v19051_v17  ;;  %v19132_v17 = vld [vmem:[#allocation6 + $0x204] ss:$28 sps:$4 sm:$0xff]  }
 0x859   :  { %11088 = vmatpush1.bf16.msra.mxu1 %v19049_v35  ;;  %v19135_v35 = vld [vmem:[#allocation6 + $0x49c] ss:$28 sps:$4 sm:$0xff]  }
 0x85a   :  { %11089 = vmatprep.subr.bf16.mxu1 %v19057_v59  ;;  %v19130_v59 = vld [vmem:[#allocation6 + $0x200] ss:$28 sps:$4 sm:$0xff]  }
 0x85d   :  { %11090 = vmatpush1.bf16.msra.mxu1 %v19055_v19  ;;  %v19133_v19 = vld [vmem:[#allocation6 + $0x498] ss:$28 sps:$4 sm:$0xff]  }
 0x85e   :  { %11100 = vmatprep.subr.bf16.mxu1 %v19063_v22  ;;  %v19138_v22 = vld [vmem:[#allocation6 + $0x23c] ss:$28 sps:$4 sm:$0xff]  }
 0x860   :  { %11092 = vmatmul.mubr.bf16.vlgmr.msra.gmra.mrb[52].mxu1 %v20695_v13  ;;  %v8792_v13 = vrot.slane %v22034_v31, %v20149_v46 }
 0x861   :  { %11101 = vmatpush1.bf16.msra.mxu1 %v19061_v57  ;;  %11132 = vmatprep.mubr.bf16.mxu1 %v19670_v0  ;;  %v19141_v57 = vld [vmem:[#allocation6 + $0x4d4] ss:$28 sps:$4 sm:$0xff]  }
 0x862   :  { %11102 = vmatprep.subr.bf16.mxu1 %v19072_v21  ;;  %v19136_v21 = vld [vmem:[#allocation6 + $0x238] ss:$28 sps:$4 sm:$0xff]  }
 0x865   :  { %11103 = vmatpush1.bf16.msra.mxu1 %v19070_v16  ;;  %v19139_v16 = vld [vmem:[#allocation6 + $0x4d0] ss:$28 sps:$4 sm:$0xff]  }
 0x866   :  { %13719 = vmatprep.subr.bf16.mxu1 %v19078_v3  ;;  %v19144_v3 = vld [vmem:[#allocation6 + $0x274] ss:$28 sps:$4 sm:$0xff]  }
 0x86c   :  { %16137 = vmatmul.mubr.msk.bf16.vlgmr.msra.gmra.mrb[52].mxu1 %vm335_vm0, %v21984_v25  ;;  %v16990_v25 = vadd.f32 %v22021_v52, %v8792_v13  ;;  %v19108_v52 = vld [vmem:[#allocation6 + $0x124] ss:$28 sps:$4 sm:$0xff]  }
 0x86d   :  { %13720 = vmatpush1.bf16.msra.mxu1 %v19076_v48  ;;  %v19147_v48 = vld [vmem:[#allocation6 + $0x50c] ss:$28 sps:$4 sm:$0xff]   ;;  %v19153_v13 = vld [vmem:[#allocation6 + $0x544] ss:$28 sps:$4 sm:$0xff]  }
 0x86e   :  { %13721 = vmatprep.subr.bf16.mxu1 %v19084_v41  ;;  %v11304_v11 = vmax.f32 %v16990_v25, 0.0  ;;  %v19142_v41 = vld [vmem:[#allocation6 + $0x270] ss:$28 sps:$4 sm:$0xff]   ;;  %v19157_v25 = vld [vmem:[#allocation6 + $0x578] ss:$28 sps:$4 sm:$0xff]  }
 0x870   :  { %v22065_v15 = vpack.c.bf16 %v11304_v11, %v11304_v11  ;;  %v19177_v11 = vld [vmem:[#allocation6 + $0x624] ss:$28 sps:$4 sm:$0xff]  }
 0x871   :  { %13722 = vmatpush1.bf16.msra.mxu1 %v19082_v30  ;;  %v19145_v30 = vld [vmem:[#allocation6 + $0x508] ss:$28 sps:$4 sm:$0xff]  }
 0x872   :  { %13723 = vmatprep.subr.bf16.mxu1 %v19090_v49  ;;  %v19150_v49 = vld [vmem:[#allocation6 + $0x2ac] ss:$28 sps:$4 sm:$0xff]  }
 0x873   :  { %v10806_v60 = vpop.f32.mrb[48].mxu1 }
 0x874   :  { %v16987_v61 = vadd.f32 %v10806_v60, %v8780_v51  ;;  %v10808_v47 = vpop.f32.mrb[49].mxu1  ;;  %v19148_v51 = vld [vmem:[#allocation6 + $0x2a8] ss:$28 sps:$4 sm:$0xff]   ;;  %v19154_v60 = vld [vmem:[#allocation6 + $0x2e0] ss:$28 sps:$4 sm:$0xff]  }
 0x875   :  { %13724 = vmatpush1.bf16.msra.mxu1 %v19088_v55  ;;  %v16988_v4 = vadd.f32 %v10808_v47, %v8784_v58  ;;  %v10810_v5 = vpop.f32.mrb[50].mxu1  ;;  %v19151_v55 = vld [vmem:[#allocation6 + $0x540] ss:$28 sps:$4 sm:$0xff]   ;;  %v19165_v47 = vld [vmem:[#allocation6 + $0x5b4] ss:$28 sps:$4 sm:$0xff]  }
 0x876   :  { %v11301_v8 = vmax.f32 %v16987_v61, 0.0  ;;  %v10811_v18 = vpop.f32.mrb[51].mxu1  ;;  %13725 = vmatprep.subr.bf16.mxu1 %v19096_v6  ;;  %v19156_v58 = vld [vmem:[#allocation6 + $0x2e4] ss:$28 sps:$4 sm:$0xff]   ;;  %v19159_v6 = vld [vmem:[#allocation6 + $0x57c] ss:$28 sps:$4 sm:$0xff]  }
 0x877   :  { %v11302_v10 = vmax.f32 %v16988_v4, 0.0  ;;  %v19162_v61 = vld [vmem:[#allocation6 + $0x31c] ss:$28 sps:$4 sm:$0xff]   ;;  %v19163_v5 = vld [vmem:[#allocation6 + $0x5b0] ss:$28 sps:$4 sm:$0xff]  }
 0x878   :  { %v22061_v7 = vpack.c.bf16 %v11301_v8, %v11301_v8  ;;  %v19160_v4 = vld [vmem:[#allocation6 + $0x318] ss:$28 sps:$4 sm:$0xff]   ;;  %v19171_v8 = vld [vmem:[#allocation6 + $0x5ec] ss:$28 sps:$4 sm:$0xff]  }
 0x879   :  { %v22059_v37 = vpack.c.bf16 %v11302_v10, %v11302_v10  ;;  %13726 = vmatpush1.bf16.msra.mxu1 %v19094_v42  ;;  %v19168_v42 = vld [vmem:[#allocation6 + $0x354] ss:$28 sps:$4 sm:$0xff]   ;;  %v19174_v10 = vld [vmem:[#allocation6 + $0x38c] ss:$28 sps:$4 sm:$0xff]  }
 0x87a   :  { %13727 = vmatprep.subr.bf16.mxu1 %v19102_v9  ;;  %v19166_v18 = vld [vmem:[#allocation6 + $0x350] ss:$28 sps:$4 sm:$0xff]   ;;  %v19169_v9 = vld [vmem:[#allocation6 + $0x5e8] ss:$28 sps:$4 sm:$0xff]  }
 0x87b   :  { %13587 = vmatprep.mubr.bf16.mxu0 %v22059_v37  ;;  %13751 = vmatprep.mubr.bf16.mxu1 %v22059_v37 }
 0x87c   :  { %13588 = vmatmul.mubr.bf16.vlgmr.msra.gmra.mrb[76].mxu0 %v22061_v7 }
 0x87d   :  { %13728 = vmatpush1.bf16.msra.mxu1 %v19100_v14  ;;  %13597 = vmatpush1.bf16.msra.mxu0 %v19103_v54  ;;  %v19172_v14 = vld [vmem:[#allocation6 + $0x388] ss:$28 sps:$4 sm:$0xff]   ;;  %v19175_v54 = vld [vmem:[#allocation6 + $0x620] ss:$28 sps:$4 sm:$0xff]  }
 0x87e   :  { %13628 = vmatprep.mubr.bf16.mxu0 %v22065_v15  ;;  %13729 = vmatprep.subr.bf16.mxu1 %v19108_v52  ;;  %v19180_v52 = vld [vmem:[#allocation6 + $0x3c4] ss:$28 sps:$4 sm:$0xff]  }
 0x87f   :  { %13598 = vmatprep.subr.bf16.mxu0 %v19111_v29  ;;  %v19183_v29 = vld [vmem:[#allocation6 + $0x65c] ss:$28 sps:$4 sm:$0xff]  }
 0x881   :  { %13730 = vmatpush1.bf16.msra.mxu1 %v19106_v50  ;;  %13599 = vmatpush1.bf16.msra.mxu0 %v19109_v23  ;;  %v19178_v50 = vld [vmem:[#allocation6 + $0x3c0] ss:$28 sps:$4 sm:$0xff]   ;;  %v19181_v23 = vld [vmem:[#allocation6 + $0x658] ss:$28 sps:$4 sm:$0xff]  }
 0x882   :  { %13731 = vmatprep.subr.bf16.mxu1 %v19114_v27  ;;  %13600 = vmatprep.subr.bf16.mxu0 %v19117_v28  ;;  %v19186_v27 = vld [vmem:[#allocation6 + $0x3fc] ss:$28 sps:$4 sm:$0xff]   ;;  %v8788_v28 = vrot.slane %v22034_v31, %v20245_v40  ;;  %v19234_v31 = vld [vmem:[#allocation6 + $0x704] ss:$28 sps:$4 sm:$0xff]  }
 0x885   :  { %13732 = vmatpush1.bf16.msra.mxu1 %v19112_v12  ;;  %13601 = vmatpush1.bf16.msra.mxu0 %v19115_v32  ;;  %v19189_v12 = vld [vmem:[#allocation6 + $0x694] ss:$28 sps:$4 sm:$0xff]  }
 0x886   :  { %13733 = vmatprep.subr.bf16.mxu1 %v19120_v34  ;;  %13602 = vmatprep.subr.bf16.mxu0 %v19123_v39  ;;  %v19184_v32 = vld [vmem:[#allocation6 + $0x3f8] ss:$28 sps:$4 sm:$0xff]   ;;  %v19187_v34 = vld [vmem:[#allocation6 + $0x690] ss:$28 sps:$4 sm:$0xff]  }
 0x887   :  { %v19192_v39 = vld [vmem:[#allocation6 + $0x434] ss:$28 sps:$4 sm:$0xff]  }
 0x889   :  { %13734 = vmatpush1.bf16.msra.mxu1 %v19118_v53  ;;  %13603 = vmatpush1.bf16.msra.mxu0 %v19121_v26  ;;  %v16989_v53 = vadd.f32 %v22019_v20, %v8788_v28  ;;  %v19195_v26 = vld [vmem:[#allocation6 + $0x6cc] ss:$28 sps:$4 sm:$0xff]   ;;  %v19240_v20 = vld [vmem:[#allocation6 + $0x73c] ss:$28 sps:$4 sm:$0xff]  }
 0x88a   :  { %13735 = vmatprep.subr.bf16.mxu1 %v19126_v45  ;;  %13604 = vmatprep.subr.bf16.mxu0 %v19129_v44  ;;  %v19190_v45 = vld [vmem:[#allocation6 + $0x430] ss:$28 sps:$4 sm:$0xff]   ;;  %v19193_v44 = vld [vmem:[#allocation6 + $0x6c8] ss:$28 sps:$4 sm:$0xff]   ;;  %v19228_v28 = vld [vmem:[#allocation6 + $0x69c] ss:$28 sps:$4 sm:$0xff]  }
 0x88d   :  { %13736 = vmatpush1.bf16.msra.mxu1 %v19124_v62  ;;  %13605 = vmatpush1.bf16.msra.mxu0 %v19127_v1  ;;  %v19198_v62 = vld [vmem:[#allocation6 + $0x46c] ss:$28 sps:$4 sm:$0xff]   ;;  %v11303_v1 = vmax.f32 %v16989_v53, 0.0 }
 0x88e   :  { %13737 = vmatprep.subr.bf16.mxu1 %v19132_v17  ;;  %13606 = vmatprep.subr.bf16.mxu0 %v19135_v35  ;;  %v19196_v17 = vld [vmem:[#allocation6 + $0x468] ss:$28 sps:$4 sm:$0xff]   ;;  %v19292_v53 = vld [vmem:[#allocation6 + $0x930] ss:$28 sps:$4 sm:$0xff]  }
 0x88f   :  { %v19201_v35 = vld [vmem:[#allocation6 + $0x4a4] ss:$28 sps:$4 sm:$0xff]  }
 0x891   :  { %13738 = vmatpush1.bf16.msra.mxu1 %v19130_v59  ;;  %13607 = vmatpush1.bf16.msra.mxu0 %v19133_v19  ;;  %v19232_v59 = vld [vmem:[#allocation6 + $0x700] ss:$28 sps:$4 sm:$0xff]   ;;  %v22074_v19 = vpack.c.bf16 %v11303_v1, %v11303_v1 }
 0x892   :  { %13739 = vmatprep.subr.bf16.mxu1 %v19138_v22  ;;  %13608 = vmatprep.subr.bf16.mxu0 %v19141_v57  ;;  %v19199_v22 = vld [vmem:[#allocation6 + $0x4a0] ss:$28 sps:$4 sm:$0xff]  }
 0x893   :  { %v19204_v57 = vld [vmem:[#allocation6 + $0x4dc] ss:$28 sps:$4 sm:$0xff]   ;;  %v19306_v1 = vld [vmem:[#allocation6 + $0x9a4] ss:$28 sps:$4 sm:$0xff]  }
 0x895   :  { %13740 = vmatpush1.bf16.msra.mxu1 %v19136_v21  ;;  %13609 = vmatpush1.bf16.msra.mxu0 %v19139_v16  ;;  %v19238_v21 = vld [vmem:[#allocation6 + $0x738] ss:$28 sps:$4 sm:$0xff]  }
 0x896   :  { %13741 = vmatprep.subr.bf16.mxu1 %v19144_v3  ;;  %13610 = vmatprep.subr.bf16.mxu0 %v19147_v48  ;;  %v19246_v16 = vld [vmem:[#allocation6 + $0x774] ss:$28 sps:$4 sm:$0xff]  }
 0x897   :  { %v19202_v3 = vld [vmem:[#allocation6 + $0x4d8] ss:$28 sps:$4 sm:$0xff]  }
 0x898   :  { %v19207_v48 = vld [vmem:[#allocation6 + $0x514] ss:$28 sps:$4 sm:$0xff]  }
 0x899   :  { %13742 = vmatpush1.bf16.msra.mxu1 %v19142_v41  ;;  %13611 = vmatpush1.bf16.msra.mxu0 %v19145_v30  ;;  %v19244_v41 = vld [vmem:[#allocation6 + $0x770] ss:$28 sps:$4 sm:$0xff]  }
 0x89a   :  { %13743 = vmatprep.subr.bf16.mxu1 %v19150_v49  ;;  %13612 = vmatprep.subr.bf16.mxu0 %v19153_v13  ;;  %v19252_v30 = vld [vmem:[#allocation6 + $0x7ac] ss:$28 sps:$4 sm:$0xff]  }
 0x89b   :  { %v19205_v49 = vld [vmem:[#allocation6 + $0x510] ss:$28 sps:$4 sm:$0xff]  }
 0x89c   :  { %v19210_v13 = vld [vmem:[#allocation6 + $0x54c] ss:$28 sps:$4 sm:$0xff]  }
 0x89d   :  { %13744 = vmatpush1.bf16.msra.mxu1 %v19148_v51  ;;  %13613 = vmatpush1.bf16.msra.mxu0 %v19151_v55  ;;  %v19250_v51 = vld [vmem:[#allocation6 + $0x7a8] ss:$28 sps:$4 sm:$0xff]  }
 0x89e   :  { %13745 = vmatprep.subr.bf16.mxu1 %v19156_v58  ;;  %13614 = vmatprep.subr.bf16.mxu0 %v19159_v6  ;;  %v19258_v55 = vld [vmem:[#allocation6 + $0x7e4] ss:$28 sps:$4 sm:$0xff]  }
 0x89f   :  { %v19208_v58 = vld [vmem:[#allocation6 + $0x548] ss:$28 sps:$4 sm:$0xff]  }
 0x8a0   :  { %v19213_v6 = vld [vmem:[#allocation6 + $0x584] ss:$28 sps:$4 sm:$0xff]  }
 0x8a1   :  { %13746 = vmatpush1.bf16.msra.mxu1 %v19154_v60  ;;  %13615 = vmatpush1.bf16.msra.mxu0 %v19157_v25  ;;  %v19256_v60 = vld [vmem:[#allocation6 + $0x7e0] ss:$28 sps:$4 sm:$0xff]  }
 0x8a2   :  { %13747 = vmatprep.subr.bf16.mxu1 %v19162_v61  ;;  %13616 = vmatprep.subr.bf16.mxu0 %v19165_v47  ;;  %v19264_v25 = vld [vmem:[#allocation6 + $0x81c] ss:$28 sps:$4 sm:$0xff]  }
 0x8a3   :  { %v19211_v61 = vld [vmem:[#allocation6 + $0x580] ss:$28 sps:$4 sm:$0xff]  }
 0x8a4   :  { %v19216_v47 = vld [vmem:[#allocation6 + $0x5bc] ss:$28 sps:$4 sm:$0xff]  }
 0x8a5   :  { %13748 = vmatpush1.bf16.msra.mxu1 %v19160_v4  ;;  %13617 = vmatpush1.bf16.msra.mxu0 %v19163_v5  ;;  %v19262_v4 = vld [vmem:[#allocation6 + $0x818] ss:$28 sps:$4 sm:$0xff]  }
 0x8a6   :  { %13749 = vmatprep.subr.bf16.mxu1 %v19168_v42  ;;  %13618 = vmatprep.subr.bf16.mxu0 %v19171_v8  ;;  %v19270_v5 = vld [vmem:[#allocation6 + $0x854] ss:$28 sps:$4 sm:$0xff]  }
 0x8a7   :  { %v19214_v42 = vld [vmem:[#allocation6 + $0x5b8] ss:$28 sps:$4 sm:$0xff]  }
 0x8a8   :  { %v19219_v8 = vld [vmem:[#allocation6 + $0x5f4] ss:$28 sps:$4 sm:$0xff]  }
 0x8a9   :  { %13750 = vmatpush1.bf16.msra.mxu1 %v19166_v18  ;;  %13619 = vmatpush1.bf16.msra.mxu0 %v19169_v9  ;;  %v19268_v18 = vld [vmem:[#allocation6 + $0x850] ss:$28 sps:$4 sm:$0xff]  }
 0x8aa   :  { %13760 = vmatprep.subr.bf16.mxu1 %v19174_v10  ;;  %13620 = vmatprep.subr.bf16.mxu0 %v19177_v11  ;;  %v19276_v9 = vld [vmem:[#allocation6 + $0x88c] ss:$28 sps:$4 sm:$0xff]  }
 0x8ab   :  { %v19217_v10 = vld [vmem:[#allocation6 + $0x5f0] ss:$28 sps:$4 sm:$0xff]  }
 0x8ac   :  { %13752 = vmatmul.mubr.bf16.vlgmr.msra.gmra.mrb[56].mxu1 %v22061_v7  ;;  %v19222_v11 = vld [vmem:[#allocation6 + $0x62c] ss:$28 sps:$4 sm:$0xff]  }
 0x8ad   :  { %13761 = vmatpush1.bf16.msra.mxu1 %v19172_v14  ;;  %13792 = vmatprep.mubr.bf16.mxu1 %v22065_v15  ;;  %v19274_v14 = vld [vmem:[#allocation6 + $0x888] ss:$28 sps:$4 sm:$0xff]  }
 0x8ae   :  { %13621 = vmatpush1.bf16.msra.mxu0 %v19175_v54  ;;  %13762 = vmatprep.subr.bf16.mxu1 %v19180_v52  ;;  %v19282_v54 = vld [vmem:[#allocation6 + $0x8c4] ss:$28 sps:$4 sm:$0xff]  }
 0x8af   :  { %13622 = vmatprep.subr.bf16.mxu0 %v19183_v29  ;;  %v19220_v52 = vld [vmem:[#allocation6 + $0x628] ss:$28 sps:$4 sm:$0xff]  }
 0x8b0   :  { %v19225_v29 = vld [vmem:[#allocation6 + $0x664] ss:$28 sps:$4 sm:$0xff]  }
 0x8b1   :  { %13763 = vmatpush1.bf16.msra.mxu1 %v19178_v50  ;;  %v19280_v50 = vld [vmem:[#allocation6 + $0x8c0] ss:$28 sps:$4 sm:$0xff]  }
 0x8b2   :  { %13623 = vmatpush1.bf16.msra.mxu0 %v19181_v23  ;;  %13764 = vmatprep.subr.bf16.mxu1 %v19186_v27  ;;  %v19288_v23 = vld [vmem:[#allocation6 + $0x8fc] ss:$28 sps:$4 sm:$0xff]  }
 0x8b3   :  { %13624 = vmatprep.subr.bf16.mxu0 %v19189_v12  ;;  %v19223_v27 = vld [vmem:[#allocation6 + $0x660] ss:$28 sps:$4 sm:$0xff]   ;;  %v19286_v12 = vld [vmem:[#allocation6 + $0x8f8] ss:$28 sps:$4 sm:$0xff]  }
 0x8b5   :  { %13765 = vmatpush1.bf16.msra.mxu1 %v19184_v32  ;;  %v19294_v32 = vld [vmem:[#allocation6 + $0x934] ss:$28 sps:$4 sm:$0xff]  }
 0x8b6   :  { %13625 = vmatpush1.bf16.msra.mxu0 %v19187_v34  ;;  %13766 = vmatprep.subr.bf16.mxu1 %v19192_v39  ;;  %v19226_v34 = vld [vmem:[#allocation6 + $0x698] ss:$28 sps:$4 sm:$0xff]  }
 0x8b7   :  { %13626 = vmatprep.subr.bf16.mxu0 %v19195_v26  ;;  %v19231_v39 = vld [vmem:[#allocation6 + $0x6d4] ss:$28 sps:$4 sm:$0xff]   ;;  %v19300_v26 = vld [vmem:[#allocation6 + $0x96c] ss:$28 sps:$4 sm:$0xff]  }
 0x8b9   :  { %13767 = vmatpush1.bf16.msra.mxu1 %v19190_v45  ;;  %v19229_v45 = vld [vmem:[#allocation6 + $0x6d0] ss:$28 sps:$4 sm:$0xff]  }
 0x8ba   :  { %13627 = vmatpush1.bf16.msra.mxu0 %v19193_v44  ;;  %13768 = vmatprep.subr.bf16.mxu1 %v19198_v62  ;;  %v19237_v44 = vld [vmem:[#allocation6 + $0x70c] ss:$28 sps:$4 sm:$0xff]  }
 0x8bb   :  { %13637 = vmatprep.subr.bf16.mxu0 %v19234_v31  ;;  %v19298_v62 = vld [vmem:[#allocation6 + $0x968] ss:$28 sps:$4 sm:$0xff]  }
 0x8bc   :  { %v19235_v31 = vld [vmem:[#allocation6 + $0x708] ss:$28 sps:$4 sm:$0xff]  }
 0x8bd   :  { %13629 = vmatmul.mubr.bf16.vlgmr.msra.gmra.mrb[76].mxu0 %v22074_v19  ;;  %13769 = vmatpush1.bf16.msra.mxu1 %v19196_v17  ;;  %v19243_v17 = vld [vmem:[#allocation6 + $0x744] ss:$28 sps:$4 sm:$0xff]  }
 0x8be   :  { %13770 = vmatprep.subr.bf16.mxu1 %v19201_v35  ;;  %13638 = vmatpush1.bf16.msra.mxu0 %v19232_v59  ;;  %v19304_v35 = vld [vmem:[#allocation6 + $0x9a0] ss:$28 sps:$4 sm:$0xff]  }
 0x8bf   :  { %13639 = vmatprep.subr.bf16.mxu0 %v19240_v20  ;;  %v19312_v59 = vld [vmem:[#allocation6 + $0x9dc] ss:$28 sps:$4 sm:$0xff]  }
 0x8c0   :  { %v19241_v20 = vld [vmem:[#allocation6 + $0x740] ss:$28 sps:$4 sm:$0xff]  }
 0x8c1   :  { %13771 = vmatpush1.bf16.msra.mxu1 %v19199_v22  ;;  %v19249_v22 = vld [vmem:[#allocation6 + $0x77c] ss:$28 sps:$4 sm:$0xff]  }
 0x8c2   :  { %13772 = vmatprep.subr.bf16.mxu1 %v19204_v57  ;;  %13640 = vmatpush1.bf16.msra.mxu0 %v19238_v21  ;;  %v19310_v57 = vld [vmem:[#allocation6 + $0x9d8] ss:$28 sps:$4 sm:$0xff]  }
 0x8c3   :  { %13641 = vmatprep.subr.bf16.mxu0 %v19246_v16  ;;  %v19318_v21 = vld [vmem:[#allocation6 + $0xa14] ss:$28 sps:$4 sm:$0xff]  }
 0x8c4   :  { %v19247_v16 = vld [vmem:[#allocation6 + $0x778] ss:$28 sps:$4 sm:$0xff]  }
 0x8c5   :  { %13773 = vmatpush1.bf16.msra.mxu1 %v19202_v3  ;;  %v19255_v3 = vld [vmem:[#allocation6 + $0x7b4] ss:$28 sps:$4 sm:$0xff]  }
 0x8c6   :  { %13774 = vmatprep.subr.bf16.mxu1 %v19207_v48  ;;  %13642 = vmatpush1.bf16.msra.mxu0 %v19244_v41  ;;  %v19316_v48 = vld [vmem:[#allocation6 + $0xa10] ss:$28 sps:$4 sm:$0xff]  }
 0x8c7   :  { %13643 = vmatprep.subr.bf16.mxu0 %v19252_v30  ;;  %v19324_v41 = vld [vmem:[#allocation6 + $0xa4c] ss:$28 sps:$4 sm:$0xff]  }
 0x8c8   :  { %v19253_v30 = vld [vmem:[#allocation6 + $0x7b0] ss:$28 sps:$4 sm:$0xff]  }
 0x8c9   :  { %13775 = vmatpush1.bf16.msra.mxu1 %v19205_v49  ;;  %v19261_v49 = vld [vmem:[#allocation6 + $0x7ec] ss:$28 sps:$4 sm:$0xff]  }
 0x8ca   :  { %13776 = vmatprep.subr.bf16.mxu1 %v19210_v13  ;;  %13644 = vmatpush1.bf16.msra.mxu0 %v19250_v51  ;;  %v19322_v13 = vld [vmem:[#allocation6 + $0xa48] ss:$28 sps:$4 sm:$0xff]  }
 0x8cb   :  { %13645 = vmatprep.subr.bf16.mxu0 %v19258_v55  ;;  %v19330_v51 = vld [vmem:[#allocation6 + $0xa84] ss:$28 sps:$4 sm:$0xff]  }
 0x8cc   :  { %v19259_v55 = vld [vmem:[#allocation6 + $0x7e8] ss:$28 sps:$4 sm:$0xff]  }
 0x8cd   :  { %13777 = vmatpush1.bf16.msra.mxu1 %v19208_v58  ;;  %v19267_v58 = vld [vmem:[#allocation6 + $0x824] ss:$28 sps:$4 sm:$0xff]  }
 0x8ce   :  { %13778 = vmatprep.subr.bf16.mxu1 %v19213_v6  ;;  %13646 = vmatpush1.bf16.msra.mxu0 %v19256_v60  ;;  %v19265_v6 = vld [vmem:[#allocation6 + $0x820] ss:$28 sps:$4 sm:$0xff]  }
 0x8cf   :  { %13647 = vmatprep.subr.bf16.mxu0 %v19264_v25  ;;  %v19273_v60 = vld [vmem:[#allocation6 + $0x85c] ss:$28 sps:$4 sm:$0xff]  }
 0x8d0   :  { %v19271_v25 = vld [vmem:[#allocation6 + $0x858] ss:$28 sps:$4 sm:$0xff]  }
 0x8d1   :  { %13779 = vmatpush1.bf16.msra.mxu1 %v19211_v61  ;;  %v19279_v61 = vld [vmem:[#allocation6 + $0x894] ss:$28 sps:$4 sm:$0xff]  }
 0x8d2   :  { %13780 = vmatprep.subr.bf16.mxu1 %v19216_v47  ;;  %13648 = vmatpush1.bf16.msra.mxu0 %v19262_v4  ;;  %v19277_v47 = vld [vmem:[#allocation6 + $0x890] ss:$28 sps:$4 sm:$0xff]  }
 0x8d3   :  { %13649 = vmatprep.subr.bf16.mxu0 %v19270_v5  ;;  %v19285_v4 = vld [vmem:[#allocation6 + $0x8cc] ss:$28 sps:$4 sm:$0xff]  }
 0x8d4   :  { %v19283_v5 = vld [vmem:[#allocation6 + $0x8c8] ss:$28 sps:$4 sm:$0xff]  }
 0x8d5   :  { %13781 = vmatpush1.bf16.msra.mxu1 %v19214_v42  ;;  %v19291_v42 = vld [vmem:[#allocation6 + $0x904] ss:$28 sps:$4 sm:$0xff]  }
 0x8d6   :  { %13782 = vmatprep.subr.bf16.mxu1 %v19219_v8  ;;  %13650 = vmatpush1.bf16.msra.mxu0 %v19268_v18  ;;  %v19289_v8 = vld [vmem:[#allocation6 + $0x900] ss:$28 sps:$4 sm:$0xff]  }
 0x8d7   :  { %13651 = vmatprep.subr.bf16.mxu0 %v19276_v9  ;;  %v19297_v18 = vld [vmem:[#allocation6 + $0x93c] ss:$28 sps:$4 sm:$0xff]  }
 0x8d8   :  { %v19295_v9 = vld [vmem:[#allocation6 + $0x938] ss:$28 sps:$4 sm:$0xff]  }
 0x8d9   :  { %13783 = vmatpush1.bf16.msra.mxu1 %v19217_v10  ;;  %v19303_v10 = vld [vmem:[#allocation6 + $0x974] ss:$28 sps:$4 sm:$0xff]  }
 0x8da   :  { %13784 = vmatprep.subr.bf16.mxu1 %v19222_v11  ;;  %13652 = vmatpush1.bf16.msra.mxu0 %v19274_v14  ;;  %v19301_v11 = vld [vmem:[#allocation6 + $0x970] ss:$28 sps:$4 sm:$0xff]  }
 0x8db   :  { %13653 = vmatprep.subr.bf16.mxu0 %v19282_v54  ;;  %v19309_v14 = vld [vmem:[#allocation6 + $0x9ac] ss:$28 sps:$4 sm:$0xff]  }
 0x8dc   :  { %v19307_v54 = vld [vmem:[#allocation6 + $0x9a8] ss:$28 sps:$4 sm:$0xff]  }
 0x8dd   :  { %13785 = vmatpush1.bf16.msra.mxu1 %v19220_v52  ;;  %v19315_v52 = vld [vmem:[#allocation6 + $0x9e4] ss:$28 sps:$4 sm:$0xff]  }
 0x8de   :  { %13786 = vmatprep.subr.bf16.mxu1 %v19225_v29  ;;  %13654 = vmatpush1.bf16.msra.mxu0 %v19280_v50  ;;  %v19313_v29 = vld [vmem:[#allocation6 + $0x9e0] ss:$28 sps:$4 sm:$0xff]  }
 0x8df   :  { %13655 = vmatprep.subr.bf16.mxu0 %v19288_v23  ;;  %v19321_v50 = vld [vmem:[#allocation6 + $0xa1c] ss:$28 sps:$4 sm:$0xff]  }
 0x8e0   :  { %v19319_v23 = vld [vmem:[#allocation6 + $0xa18] ss:$28 sps:$4 sm:$0xff]  }
 0x8e1   :  { %13787 = vmatpush1.bf16.msra.mxu1 %v19223_v27  ;;  %v19327_v27 = vld [vmem:[#allocation6 + $0xa54] ss:$28 sps:$4 sm:$0xff]  }
 0x8e2   :  { %13788 = vmatprep.subr.bf16.mxu1 %v19228_v28  ;;  %13656 = vmatpush1.bf16.msra.mxu0 %v19286_v12  ;;  %v19325_v28 = vld [vmem:[#allocation6 + $0xa50] ss:$28 sps:$4 sm:$0xff]  }
 0x8e3   :  { %13657 = vmatprep.subr.bf16.mxu0 %v19294_v32  ;;  %v19333_v12 = vld [vmem:[#allocation6 + $0xa8c] ss:$28 sps:$4 sm:$0xff]   ;;  %v19594_v32 = vld [vmem:[%s22320_s14] sm:$0x7f] }
 0x8e5   :  { %13789 = vmatpush1.bf16.msra.mxu1 %v19226_v34  ;;  %v8796_v34 = vrot.slane %v19594_v32, %v20272_v63 }
 0x8e6   :  { %13790 = vmatprep.subr.bf16.mxu1 %v19231_v39  ;;  %13658 = vmatpush1.bf16.msra.mxu0 %v19292_v53  ;;  %v8800_v39 = vrot.slane %v19594_v32, %v20366_v2  ;;  %v19375_v32 = vld [vmem:[#allocation6 + $0x198] ss:$28 sps:$4 sm:$0xff]  }
 0x8e7   :  { %13659 = vmatprep.subr.bf16.mxu0 %v19300_v26 }
 0x8e9   :  { %13791 = vmatpush1.bf16.msra.mxu1 %v19229_v45 }
 0x8ea   :  { %13801 = vmatprep.subr.bf16.mxu1 %v19237_v44  ;;  %13660 = vmatpush1.bf16.msra.mxu0 %v19298_v62 }
 0x8eb   :  { %13661 = vmatprep.subr.bf16.mxu0 %v19306_v1 }
 0x8ec   :  { %13793 = vmatmul.mubr.bf16.vlgmr.msra.gmra.mrb[56].mxu1 %v22074_v19 }
 0x8ed   :  { %13802 = vmatpush1.bf16.msra.mxu1 %v19235_v31 }
 0x8ee   :  { %13803 = vmatprep.subr.bf16.mxu1 %v19243_v17  ;;  %13662 = vmatpush1.bf16.msra.mxu0 %v19304_v35 }
 0x8ef   :  { %13663 = vmatprep.subr.bf16.mxu0 %v19312_v59  ;;  %v19328_v59 = vld [vmem:[#allocation6 + $0xa80] ss:$28 sps:$4 sm:$0xff]  }
 0x8f1   :  { %13804 = vmatpush1.bf16.msra.mxu1 %v19241_v20  ;;  %v19331_v20 = vld [vmem:[#allocation6 + $0xa88] ss:$28 sps:$4 sm:$0xff]  }
 0x8f2   :  { %13805 = vmatprep.subr.bf16.mxu1 %v19249_v22  ;;  %13664 = vmatpush1.bf16.msra.mxu0 %v19310_v57  ;;  %v19336_v57 = vld [vmem:[#allocation6 + $0xabc] ss:$28 sps:$4 sm:$0xff]  }
 0x8f3   :  { %13665 = vmatprep.subr.bf16.mxu0 %v19318_v21  ;;  %v19339_v21 = vld [vmem:[#allocation6 + $0xac4] ss:$28 sps:$4 sm:$0xff]  }
 0x8f5   :  { %13806 = vmatpush1.bf16.msra.mxu1 %v19247_v16  ;;  %v19334_v16 = vld [vmem:[#allocation6 + $0xab8] ss:$28 sps:$4 sm:$0xff]  }
 0x8f6   :  { %13807 = vmatprep.subr.bf16.mxu1 %v19255_v3  ;;  %13666 = vmatpush1.bf16.msra.mxu0 %v19316_v48  ;;  %v19337_v3 = vld [vmem:[#allocation6 + $0xac0] ss:$28 sps:$4 sm:$0xff]   ;;  %v19342_v48 = vld [vmem:[#allocation6 + $0x14] ss:$28 sps:$4 sm:$0xff]  }
 0x8f7   :  { %13667 = vmatprep.subr.bf16.mxu0 %v19324_v41  ;;  %v19343_v41 = vld [vmem:[#allocation6 + $0x1d8] ss:$28 sps:$4 sm:$0xff]  }
 0x8f9   :  { %13808 = vmatpush1.bf16.msra.mxu1 %v19253_v30  ;;  %v11307_v30 = vmax.f32 %v22044_v43, 0.0  ;;  %v19352_v43 = vld [vmem:[#allocation6 + $0x84] ss:$28 sps:$4 sm:$0xff]  }
 0x8fa   :  { %13809 = vmatprep.subr.bf16.mxu1 %v19261_v49  ;;  %13668 = vmatpush1.bf16.msra.mxu0 %v19322_v13  ;;  %v19340_v49 = vld [vmem:[#allocation6 + $0x10] ss:$28 sps:$4 sm:$0xff]   ;;  %v19344_v13 = vld [vmem:[#allocation6 + $0x18] ss:$28 sps:$4 sm:$0xff]  }
 0x8fb   :  { %13678 = vmatprep.subr.bf16.mxu0 %v19330_v51  ;;  %v22094_v51 = vpack.c.bf16 %v11307_v30, %v11307_v30  ;;  %v19403_v30 = vld [vmem:[#allocation6 + $0x638] ss:$28 sps:$4 sm:$0xff]  }
 0x8fd   :  { %13810 = vmatpush1.bf16.msra.mxu1 %v19259_v55  ;;  %v19347_v55 = vld [vmem:[#allocation6 + $0x4c] ss:$28 sps:$4 sm:$0xff]  }
 0x8fe   :  { %13811 = vmatprep.subr.bf16.mxu1 %v19267_v58  ;;  %v19348_v58 = vld [vmem:[#allocation6 + $0x210] ss:$28 sps:$4 sm:$0xff]  }
 0x901   :  { %13812 = vmatpush1.bf16.msra.mxu1 %v19265_v6  ;;  %v19345_v6 = vld [vmem:[#allocation6 + $0x48] ss:$28 sps:$4 sm:$0xff]  }
 0x902   :  { %13813 = vmatprep.subr.bf16.mxu1 %v19273_v60  ;;  %v19349_v60 = vld [vmem:[#allocation6 + $0x50] ss:$28 sps:$4 sm:$0xff]  }
 0x905   :  { %13814 = vmatpush1.bf16.msra.mxu1 %v19271_v25  ;;  %v19353_v25 = vld [vmem:[#allocation6 + $0x248] ss:$28 sps:$4 sm:$0xff]  }
 0x906   :  { %13815 = vmatprep.subr.bf16.mxu1 %v19279_v61  ;;  %v19350_v61 = vld [vmem:[#allocation6 + $0x80] ss:$28 sps:$4 sm:$0xff]  }
 0x909   :  { %13816 = vmatpush1.bf16.msra.mxu1 %v19277_v47  ;;  %v19354_v47 = vld [vmem:[#allocation6 + $0x88] ss:$28 sps:$4 sm:$0xff]  }
 0x90a   :  { %13817 = vmatprep.subr.bf16.mxu1 %v19285_v4  ;;  %v19357_v4 = vld [vmem:[#allocation6 + $0xbc] ss:$28 sps:$4 sm:$0xff]  }
 0x90d   :  { %13818 = vmatpush1.bf16.msra.mxu1 %v19283_v5  ;;  %v19358_v5 = vld [vmem:[#allocation6 + $0x280] ss:$28 sps:$4 sm:$0xff]  }
 0x90e   :  { %13819 = vmatprep.subr.bf16.mxu1 %v19291_v42  ;;  %v19355_v42 = vld [vmem:[#allocation6 + $0xb8] ss:$28 sps:$4 sm:$0xff]  }
 0x911   :  { %13820 = vmatpush1.bf16.msra.mxu1 %v19289_v8  ;;  %v19359_v8 = vld [vmem:[#allocation6 + $0xc0] ss:$28 sps:$4 sm:$0xff]  }
 0x912   :  { %13821 = vmatprep.subr.bf16.mxu1 %v19297_v18  ;;  %v19362_v18 = vld [vmem:[#allocation6 + $0xf4] ss:$28 sps:$4 sm:$0xff]  }
 0x915   :  { %13822 = vmatpush1.bf16.msra.mxu1 %v19295_v9  ;;  %v19360_v9 = vld [vmem:[#allocation6 + $0xf0] ss:$28 sps:$4 sm:$0xff]  }
 0x916   :  { %13823 = vmatprep.subr.bf16.mxu1 %v19303_v10  ;;  %v19364_v10 = vld [vmem:[#allocation6 + $0xf8] ss:$28 sps:$4 sm:$0xff]  }
 0x919   :  { %13824 = vmatpush1.bf16.msra.mxu1 %v19301_v11  ;;  %v19367_v11 = vld [vmem:[#allocation6 + $0x12c] ss:$28 sps:$4 sm:$0xff]  }
 0x91a   :  { %13825 = vmatprep.subr.bf16.mxu1 %v19309_v14  ;;  %v19368_v14 = vld [vmem:[#allocation6 + $0x2f0] ss:$28 sps:$4 sm:$0xff]  }
 0x91d   :  { %13826 = vmatpush1.bf16.msra.mxu1 %v19307_v54  ;;  %v19365_v54 = vld [vmem:[#allocation6 + $0x128] ss:$28 sps:$4 sm:$0xff]  }
 0x91e   :  { %13827 = vmatprep.subr.bf16.mxu1 %v19315_v52  ;;  %v19369_v52 = vld [vmem:[#allocation6 + $0x130] ss:$28 sps:$4 sm:$0xff]  }
 0x921   :  { %13828 = vmatpush1.bf16.msra.mxu1 %v19313_v29  ;;  %v19372_v29 = vld [vmem:[#allocation6 + $0x164] ss:$28 sps:$4 sm:$0xff]  }
 0x922   :  { %13829 = vmatprep.subr.bf16.mxu1 %v19321_v50  ;;  %v19373_v50 = vld [vmem:[#allocation6 + $0x328] ss:$28 sps:$4 sm:$0xff]  }
 0x925   :  { %13830 = vmatpush1.bf16.msra.mxu1 %v19319_v23  ;;  %v19370_v23 = vld [vmem:[#allocation6 + $0x160] ss:$28 sps:$4 sm:$0xff]  }
 0x926   :  { %13831 = vmatprep.subr.bf16.mxu1 %v19327_v27  ;;  %v19374_v27 = vld [vmem:[#allocation6 + $0x168] ss:$28 sps:$4 sm:$0xff]  }
 0x929   :  { %13832 = vmatpush1.bf16.msra.mxu1 %v19325_v28  ;;  %v19377_v28 = vld [vmem:[#allocation6 + $0x19c] ss:$28 sps:$4 sm:$0xff]  }
 0x92a   :  { %13842 = vmatprep.subr.bf16.mxu1 %v19333_v12  ;;  %v19378_v12 = vld [vmem:[#allocation6 + $0x360] ss:$28 sps:$4 sm:$0xff]  }
 0x93f   :  { %v11134_v53 = vpop.f32.mrb[52].mxu1 }
 0x940   :  { %v16991_v26 = vadd.f32 %v11134_v53, %v8796_v34  ;;  %v11136_v45 = vpop.f32.mrb[53].mxu1  ;;  %v19379_v34 = vld [vmem:[#allocation6 + $0x1a0] ss:$28 sps:$4 sm:$0xff]   ;;  %v19383_v53 = vld [vmem:[#allocation6 + $0x558] ss:$28 sps:$4 sm:$0xff]  }
 0x941   :  { %v16992_v44 = vadd.f32 %v11136_v45, %v8800_v39  ;;  %v11138_v62 = vpop.f32.mrb[54].mxu1  ;;  %v19382_v39 = vld [vmem:[#allocation6 + $0x1d4] ss:$28 sps:$4 sm:$0xff]  }
 0x942   :  { %v11305_v1 = vmax.f32 %v16991_v26, 0.0  ;;  %v11139_v31 = vpop.f32.mrb[55].mxu1  ;;  %v19380_v26 = vld [vmem:[#allocation6 + $0x1d0] ss:$28 sps:$4 sm:$0xff]   ;;  %v19384_v45 = vld [vmem:[#allocation6 + $0x398] ss:$28 sps:$4 sm:$0xff]  }
 0x943   :  { %v11306_v17 = vmax.f32 %v16992_v44, 0.0  ;;  %v19387_v44 = vld [vmem:[#allocation6 + $0x20c] ss:$28 sps:$4 sm:$0xff]  }
 0x944   :  { %v22085_v22 = vpack.c.bf16 %v11305_v1, %v11305_v1  ;;  %v19388_v62 = vld [vmem:[#allocation6 + $0x590] ss:$28 sps:$4 sm:$0xff]   ;;  %v19385_v1 = vld [vmem:[#allocation6 + $0x208] ss:$28 sps:$4 sm:$0xff]  }
 0x945   :  { %v22083_v35 = vpack.c.bf16 %v11306_v17, %v11306_v17  ;;  %v19389_v31 = vld [vmem:[#allocation6 + $0x3d0] ss:$28 sps:$4 sm:$0xff]   ;;  %v19392_v17 = vld [vmem:[#allocation6 + $0x244] ss:$28 sps:$4 sm:$0xff]  }
 0x947   :  { %13669 = vmatprep.mubr.bf16.mxu0 %v22083_v35  ;;  %13833 = vmatprep.mubr.bf16.mxu1 %v22083_v35 }
 0x948   :  { %13670 = vmatmul.mubr.bf16.vlgmr.msra.gmra.mrb[76].mxu0 %v22085_v22  ;;  %13834 = vmatmul.mubr.bf16.vlgmr.msra.gmra.mrb[56].mxu1 %v22085_v22 }
 0x949   :  { %13679 = vmatpush1.bf16.msra.mxu0 %v19328_v59  ;;  %13843 = vmatpush1.bf16.msra.mxu1 %v19331_v20  ;;  %v19393_v59 = vld [vmem:[#allocation6 + $0x5c8] ss:$28 sps:$4 sm:$0xff]   ;;  %v19390_v20 = vld [vmem:[#allocation6 + $0x240] ss:$28 sps:$4 sm:$0xff]  }
 0x94a   :  { %13680 = vmatprep.subr.bf16.mxu0 %v19336_v57  ;;  %13844 = vmatprep.subr.bf16.mxu1 %v19339_v21  ;;  %v19394_v57 = vld [vmem:[#allocation6 + $0x408] ss:$28 sps:$4 sm:$0xff]   ;;  %v19397_v21 = vld [vmem:[#allocation6 + $0x27c] ss:$28 sps:$4 sm:$0xff]  }
 0x94b   :  { %13710 = vmatprep.mubr.bf16.mxu0 %v19670_v0  ;;  %13874 = vmatprep.mubr.bf16.mxu1 %v19670_v0 }
 0x94d   :  { %13681 = vmatpush1.bf16.msra.mxu0 %v19334_v16  ;;  %13845 = vmatpush1.bf16.msra.mxu1 %v19337_v3  ;;  %v19398_v16 = vld [vmem:[#allocation6 + $0x600] ss:$28 sps:$4 sm:$0xff]   ;;  %v19395_v3 = vld [vmem:[#allocation6 + $0x278] ss:$28 sps:$4 sm:$0xff]  }
 0x94e   :  { %13883 = vmatprep.subr.bf16.mxu0 %v19342_v48  ;;  %16779 = vmatprep.subr.bf16.mxu1 %v19343_v41  ;;  %v19399_v48 = vld [vmem:[#allocation6 + $0x440] ss:$28 sps:$4 sm:$0xff]   ;;  %v19402_v41 = vld [vmem:[#allocation6 + $0x2b4] ss:$28 sps:$4 sm:$0xff]  }
 0x954   :  { %16489 = vmatmul.mubr.msk.bf16.vlgmr.msra.gmra.mrb[76].mxu0 %vm335_vm0, %v22094_v51  ;;  %16490 = vmatmul.mubr.msk.bf16.vlgmr.msra.gmra.mrb[56].mxu1 %vm335_vm0, %v22094_v51 }
 0x955   :  { %13884 = vmatpush1.bf16.msra.mxu0 %v19340_v49  ;;  %16780 = vmatpush3.bf16.msra.mxu1 %v19344_v13  ;;  %v19400_v49 = vld [vmem:[#allocation6 + $0x2b0] ss:$28 sps:$4 sm:$0xff]   ;;  %v19404_v13 = vld [vmem:[#allocation6 + $0x478] ss:$28 sps:$4 sm:$0xff]  }
 0x956   :  { %13915 = vmatprep.mubr.bf16.mxu0 %v22059_v37  ;;  %14079 = vmatprep.mubr.bf16.mxu1 %v22059_v37  ;;  %v19363_v37 = vld [vmem:[#allocation6 + $0x2b8] ss:$28 sps:$4 sm:$0xff]  }
 0x957   :  { %13885 = vmatprep.subr.bf16.mxu0 %v19347_v55  ;;  %16781 = vmatprep.subr.bf16.mxu1 %v19348_v58  ;;  %v19407_v55 = vld [vmem:[#allocation6 + $0x2ec] ss:$28 sps:$4 sm:$0xff]  }
 0x958   :  { %v19408_v58 = vld [vmem:[#allocation6 + $0x670] ss:$28 sps:$4 sm:$0xff]  }
 0x959   :  { %13886 = vmatpush1.bf16.msra.mxu0 %v19345_v6  ;;  %16782 = vmatpush3.bf16.msra.mxu1 %v19349_v60  ;;  %v19405_v6 = vld [vmem:[#allocation6 + $0x2e8] ss:$28 sps:$4 sm:$0xff]   ;;  %v19409_v60 = vld [vmem:[#allocation6 + $0x4b0] ss:$28 sps:$4 sm:$0xff]  }
 0x95a   :  { %13887 = vmatprep.subr.bf16.mxu0 %v19352_v43  ;;  %16783 = vmatprep.subr.bf16.mxu1 %v19353_v25  ;;  %v19412_v43 = vld [vmem:[#allocation6 + $0x324] ss:$28 sps:$4 sm:$0xff]  }
 0x95b   :  { %v19413_v25 = vld [vmem:[#allocation6 + $0x6a8] ss:$28 sps:$4 sm:$0xff]  }
 0x95d   :  { %13888 = vmatpush1.bf16.msra.mxu0 %v19350_v61  ;;  %16784 = vmatpush3.bf16.msra.mxu1 %v19354_v47  ;;  %v19410_v61 = vld [vmem:[#allocation6 + $0x320] ss:$28 sps:$4 sm:$0xff]   ;;  %v19414_v47 = vld [vmem:[#allocation6 + $0x4e8] ss:$28 sps:$4 sm:$0xff]  }
 0x95e   :  { %13889 = vmatprep.subr.bf16.mxu0 %v19357_v4  ;;  %16785 = vmatprep.subr.bf16.mxu1 %v19358_v5  ;;  %v19417_v4 = vld [vmem:[#allocation6 + $0x35c] ss:$28 sps:$4 sm:$0xff]  }
 0x95f   :  { %v19418_v5 = vld [vmem:[#allocation6 + $0x6e0] ss:$28 sps:$4 sm:$0xff]  }
 0x961   :  { %13890 = vmatpush1.bf16.msra.mxu0 %v19355_v42  ;;  %16786 = vmatpush3.bf16.msra.mxu1 %v19359_v8  ;;  %v19415_v42 = vld [vmem:[#allocation6 + $0x358] ss:$28 sps:$4 sm:$0xff]   ;;  %v19419_v8 = vld [vmem:[#allocation6 + $0x520] ss:$28 sps:$4 sm:$0xff]  }
 0x962   :  { %13891 = vmatprep.subr.bf16.mxu0 %v19362_v18  ;;  %16787 = vmatprep.subr.bf16.mxu1 %v19363_v37  ;;  %v19422_v18 = vld [vmem:[#allocation6 + $0x394] ss:$28 sps:$4 sm:$0xff]  }
 0x963   :  { %v19423_v37 = vld [vmem:[#allocation6 + $0x8d8] ss:$28 sps:$4 sm:$0xff]  }
 0x965   :  { %13892 = vmatpush1.bf16.msra.mxu0 %v19360_v9  ;;  %16788 = vmatpush3.bf16.msra.mxu1 %v19364_v10  ;;  %v19420_v9 = vld [vmem:[#allocation6 + $0x390] ss:$28 sps:$4 sm:$0xff]   ;;  %v19424_v10 = vld [vmem:[#allocation6 + $0x718] ss:$28 sps:$4 sm:$0xff]  }
 0x966   :  { %13893 = vmatprep.subr.bf16.mxu0 %v19367_v11  ;;  %16789 = vmatprep.subr.bf16.mxu1 %v19368_v14  ;;  %v19427_v11 = vld [vmem:[#allocation6 + $0x3cc] ss:$28 sps:$4 sm:$0xff]  }
 0x967   :  { %v19428_v14 = vld [vmem:[#allocation6 + $0x910] ss:$28 sps:$4 sm:$0xff]  }
 0x969   :  { %13894 = vmatpush1.bf16.msra.mxu0 %v19365_v54  ;;  %16790 = vmatpush3.bf16.msra.mxu1 %v19369_v52  ;;  %v19425_v54 = vld [vmem:[#allocation6 + $0x3c8] ss:$28 sps:$4 sm:$0xff]   ;;  %v19429_v52 = vld [vmem:[#allocation6 + $0x750] ss:$28 sps:$4 sm:$0xff]  }
 0x96a   :  { %13895 = vmatprep.subr.bf16.mxu0 %v19372_v29  ;;  %16791 = vmatprep.subr.bf16.mxu1 %v19373_v50  ;;  %v19432_v29 = vld [vmem:[#allocation6 + $0x404] ss:$28 sps:$4 sm:$0xff]  }
 0x96b   :  { %v19433_v50 = vld [vmem:[#allocation6 + $0x948] ss:$28 sps:$4 sm:$0xff]  }
 0x96d   :  { %13896 = vmatpush1.bf16.msra.mxu0 %v19370_v23  ;;  %16792 = vmatpush3.bf16.msra.mxu1 %v19374_v27  ;;  %v19430_v23 = vld [vmem:[#allocation6 + $0x400] ss:$28 sps:$4 sm:$0xff]   ;;  %v19434_v27 = vld [vmem:[#allocation6 + $0x788] ss:$28 sps:$4 sm:$0xff]  }
 0x96e   :  { %13897 = vmatprep.subr.bf16.mxu0 %v19377_v28  ;;  %16793 = vmatprep.subr.bf16.mxu1 %v19378_v12  ;;  %v19438_v28 = vld [vmem:[#allocation6 + $0x980] ss:$28 sps:$4 sm:$0xff]   ;;  %v19435_v12 = vld [vmem:[#allocation6 + $0x438] ss:$28 sps:$4 sm:$0xff]  }
 0x971   :  { %13898 = vmatpush1.bf16.msra.mxu0 %v19375_v32  ;;  %16794 = vmatpush3.bf16.msra.mxu1 %v19379_v34  ;;  %v19442_v32 = vld [vmem:[#allocation6 + $0x474] ss:$28 sps:$4 sm:$0xff]  }
 0x972   :  { %13899 = vmatprep.subr.bf16.mxu0 %v19382_v39  ;;  %16801 = vmatprep.subr.bf16.mxu1 %v19383_v53  ;;  %v19443_v34 = vld [vmem:[#allocation6 + $0x9b8] ss:$28 sps:$4 sm:$0xff]   ;;  %v19440_v39 = vld [vmem:[#allocation6 + $0x470] ss:$28 sps:$4 sm:$0xff]  }
 0x973   :  { %v19444_v53 = vld [vmem:[#allocation6 + $0x7f8] ss:$28 sps:$4 sm:$0xff]  }
 0x974   :  { %14080 = vmatmul.mubr.bf16.vlgmr.msra.gmra.mrb[60].mxu1 %v22061_v7 }
 0x975   :  { %13900 = vmatpush1.bf16.msra.mxu0 %v19380_v26  ;;  %16802 = vmatpush3.bf16.msra.mxu1 %v19384_v45  ;;  %v19447_v26 = vld [vmem:[#allocation6 + $0x4ac] ss:$28 sps:$4 sm:$0xff]  }
 0x976   :  { %14119 = vmatprep.mubr.bf16.mxu1 %v22065_v15  ;;  %13901 = vmatprep.subr.bf16.mxu0 %v19387_v44  ;;  %v19448_v45 = vld [vmem:[#allocation6 + $0x9f0] ss:$28 sps:$4 sm:$0xff]   ;;  %v19445_v44 = vld [vmem:[#allocation6 + $0x4a8] ss:$28 sps:$4 sm:$0xff]  }
 0x977   :  { %16803 = vmatprep.subr.bf16.mxu1 %v19388_v62  ;;  %v19449_v62 = vld [vmem:[#allocation6 + $0x830] ss:$28 sps:$4 sm:$0xff]  }
 0x979   :  { %13902 = vmatpush1.bf16.msra.mxu0 %v19385_v1  ;;  %16804 = vmatpush3.bf16.msra.mxu1 %v19389_v31  ;;  %v19452_v1 = vld [vmem:[#allocation6 + $0x4e4] ss:$28 sps:$4 sm:$0xff]  }
 0x97a   :  { %13903 = vmatprep.subr.bf16.mxu0 %v19392_v17  ;;  %16805 = vmatprep.subr.bf16.mxu1 %v19393_v59  ;;  %v19453_v31 = vld [vmem:[#allocation6 + $0xa28] ss:$28 sps:$4 sm:$0xff]   ;;  %v19450_v17 = vld [vmem:[#allocation6 + $0x4e0] ss:$28 sps:$4 sm:$0xff]  }
 0x97b   :  { %v19454_v59 = vld [vmem:[#allocation6 + $0x868] ss:$28 sps:$4 sm:$0xff]  }
 0x97d   :  { %13904 = vmatpush1.bf16.msra.mxu0 %v19390_v20  ;;  %16806 = vmatpush3.bf16.msra.mxu1 %v19394_v57  ;;  %v19457_v20 = vld [vmem:[#allocation6 + $0x51c] ss:$28 sps:$4 sm:$0xff]  }
 0x97e   :  { %13905 = vmatprep.subr.bf16.mxu0 %v19397_v21  ;;  %16807 = vmatprep.subr.bf16.mxu1 %v19398_v16  ;;  %v19458_v57 = vld [vmem:[#allocation6 + $0xa60] ss:$28 sps:$4 sm:$0xff]   ;;  %v19455_v21 = vld [vmem:[#allocation6 + $0x518] ss:$28 sps:$4 sm:$0xff]  }
 0x97f   :  { %v19459_v16 = vld [vmem:[#allocation6 + $0x8a0] ss:$28 sps:$4 sm:$0xff]  }
 0x981   :  { %13906 = vmatpush1.bf16.msra.mxu0 %v19395_v3  ;;  %16808 = vmatpush3.bf16.msra.mxu1 %v19399_v48  ;;  %v19462_v3 = vld [vmem:[#allocation6 + $0x554] ss:$28 sps:$4 sm:$0xff]  }
 0x982   :  { %13907 = vmatprep.subr.bf16.mxu0 %v19402_v41  ;;  %16809 = vmatprep.subr.bf16.mxu1 %v19403_v30  ;;  %v19460_v48 = vld [vmem:[#allocation6 + $0x550] ss:$28 sps:$4 sm:$0xff]   ;;  %v19463_v41 = vld [vmem:[#allocation6 + $0xa98] ss:$28 sps:$4 sm:$0xff]  }
 0x983   :  { %v19466_v30 = vld [vmem:[#allocation6 + $0x58c] ss:$28 sps:$4 sm:$0xff]  }
 0x985   :  { %13908 = vmatpush1.bf16.msra.mxu0 %v19400_v49  ;;  %16810 = vmatpush3.bf16.msra.mxu1 %v19404_v13  ;;  %v19464_v49 = vld [vmem:[#allocation6 + $0x588] ss:$28 sps:$4 sm:$0xff]   ;;  %v19467_v13 = vld [vmem:[#allocation6 + $0xad0] ss:$28 sps:$4 sm:$0xff]  }
 0x986   :  { %13909 = vmatprep.subr.bf16.mxu0 %v19407_v55  ;;  %16811 = vmatprep.subr.bf16.mxu1 %v19408_v58  ;;  %v19470_v55 = vld [vmem:[#allocation6 + $0x5c4] ss:$28 sps:$4 sm:$0xff]  }
 0x987   :  { %v19534_v58 = vld [vmem:[%s22323_s17 + $0x40] sm:$0xff]  }
 0x989   :  { %13910 = vmatpush1.bf16.msra.mxu0 %v19405_v6  ;;  %16812 = vmatpush3.bf16.msra.mxu1 %v19409_v60  ;;  %v19468_v6 = vld [vmem:[#allocation6 + $0x5c0] ss:$28 sps:$4 sm:$0xff]  }
 0x98a   :  { %13911 = vmatprep.subr.bf16.mxu0 %v19412_v43  ;;  %16813 = vmatprep.subr.bf16.mxu1 %v19413_v25  ;;  %v19473_v60 = vld [vmem:[#allocation6 + $0x5fc] ss:$28 sps:$4 sm:$0xff]   ;;  %v19535_v43 = vld [vmem:[%s22323_s17] sm:$0xff]   ;;  %v19539_v25 = vld [vmem:[%s22323_s17 + $0x48] sm:$0xff]  }
 0x98d   :  { %13912 = vmatpush1.bf16.msra.mxu0 %v19410_v61  ;;  %16814 = vmatpush3.bf16.msra.mxu1 %v19414_v47  ;;  %v19471_v61 = vld [vmem:[#allocation6 + $0x5f8] ss:$28 sps:$4 sm:$0xff]  }
 0x98e   :  { %13913 = vmatprep.subr.bf16.mxu0 %v19417_v4  ;;  %16815 = vmatprep.subr.bf16.mxu1 %v19418_v5  ;;  %v19476_v47 = vld [vmem:[#allocation6 + $0x634] ss:$28 sps:$4 sm:$0xff]   ;;  %v19540_v4 = vld [vmem:[%s22323_s17 + $0x8] sm:$0xff]  }
 0x98f   :  { %v19541_v5 = vld [vmem:[%s22323_s17 + $0x50] sm:$0xff]  }
 0x991   :  { %13914 = vmatpush1.bf16.msra.mxu0 %v19415_v42  ;;  %16816 = vmatpush3.bf16.msra.mxu1 %v19419_v8  ;;  %v19474_v42 = vld [vmem:[#allocation6 + $0x630] ss:$28 sps:$4 sm:$0xff]  }
 0x992   :  { %13924 = vmatprep.subr.bf16.mxu0 %v19422_v18  ;;  %16823 = vmatprep.subr.bf16.mxu1 %v19423_v37  ;;  %v19479_v8 = vld [vmem:[#allocation6 + $0x66c] ss:$28 sps:$4 sm:$0xff]   ;;  %v19545_v18 = vld [vmem:[%s22323_s17 + $0x10] sm:$0xff]   ;;  %v19546_v37 = vld [vmem:[%s22323_s17 + $0x58] sm:$0xff]  }
 0x994   :  { %13916 = vmatmul.mubr.bf16.vlgmr.msra.gmra.mrb[80].mxu0 %v22061_v7  ;;  %14120 = vmatmul.mubr.bf16.vlgmr.msra.gmra.mrb[64].mxu1 %v22074_v19  ;;  %v19437_v7 = vld [vmem:[#allocation6 + $0x43c] ss:$28 sps:$4 sm:$0xff]  }
 0x995   :  { %13925 = vmatpush1.bf16.msra.mxu0 %v19420_v9  ;;  %13956 = vmatprep.mubr.bf16.mxu0 %v22065_v15  ;;  %v19439_v15 = vld [vmem:[#allocation6 + $0x7c0] ss:$28 sps:$4 sm:$0xff]   ;;  %v19477_v9 = vld [vmem:[#allocation6 + $0x668] ss:$28 sps:$4 sm:$0xff]  }
 0x996   :  { %16824 = vmatpush3.bf16.msra.mxu1 %v19424_v10  ;;  %14159 = vmatprep.mubr.bf16.mxu1 %v22083_v35  ;;  %v19482_v10 = vld [vmem:[#allocation6 + $0x6a4] ss:$28 sps:$4 sm:$0xff]  }
 0x997   :  { %13926 = vmatprep.subr.bf16.mxu0 %v19427_v11  ;;  %16825 = vmatprep.subr.bf16.mxu1 %v19428_v14  ;;  %v19547_v11 = vld [vmem:[%s22323_s17 + $0x18] sm:$0xff]   ;;  %v19550_v14 = vld [vmem:[%s22323_s17 + $0x60] sm:$0xff]  }
 0x999   :  { %13927 = vmatpush1.bf16.msra.mxu0 %v19425_v54  ;;  %v19480_v54 = vld [vmem:[#allocation6 + $0x6a0] ss:$28 sps:$4 sm:$0xff]  }
 0x99a   :  { %16826 = vmatpush3.bf16.msra.mxu1 %v19429_v52  ;;  %13928 = vmatprep.subr.bf16.mxu0 %v19432_v29  ;;  %v19485_v52 = vld [vmem:[#allocation6 + $0x6dc] ss:$28 sps:$4 sm:$0xff]   ;;  %v19551_v29 = vld [vmem:[%s22323_s17 + $0x20] sm:$0xff]  }
 0x99b   :  { %16827 = vmatprep.subr.bf16.mxu1 %v19433_v50  ;;  %v19554_v50 = vld [vmem:[%s22323_s17 + $0x68] sm:$0xff]  }
 0x99d   :  { %13929 = vmatpush1.bf16.msra.mxu0 %v19430_v23  ;;  %v19483_v23 = vld [vmem:[#allocation6 + $0x6d8] ss:$28 sps:$4 sm:$0xff]  }
 0x99e   :  { %16828 = vmatpush3.bf16.msra.mxu1 %v19434_v27  ;;  %13930 = vmatprep.subr.bf16.mxu0 %v19437_v7  ;;  %v19488_v27 = vld [vmem:[#allocation6 + $0x714] ss:$28 sps:$4 sm:$0xff]   ;;  %v19555_v7 = vld [vmem:[%s22323_s17 + $0x28] sm:$0xff]  }
 0x99f   :  { %16829 = vmatprep.subr.bf16.mxu1 %v19438_v28  ;;  %v19558_v28 = vld [vmem:[%s22323_s17 + $0x70] sm:$0xff]  }
 0x9a1   :  { %13931 = vmatpush1.bf16.msra.mxu0 %v19435_v12  ;;  %v19486_v12 = vld [vmem:[#allocation6 + $0x710] ss:$28 sps:$4 sm:$0xff]  }
 0x9a2   :  { %16830 = vmatpush3.bf16.msra.mxu1 %v19439_v15  ;;  %13932 = vmatprep.subr.bf16.mxu0 %v19442_v32  ;;  %v19491_v15 = vld [vmem:[#allocation6 + $0x74c] ss:$28 sps:$4 sm:$0xff]   ;;  %v19559_v32 = vld [vmem:[%s22323_s17 + $0x30] sm:$0xff]  }
 0x9a3   :  { %16831 = vmatprep.subr.bf16.mxu1 %v19443_v34  ;;  %v19562_v34 = vld [vmem:[%s22323_s17 + $0x78] sm:$0xff]  }
 0x9a5   :  { %13933 = vmatpush1.bf16.msra.mxu0 %v19440_v39  ;;  %v19489_v39 = vld [vmem:[#allocation6 + $0x748] ss:$28 sps:$4 sm:$0xff]  }
 0x9a6   :  { %16832 = vmatpush3.bf16.msra.mxu1 %v19444_v53  ;;  %13934 = vmatprep.subr.bf16.mxu0 %v19447_v26  ;;  %v19494_v53 = vld [vmem:[#allocation6 + $0x784] ss:$28 sps:$4 sm:$0xff]   ;;  %v19563_v26 = vld [vmem:[%s22323_s17 + $0x38] sm:$0xff]  }
 0x9a7   :  { %16833 = vmatprep.subr.bf16.mxu1 %v19448_v45  ;;  %v19492_v45 = vld [vmem:[#allocation6 + $0x780] ss:$28 sps:$4 sm:$0xff]  }
 0x9a9   :  { %13935 = vmatpush1.bf16.msra.mxu0 %v19445_v44  ;;  %v19497_v44 = vld [vmem:[#allocation6 + $0x7bc] ss:$28 sps:$4 sm:$0xff]  }
 0x9aa   :  { %16834 = vmatpush3.bf16.msra.mxu1 %v19449_v62  ;;  %13936 = vmatprep.subr.bf16.mxu0 %v19452_v1  ;;  %v19495_v62 = vld [vmem:[#allocation6 + $0x7b8] ss:$28 sps:$4 sm:$0xff]   ;;  %v19503_v1 = vld [vmem:[#allocation6 + $0x82c] ss:$28 sps:$4 sm:$0xff]  }
 0x9ab   :  { %16835 = vmatprep.subr.bf16.mxu1 %v19453_v31  ;;  %v19501_v31 = vld [vmem:[#allocation6 + $0x828] ss:$28 sps:$4 sm:$0xff]  }
 0x9ad   :  { %13937 = vmatpush1.bf16.msra.mxu0 %v19450_v17  ;;  %v19506_v17 = vld [vmem:[#allocation6 + $0x864] ss:$28 sps:$4 sm:$0xff]  }
 0x9ae   :  { %16836 = vmatpush3.bf16.msra.mxu1 %v19454_v59  ;;  %13938 = vmatprep.subr.bf16.mxu0 %v19457_v20  ;;  %v19504_v59 = vld [vmem:[#allocation6 + $0x860] ss:$28 sps:$4 sm:$0xff]  }
 0x9af   :  { %16837 = vmatprep.subr.bf16.mxu1 %v19458_v57  ;;  %v19509_v20 = vld [vmem:[#allocation6 + $0x89c] ss:$28 sps:$4 sm:$0xff]  }
 0x9b0   :  { %v19507_v57 = vld [vmem:[#allocation6 + $0x898] ss:$28 sps:$4 sm:$0xff]  }
 0x9b1   :  { %13939 = vmatpush1.bf16.msra.mxu0 %v19455_v21  ;;  %v19512_v21 = vld [vmem:[#allocation6 + $0x8d4] ss:$28 sps:$4 sm:$0xff]  }
 0x9b2   :  { %16838 = vmatpush3.bf16.msra.mxu1 %v19459_v16  ;;  %13940 = vmatprep.subr.bf16.mxu0 %v19462_v3  ;;  %v19510_v16 = vld [vmem:[#allocation6 + $0x8d0] ss:$28 sps:$4 sm:$0xff]  }
 0x9b3   :  { %16955 = vmatprep.subr.bf16.mxu1 %v19671_v33  ;;  %v19515_v3 = vld [vmem:[#allocation6 + $0x90c] ss:$28 sps:$4 sm:$0xff]  }
 0x9b5   :  { %14160 = vmatmul.mubr.bf16.vlgmr.msra.gmra.mrb[68].mxu1 %v22085_v22  ;;  %13941 = vmatpush1.bf16.msra.mxu0 %v19460_v48  ;;  %v19513_v48 = vld [vmem:[#allocation6 + $0x908] ss:$28 sps:$4 sm:$0xff]  }
 0x9b6   :  { %16956 = vmatpush3.bf16.msra.mxu1 %v19463_v41  ;;  %13942 = vmatprep.subr.bf16.mxu0 %v19466_v30  ;;  %v19518_v41 = vld [vmem:[#allocation6 + $0x944] ss:$28 sps:$4 sm:$0xff]  }
 0x9b7   :  { %16957 = vmatprep.subr.bf16.mxu1 %v19671_v33  ;;  %16959 = vmatprep.mubr.msk.bf16.mxu1 %vm19672_vm1, %v19671_v33  ;;  %v19516_v30 = vld [vmem:[#allocation6 + $0x940] ss:$28 sps:$4 sm:$0xff]  }
 0x9b9   :  { %13943 = vmatpush1.bf16.msra.mxu0 %v19464_v49  ;;  %v19521_v49 = vld [vmem:[#allocation6 + $0x97c] ss:$28 sps:$4 sm:$0xff]  }
 0x9ba   :  { %16958 = vmatpush3.bf16.msra.mxu1 %v19467_v13  ;;  %13944 = vmatprep.subr.bf16.mxu0 %v19470_v55  ;;  %v19519_v13 = vld [vmem:[#allocation6 + $0x978] ss:$28 sps:$4 sm:$0xff]  }
 0x9bb   :  { %16848 = vmatprep.subr.bf16.mxu1 %v19534_v58  ;;  %v19524_v55 = vld [vmem:[#allocation6 + $0x9b4] ss:$28 sps:$4 sm:$0xff]  }
 0x9bc   :  { %v19522_v58 = vld [vmem:[#allocation6 + $0x9b0] ss:$28 sps:$4 sm:$0xff]  }
 0x9bd   :  { %16960 = vmatmul.mubr.msk.bf16.vlgmr.msra.gmra.mrb[72].mxu1 %vm335_vm0, %v22094_v51  ;;  %13945 = vmatpush1.bf16.msra.mxu0 %v19468_v6  ;;  %v19527_v6 = vld [vmem:[#allocation6 + $0x9ec] ss:$28 sps:$4 sm:$0xff]  }
 0x9be   :  { %13946 = vmatprep.subr.bf16.mxu0 %v19473_v60  ;;  %16849 = vmatpush3.bf16.msra.mxu1 %v19535_v43  ;;  %v19525_v60 = vld [vmem:[#allocation6 + $0x9e8] ss:$28 sps:$4 sm:$0xff]  }
 0x9bf   :  { %16850 = vmatprep.subr.bf16.mxu1 %v19539_v25  ;;  %v19530_v43 = vld [vmem:[#allocation6 + $0xa24] ss:$28 sps:$4 sm:$0xff]  }
 0x9c0   :  { %v19528_v25 = vld [vmem:[#allocation6 + $0xa20] ss:$28 sps:$4 sm:$0xff]  }
 0x9c1   :  { %13947 = vmatpush1.bf16.msra.mxu0 %v19471_v61  ;;  %v19533_v61 = vld [vmem:[#allocation6 + $0xa5c] ss:$28 sps:$4 sm:$0xff]  }
 0x9c2   :  { %13948 = vmatprep.subr.bf16.mxu0 %v19476_v47  ;;  %16851 = vmatpush3.bf16.msra.mxu1 %v19540_v4  ;;  %v19531_v47 = vld [vmem:[#allocation6 + $0xa58] ss:$28 sps:$4 sm:$0xff]  }
 0x9c3   :  { %16852 = vmatprep.subr.bf16.mxu1 %v19541_v5  ;;  %v19538_v4 = vld [vmem:[#allocation6 + $0xa94] ss:$28 sps:$4 sm:$0xff]  }
 0x9c4   :  { %v19536_v5 = vld [vmem:[#allocation6 + $0xa90] ss:$28 sps:$4 sm:$0xff]  }
 0x9c5   :  { %13949 = vmatpush1.bf16.msra.mxu0 %v19474_v42  ;;  %v19544_v42 = vld [vmem:[#allocation6 + $0xacc] ss:$28 sps:$4 sm:$0xff]  }
 0x9c6   :  { %13950 = vmatprep.subr.bf16.mxu0 %v19479_v8  ;;  %16853 = vmatpush3.bf16.msra.mxu1 %v19545_v18  ;;  %v19542_v8 = vld [vmem:[#allocation6 + $0xac8] ss:$28 sps:$4 sm:$0xff]  }
 0x9c7   :  { %16854 = vmatprep.subr.bf16.mxu1 %v19546_v37  ;;  %v19548_v18 = vld [vmem:[%s22323_s17 + $0xc0] sm:$0xff]  }
 0x9c8   :  { %v19574_v37 = vld [vmem:[%s22323_s17 + $0x140] sm:$0xff]  }
 0x9c9   :  { %13951 = vmatpush1.bf16.msra.mxu0 %v19477_v9  ;;  %v19553_v9 = vld [vmem:[%s22323_s17 + $0x88] sm:$0xff]  }
 0x9ca   :  { %13952 = vmatprep.subr.bf16.mxu0 %v19482_v10  ;;  %16855 = vmatpush3.bf16.msra.mxu1 %v19547_v11  ;;  %v22187_v10 = vld [vmem:[%s22322_s16] sm:$0x7f]  ;;  %v19556_v11 = vld [vmem:[%s22323_s17 + $0xd0] sm:$0xff]  }
 0x9cb   :  { %16856 = vmatprep.subr.bf16.mxu1 %v19550_v14  ;;  %v11720_v14 = vrot.slane %v22187_v10, %v20134_v36 }
 0x9cd   :  { %13953 = vmatpush1.bf16.msra.mxu0 %v19480_v54  ;;  %v11724_v54 = vrot.slane %v22187_v10, %v20142_v38  ;;  %v19561_v38 = vld [vmem:[%s22323_s17 + $0x98] sm:$0xff]  }
 0x9ce   :  { %13954 = vmatprep.subr.bf16.mxu0 %v19485_v52  ;;  %16857 = vmatpush3.bf16.msra.mxu1 %v19551_v29  ;;  %v11732_v52 = vrot.slane %v22187_v10, %v20149_v46  ;;  %v19560_v29 = vld [vmem:[%s22323_s17 + $0xd8] sm:$0xff]  }
 0x9cf   :  { %16858 = vmatprep.subr.bf16.mxu1 %v19554_v50 }
 0x9d1   :  { %13955 = vmatpush1.bf16.msra.mxu0 %v19483_v23 }
 0x9d2   :  { %13965 = vmatprep.subr.bf16.mxu0 %v19488_v27  ;;  %16859 = vmatpush3.bf16.msra.mxu1 %v19555_v7 }
 0x9d3   :  { %16860 = vmatprep.subr.bf16.mxu1 %v19558_v28 }
 0x9d4   :  { %13957 = vmatmul.mubr.bf16.vlgmr.msra.gmra.mrb[80].mxu0 %v22074_v19  ;;  %v19500_v19 = vld [vmem:[#allocation6 + $0x7f4] ss:$28 sps:$4 sm:$0xff]  }
 0x9d5   :  { %13966 = vmatpush1.bf16.msra.mxu0 %v19486_v12  ;;  %13997 = vmatprep.mubr.bf16.mxu0 %v22083_v35  ;;  %v19498_v35 = vld [vmem:[#allocation6 + $0x7f0] ss:$28 sps:$4 sm:$0xff]  }
 0x9d6   :  { %13967 = vmatprep.subr.bf16.mxu0 %v19491_v15  ;;  %16861 = vmatpush3.bf16.msra.mxu1 %v19559_v32 }
 0x9d7   :  { %16862 = vmatprep.subr.bf16.mxu1 %v19562_v34 }
 0x9d9   :  { %13968 = vmatpush1.bf16.msra.mxu0 %v19489_v39 }
 0x9da   :  { %13969 = vmatprep.subr.bf16.mxu0 %v19494_v53  ;;  %16863 = vmatpush3.bf16.msra.mxu1 %v19563_v26  ;;  %v19564_v53 = vld [vmem:[%s22323_s17 + $0xe0] sm:$0xff]  }
 0x9db   :  { %16892 = vmatprep.subr.bf16.mxu1 %v19574_v37  ;;  %v11744_v37 = vrot.slane %v22187_v10, %v20168_v56  ;;  %v19588_v56 = vld [vmem:[%s22323_s17 + $0x178] sm:$0xff]  }
 0x9dd   :  { %13970 = vmatpush1.bf16.msra.mxu0 %v19492_v45 }
 0x9de   :  { %13971 = vmatprep.subr.bf16.mxu0 %v19497_v44 }
 0x9e1   :  { %13972 = vmatpush1.bf16.msra.mxu0 %v19495_v62 }
 0x9e2   :  { %13973 = vmatprep.subr.bf16.mxu0 %v19500_v19  ;;  %v19565_v19 = vld [vmem:[%s22323_s17 + $0xa0] sm:$0xff]  }
 0x9e5   :  { %13974 = vmatpush1.bf16.msra.mxu0 %v19498_v35  ;;  %v19575_v35 = vld [vmem:[%s22323_s17 + $0x100] sm:$0xff]  }
 0x9e6   :  { %13975 = vmatprep.subr.bf16.mxu0 %v19503_v1 }
 0x9e9   :  { %13976 = vmatpush1.bf16.msra.mxu0 %v19501_v31  ;;  %v19566_v31 = vld [vmem:[%s22323_s17 + $0xe8] sm:$0xff]  }
 0x9ea   :  { %13977 = vmatprep.subr.bf16.mxu0 %v19506_v17  ;;  %v19576_v17 = vld [vmem:[%s22323_s17 + $0x148] sm:$0xff]  }
 0x9ed   :  { %13978 = vmatpush1.bf16.msra.mxu0 %v19504_v59  ;;  %v19567_v59 = vld [vmem:[%s22323_s17 + $0xa8] sm:$0xff]  }
 0x9ee   :  { %13979 = vmatprep.subr.bf16.mxu0 %v19509_v20  ;;  %v19577_v20 = vld [vmem:[%s22323_s17 + $0x108] sm:$0xff]  }
 0x9f1   :  { %13980 = vmatpush1.bf16.msra.mxu0 %v19507_v57  ;;  %v11728_v57 = vrot.slane %v22187_v10, %v20245_v40  ;;  %v19579_v40 = vld [vmem:[%s22323_s17 + $0x110] sm:$0xff]  }
 0x9f2   :  { %13981 = vmatprep.subr.bf16.mxu0 %v19512_v21  ;;  %v19568_v21 = vld [vmem:[%s22323_s17 + $0xf0] sm:$0xff]  }
 0x9f5   :  { %13982 = vmatpush1.bf16.msra.mxu0 %v19510_v16  ;;  %v19578_v16 = vld [vmem:[%s22323_s17 + $0x150] sm:$0xff]  }
 0x9f6   :  { %13983 = vmatprep.subr.bf16.mxu0 %v19515_v3  ;;  %v19569_v3 = vld [vmem:[%s22323_s17 + $0xb0] sm:$0xff]  }
 0x9f9   :  { %13984 = vmatpush1.bf16.msra.mxu0 %v19513_v48 }
 0x9fa   :  { %13985 = vmatprep.subr.bf16.mxu0 %v19518_v41  ;;  %v19570_v41 = vld [vmem:[%s22323_s17 + $0xf8] sm:$0xff]  }
 0x9fd   :  { %13986 = vmatpush1.bf16.msra.mxu0 %v19516_v30  ;;  %v19580_v30 = vld [vmem:[%s22323_s17 + $0x158] sm:$0xff]  }
 0x9fe   :  { %13987 = vmatprep.subr.bf16.mxu0 %v19521_v49  ;;  %v19571_v49 = vld [vmem:[%s22323_s17 + $0xb8] sm:$0xff]  }
 0xa01   :  { %13988 = vmatpush1.bf16.msra.mxu0 %v19519_v13  ;;  %v19581_v13 = vld [vmem:[%s22323_s17 + $0x118] sm:$0xff]  }
 0xa02   :  { %13989 = vmatprep.subr.bf16.mxu0 %v19524_v55 }
 0xa05   :  { %13990 = vmatpush1.bf16.msra.mxu0 %v19522_v58  ;;  %v19582_v58 = vld [vmem:[%s22323_s17 + $0x160] sm:$0xff]  }
 0xa06   :  { %13991 = vmatprep.subr.bf16.mxu0 %v19527_v6  ;;  %v19572_v6 = vld [vmem:[%s22323_s17 + $0x180] sm:$0xff]  }
 0xa09   :  { %13992 = vmatpush1.bf16.msra.mxu0 %v19525_v60 }
 0xa0a   :  { %13993 = vmatprep.subr.bf16.mxu0 %v19530_v43  ;;  %v19583_v43 = vld [vmem:[%s22323_s17 + $0x120] sm:$0xff]  }
 0xa0d   :  { %13994 = vmatpush1.bf16.msra.mxu0 %v19528_v25  ;;  %v19584_v25 = vld [vmem:[%s22323_s17 + $0x168] sm:$0xff]  }
 0xa0e   :  { %13995 = vmatprep.subr.bf16.mxu0 %v19533_v61  ;;  %v19573_v61 = vld [vmem:[%s22323_s17 + $0x188] sm:$0xff]  }
 0xa11   :  { %13996 = vmatpush1.bf16.msra.mxu0 %v19531_v47  ;;  %v19585_v47 = vld [vmem:[%s22323_s17 + $0x128] sm:$0xff]  }
 0xa12   :  { %14006 = vmatprep.subr.bf16.mxu0 %v19538_v4 }
 0xa14   :  { %13998 = vmatmul.mubr.bf16.vlgmr.msra.gmra.mrb[80].mxu0 %v22085_v22  ;;  %v19549_v22 = vld [vmem:[%s22323_s17 + $0x80] sm:$0xff]  }
 0xa15   :  { %14007 = vmatpush1.bf16.msra.mxu0 %v19536_v5  ;;  %14038 = vmatprep.mubr.bf16.mxu0 %v19670_v0  ;;  %v19552_v0 = vld [vmem:[%s22323_s17 + $0xc8] sm:$0xff]  }
 0xa16   :  { %14008 = vmatprep.subr.bf16.mxu0 %v19544_v42 }
 0xa19   :  { %14009 = vmatpush1.bf16.msra.mxu0 %v19542_v8 }
 0xa1a   :  { %16870 = vmatprep.subr.bf16.mxu0 %v19548_v18 }
 0xa20   :  { %16491 = vmatmul.mubr.msk.bf16.vlgmr.msra.gmra.mrb[80].mxu0 %vm335_vm0, %v22094_v51  ;;  %v19557_v51 = vld [vmem:[%s22323_s17 + $0x90] sm:$0xff]  }
 0xa21   :  { %16871 = vmatpush3.bf16.msra.mxu0 %v19549_v22 }
 0xa22   :  { %16872 = vmatprep.subr.bf16.mxu0 %v19552_v0 }
 0xa25   :  { %16873 = vmatpush3.bf16.msra.mxu0 %v19553_v9 }
 0xa26   :  { %16874 = vmatprep.subr.bf16.mxu0 %v19556_v11 }
 0xa27   :  { %v13712_v50 = vpop.f32.mrb[76].mxu0  ;;  %v13876_v23 = vpop.f32.mrb[56].mxu1 }
 0xa28   :  { %v16993_v27 = vadd.f32 %v13712_v50, %v11720_v14  ;;  %v13714_v36 = vpop.f32.mrb[77].mxu0  ;;  %v13878_v7 = vpop.f32.mrb[57].mxu1  ;;  %v16995_v48 = vadd.f32 %v13876_v23, %v11728_v57 }
 0xa29   :  { %16875 = vmatpush3.bf16.msra.mxu0 %v19557_v51  ;;  %v16994_v28 = vadd.f32 %v13714_v36, %v11724_v54  ;;  %v16996_v12 = vadd.f32 %v13878_v7, %v11732_v52  ;;  %v13716_v15 = vpop.f32.mrb[78].mxu0  ;;  %v13880_v32 = vpop.f32.mrb[58].mxu1  ;;  %v19586_v54 = vld [vmem:[%s22323_s17 + $0x170] sm:$0xff]  }
 0xa2a   :  { %v14207_v46 = vmax.f32 %v16993_v27, 0.0  ;;  %v13717_v34 = vpop.f32.mrb[79].mxu0  ;;  %v13881_v39 = vpop.f32.mrb[59].mxu1  ;;  %16876 = vmatprep.subr.bf16.mxu0 %v19560_v29  ;;  %v14209_v55 = vmax.f32 %v16995_v48, 0.0  ;;  %v19587_v52 = vld [vmem:[%s22323_s17 + $0x130] sm:$0xff]   ;;  %v19589_v29 = vld [vmem:[%s22323_s17 + $0x138] sm:$0xff]  }
 0xa2b   :  { %v14208_v26 = vmax.f32 %v16994_v28, 0.0  ;;  %v14210_v45 = vmax.f32 %v16996_v12, 0.0 }
 0xa2c   :  { %v14214_v1 = vpack.c.bf16 %v14207_v46, %v14207_v46  ;;  %v14216_v60 = vpack.c.bf16 %v14209_v55, %v14209_v55 }
 0xa2d   :  { %v14215_v44 = vpack.c.bf16 %v14208_v26, %v14208_v26  ;;  %v14217_v62 = vpack.c.bf16 %v14210_v45, %v14210_v45  ;;  %16877 = vmatpush3.bf16.msra.mxu0 %v19561_v38  ;;  %v11740_v26 = vrot.slane %v22187_v10, %v20366_v2  ;;  %v16493_v2 = vld [vmem:[%s22324_s18] ss:$0 sm:$0xff] }
 0xa2e   :  { %16878 = vmatprep.subr.bf16.mxu0 %v19564_v53  ;;  %v11736_v53 = vrot.slane %v22187_v10, %v20272_v63 }
 0xa2f   :  { %14663 = vmatprep.mubr.bf16.mxu1 %v14215_v44  ;;  %14703 = vmatprep.mubr.bf16.mxu0 %v14217_v62 }
 0xa30   :  { %14664 = vmatmul.mubr.bf16.vlgmr.msra.gmra.mrb[76].mxu1 %v14214_v1 }
 0xa31   :  { %16879 = vmatpush3.bf16.msra.mxu0 %v19565_v19  ;;  %16893 = vmatpush3.bf16.msra.mxu1 %v19575_v35 }
 0xa32   :  { %16880 = vmatprep.subr.bf16.mxu0 %v19566_v31  ;;  %16894 = vmatprep.subr.bf16.mxu1 %v19576_v17 }
 0xa35   :  { %16881 = vmatpush3.bf16.msra.mxu0 %v19567_v59  ;;  %16895 = vmatpush3.bf16.msra.mxu1 %v19577_v20 }
 0xa36   :  { %16882 = vmatprep.subr.bf16.mxu0 %v19568_v21  ;;  %16896 = vmatprep.subr.bf16.mxu1 %v19578_v16 }
 0xa39   :  { %16883 = vmatpush3.bf16.msra.mxu0 %v19569_v3  ;;  %16897 = vmatpush3.bf16.msra.mxu1 %v19579_v40 }
 0xa3a   :  { %16884 = vmatprep.subr.bf16.mxu0 %v19570_v41  ;;  %16898 = vmatprep.subr.bf16.mxu1 %v19580_v30 }
 0xa3d   :  { %16885 = vmatpush3.bf16.msra.mxu0 %v19571_v49  ;;  %16899 = vmatpush3.bf16.msra.mxu1 %v19581_v13 }
 0xa3e   :  { %16963 = vmatprep.subr.bf16.mxu0 %v19671_v33  ;;  %16900 = vmatprep.subr.bf16.mxu1 %v19582_v58 }
 0xa40   :  { %14704 = vmatmul.mubr.bf16.vlgmr.msra.gmra.mrb[84].mxu0 %v14216_v60 }
 0xa41   :  { %16964 = vmatpush3.bf16.msra.mxu0 %v19572_v6  ;;  %16967 = vmatprep.mubr.msk.bf16.mxu0 %vm19672_vm1, %v19671_v33 }
 0xa42   :  { %16965 = vmatprep.subr.bf16.mxu0 %v19671_v33  ;;  %16901 = vmatpush3.bf16.msra.mxu1 %v19583_v43 }
 0xa43   :  { %16902 = vmatprep.subr.bf16.mxu1 %v19584_v25 }
 0xa45   :  { %16966 = vmatpush3.bf16.msra.mxu0 %v19573_v61 }
 0xa46   :  { %16903 = vmatpush3.bf16.msra.mxu1 %v19585_v47 }
 0xa47   :  { %v16795_v4 = vpop.f32.mrb[60].mxu1  ;;  %16904 = vmatprep.subr.bf16.mxu1 %v19586_v54 }
 0xa48   :  { %v16796_v5 = vpop.f32.mrb[61].mxu1 }
 0xa49   :  { %v16797_v42 = vadd.f32 %v16796_v5, %v16795_v4  ;;  %v16798_v8 = vpop.f32.mrb[62].mxu1  ;;  %v15782_v4 = vld [vmem:[%s22318_s12] ss:$0 sm:$0xff] }
 0xa4a   :  { %v16799_v18 = vpop.f32.mrb[63].mxu1  ;;  %16905 = vmatpush3.bf16.msra.mxu1 %v19587_v52  ;;  %v8364_v8 = vadd.f32 %v15782_v4, %v22027_v24 }
 0xa4b   :  { %v14082_v9 = vadd.f32 %v16797_v42, %v11744_v37  ;;  %16906 = vmatprep.subr.bf16.mxu1 %v19588_v56 }
 0xa4e   :  { %16907 = vmatpush3.bf16.msra.mxu1 %v19589_v29 }
 0xa67   :  { %v16817_v22 = vpop.f32.mrb[64].mxu1 }
 0xa68   :  { %v16818_v0 = vpop.f32.mrb[65].mxu1 }
 0xa69   :  { %v16819_v33 = vadd.f32 %v16818_v0, %v16817_v22  ;;  %v16820_v11 = vpop.f32.mrb[66].mxu1 }
 0xa6a   :  { %v16821_v14 = vpop.f32.mrb[67].mxu1 }
 0xa6b   :  { %v14122_v51 = vadd.f32 %v16819_v33, %v14082_v9 }
 0xa88   :  { %v16839_v50 = vpop.f32.mrb[68].mxu1 }
 0xa89   :  { %v16840_v23 = vpop.f32.mrb[69].mxu1 }
 0xa8a   :  { %v16841_v27 = vadd.f32 %v16840_v23, %v16839_v50  ;;  %v16842_v36 = vpop.f32.mrb[70].mxu1 }
 0xa8b   :  { %v16843_v7 = vpop.f32.mrb[71].mxu1 }
 0xa8c   :  { %v14162_v28 = vadd.f32 %v16841_v27, %v14122_v51 }
 0xa90   :  { %v14201_v12 = vpop.f32.mrb[72].mxu1 }
 0xa91   :  { %v14202_v15 = vadd.f32 %v14201_v12, %v14162_v28  ;;  %v16961_v32 = vpop.f32.mrb[73].mxu1 }
 0xa92   :  { %v14204_v38 = vpop.f32.mrb[74].mxu1 }
 0xa93   :  { %v14213_v46 = vmax.f32 %v14202_v15, 0.0  ;;  %v16962_v34 = vpop.f32.mrb[75].mxu1 }
 0xa95   :  { %v14220_v39 = vpack.c.bf16 %v14213_v46, %v14213_v46 }
 0xa97   :  { %16968 = vmatmul.mubr.msk.bf16.vlgmr.msra.gmra.mrb[88].mxu0 %vm335_vm0, %v14220_v39 }
 0xaf3   :  { %v14040_v45 = vpop.f32.mrb[80].mxu0 }
 0xaf4   :  { %v16997_v44 = vadd.f32 %v14040_v45, %v11736_v53  ;;  %v14042_v62 = vpop.f32.mrb[81].mxu0 }
 0xaf5   :  { %v16998_v19 = vadd.f32 %v14042_v62, %v11740_v26  ;;  %v14044_v35 = vpop.f32.mrb[82].mxu0 }
 0xaf6   :  { %v14211_v1 = vmax.f32 %v16997_v44, 0.0  ;;  %v14045_v31 = vpop.f32.mrb[83].mxu0 }
 0xaf7   :  { %v14212_v17 = vmax.f32 %v16998_v19, 0.0 }
 0xaf8   :  { %v14218_v20 = vpack.c.bf16 %v14211_v1, %v14211_v1 }
 0xaf9   :  { %v14219_v59 = vpack.c.bf16 %v14212_v17, %v14212_v17 }
 0xafb   :  { %14743 = vmatprep.mubr.bf16.mxu1 %v14219_v59 }
 0xafc   :  { %14744 = vmatmul.mubr.bf16.vlgmr.msra.gmra.mrb[80].mxu1 %v14218_v20 }
 0xb03   :  { %v16864_v57 = vpop.f32.mrb[76].mxu1 }
 0xb04   :  { %v16865_v21 = vpop.f32.mrb[77].mxu1 }
 0xb05   :  { %v16866_v16 = vadd.f32 %v16865_v21, %v16864_v57  ;;  %v16867_v3 = vpop.f32.mrb[78].mxu1 }
 0xb06   :  { %v16868_v63 = vpop.f32.mrb[79].mxu1 }
 0xb07   :  { %v14666_v48 = vadd.f32 %v16866_v16, %v16493_v2 }
 0xb13   :  { %v16886_v10 = vpop.f32.mrb[84].mxu0 }
 0xb14   :  { %v16887_v40 = vpop.f32.mrb[85].mxu0 }
 0xb15   :  { %v16888_v41 = vadd.f32 %v16887_v40, %v16886_v10  ;;  %v16889_v30 = vpop.f32.mrb[86].mxu0 }
 0xb16   :  { %v16890_v49 = vpop.f32.mrb[87].mxu0 }
 0xb17   :  { %v14706_v13 = vadd.f32 %v16888_v41, %v14666_v48 }
 0xb6a   :  { %v14785_v55 = vpop.f32.mrb[88].mxu0 }
 0xb6b   :  { %v16969_v58 = vpop.f32.mrb[89].mxu0 }
 0xb6c   :  { %v14788_v6 = vpop.f32.mrb[90].mxu0 }
 0xb6d   :  { %v16970_v60 = vpop.f32.mrb[91].mxu0 }
 0xbcf   :  { %v16908_v43 = vpop.f32.mrb[80].mxu1 }
 0xbd0   :  { %v16909_v25 = vpop.f32.mrb[81].mxu1 }
 0xbd1   :  { %v16910_v61 = vadd.f32 %v16909_v25, %v16908_v43  ;;  %v16911_v47 = vpop.f32.mrb[82].mxu1 }
 0xbd2   :  { %v16912_v5 = vpop.f32.mrb[83].mxu1 }
 0xbd3   :  { %v14746_v42 = vadd.f32 %v16910_v61, %v14706_v13 }
 0xbd5   :  { %v14786_v18 = vadd.f32 %v14785_v55, %v14746_v42 }
 0xbd7   :  { %v14791_v37 = vsub.f32 %v8364_v8, %v14786_v18 }
 0xbd9   :  { %v14792_v22 = vadd.f32 1e-06, %v14791_v37 }
 0xbdb   :  { %v14793_v0 = vmul.f32 %v14792_v22, %v14792_v22 }
 0xbdd   :  { %v14794_v9 = vsel %vm8225_vm3, %v14793_v0, 0.0 }
 0xbde   :  { %14795 = vadd.xlane.f32.xlu1 %v14794_v9 }
 0xc6b   :  { %v14796_v33 = vpop.xlane.xlu1 %14795 }
 0xc6c   :  { %19590 = vrsqrt.f32 %v14796_v33  ;;  %vm14799_vm5 = vcmp.eq.f32.partialorder %v14796_v33, inf  ;;  %v14802_v51 = vand.u32 2147483648, %v14796_v33  ;;  %vm14801_vm6 = vcmp.eq.f32.partialorder %v14796_v33, 0.0 }
 0xc76   :  { %v19591_v11 = vpop.eup %19590 }
 0xc77   :  { %v14798_v14 = vmul.f32 %v19591_v11, %v14796_v33 }
 0xc79   :  { %v14800_v54 = vsel %vm14799_vm5, %v14796_v33, %v14798_v14 }
 0xc7a   :  { %v14803_v52 = vsel %vm14801_vm6, %v14802_v51, %v14800_v54 }
 0xc7b   :  { %14805 = vst.msk [vmem:[%s22325_s19] sm:$0xff] %vm14804_vm4, %v14803_v52 }
 0xc7c   :  { %14810 = vsyncpa [#allocation3], 1 }
 0xc7d   :  { %14811 = vsyncpa [#allocation5], 1 }

</bundles_post_ra>
